<compile_context>
chip_gen: v5e
topology: v5e:2x2
jax: 0.10.0
libtpu: 0.0.40
codegen_flags: <defaults>
</compile_context>

<pallas_src>
import functools
import numpy as np

import jax
import jax.numpy as jnp
from jax.experimental import pallas as pl
from jax.experimental.pallas import tpu as pltpu


SEQ_LEN = 72      # fixed by nn.MaxPool1d(72) in MulticlassClassification
LANE = 128        # TPU lane width


def _round_up(x, m):
    return ((x + m - 1) // m) * m


# ------------------------------ fused kernel ------------------------------

def _layer_norm(x, gamma, beta, inv_n, eps=1e-5):
    """LayerNorm over a zero-padded hidden dim; statistics use the real width
    (padded columns are exactly zero, and gamma/beta are zero-padded)."""
    mu = jnp.sum(x, axis=-1, keepdims=True) * inv_n
    ex2 = jnp.sum(x * x, axis=-1, keepdims=True) * inv_n
    var = ex2 - mu * mu
    return (x - mu) * jax.lax.rsqrt(var + eps) * gamma + beta


def _fused_model_kernel(x_ref, mask_ref,
                        emb_w_ref, emb_b_ref, pe_ref,
                        wqkv_ref, bqkv_ref, wo_ref, bo_ref,
                        w1_ref, b1_ref, w2_ref, b2_ref,
                        ln1g_ref, ln1b_ref, ln2g_ref, ln2b_ref,
                        cls_w_ref, cls_b_ref,
                        out_ref,
                        *, n_layers, n_heads, hidden):
    f32 = jnp.float32
    bf16 = jnp.bfloat16
    hp = pe_ref.shape[-1]                       # padded hidden (lane width)
    dh = hidden // n_heads
    inv_h = 1.0 / float(hidden)
    scale = 1.0 / float(np.sqrt(dh))

    x = x_ref[0]                                # [S, FP]  zero-padded features
    m_add = mask_ref[0]                         # [1, S]   additive mask (0/-1e9)

    # ---- TVTSBERT input embedding + positional encoding (fused) ----
    h = (jnp.dot(x.astype(bf16), emb_w_ref[...], preferred_element_type=f32)
         + emb_b_ref[...] + pe_ref[...])        # [S, HP] f32

    # ---- transformer encoder layers (pre-LN) ----
    for l in range(n_layers):
        # masked multi-head self-attention sublayer
        xn = _layer_norm(h, ln1g_ref[l], ln1b_ref[l], inv_h)
        qkv = (jnp.dot(xn.astype(bf16), wqkv_ref[l], preferred_element_type=f32)
               + bqkv_ref[l])                   # [S, 3*HP]
        q = qkv[:, 0 * hp:1 * hp]
        k = qkv[:, 1 * hp:2 * hp]
        v = qkv[:, 2 * hp:3 * hp]

        ctx = jnp.zeros_like(h)                 # accumulates (head_out @ W_o)
        for hd in range(n_heads):
            lo = hd * dh
            qh = q[:, lo:lo + dh]               # [S, dh] f32
            kh = k[:, lo:lo + dh]
            vh = v[:, lo:lo + dh]
            s = jnp.dot(qh, kh.T, preferred_element_type=f32) * scale + m_add
            s = s - jnp.max(s, axis=-1, keepdims=True)
            p = jnp.exp(s)
            p = p * pl.reciprocal(jnp.sum(p, axis=-1, keepdims=True),
                                  approx=True)
            ho = jnp.dot(p, vh, preferred_element_type=f32)          # [S, dh]
            ctx = ctx + jnp.dot(ho, wo_ref[l, lo:lo + dh, :],
                                preferred_element_type=f32)          # [S, HP]
        h = ctx + bo_ref[l] + h                 # residual

        # position-wise feed-forward sublayer
        xn = _layer_norm(h, ln2g_ref[l], ln2b_ref[l], inv_h)
        f = (jnp.dot(xn.astype(bf16), w1_ref[l], preferred_element_type=f32)
             + b1_ref[l])
        f = jax.nn.gelu(f, approximate=True)
        h = (jnp.dot(f.astype(bf16), w2_ref[l], preferred_element_type=f32)
             + b2_ref[l] + h)                   # residual

    # ---- head: permute(0,2,1) + MaxPool1d(S) + squeeze + Linear ----
    pooled = jnp.max(h, axis=0, keepdims=True)                       # [1, HP]
    logits = (jnp.dot(pooled.astype(bf16), cls_w_ref[...],
                      preferred_element_type=f32) + cls_b_ref[...])  # [1, CP]
    out_ref[0] = jnp.broadcast_to(logits, out_ref.shape[1:])


# --------------------------- forward wrapper ---------------------------

@functools.partial(jax.jit, static_argnames=("hidden", "n_heads", "num_classes"))
def tvtsbert_classification_forward(packed, x, mask, *, hidden, n_heads,
                                    num_classes):
    """x: [B, S, F] float32, mask: [B, S] (1 = valid, 0 = pad) -> [B, C]."""
    B, S, F = x.shape
    fp = packed["emb_w"].shape[0]
    cp = packed["cls_w"].shape[-1]
    n_layers = packed["wqkv"].shape[0]

    # zero-pad features to a full lane width (exact: padded weight rows are 0)
    xp = jnp.pad(x.astype(jnp.float32), ((0, 0), (0, 0), (0, fp - F)))
    # additive attention mask, computed once for all layers / heads
    mask_add = jnp.where(mask > 0, 0.0, -1e9).astype(jnp.float32)
    mask_add = mask_add.reshape(B, 1, S)

    kernel = functools.partial(_fused_model_kernel, n_layers=n_layers,
                               n_heads=n_heads, hidden=hidden)

    w_names = ("emb_w", "emb_b", "pe", "wqkv", "bqkv", "wo", "bo",
               "w1", "b1", "w2", "b2", "ln1_g", "ln1_b", "ln2_g", "ln2_b",
               "cls_w", "cls_b")
    w_args = [packed[n] for n in w_names]

    def _const_spec(arr):
        nd = arr.ndim
        return pl.BlockSpec(arr.shape, lambda b, _nd=nd: (0,) * _nd)

    out = pl.pallas_call(
        kernel,
        out_shape=jax.ShapeDtypeStruct((B, 8, cp), jnp.float32),
        grid=(B,),
        in_specs=[pl.BlockSpec((1, S, fp), lambda b: (b, 0, 0)),
                  pl.BlockSpec((1, 1, S), lambda b: (b, 0, 0))]
                 + [_const_spec(a) for a in w_args],
        out_specs=pl.BlockSpec((1, 8, cp), lambda b: (b, 0, 0)),
        compiler_params=pltpu.CompilerParams(
            dimension_semantics=("parallel",)),
    )(xp, mask_add, *w_args)

    return out[:, 0, :num_classes]


# ------------------------------ parameters ------------------------------

def sinusoidal_pe(seq_len, hidden):
    pos = np.arange(seq_len)[:, None].astype(np.float32)
    i = np.arange(0, hidden, 2).astype(np.float32)
    div = np.exp(-np.log(10000.0) * i / hidden)
    pe = np.zeros((seq_len, hidden), dtype=np.float32)
    pe[:, 0::2] = np.sin(pos * div)
    pe[:, 1::2] = np.cos(pos * div)
    return jnp.asarray(pe)


def init_params(key, num_features, hidden, n_layers, n_heads, num_classes):
    """Raw (unpadded, f32) parameters mirroring the PyTorch module."""
    def lin(k, fan_in, fan_out):
        kw, _ = jax.random.split(k)
        w = jax.random.normal(kw, (fan_in, fan_out), jnp.float32) * 0.02
        b = jnp.zeros((fan_out,), jnp.float32)
        return w, b

    keys = jax.random.split(key, 2 + n_layers)
    emb_w, emb_b = lin(keys[0], num_features, hidden)
    cls_w, cls_b = lin(keys[1], hidden, num_classes)

    layers = []
    for li in range(n_layers):
        lk = jax.random.split(keys[2 + li], 6)
        wq, bq = lin(lk[0], hidden, hidden)
        wk, bk = lin(lk[1], hidden, hidden)
        wv, bv = lin(lk[2], hidden, hidden)
        wo, bo = lin(lk[3], hidden, hidden)
        w1, b1 = lin(lk[4], hidden, 4 * hidden)
        w2, b2 = lin(lk[5], 4 * hidden, hidden)
        layers.append(dict(
            wq=wq, bq=bq, wk=wk, bk=bk, wv=wv, bv=bv, wo=wo, bo=bo,
            w1=w1, b1=b1, w2=w2, b2=b2,
            ln1_g=jnp.ones((hidden,), jnp.float32),
            ln1_b=jnp.zeros((hidden,), jnp.float32),
            ln2_g=jnp.ones((hidden,), jnp.float32),
            ln2_b=jnp.zeros((hidden,), jnp.float32),
        ))

    return dict(emb_w=emb_w, emb_b=emb_b, pe=sinusoidal_pe(SEQ_LEN, hidden),
                layers=layers, cls_w=cls_w, cls_b=cls_b)


def pack_params(raw):
    """Zero-pad to lane-dense (multiple-of-128) shapes, stack the per-layer
    weights along a leading L axis, and cast large matmul weights to bf16.
    Zero padding keeps the math exact (padded rows/cols contribute nothing)."""
    F, H = raw["emb_w"].shape
    C = raw["cls_w"].shape[1]
    FF = raw["layers"][0]["w1"].shape[1]
    FP, HP, FFP, CP = (_round_up(d, LANE) for d in (F, H, FF, C))

    def pad2(w, rows, cols, dtype=jnp.float32):
        r, c = w.shape
        return jnp.pad(w, ((0, rows - r), (0, cols - c))).astype(dtype)

    def pad_row(v, cols):
        return jnp.pad(v.reshape(1, -1), ((0, 0), (0, cols - v.shape[0])))

    def stack(fn):
        return jnp.stack([fn(l) for l in raw["layers"]], axis=0)

    bf16 = jnp.bfloat16
    return dict(
        emb_w=pad2(raw["emb_w"], FP, HP, bf16),
        emb_b=pad_row(raw["emb_b"], HP),
        pe=pad2(raw["pe"], SEQ_LEN, HP),
        wqkv=stack(lambda l: jnp.concatenate(
            [pad2(l["wq"], HP, HP, bf16), pad2(l["wk"], HP, HP, bf16),
             pad2(l["wv"], HP, HP, bf16)], axis=-1)),
        bqkv=stack(lambda l: jnp.concatenate(
            [pad_row(l["bq"], HP), pad_row(l["bk"], HP), pad_row(l["bv"], HP)],
            axis=-1)),
        wo=stack(lambda l: pad2(l["wo"], H, HP)),      # f32: sliced per head
        bo=stack(lambda l: pad_row(l["bo"], HP)),
        w1=stack(lambda l: pad2(l["w1"], HP, FFP, bf16)),
        b1=stack(lambda l: pad_row(l["b1"], FFP)),
        w2=stack(lambda l: pad2(l["w2"], FFP, HP, bf16)),
        b2=stack(lambda l: pad_row(l["b2"], HP)),
        ln1_g=stack(lambda l: pad_row(l["ln1_g"], HP)),
        ln1_b=stack(lambda l: pad_row(l["ln1_b"], HP)),
        ln2_g=stack(lambda l: pad_row(l["ln2_g"], HP)),
        ln2_b=stack(lambda l: pad_row(l["ln2_b"], HP)),
        cls_w=pad2(raw["cls_w"], HP, CP, bf16),
        cls_b=pad_row(raw["cls_b"], CP),
    )


# ------------------------------ demo ------------------------------

if __name__ == "__main__":
    B = 2
    NUM_FEATURES = 10
    HIDDEN = 32
    N_LAYERS = 2
    N_HEADS = 4
    NUM_CLASSES = 5

    key = jax.random.PRNGKey(0)
    k_param, k_x = jax.random.split(key)

    raw_params = init_params(k_param, NUM_FEATURES, HIDDEN, N_LAYERS, N_HEADS,
                             NUM_CLASSES)
    packed = pack_params(raw_params)

    x = jax.random.normal(k_x, (B, SEQ_LEN, NUM_FEATURES), jnp.float32)
    mask = jnp.ones((B, SEQ_LEN), jnp.int32)
    mask = mask.at[1, 64:].set(0)          # pad the tail of the second sequence

    logits = tvtsbert_classification_forward(
        packed, x, mask,
        hidden=HIDDEN, n_heads=N_HEADS, num_classes=NUM_CLASSES)
    jax.block_until_ready(logits)
    assert logits.shape == (B, NUM_CLASSES)
    print("KERNEL_OK")
</pallas_src>

<mosaic_0001>
module attributes {stable_mosaic.version = 11 : i64} {
  func.func @_fused_model_kernel(%arg0: i32, %arg1: memref<1x72x128xf32, #tpu.memory_space<vmem>>, %arg2: memref<1x1x72xf32, #tpu.memory_space<vmem>>, %arg3: memref<128x128xbf16, #tpu.memory_space<vmem>>, %arg4: memref<1x128xf32, #tpu.memory_space<vmem>>, %arg5: memref<72x128xf32, #tpu.memory_space<vmem>>, %arg6: memref<2x128x384xbf16, #tpu.memory_space<vmem>>, %arg7: memref<2x1x384xf32, #tpu.memory_space<vmem>>, %arg8: memref<2x32x128xf32, #tpu.memory_space<vmem>>, %arg9: memref<2x1x128xf32, #tpu.memory_space<vmem>>, %arg10: memref<2x128x128xbf16, #tpu.memory_space<vmem>>, %arg11: memref<2x1x128xf32, #tpu.memory_space<vmem>>, %arg12: memref<2x128x128xbf16, #tpu.memory_space<vmem>>, %arg13: memref<2x1x128xf32, #tpu.memory_space<vmem>>, %arg14: memref<2x1x128xf32, #tpu.memory_space<vmem>>, %arg15: memref<2x1x128xf32, #tpu.memory_space<vmem>>, %arg16: memref<2x1x128xf32, #tpu.memory_space<vmem>>, %arg17: memref<2x1x128xf32, #tpu.memory_space<vmem>>, %arg18: memref<128x128xbf16, #tpu.memory_space<vmem>>, %arg19: memref<1x128xf32, #tpu.memory_space<vmem>>, %arg20: memref<1x8x128xf32, #tpu.memory_space<vmem>>) attributes {dimension_semantics = [#tpu.dimension_semantics<parallel>], iteration_bounds = array<i64: 2>, scalar_prefetch = 0 : i64, scratch_operands = 0 : i64, tpu.core_type = #tpu.core_type<tc>, window_params = [{transform_indices = @transform_0, window_bounds = array<i64: 1, 72, 128>}, {transform_indices = @transform_1, window_bounds = array<i64: 1, 1, 72>}, {pipeline_mode = #tpu.pipeline_mode<synchronous>, transform_indices = @transform_2, window_bounds = array<i64: 128, 128>}, {pipeline_mode = #tpu.pipeline_mode<synchronous>, transform_indices = @transform_3, window_bounds = array<i64: 1, 128>}, {pipeline_mode = #tpu.pipeline_mode<synchronous>, transform_indices = @transform_4, window_bounds = array<i64: 72, 128>}, {pipeline_mode = #tpu.pipeline_mode<synchronous>, transform_indices = @transform_5, window_bounds = array<i64: 2, 128, 384>}, {pipeline_mode = #tpu.pipeline_mode<synchronous>, transform_indices = @transform_6, window_bounds = array<i64: 2, 1, 384>}, {pipeline_mode = #tpu.pipeline_mode<synchronous>, transform_indices = @transform_7, window_bounds = array<i64: 2, 32, 128>}, {pipeline_mode = #tpu.pipeline_mode<synchronous>, transform_indices = @transform_8, window_bounds = array<i64: 2, 1, 128>}, {pipeline_mode = #tpu.pipeline_mode<synchronous>, transform_indices = @transform_9, window_bounds = array<i64: 2, 128, 128>}, {pipeline_mode = #tpu.pipeline_mode<synchronous>, transform_indices = @transform_10, window_bounds = array<i64: 2, 1, 128>}, {pipeline_mode = #tpu.pipeline_mode<synchronous>, transform_indices = @transform_11, window_bounds = array<i64: 2, 128, 128>}, {pipeline_mode = #tpu.pipeline_mode<synchronous>, transform_indices = @transform_12, window_bounds = array<i64: 2, 1, 128>}, {pipeline_mode = #tpu.pipeline_mode<synchronous>, transform_indices = @transform_13, window_bounds = array<i64: 2, 1, 128>}, {pipeline_mode = #tpu.pipeline_mode<synchronous>, transform_indices = @transform_14, window_bounds = array<i64: 2, 1, 128>}, {pipeline_mode = #tpu.pipeline_mode<synchronous>, transform_indices = @transform_15, window_bounds = array<i64: 2, 1, 128>}, {pipeline_mode = #tpu.pipeline_mode<synchronous>, transform_indices = @transform_16, window_bounds = array<i64: 2, 1, 128>}, {pipeline_mode = #tpu.pipeline_mode<synchronous>, transform_indices = @transform_17, window_bounds = array<i64: 128, 128>}, {pipeline_mode = #tpu.pipeline_mode<synchronous>, transform_indices = @transform_18, window_bounds = array<i64: 1, 128>}, {transform_indices = @transform_19, window_bounds = array<i64: 1, 8, 128>}]} {
    %c0 = arith.constant 0 : index
    %c0_0 = arith.constant 0 : index
    %c0_1 = arith.constant 0 : index
    %0 = vector.load %arg1[%c0, %c0_0, %c0_1] : memref<1x72x128xf32, #tpu.memory_space<vmem>>, vector<1x72x128xf32>
    %1 = vector.shape_cast %0 : vector<1x72x128xf32> to vector<72x128xf32>
    %c0_2 = arith.constant 0 : index
    %c0_3 = arith.constant 0 : index
    %c0_4 = arith.constant 0 : index
    %2 = vector.load %arg2[%c0_2, %c0_3, %c0_4] : memref<1x1x72xf32, #tpu.memory_space<vmem>>, vector<1x1x72xf32>
    %3 = vector.shape_cast %2 : vector<1x1x72xf32> to vector<1x72xf32>
    %4 = arith.truncf %1 : vector<72x128xf32> to vector<72x128xbf16>
    %c0_5 = arith.constant 0 : index
    %c0_6 = arith.constant 0 : index
    %5 = vector.load %arg3[%c0_5, %c0_6] : memref<128x128xbf16, #tpu.memory_space<vmem>>, vector<128x128xbf16>
    %cst = arith.constant dense<0.000000e+00> : vector<72x128xf32>
    %6 = tpu.matmul %4, %5, %cst {dimension_numbers = #tpu.dot_dimension_numbers<[1], [0], [0], [1], [0, 0, 1, 1], [], []>} : vector<72x128xbf16>, vector<128x128xbf16>, vector<72x128xf32> -> vector<72x128xf32>
    %c0_7 = arith.constant 0 : index
    %c0_8 = arith.constant 0 : index
    %7 = vector.load %arg4[%c0_7, %c0_8] : memref<1x128xf32, #tpu.memory_space<vmem>>, vector<1x128xf32>
    %8 = vector.broadcast %7 : vector<1x128xf32> to vector<72x128xf32>
    %9 = arith.addf %6, %8 : vector<72x128xf32>
    %c0_9 = arith.constant 0 : index
    %c0_10 = arith.constant 0 : index
    %10 = vector.load %arg5[%c0_9, %c0_10] : memref<72x128xf32, #tpu.memory_space<vmem>>, vector<72x128xf32>
    %11 = arith.addf %9, %10 : vector<72x128xf32>
    %c0_11 = arith.constant 0 : index
    %c0_12 = arith.constant 0 : index
    %c0_13 = arith.constant 0 : index
    %12 = vector.load %arg14[%c0_11, %c0_12, %c0_13] : memref<2x1x128xf32, #tpu.memory_space<vmem>>, vector<1x1x128xf32>
    %13 = vector.shape_cast %12 : vector<1x1x128xf32> to vector<1x128xf32>
    %c0_14 = arith.constant 0 : index
    %c0_15 = arith.constant 0 : index
    %c0_16 = arith.constant 0 : index
    %14 = vector.load %arg15[%c0_14, %c0_15, %c0_16] : memref<2x1x128xf32, #tpu.memory_space<vmem>>, vector<1x1x128xf32>
    %15 = vector.shape_cast %14 : vector<1x1x128xf32> to vector<1x128xf32>
    %cst_17 = arith.constant dense<0.000000e+00> : vector<72xf32>
    %16 = vector.multi_reduction <add>, %11, %cst_17 [1] : vector<72x128xf32> to vector<72xf32>
    %17 = vector.shape_cast %16 : vector<72xf32> to vector<72x1xf32>
    %cst_18 = arith.constant 3.125000e-02 : f32
    %18 = vector.broadcast %cst_18 : f32 to vector<72x1xf32>
    %19 = arith.mulf %17, %18 : vector<72x1xf32>
    %20 = arith.mulf %11, %11 : vector<72x128xf32>
    %cst_19 = arith.constant dense<0.000000e+00> : vector<72xf32>
    %21 = vector.multi_reduction <add>, %20, %cst_19 [1] : vector<72x128xf32> to vector<72xf32>
    %22 = vector.shape_cast %21 : vector<72xf32> to vector<72x1xf32>
    %cst_20 = arith.constant 3.125000e-02 : f32
    %23 = vector.broadcast %cst_20 : f32 to vector<72x1xf32>
    %24 = arith.mulf %22, %23 : vector<72x1xf32>
    %25 = arith.mulf %19, %19 : vector<72x1xf32>
    %26 = arith.subf %24, %25 : vector<72x1xf32>
    %27 = vector.broadcast %19 : vector<72x1xf32> to vector<72x128xf32>
    %28 = arith.subf %11, %27 : vector<72x128xf32>
    %cst_21 = arith.constant 9.99999974E-6 : f32
    %29 = vector.broadcast %cst_21 : f32 to vector<72x1xf32>
    %30 = arith.addf %26, %29 : vector<72x1xf32>
    %31 = math.rsqrt %30 : vector<72x1xf32>
    %32 = vector.broadcast %31 : vector<72x1xf32> to vector<72x128xf32>
    %33 = arith.mulf %28, %32 : vector<72x128xf32>
    %34 = vector.broadcast %13 : vector<1x128xf32> to vector<72x128xf32>
    %35 = arith.mulf %33, %34 : vector<72x128xf32>
    %36 = vector.broadcast %15 : vector<1x128xf32> to vector<72x128xf32>
    %37 = arith.addf %35, %36 : vector<72x128xf32>
    %38 = arith.truncf %37 : vector<72x128xf32> to vector<72x128xbf16>
    %c0_22 = arith.constant 0 : index
    %c0_23 = arith.constant 0 : index
    %c0_24 = arith.constant 0 : index
    %39 = vector.load %arg6[%c0_22, %c0_23, %c0_24] : memref<2x128x384xbf16, #tpu.memory_space<vmem>>, vector<1x128x384xbf16>
    %40 = vector.shape_cast %39 : vector<1x128x384xbf16> to vector<128x384xbf16>
    %cst_25 = arith.constant dense<0.000000e+00> : vector<72x384xf32>
    %41 = tpu.matmul %38, %40, %cst_25 {dimension_numbers = #tpu.dot_dimension_numbers<[1], [0], [0], [1], [0, 0, 1, 1], [], []>} : vector<72x128xbf16>, vector<128x384xbf16>, vector<72x384xf32> -> vector<72x384xf32>
    %c0_26 = arith.constant 0 : index
    %c0_27 = arith.constant 0 : index
    %c0_28 = arith.constant 0 : index
    %42 = vector.load %arg7[%c0_26, %c0_27, %c0_28] : memref<2x1x384xf32, #tpu.memory_space<vmem>>, vector<1x1x384xf32>
    %43 = vector.shape_cast %42 : vector<1x1x384xf32> to vector<1x384xf32>
    %44 = vector.broadcast %43 : vector<1x384xf32> to vector<72x384xf32>
    %45 = arith.addf %41, %44 : vector<72x384xf32>
    %46 = vector.extract_strided_slice %45 {offsets = [0, 0], sizes = [72, 128], strides = [1, 1]} : vector<72x384xf32> to vector<72x128xf32>
    %47 = vector.extract_strided_slice %45 {offsets = [0, 128], sizes = [72, 128], strides = [1, 1]} : vector<72x384xf32> to vector<72x128xf32>
    %48 = vector.extract_strided_slice %45 {offsets = [0, 256], sizes = [72, 128], strides = [1, 1]} : vector<72x384xf32> to vector<72x128xf32>
    %cst_29 = arith.constant 0.000000e+00 : f32
    %49 = vector.broadcast %cst_29 : f32 to vector<72x128xf32>
    %50 = vector.extract_strided_slice %46 {offsets = [0, 0], sizes = [72, 8], strides = [1, 1]} : vector<72x128xf32> to vector<72x8xf32>
    %51 = vector.extract_strided_slice %47 {offsets = [0, 0], sizes = [72, 8], strides = [1, 1]} : vector<72x128xf32> to vector<72x8xf32>
    %52 = vector.extract_strided_slice %48 {offsets = [0, 0], sizes = [72, 8], strides = [1, 1]} : vector<72x128xf32> to vector<72x8xf32>
    %53 = tpu.transpose %51, [1, 0] : vector<72x8xf32> -> vector<8x72xf32>
    %cst_30 = arith.constant dense<0.000000e+00> : vector<72x72xf32>
    %54 = tpu.matmul %50, %53, %cst_30 {dimension_numbers = #tpu.dot_dimension_numbers<[1], [0], [0], [1], [0, 0, 1, 1], [], []>} : vector<72x8xf32>, vector<8x72xf32>, vector<72x72xf32> -> vector<72x72xf32>
    %cst_31 = arith.constant 0.353553385 : f32
    %55 = vector.broadcast %cst_31 : f32 to vector<72x72xf32>
    %56 = arith.mulf %54, %55 : vector<72x72xf32>
    %57 = vector.broadcast %3 : vector<1x72xf32> to vector<72x72xf32>
    %58 = arith.addf %56, %57 : vector<72x72xf32>
    %cst_32 = arith.constant dense<0xFF800000> : vector<72xf32>
    %59 = vector.multi_reduction <maximumf>, %58, %cst_32 [1] : vector<72x72xf32> to vector<72xf32>
    %60 = vector.shape_cast %59 : vector<72xf32> to vector<72x1xf32>
    %61 = vector.broadcast %60 : vector<72x1xf32> to vector<72x72xf32>
    %62 = arith.subf %58, %61 : vector<72x72xf32>
    %63 = math.exp %62 : vector<72x72xf32>
    %cst_33 = arith.constant dense<0.000000e+00> : vector<72xf32>
    %64 = vector.multi_reduction <add>, %63, %cst_33 [1] : vector<72x72xf32> to vector<72xf32>
    %65 = vector.shape_cast %64 : vector<72xf32> to vector<72x1xf32>
    %66 = tpu.reciprocal %65 {approx = true} : vector<72x1xf32> -> vector<72x1xf32>
    %67 = vector.broadcast %66 : vector<72x1xf32> to vector<72x72xf32>
    %68 = arith.mulf %63, %67 : vector<72x72xf32>
    %cst_34 = arith.constant dense<0.000000e+00> : vector<72x8xf32>
    %69 = tpu.matmul %68, %52, %cst_34 {dimension_numbers = #tpu.dot_dimension_numbers<[1], [0], [0], [1], [0, 0, 1, 1], [], []>} : vector<72x72xf32>, vector<72x8xf32>, vector<72x8xf32> -> vector<72x8xf32>
    %c0_35 = arith.constant 0 : index
    %c0_36 = arith.constant 0 : index
    %c0_37 = arith.constant 0 : index
    %70 = vector.load %arg8[%c0_35, %c0_36, %c0_37] : memref<2x32x128xf32, #tpu.memory_space<vmem>>, vector<1x8x128xf32>
    %71 = vector.shape_cast %70 : vector<1x8x128xf32> to vector<8x128xf32>
    %cst_38 = arith.constant dense<0.000000e+00> : vector<72x128xf32>
    %72 = tpu.matmul %69, %71, %cst_38 {dimension_numbers = #tpu.dot_dimension_numbers<[1], [0], [0], [1], [0, 0, 1, 1], [], []>} : vector<72x8xf32>, vector<8x128xf32>, vector<72x128xf32> -> vector<72x128xf32>
    %73 = arith.addf %49, %72 : vector<72x128xf32>
    %74 = vector.extract_strided_slice %46 {offsets = [0, 8], sizes = [72, 8], strides = [1, 1]} : vector<72x128xf32> to vector<72x8xf32>
    %75 = vector.extract_strided_slice %47 {offsets = [0, 8], sizes = [72, 8], strides = [1, 1]} : vector<72x128xf32> to vector<72x8xf32>
    %76 = vector.extract_strided_slice %48 {offsets = [0, 8], sizes = [72, 8], strides = [1, 1]} : vector<72x128xf32> to vector<72x8xf32>
    %77 = tpu.transpose %75, [1, 0] : vector<72x8xf32> -> vector<8x72xf32>
    %cst_39 = arith.constant dense<0.000000e+00> : vector<72x72xf32>
    %78 = tpu.matmul %74, %77, %cst_39 {dimension_numbers = #tpu.dot_dimension_numbers<[1], [0], [0], [1], [0, 0, 1, 1], [], []>} : vector<72x8xf32>, vector<8x72xf32>, vector<72x72xf32> -> vector<72x72xf32>
    %cst_40 = arith.constant 0.353553385 : f32
    %79 = vector.broadcast %cst_40 : f32 to vector<72x72xf32>
    %80 = arith.mulf %78, %79 : vector<72x72xf32>
    %81 = vector.broadcast %3 : vector<1x72xf32> to vector<72x72xf32>
    %82 = arith.addf %80, %81 : vector<72x72xf32>
    %cst_41 = arith.constant dense<0xFF800000> : vector<72xf32>
    %83 = vector.multi_reduction <maximumf>, %82, %cst_41 [1] : vector<72x72xf32> to vector<72xf32>
    %84 = vector.shape_cast %83 : vector<72xf32> to vector<72x1xf32>
    %85 = vector.broadcast %84 : vector<72x1xf32> to vector<72x72xf32>
    %86 = arith.subf %82, %85 : vector<72x72xf32>
    %87 = math.exp %86 : vector<72x72xf32>
    %cst_42 = arith.constant dense<0.000000e+00> : vector<72xf32>
    %88 = vector.multi_reduction <add>, %87, %cst_42 [1] : vector<72x72xf32> to vector<72xf32>
    %89 = vector.shape_cast %88 : vector<72xf32> to vector<72x1xf32>
    %90 = tpu.reciprocal %89 {approx = true} : vector<72x1xf32> -> vector<72x1xf32>
    %91 = vector.broadcast %90 : vector<72x1xf32> to vector<72x72xf32>
    %92 = arith.mulf %87, %91 : vector<72x72xf32>
    %cst_43 = arith.constant dense<0.000000e+00> : vector<72x8xf32>
    %93 = tpu.matmul %92, %76, %cst_43 {dimension_numbers = #tpu.dot_dimension_numbers<[1], [0], [0], [1], [0, 0, 1, 1], [], []>} : vector<72x72xf32>, vector<72x8xf32>, vector<72x8xf32> -> vector<72x8xf32>
    %c0_44 = arith.constant 0 : index
    %c8 = arith.constant 8 : index
    %c0_45 = arith.constant 0 : index
    %94 = vector.load %arg8[%c0_44, %c8, %c0_45] : memref<2x32x128xf32, #tpu.memory_space<vmem>>, vector<1x8x128xf32>
    %95 = vector.shape_cast %94 : vector<1x8x128xf32> to vector<8x128xf32>
    %cst_46 = arith.constant dense<0.000000e+00> : vector<72x128xf32>
    %96 = tpu.matmul %93, %95, %cst_46 {dimension_numbers = #tpu.dot_dimension_numbers<[1], [0], [0], [1], [0, 0, 1, 1], [], []>} : vector<72x8xf32>, vector<8x128xf32>, vector<72x128xf32> -> vector<72x128xf32>
    %97 = arith.addf %73, %96 : vector<72x128xf32>
    %98 = vector.extract_strided_slice %46 {offsets = [0, 16], sizes = [72, 8], strides = [1, 1]} : vector<72x128xf32> to vector<72x8xf32>
    %99 = vector.extract_strided_slice %47 {offsets = [0, 16], sizes = [72, 8], strides = [1, 1]} : vector<72x128xf32> to vector<72x8xf32>
    %100 = vector.extract_strided_slice %48 {offsets = [0, 16], sizes = [72, 8], strides = [1, 1]} : vector<72x128xf32> to vector<72x8xf32>
    %101 = tpu.transpose %99, [1, 0] : vector<72x8xf32> -> vector<8x72xf32>
    %cst_47 = arith.constant dense<0.000000e+00> : vector<72x72xf32>
    %102 = tpu.matmul %98, %101, %cst_47 {dimension_numbers = #tpu.dot_dimension_numbers<[1], [0], [0], [1], [0, 0, 1, 1], [], []>} : vector<72x8xf32>, vector<8x72xf32>, vector<72x72xf32> -> vector<72x72xf32>
    %cst_48 = arith.constant 0.353553385 : f32
    %103 = vector.broadcast %cst_48 : f32 to vector<72x72xf32>
    %104 = arith.mulf %102, %103 : vector<72x72xf32>
    %105 = vector.broadcast %3 : vector<1x72xf32> to vector<72x72xf32>
    %106 = arith.addf %104, %105 : vector<72x72xf32>
    %cst_49 = arith.constant dense<0xFF800000> : vector<72xf32>
    %107 = vector.multi_reduction <maximumf>, %106, %cst_49 [1] : vector<72x72xf32> to vector<72xf32>
    %108 = vector.shape_cast %107 : vector<72xf32> to vector<72x1xf32>
    %109 = vector.broadcast %108 : vector<72x1xf32> to vector<72x72xf32>
    %110 = arith.subf %106, %109 : vector<72x72xf32>
    %111 = math.exp %110 : vector<72x72xf32>
    %cst_50 = arith.constant dense<0.000000e+00> : vector<72xf32>
    %112 = vector.multi_reduction <add>, %111, %cst_50 [1] : vector<72x72xf32> to vector<72xf32>
    %113 = vector.shape_cast %112 : vector<72xf32> to vector<72x1xf32>
    %114 = tpu.reciprocal %113 {approx = true} : vector<72x1xf32> -> vector<72x1xf32>
    %115 = vector.broadcast %114 : vector<72x1xf32> to vector<72x72xf32>
    %116 = arith.mulf %111, %115 : vector<72x72xf32>
    %cst_51 = arith.constant dense<0.000000e+00> : vector<72x8xf32>
    %117 = tpu.matmul %116, %100, %cst_51 {dimension_numbers = #tpu.dot_dimension_numbers<[1], [0], [0], [1], [0, 0, 1, 1], [], []>} : vector<72x72xf32>, vector<72x8xf32>, vector<72x8xf32> -> vector<72x8xf32>
    %c0_52 = arith.constant 0 : index
    %c16 = arith.constant 16 : index
    %c0_53 = arith.constant 0 : index
    %118 = vector.load %arg8[%c0_52, %c16, %c0_53] : memref<2x32x128xf32, #tpu.memory_space<vmem>>, vector<1x8x128xf32>
    %119 = vector.shape_cast %118 : vector<1x8x128xf32> to vector<8x128xf32>
    %cst_54 = arith.constant dense<0.000000e+00> : vector<72x128xf32>
    %120 = tpu.matmul %117, %119, %cst_54 {dimension_numbers = #tpu.dot_dimension_numbers<[1], [0], [0], [1], [0, 0, 1, 1], [], []>} : vector<72x8xf32>, vector<8x128xf32>, vector<72x128xf32> -> vector<72x128xf32>
    %121 = arith.addf %97, %120 : vector<72x128xf32>
    %122 = vector.extract_strided_slice %46 {offsets = [0, 24], sizes = [72, 8], strides = [1, 1]} : vector<72x128xf32> to vector<72x8xf32>
    %123 = vector.extract_strided_slice %47 {offsets = [0, 24], sizes = [72, 8], strides = [1, 1]} : vector<72x128xf32> to vector<72x8xf32>
    %124 = vector.extract_strided_slice %48 {offsets = [0, 24], sizes = [72, 8], strides = [1, 1]} : vector<72x128xf32> to vector<72x8xf32>
    %125 = tpu.transpose %123, [1, 0] : vector<72x8xf32> -> vector<8x72xf32>
    %cst_55 = arith.constant dense<0.000000e+00> : vector<72x72xf32>
    %126 = tpu.matmul %122, %125, %cst_55 {dimension_numbers = #tpu.dot_dimension_numbers<[1], [0], [0], [1], [0, 0, 1, 1], [], []>} : vector<72x8xf32>, vector<8x72xf32>, vector<72x72xf32> -> vector<72x72xf32>
    %cst_56 = arith.constant 0.353553385 : f32
    %127 = vector.broadcast %cst_56 : f32 to vector<72x72xf32>
    %128 = arith.mulf %126, %127 : vector<72x72xf32>
    %129 = vector.broadcast %3 : vector<1x72xf32> to vector<72x72xf32>
    %130 = arith.addf %128, %129 : vector<72x72xf32>
    %cst_57 = arith.constant dense<0xFF800000> : vector<72xf32>
    %131 = vector.multi_reduction <maximumf>, %130, %cst_57 [1] : vector<72x72xf32> to vector<72xf32>
    %132 = vector.shape_cast %131 : vector<72xf32> to vector<72x1xf32>
    %133 = vector.broadcast %132 : vector<72x1xf32> to vector<72x72xf32>
    %134 = arith.subf %130, %133 : vector<72x72xf32>
    %135 = math.exp %134 : vector<72x72xf32>
    %cst_58 = arith.constant dense<0.000000e+00> : vector<72xf32>
    %136 = vector.multi_reduction <add>, %135, %cst_58 [1] : vector<72x72xf32> to vector<72xf32>
    %137 = vector.shape_cast %136 : vector<72xf32> to vector<72x1xf32>
    %138 = tpu.reciprocal %137 {approx = true} : vector<72x1xf32> -> vector<72x1xf32>
    %139 = vector.broadcast %138 : vector<72x1xf32> to vector<72x72xf32>
    %140 = arith.mulf %135, %139 : vector<72x72xf32>
    %cst_59 = arith.constant dense<0.000000e+00> : vector<72x8xf32>
    %141 = tpu.matmul %140, %124, %cst_59 {dimension_numbers = #tpu.dot_dimension_numbers<[1], [0], [0], [1], [0, 0, 1, 1], [], []>} : vector<72x72xf32>, vector<72x8xf32>, vector<72x8xf32> -> vector<72x8xf32>
    %c0_60 = arith.constant 0 : index
    %c24 = arith.constant 24 : index
    %c0_61 = arith.constant 0 : index
    %142 = vector.load %arg8[%c0_60, %c24, %c0_61] : memref<2x32x128xf32, #tpu.memory_space<vmem>>, vector<1x8x128xf32>
    %143 = vector.shape_cast %142 : vector<1x8x128xf32> to vector<8x128xf32>
    %cst_62 = arith.constant dense<0.000000e+00> : vector<72x128xf32>
    %144 = tpu.matmul %141, %143, %cst_62 {dimension_numbers = #tpu.dot_dimension_numbers<[1], [0], [0], [1], [0, 0, 1, 1], [], []>} : vector<72x8xf32>, vector<8x128xf32>, vector<72x128xf32> -> vector<72x128xf32>
    %145 = arith.addf %121, %144 : vector<72x128xf32>
    %c0_63 = arith.constant 0 : index
    %c0_64 = arith.constant 0 : index
    %c0_65 = arith.constant 0 : index
    %146 = vector.load %arg9[%c0_63, %c0_64, %c0_65] : memref<2x1x128xf32, #tpu.memory_space<vmem>>, vector<1x1x128xf32>
    %147 = vector.shape_cast %146 : vector<1x1x128xf32> to vector<1x128xf32>
    %148 = vector.broadcast %147 : vector<1x128xf32> to vector<72x128xf32>
    %149 = arith.addf %145, %148 : vector<72x128xf32>
    %150 = arith.addf %149, %11 : vector<72x128xf32>
    %c0_66 = arith.constant 0 : index
    %c0_67 = arith.constant 0 : index
    %c0_68 = arith.constant 0 : index
    %151 = vector.load %arg16[%c0_66, %c0_67, %c0_68] : memref<2x1x128xf32, #tpu.memory_space<vmem>>, vector<1x1x128xf32>
    %152 = vector.shape_cast %151 : vector<1x1x128xf32> to vector<1x128xf32>
    %c0_69 = arith.constant 0 : index
    %c0_70 = arith.constant 0 : index
    %c0_71 = arith.constant 0 : index
    %153 = vector.load %arg17[%c0_69, %c0_70, %c0_71] : memref<2x1x128xf32, #tpu.memory_space<vmem>>, vector<1x1x128xf32>
    %154 = vector.shape_cast %153 : vector<1x1x128xf32> to vector<1x128xf32>
    %cst_72 = arith.constant dense<0.000000e+00> : vector<72xf32>
    %155 = vector.multi_reduction <add>, %150, %cst_72 [1] : vector<72x128xf32> to vector<72xf32>
    %156 = vector.shape_cast %155 : vector<72xf32> to vector<72x1xf32>
    %cst_73 = arith.constant 3.125000e-02 : f32
    %157 = vector.broadcast %cst_73 : f32 to vector<72x1xf32>
    %158 = arith.mulf %156, %157 : vector<72x1xf32>
    %159 = arith.mulf %150, %150 : vector<72x128xf32>
    %cst_74 = arith.constant dense<0.000000e+00> : vector<72xf32>
    %160 = vector.multi_reduction <add>, %159, %cst_74 [1] : vector<72x128xf32> to vector<72xf32>
    %161 = vector.shape_cast %160 : vector<72xf32> to vector<72x1xf32>
    %cst_75 = arith.constant 3.125000e-02 : f32
    %162 = vector.broadcast %cst_75 : f32 to vector<72x1xf32>
    %163 = arith.mulf %161, %162 : vector<72x1xf32>
    %164 = arith.mulf %158, %158 : vector<72x1xf32>
    %165 = arith.subf %163, %164 : vector<72x1xf32>
    %166 = vector.broadcast %158 : vector<72x1xf32> to vector<72x128xf32>
    %167 = arith.subf %150, %166 : vector<72x128xf32>
    %cst_76 = arith.constant 9.99999974E-6 : f32
    %168 = vector.broadcast %cst_76 : f32 to vector<72x1xf32>
    %169 = arith.addf %165, %168 : vector<72x1xf32>
    %170 = math.rsqrt %169 : vector<72x1xf32>
    %171 = vector.broadcast %170 : vector<72x1xf32> to vector<72x128xf32>
    %172 = arith.mulf %167, %171 : vector<72x128xf32>
    %173 = vector.broadcast %152 : vector<1x128xf32> to vector<72x128xf32>
    %174 = arith.mulf %172, %173 : vector<72x128xf32>
    %175 = vector.broadcast %154 : vector<1x128xf32> to vector<72x128xf32>
    %176 = arith.addf %174, %175 : vector<72x128xf32>
    %177 = arith.truncf %176 : vector<72x128xf32> to vector<72x128xbf16>
    %c0_77 = arith.constant 0 : index
    %c0_78 = arith.constant 0 : index
    %c0_79 = arith.constant 0 : index
    %178 = vector.load %arg10[%c0_77, %c0_78, %c0_79] : memref<2x128x128xbf16, #tpu.memory_space<vmem>>, vector<1x128x128xbf16>
    %179 = vector.shape_cast %178 : vector<1x128x128xbf16> to vector<128x128xbf16>
    %cst_80 = arith.constant dense<0.000000e+00> : vector<72x128xf32>
    %180 = tpu.matmul %177, %179, %cst_80 {dimension_numbers = #tpu.dot_dimension_numbers<[1], [0], [0], [1], [0, 0, 1, 1], [], []>} : vector<72x128xbf16>, vector<128x128xbf16>, vector<72x128xf32> -> vector<72x128xf32>
    %c0_81 = arith.constant 0 : index
    %c0_82 = arith.constant 0 : index
    %c0_83 = arith.constant 0 : index
    %181 = vector.load %arg11[%c0_81, %c0_82, %c0_83] : memref<2x1x128xf32, #tpu.memory_space<vmem>>, vector<1x1x128xf32>
    %182 = vector.shape_cast %181 : vector<1x1x128xf32> to vector<1x128xf32>
    %183 = vector.broadcast %182 : vector<1x128xf32> to vector<72x128xf32>
    %184 = arith.addf %180, %183 : vector<72x128xf32>
    %185 = arith.mulf %184, %184 : vector<72x128xf32>
    %186 = arith.mulf %184, %185 : vector<72x128xf32>
    %cst_84 = arith.constant 4.471500e-02 : f32
    %187 = vector.broadcast %cst_84 : f32 to vector<72x128xf32>
    %188 = arith.mulf %187, %186 : vector<72x128xf32>
    %189 = arith.addf %184, %188 : vector<72x128xf32>
    %cst_85 = arith.constant 0.797884583 : f32
    %190 = vector.broadcast %cst_85 : f32 to vector<72x128xf32>
    %191 = arith.mulf %190, %189 : vector<72x128xf32>
    %192 = math.tanh %191 : vector<72x128xf32>
    %cst_86 = arith.constant 1.000000e+00 : f32
    %193 = vector.broadcast %cst_86 : f32 to vector<72x128xf32>
    %194 = arith.addf %193, %192 : vector<72x128xf32>
    %cst_87 = arith.constant 5.000000e-01 : f32
    %195 = vector.broadcast %cst_87 : f32 to vector<72x128xf32>
    %196 = arith.mulf %195, %194 : vector<72x128xf32>
    %197 = arith.mulf %184, %196 : vector<72x128xf32>
    %198 = arith.truncf %197 : vector<72x128xf32> to vector<72x128xbf16>
    %c0_88 = arith.constant 0 : index
    %c0_89 = arith.constant 0 : index
    %c0_90 = arith.constant 0 : index
    %199 = vector.load %arg12[%c0_88, %c0_89, %c0_90] : memref<2x128x128xbf16, #tpu.memory_space<vmem>>, vector<1x128x128xbf16>
    %200 = vector.shape_cast %199 : vector<1x128x128xbf16> to vector<128x128xbf16>
    %cst_91 = arith.constant dense<0.000000e+00> : vector<72x128xf32>
    %201 = tpu.matmul %198, %200, %cst_91 {dimension_numbers = #tpu.dot_dimension_numbers<[1], [0], [0], [1], [0, 0, 1, 1], [], []>} : vector<72x128xbf16>, vector<128x128xbf16>, vector<72x128xf32> -> vector<72x128xf32>
    %c0_92 = arith.constant 0 : index
    %c0_93 = arith.constant 0 : index
    %c0_94 = arith.constant 0 : index
    %202 = vector.load %arg13[%c0_92, %c0_93, %c0_94] : memref<2x1x128xf32, #tpu.memory_space<vmem>>, vector<1x1x128xf32>
    %203 = vector.shape_cast %202 : vector<1x1x128xf32> to vector<1x128xf32>
    %204 = vector.broadcast %203 : vector<1x128xf32> to vector<72x128xf32>
    %205 = arith.addf %201, %204 : vector<72x128xf32>
    %206 = arith.addf %205, %150 : vector<72x128xf32>
    %c1 = arith.constant 1 : index
    %c0_95 = arith.constant 0 : index
    %c0_96 = arith.constant 0 : index
    %207 = vector.load %arg14[%c1, %c0_95, %c0_96] : memref<2x1x128xf32, #tpu.memory_space<vmem>>, vector<1x1x128xf32>
    %208 = vector.shape_cast %207 : vector<1x1x128xf32> to vector<1x128xf32>
    %c1_97 = arith.constant 1 : index
    %c0_98 = arith.constant 0 : index
    %c0_99 = arith.constant 0 : index
    %209 = vector.load %arg15[%c1_97, %c0_98, %c0_99] : memref<2x1x128xf32, #tpu.memory_space<vmem>>, vector<1x1x128xf32>
    %210 = vector.shape_cast %209 : vector<1x1x128xf32> to vector<1x128xf32>
    %cst_100 = arith.constant dense<0.000000e+00> : vector<72xf32>
    %211 = vector.multi_reduction <add>, %206, %cst_100 [1] : vector<72x128xf32> to vector<72xf32>
    %212 = vector.shape_cast %211 : vector<72xf32> to vector<72x1xf32>
    %cst_101 = arith.constant 3.125000e-02 : f32
    %213 = vector.broadcast %cst_101 : f32 to vector<72x1xf32>
    %214 = arith.mulf %212, %213 : vector<72x1xf32>
    %215 = arith.mulf %206, %206 : vector<72x128xf32>
    %cst_102 = arith.constant dense<0.000000e+00> : vector<72xf32>
    %216 = vector.multi_reduction <add>, %215, %cst_102 [1] : vector<72x128xf32> to vector<72xf32>
    %217 = vector.shape_cast %216 : vector<72xf32> to vector<72x1xf32>
    %cst_103 = arith.constant 3.125000e-02 : f32
    %218 = vector.broadcast %cst_103 : f32 to vector<72x1xf32>
    %219 = arith.mulf %217, %218 : vector<72x1xf32>
    %220 = arith.mulf %214, %214 : vector<72x1xf32>
    %221 = arith.subf %219, %220 : vector<72x1xf32>
    %222 = vector.broadcast %214 : vector<72x1xf32> to vector<72x128xf32>
    %223 = arith.subf %206, %222 : vector<72x128xf32>
    %cst_104 = arith.constant 9.99999974E-6 : f32
    %224 = vector.broadcast %cst_104 : f32 to vector<72x1xf32>
    %225 = arith.addf %221, %224 : vector<72x1xf32>
    %226 = math.rsqrt %225 : vector<72x1xf32>
    %227 = vector.broadcast %226 : vector<72x1xf32> to vector<72x128xf32>
    %228 = arith.mulf %223, %227 : vector<72x128xf32>
    %229 = vector.broadcast %208 : vector<1x128xf32> to vector<72x128xf32>
    %230 = arith.mulf %228, %229 : vector<72x128xf32>
    %231 = vector.broadcast %210 : vector<1x128xf32> to vector<72x128xf32>
    %232 = arith.addf %230, %231 : vector<72x128xf32>
    %233 = arith.truncf %232 : vector<72x128xf32> to vector<72x128xbf16>
    %c1_105 = arith.constant 1 : index
    %c0_106 = arith.constant 0 : index
    %c0_107 = arith.constant 0 : index
    %234 = vector.load %arg6[%c1_105, %c0_106, %c0_107] : memref<2x128x384xbf16, #tpu.memory_space<vmem>>, vector<1x128x384xbf16>
    %235 = vector.shape_cast %234 : vector<1x128x384xbf16> to vector<128x384xbf16>
    %cst_108 = arith.constant dense<0.000000e+00> : vector<72x384xf32>
    %236 = tpu.matmul %233, %235, %cst_108 {dimension_numbers = #tpu.dot_dimension_numbers<[1], [0], [0], [1], [0, 0, 1, 1], [], []>} : vector<72x128xbf16>, vector<128x384xbf16>, vector<72x384xf32> -> vector<72x384xf32>
    %c1_109 = arith.constant 1 : index
    %c0_110 = arith.constant 0 : index
    %c0_111 = arith.constant 0 : index
    %237 = vector.load %arg7[%c1_109, %c0_110, %c0_111] : memref<2x1x384xf32, #tpu.memory_space<vmem>>, vector<1x1x384xf32>
    %238 = vector.shape_cast %237 : vector<1x1x384xf32> to vector<1x384xf32>
    %239 = vector.broadcast %238 : vector<1x384xf32> to vector<72x384xf32>
    %240 = arith.addf %236, %239 : vector<72x384xf32>
    %241 = vector.extract_strided_slice %240 {offsets = [0, 0], sizes = [72, 128], strides = [1, 1]} : vector<72x384xf32> to vector<72x128xf32>
    %242 = vector.extract_strided_slice %240 {offsets = [0, 128], sizes = [72, 128], strides = [1, 1]} : vector<72x384xf32> to vector<72x128xf32>
    %243 = vector.extract_strided_slice %240 {offsets = [0, 256], sizes = [72, 128], strides = [1, 1]} : vector<72x384xf32> to vector<72x128xf32>
    %cst_112 = arith.constant 0.000000e+00 : f32
    %244 = vector.broadcast %cst_112 : f32 to vector<72x128xf32>
    %245 = vector.extract_strided_slice %241 {offsets = [0, 0], sizes = [72, 8], strides = [1, 1]} : vector<72x128xf32> to vector<72x8xf32>
    %246 = vector.extract_strided_slice %242 {offsets = [0, 0], sizes = [72, 8], strides = [1, 1]} : vector<72x128xf32> to vector<72x8xf32>
    %247 = vector.extract_strided_slice %243 {offsets = [0, 0], sizes = [72, 8], strides = [1, 1]} : vector<72x128xf32> to vector<72x8xf32>
    %248 = tpu.transpose %246, [1, 0] : vector<72x8xf32> -> vector<8x72xf32>
    %cst_113 = arith.constant dense<0.000000e+00> : vector<72x72xf32>
    %249 = tpu.matmul %245, %248, %cst_113 {dimension_numbers = #tpu.dot_dimension_numbers<[1], [0], [0], [1], [0, 0, 1, 1], [], []>} : vector<72x8xf32>, vector<8x72xf32>, vector<72x72xf32> -> vector<72x72xf32>
    %cst_114 = arith.constant 0.353553385 : f32
    %250 = vector.broadcast %cst_114 : f32 to vector<72x72xf32>
    %251 = arith.mulf %249, %250 : vector<72x72xf32>
    %252 = vector.broadcast %3 : vector<1x72xf32> to vector<72x72xf32>
    %253 = arith.addf %251, %252 : vector<72x72xf32>
    %cst_115 = arith.constant dense<0xFF800000> : vector<72xf32>
    %254 = vector.multi_reduction <maximumf>, %253, %cst_115 [1] : vector<72x72xf32> to vector<72xf32>
    %255 = vector.shape_cast %254 : vector<72xf32> to vector<72x1xf32>
    %256 = vector.broadcast %255 : vector<72x1xf32> to vector<72x72xf32>
    %257 = arith.subf %253, %256 : vector<72x72xf32>
    %258 = math.exp %257 : vector<72x72xf32>
    %cst_116 = arith.constant dense<0.000000e+00> : vector<72xf32>
    %259 = vector.multi_reduction <add>, %258, %cst_116 [1] : vector<72x72xf32> to vector<72xf32>
    %260 = vector.shape_cast %259 : vector<72xf32> to vector<72x1xf32>
    %261 = tpu.reciprocal %260 {approx = true} : vector<72x1xf32> -> vector<72x1xf32>
    %262 = vector.broadcast %261 : vector<72x1xf32> to vector<72x72xf32>
    %263 = arith.mulf %258, %262 : vector<72x72xf32>
    %cst_117 = arith.constant dense<0.000000e+00> : vector<72x8xf32>
    %264 = tpu.matmul %263, %247, %cst_117 {dimension_numbers = #tpu.dot_dimension_numbers<[1], [0], [0], [1], [0, 0, 1, 1], [], []>} : vector<72x72xf32>, vector<72x8xf32>, vector<72x8xf32> -> vector<72x8xf32>
    %c1_118 = arith.constant 1 : index
    %c0_119 = arith.constant 0 : index
    %c0_120 = arith.constant 0 : index
    %265 = vector.load %arg8[%c1_118, %c0_119, %c0_120] : memref<2x32x128xf32, #tpu.memory_space<vmem>>, vector<1x8x128xf32>
    %266 = vector.shape_cast %265 : vector<1x8x128xf32> to vector<8x128xf32>
    %cst_121 = arith.constant dense<0.000000e+00> : vector<72x128xf32>
    %267 = tpu.matmul %264, %266, %cst_121 {dimension_numbers = #tpu.dot_dimension_numbers<[1], [0], [0], [1], [0, 0, 1, 1], [], []>} : vector<72x8xf32>, vector<8x128xf32>, vector<72x128xf32> -> vector<72x128xf32>
    %268 = arith.addf %244, %267 : vector<72x128xf32>
    %269 = vector.extract_strided_slice %241 {offsets = [0, 8], sizes = [72, 8], strides = [1, 1]} : vector<72x128xf32> to vector<72x8xf32>
    %270 = vector.extract_strided_slice %242 {offsets = [0, 8], sizes = [72, 8], strides = [1, 1]} : vector<72x128xf32> to vector<72x8xf32>
    %271 = vector.extract_strided_slice %243 {offsets = [0, 8], sizes = [72, 8], strides = [1, 1]} : vector<72x128xf32> to vector<72x8xf32>
    %272 = tpu.transpose %270, [1, 0] : vector<72x8xf32> -> vector<8x72xf32>
    %cst_122 = arith.constant dense<0.000000e+00> : vector<72x72xf32>
    %273 = tpu.matmul %269, %272, %cst_122 {dimension_numbers = #tpu.dot_dimension_numbers<[1], [0], [0], [1], [0, 0, 1, 1], [], []>} : vector<72x8xf32>, vector<8x72xf32>, vector<72x72xf32> -> vector<72x72xf32>
    %cst_123 = arith.constant 0.353553385 : f32
    %274 = vector.broadcast %cst_123 : f32 to vector<72x72xf32>
    %275 = arith.mulf %273, %274 : vector<72x72xf32>
    %276 = vector.broadcast %3 : vector<1x72xf32> to vector<72x72xf32>
    %277 = arith.addf %275, %276 : vector<72x72xf32>
    %cst_124 = arith.constant dense<0xFF800000> : vector<72xf32>
    %278 = vector.multi_reduction <maximumf>, %277, %cst_124 [1] : vector<72x72xf32> to vector<72xf32>
    %279 = vector.shape_cast %278 : vector<72xf32> to vector<72x1xf32>
    %280 = vector.broadcast %279 : vector<72x1xf32> to vector<72x72xf32>
    %281 = arith.subf %277, %280 : vector<72x72xf32>
    %282 = math.exp %281 : vector<72x72xf32>
    %cst_125 = arith.constant dense<0.000000e+00> : vector<72xf32>
    %283 = vector.multi_reduction <add>, %282, %cst_125 [1] : vector<72x72xf32> to vector<72xf32>
    %284 = vector.shape_cast %283 : vector<72xf32> to vector<72x1xf32>
    %285 = tpu.reciprocal %284 {approx = true} : vector<72x1xf32> -> vector<72x1xf32>
    %286 = vector.broadcast %285 : vector<72x1xf32> to vector<72x72xf32>
    %287 = arith.mulf %282, %286 : vector<72x72xf32>
    %cst_126 = arith.constant dense<0.000000e+00> : vector<72x8xf32>
    %288 = tpu.matmul %287, %271, %cst_126 {dimension_numbers = #tpu.dot_dimension_numbers<[1], [0], [0], [1], [0, 0, 1, 1], [], []>} : vector<72x72xf32>, vector<72x8xf32>, vector<72x8xf32> -> vector<72x8xf32>
    %c1_127 = arith.constant 1 : index
    %c8_128 = arith.constant 8 : index
    %c0_129 = arith.constant 0 : index
    %289 = vector.load %arg8[%c1_127, %c8_128, %c0_129] : memref<2x32x128xf32, #tpu.memory_space<vmem>>, vector<1x8x128xf32>
    %290 = vector.shape_cast %289 : vector<1x8x128xf32> to vector<8x128xf32>
    %cst_130 = arith.constant dense<0.000000e+00> : vector<72x128xf32>
    %291 = tpu.matmul %288, %290, %cst_130 {dimension_numbers = #tpu.dot_dimension_numbers<[1], [0], [0], [1], [0, 0, 1, 1], [], []>} : vector<72x8xf32>, vector<8x128xf32>, vector<72x128xf32> -> vector<72x128xf32>
    %292 = arith.addf %268, %291 : vector<72x128xf32>
    %293 = vector.extract_strided_slice %241 {offsets = [0, 16], sizes = [72, 8], strides = [1, 1]} : vector<72x128xf32> to vector<72x8xf32>
    %294 = vector.extract_strided_slice %242 {offsets = [0, 16], sizes = [72, 8], strides = [1, 1]} : vector<72x128xf32> to vector<72x8xf32>
    %295 = vector.extract_strided_slice %243 {offsets = [0, 16], sizes = [72, 8], strides = [1, 1]} : vector<72x128xf32> to vector<72x8xf32>
    %296 = tpu.transpose %294, [1, 0] : vector<72x8xf32> -> vector<8x72xf32>
    %cst_131 = arith.constant dense<0.000000e+00> : vector<72x72xf32>
    %297 = tpu.matmul %293, %296, %cst_131 {dimension_numbers = #tpu.dot_dimension_numbers<[1], [0], [0], [1], [0, 0, 1, 1], [], []>} : vector<72x8xf32>, vector<8x72xf32>, vector<72x72xf32> -> vector<72x72xf32>
    %cst_132 = arith.constant 0.353553385 : f32
    %298 = vector.broadcast %cst_132 : f32 to vector<72x72xf32>
    %299 = arith.mulf %297, %298 : vector<72x72xf32>
    %300 = vector.broadcast %3 : vector<1x72xf32> to vector<72x72xf32>
    %301 = arith.addf %299, %300 : vector<72x72xf32>
    %cst_133 = arith.constant dense<0xFF800000> : vector<72xf32>
    %302 = vector.multi_reduction <maximumf>, %301, %cst_133 [1] : vector<72x72xf32> to vector<72xf32>
    %303 = vector.shape_cast %302 : vector<72xf32> to vector<72x1xf32>
    %304 = vector.broadcast %303 : vector<72x1xf32> to vector<72x72xf32>
    %305 = arith.subf %301, %304 : vector<72x72xf32>
    %306 = math.exp %305 : vector<72x72xf32>
    %cst_134 = arith.constant dense<0.000000e+00> : vector<72xf32>
    %307 = vector.multi_reduction <add>, %306, %cst_134 [1] : vector<72x72xf32> to vector<72xf32>
    %308 = vector.shape_cast %307 : vector<72xf32> to vector<72x1xf32>
    %309 = tpu.reciprocal %308 {approx = true} : vector<72x1xf32> -> vector<72x1xf32>
    %310 = vector.broadcast %309 : vector<72x1xf32> to vector<72x72xf32>
    %311 = arith.mulf %306, %310 : vector<72x72xf32>
    %cst_135 = arith.constant dense<0.000000e+00> : vector<72x8xf32>
    %312 = tpu.matmul %311, %295, %cst_135 {dimension_numbers = #tpu.dot_dimension_numbers<[1], [0], [0], [1], [0, 0, 1, 1], [], []>} : vector<72x72xf32>, vector<72x8xf32>, vector<72x8xf32> -> vector<72x8xf32>
    %c1_136 = arith.constant 1 : index
    %c16_137 = arith.constant 16 : index
    %c0_138 = arith.constant 0 : index
    %313 = vector.load %arg8[%c1_136, %c16_137, %c0_138] : memref<2x32x128xf32, #tpu.memory_space<vmem>>, vector<1x8x128xf32>
    %314 = vector.shape_cast %313 : vector<1x8x128xf32> to vector<8x128xf32>
    %cst_139 = arith.constant dense<0.000000e+00> : vector<72x128xf32>
    %315 = tpu.matmul %312, %314, %cst_139 {dimension_numbers = #tpu.dot_dimension_numbers<[1], [0], [0], [1], [0, 0, 1, 1], [], []>} : vector<72x8xf32>, vector<8x128xf32>, vector<72x128xf32> -> vector<72x128xf32>
    %316 = arith.addf %292, %315 : vector<72x128xf32>
    %317 = vector.extract_strided_slice %241 {offsets = [0, 24], sizes = [72, 8], strides = [1, 1]} : vector<72x128xf32> to vector<72x8xf32>
    %318 = vector.extract_strided_slice %242 {offsets = [0, 24], sizes = [72, 8], strides = [1, 1]} : vector<72x128xf32> to vector<72x8xf32>
    %319 = vector.extract_strided_slice %243 {offsets = [0, 24], sizes = [72, 8], strides = [1, 1]} : vector<72x128xf32> to vector<72x8xf32>
    %320 = tpu.transpose %318, [1, 0] : vector<72x8xf32> -> vector<8x72xf32>
    %cst_140 = arith.constant dense<0.000000e+00> : vector<72x72xf32>
    %321 = tpu.matmul %317, %320, %cst_140 {dimension_numbers = #tpu.dot_dimension_numbers<[1], [0], [0], [1], [0, 0, 1, 1], [], []>} : vector<72x8xf32>, vector<8x72xf32>, vector<72x72xf32> -> vector<72x72xf32>
    %cst_141 = arith.constant 0.353553385 : f32
    %322 = vector.broadcast %cst_141 : f32 to vector<72x72xf32>
    %323 = arith.mulf %321, %322 : vector<72x72xf32>
    %324 = vector.broadcast %3 : vector<1x72xf32> to vector<72x72xf32>
    %325 = arith.addf %323, %324 : vector<72x72xf32>
    %cst_142 = arith.constant dense<0xFF800000> : vector<72xf32>
    %326 = vector.multi_reduction <maximumf>, %325, %cst_142 [1] : vector<72x72xf32> to vector<72xf32>
    %327 = vector.shape_cast %326 : vector<72xf32> to vector<72x1xf32>
    %328 = vector.broadcast %327 : vector<72x1xf32> to vector<72x72xf32>
    %329 = arith.subf %325, %328 : vector<72x72xf32>
    %330 = math.exp %329 : vector<72x72xf32>
    %cst_143 = arith.constant dense<0.000000e+00> : vector<72xf32>
    %331 = vector.multi_reduction <add>, %330, %cst_143 [1] : vector<72x72xf32> to vector<72xf32>
    %332 = vector.shape_cast %331 : vector<72xf32> to vector<72x1xf32>
    %333 = tpu.reciprocal %332 {approx = true} : vector<72x1xf32> -> vector<72x1xf32>
    %334 = vector.broadcast %333 : vector<72x1xf32> to vector<72x72xf32>
    %335 = arith.mulf %330, %334 : vector<72x72xf32>
    %cst_144 = arith.constant dense<0.000000e+00> : vector<72x8xf32>
    %336 = tpu.matmul %335, %319, %cst_144 {dimension_numbers = #tpu.dot_dimension_numbers<[1], [0], [0], [1], [0, 0, 1, 1], [], []>} : vector<72x72xf32>, vector<72x8xf32>, vector<72x8xf32> -> vector<72x8xf32>
    %c1_145 = arith.constant 1 : index
    %c24_146 = arith.constant 24 : index
    %c0_147 = arith.constant 0 : index
    %337 = vector.load %arg8[%c1_145, %c24_146, %c0_147] : memref<2x32x128xf32, #tpu.memory_space<vmem>>, vector<1x8x128xf32>
    %338 = vector.shape_cast %337 : vector<1x8x128xf32> to vector<8x128xf32>
    %cst_148 = arith.constant dense<0.000000e+00> : vector<72x128xf32>
    %339 = tpu.matmul %336, %338, %cst_148 {dimension_numbers = #tpu.dot_dimension_numbers<[1], [0], [0], [1], [0, 0, 1, 1], [], []>} : vector<72x8xf32>, vector<8x128xf32>, vector<72x128xf32> -> vector<72x128xf32>
    %340 = arith.addf %316, %339 : vector<72x128xf32>
    %c1_149 = arith.constant 1 : index
    %c0_150 = arith.constant 0 : index
    %c0_151 = arith.constant 0 : index
    %341 = vector.load %arg9[%c1_149, %c0_150, %c0_151] : memref<2x1x128xf32, #tpu.memory_space<vmem>>, vector<1x1x128xf32>
    %342 = vector.shape_cast %341 : vector<1x1x128xf32> to vector<1x128xf32>
    %343 = vector.broadcast %342 : vector<1x128xf32> to vector<72x128xf32>
    %344 = arith.addf %340, %343 : vector<72x128xf32>
    %345 = arith.addf %344, %206 : vector<72x128xf32>
    %c1_152 = arith.constant 1 : index
    %c0_153 = arith.constant 0 : index
    %c0_154 = arith.constant 0 : index
    %346 = vector.load %arg16[%c1_152, %c0_153, %c0_154] : memref<2x1x128xf32, #tpu.memory_space<vmem>>, vector<1x1x128xf32>
    %347 = vector.shape_cast %346 : vector<1x1x128xf32> to vector<1x128xf32>
    %c1_155 = arith.constant 1 : index
    %c0_156 = arith.constant 0 : index
    %c0_157 = arith.constant 0 : index
    %348 = vector.load %arg17[%c1_155, %c0_156, %c0_157] : memref<2x1x128xf32, #tpu.memory_space<vmem>>, vector<1x1x128xf32>
    %349 = vector.shape_cast %348 : vector<1x1x128xf32> to vector<1x128xf32>
    %cst_158 = arith.constant dense<0.000000e+00> : vector<72xf32>
    %350 = vector.multi_reduction <add>, %345, %cst_158 [1] : vector<72x128xf32> to vector<72xf32>
    %351 = vector.shape_cast %350 : vector<72xf32> to vector<72x1xf32>
    %cst_159 = arith.constant 3.125000e-02 : f32
    %352 = vector.broadcast %cst_159 : f32 to vector<72x1xf32>
    %353 = arith.mulf %351, %352 : vector<72x1xf32>
    %354 = arith.mulf %345, %345 : vector<72x128xf32>
    %cst_160 = arith.constant dense<0.000000e+00> : vector<72xf32>
    %355 = vector.multi_reduction <add>, %354, %cst_160 [1] : vector<72x128xf32> to vector<72xf32>
    %356 = vector.shape_cast %355 : vector<72xf32> to vector<72x1xf32>
    %cst_161 = arith.constant 3.125000e-02 : f32
    %357 = vector.broadcast %cst_161 : f32 to vector<72x1xf32>
    %358 = arith.mulf %356, %357 : vector<72x1xf32>
    %359 = arith.mulf %353, %353 : vector<72x1xf32>
    %360 = arith.subf %358, %359 : vector<72x1xf32>
    %361 = vector.broadcast %353 : vector<72x1xf32> to vector<72x128xf32>
    %362 = arith.subf %345, %361 : vector<72x128xf32>
    %cst_162 = arith.constant 9.99999974E-6 : f32
    %363 = vector.broadcast %cst_162 : f32 to vector<72x1xf32>
    %364 = arith.addf %360, %363 : vector<72x1xf32>
    %365 = math.rsqrt %364 : vector<72x1xf32>
    %366 = vector.broadcast %365 : vector<72x1xf32> to vector<72x128xf32>
    %367 = arith.mulf %362, %366 : vector<72x128xf32>
    %368 = vector.broadcast %347 : vector<1x128xf32> to vector<72x128xf32>
    %369 = arith.mulf %367, %368 : vector<72x128xf32>
    %370 = vector.broadcast %349 : vector<1x128xf32> to vector<72x128xf32>
    %371 = arith.addf %369, %370 : vector<72x128xf32>
    %372 = arith.truncf %371 : vector<72x128xf32> to vector<72x128xbf16>
    %c1_163 = arith.constant 1 : index
    %c0_164 = arith.constant 0 : index
    %c0_165 = arith.constant 0 : index
    %373 = vector.load %arg10[%c1_163, %c0_164, %c0_165] : memref<2x128x128xbf16, #tpu.memory_space<vmem>>, vector<1x128x128xbf16>
    %374 = vector.shape_cast %373 : vector<1x128x128xbf16> to vector<128x128xbf16>
    %cst_166 = arith.constant dense<0.000000e+00> : vector<72x128xf32>
    %375 = tpu.matmul %372, %374, %cst_166 {dimension_numbers = #tpu.dot_dimension_numbers<[1], [0], [0], [1], [0, 0, 1, 1], [], []>} : vector<72x128xbf16>, vector<128x128xbf16>, vector<72x128xf32> -> vector<72x128xf32>
    %c1_167 = arith.constant 1 : index
    %c0_168 = arith.constant 0 : index
    %c0_169 = arith.constant 0 : index
    %376 = vector.load %arg11[%c1_167, %c0_168, %c0_169] : memref<2x1x128xf32, #tpu.memory_space<vmem>>, vector<1x1x128xf32>
    %377 = vector.shape_cast %376 : vector<1x1x128xf32> to vector<1x128xf32>
    %378 = vector.broadcast %377 : vector<1x128xf32> to vector<72x128xf32>
    %379 = arith.addf %375, %378 : vector<72x128xf32>
    %380 = arith.mulf %379, %379 : vector<72x128xf32>
    %381 = arith.mulf %379, %380 : vector<72x128xf32>
    %cst_170 = arith.constant 4.471500e-02 : f32
    %382 = vector.broadcast %cst_170 : f32 to vector<72x128xf32>
    %383 = arith.mulf %382, %381 : vector<72x128xf32>
    %384 = arith.addf %379, %383 : vector<72x128xf32>
    %cst_171 = arith.constant 0.797884583 : f32
    %385 = vector.broadcast %cst_171 : f32 to vector<72x128xf32>
    %386 = arith.mulf %385, %384 : vector<72x128xf32>
    %387 = math.tanh %386 : vector<72x128xf32>
    %cst_172 = arith.constant 1.000000e+00 : f32
    %388 = vector.broadcast %cst_172 : f32 to vector<72x128xf32>
    %389 = arith.addf %388, %387 : vector<72x128xf32>
    %cst_173 = arith.constant 5.000000e-01 : f32
    %390 = vector.broadcast %cst_173 : f32 to vector<72x128xf32>
    %391 = arith.mulf %390, %389 : vector<72x128xf32>
    %392 = arith.mulf %379, %391 : vector<72x128xf32>
    %393 = arith.truncf %392 : vector<72x128xf32> to vector<72x128xbf16>
    %c1_174 = arith.constant 1 : index
    %c0_175 = arith.constant 0 : index
    %c0_176 = arith.constant 0 : index
    %394 = vector.load %arg12[%c1_174, %c0_175, %c0_176] : memref<2x128x128xbf16, #tpu.memory_space<vmem>>, vector<1x128x128xbf16>
    %395 = vector.shape_cast %394 : vector<1x128x128xbf16> to vector<128x128xbf16>
    %cst_177 = arith.constant dense<0.000000e+00> : vector<72x128xf32>
    %396 = tpu.matmul %393, %395, %cst_177 {dimension_numbers = #tpu.dot_dimension_numbers<[1], [0], [0], [1], [0, 0, 1, 1], [], []>} : vector<72x128xbf16>, vector<128x128xbf16>, vector<72x128xf32> -> vector<72x128xf32>
    %c1_178 = arith.constant 1 : index
    %c0_179 = arith.constant 0 : index
    %c0_180 = arith.constant 0 : index
    %397 = vector.load %arg13[%c1_178, %c0_179, %c0_180] : memref<2x1x128xf32, #tpu.memory_space<vmem>>, vector<1x1x128xf32>
    %398 = vector.shape_cast %397 : vector<1x1x128xf32> to vector<1x128xf32>
    %399 = vector.broadcast %398 : vector<1x128xf32> to vector<72x128xf32>
    %400 = arith.addf %396, %399 : vector<72x128xf32>
    %401 = arith.addf %400, %345 : vector<72x128xf32>
    %cst_181 = arith.constant dense<0xFF800000> : vector<128xf32>
    %402 = vector.multi_reduction <maximumf>, %401, %cst_181 [0] : vector<72x128xf32> to vector<128xf32>
    %403 = vector.shape_cast %402 : vector<128xf32> to vector<1x128xf32>
    %404 = arith.truncf %403 : vector<1x128xf32> to vector<1x128xbf16>
    %c0_182 = arith.constant 0 : index
    %c0_183 = arith.constant 0 : index
    %405 = vector.load %arg18[%c0_182, %c0_183] : memref<128x128xbf16, #tpu.memory_space<vmem>>, vector<128x128xbf16>
    %cst_184 = arith.constant dense<0.000000e+00> : vector<1x128xf32>
    %406 = tpu.matmul %404, %405, %cst_184 {dimension_numbers = #tpu.dot_dimension_numbers<[1], [0], [0], [1], [0, 0, 1, 1], [], []>} : vector<1x128xbf16>, vector<128x128xbf16>, vector<1x128xf32> -> vector<1x128xf32>
    %c0_185 = arith.constant 0 : index
    %c0_186 = arith.constant 0 : index
    %407 = vector.load %arg19[%c0_185, %c0_186] : memref<1x128xf32, #tpu.memory_space<vmem>>, vector<1x128xf32>
    %408 = arith.addf %406, %407 : vector<1x128xf32>
    %409 = vector.shape_cast %408 : vector<1x128xf32> to vector<1x128xf32>
    %410 = vector.broadcast %409 : vector<1x128xf32> to vector<8x128xf32>
    %c0_187 = arith.constant 0 : index
    %c0_188 = arith.constant 0 : index
    %c0_189 = arith.constant 0 : index
    %411 = vector.load %arg20[%c0_187, %c0_188, %c0_189] : memref<1x8x128xf32, #tpu.memory_space<vmem>>, vector<1x8x128xf32>
    %412 = vector.shape_cast %411 : vector<1x8x128xf32> to vector<8x128xf32>
    %413 = vector.shape_cast %410 : vector<8x128xf32> to vector<1x8x128xf32>
    tpu.vector_store %arg20[%c0_187, %c0_188, %c0_189], %413 {strides = array<i32>} : memref<1x8x128xf32, #tpu.memory_space<vmem>>, vector<1x8x128xf32>,
    return
  }
  func.func @transform_0(%arg0: i32) -> (i32, i32, i32) {
    %c0_i32 = arith.constant 0 : i32
    %c0_i32_0 = arith.constant 0 : i32
    %c0_i32_1 = arith.constant 0 : i32
    return %arg0, %c0_i32, %c0_i32_0 : i32, i32, i32
  }
  func.func @transform_1(%arg0: i32) -> (i32, i32, i32) {
    %c0_i32 = arith.constant 0 : i32
    %c0_i32_0 = arith.constant 0 : i32
    %c0_i32_1 = arith.constant 0 : i32
    return %arg0, %c0_i32, %c0_i32_0 : i32, i32, i32
  }
  func.func @transform_2(%arg0: i32) -> (i32, i32) {
    %c0_i32 = arith.constant 0 : i32
    %c0_i32_0 = arith.constant 0 : i32
    %c0_i32_1 = arith.constant 0 : i32
    return %c0_i32, %c0_i32_0 : i32, i32
  }
  func.func @transform_3(%arg0: i32) -> (i32, i32) {
    %c0_i32 = arith.constant 0 : i32
    %c0_i32_0 = arith.constant 0 : i32
    %c0_i32_1 = arith.constant 0 : i32
    return %c0_i32, %c0_i32_0 : i32, i32
  }
  func.func @transform_4(%arg0: i32) -> (i32, i32) {
    %c0_i32 = arith.constant 0 : i32
    %c0_i32_0 = arith.constant 0 : i32
    %c0_i32_1 = arith.constant 0 : i32
    return %c0_i32, %c0_i32_0 : i32, i32
  }
  func.func @transform_5(%arg0: i32) -> (i32, i32, i32) {
    %c0_i32 = arith.constant 0 : i32
    %c0_i32_0 = arith.constant 0 : i32
    %c0_i32_1 = arith.constant 0 : i32
    %c0_i32_2 = arith.constant 0 : i32
    return %c0_i32, %c0_i32_0, %c0_i32_1 : i32, i32, i32
  }
  func.func @transform_6(%arg0: i32) -> (i32, i32, i32) {
    %c0_i32 = arith.constant 0 : i32
    %c0_i32_0 = arith.constant 0 : i32
    %c0_i32_1 = arith.constant 0 : i32
    %c0_i32_2 = arith.constant 0 : i32
    return %c0_i32, %c0_i32_0, %c0_i32_1 : i32, i32, i32
  }
  func.func @transform_7(%arg0: i32) -> (i32, i32, i32) {
    %c0_i32 = arith.constant 0 : i32
    %c0_i32_0 = arith.constant 0 : i32
    %c0_i32_1 = arith.constant 0 : i32
    %c0_i32_2 = arith.constant 0 : i32
    return %c0_i32, %c0_i32_0, %c0_i32_1 : i32, i32, i32
  }
  func.func @transform_8(%arg0: i32) -> (i32, i32, i32) {
    %c0_i32 = arith.constant 0 : i32
    %c0_i32_0 = arith.constant 0 : i32
    %c0_i32_1 = arith.constant 0 : i32
    %c0_i32_2 = arith.constant 0 : i32
    return %c0_i32, %c0_i32_0, %c0_i32_1 : i32, i32, i32
  }
  func.func @transform_9(%arg0: i32) -> (i32, i32, i32) {
    %c0_i32 = arith.constant 0 : i32
    %c0_i32_0 = arith.constant 0 : i32
    %c0_i32_1 = arith.constant 0 : i32
    %c0_i32_2 = arith.constant 0 : i32
    return %c0_i32, %c0_i32_0, %c0_i32_1 : i32, i32, i32
  }
  func.func @transform_10(%arg0: i32) -> (i32, i32, i32) {
    %c0_i32 = arith.constant 0 : i32
    %c0_i32_0 = arith.constant 0 : i32
    %c0_i32_1 = arith.constant 0 : i32
    %c0_i32_2 = arith.constant 0 : i32
    return %c0_i32, %c0_i32_0, %c0_i32_1 : i32, i32, i32
  }
  func.func @transform_11(%arg0: i32) -> (i32, i32, i32) {
    %c0_i32 = arith.constant 0 : i32
    %c0_i32_0 = arith.constant 0 : i32
    %c0_i32_1 = arith.constant 0 : i32
    %c0_i32_2 = arith.constant 0 : i32
    return %c0_i32, %c0_i32_0, %c0_i32_1 : i32, i32, i32
  }
  func.func @transform_12(%arg0: i32) -> (i32, i32, i32) {
    %c0_i32 = arith.constant 0 : i32
    %c0_i32_0 = arith.constant 0 : i32
    %c0_i32_1 = arith.constant 0 : i32
    %c0_i32_2 = arith.constant 0 : i32
    return %c0_i32, %c0_i32_0, %c0_i32_1 : i32, i32, i32
  }
  func.func @transform_13(%arg0: i32) -> (i32, i32, i32) {
    %c0_i32 = arith.constant 0 : i32
    %c0_i32_0 = arith.constant 0 : i32
    %c0_i32_1 = arith.constant 0 : i32
    %c0_i32_2 = arith.constant 0 : i32
    return %c0_i32, %c0_i32_0, %c0_i32_1 : i32, i32, i32
  }
  func.func @transform_14(%arg0: i32) -> (i32, i32, i32) {
    %c0_i32 = arith.constant 0 : i32
    %c0_i32_0 = arith.constant 0 : i32
    %c0_i32_1 = arith.constant 0 : i32
    %c0_i32_2 = arith.constant 0 : i32
    return %c0_i32, %c0_i32_0, %c0_i32_1 : i32, i32, i32
  }
  func.func @transform_15(%arg0: i32) -> (i32, i32, i32) {
    %c0_i32 = arith.constant 0 : i32
    %c0_i32_0 = arith.constant 0 : i32
    %c0_i32_1 = arith.constant 0 : i32
    %c0_i32_2 = arith.constant 0 : i32
    return %c0_i32, %c0_i32_0, %c0_i32_1 : i32, i32, i32
  }
  func.func @transform_16(%arg0: i32) -> (i32, i32, i32) {
    %c0_i32 = arith.constant 0 : i32
    %c0_i32_0 = arith.constant 0 : i32
    %c0_i32_1 = arith.constant 0 : i32
    %c0_i32_2 = arith.constant 0 : i32
    return %c0_i32, %c0_i32_0, %c0_i32_1 : i32, i32, i32
  }
  func.func @transform_17(%arg0: i32) -> (i32, i32) {
    %c0_i32 = arith.constant 0 : i32
    %c0_i32_0 = arith.constant 0 : i32
    %c0_i32_1 = arith.constant 0 : i32
    return %c0_i32, %c0_i32_0 : i32, i32
  }
  func.func @transform_18(%arg0: i32) -> (i32, i32) {
    %c0_i32 = arith.constant 0 : i32
    %c0_i32_0 = arith.constant 0 : i32
    %c0_i32_1 = arith.constant 0 : i32
    return %c0_i32, %c0_i32_0 : i32, i32
  }
  func.func @transform_19(%arg0: i32) -> (i32, i32, i32) {
    %c0_i32 = arith.constant 0 : i32
    %c0_i32_0 = arith.constant 0 : i32
    %c0_i32_1 = arith.constant 0 : i32
    return %arg0, %c0_i32, %c0_i32_0 : i32, i32, i32
  }
}

</mosaic_0001>

<bundles_post_ra>
// kernel: tvtsbert_classification_forward.1
= control target key start
LH: loop header
LB: loop body
LE: loop exit
PB: predicated region body
PF: predicated region fallthrough
CT: control target
= control target key end

     0   :  { %s11079_s0 = inlined_call_operand.vmem [shape: f32[2,72,128], index: 0, kind: input, shape index: {}]   ;;  %s11080_s1 = inlined_call_operand.vmem [shape: f32[2,1,72], index: 1, kind: input, shape index: {}]   ;;  %s11081_s2 = inlined_call_operand.vmem [shape: bf16[128,128], index: 2, kind: input, shape index: {}]   ;;  %s11082_s3 = inlined_call_operand.vmem [shape: f32[1,128], index: 3, kind: input, shape index: {}]   ;;  %s11083_s4 = inlined_call_operand.hbm [shape: f32[72,128], index: 4, kind: input, shape index: {}]   ;;  %s11084_s5 = inlined_call_operand.vmem [shape: bf16[2,128,384], index: 5, kind: input, shape index: {}]   ;;  %s11085_s6 = inlined_call_operand.vmem [shape: f32[2,1,384], index: 6, kind: input, shape index: {}]   ;;  %s11086_s7 = inlined_call_operand.hbm [shape: f32[2,32,128], index: 7, kind: input, shape index: {}]   ;;  %s11087_s8 = inlined_call_operand.vmem [shape: f32[2,1,128], index: 8, kind: input, shape index: {}]   ;;  %s11088_s9 = inlined_call_operand.hbm [shape: bf16[2,128,128], index: 9, kind: input, shape index: {}]   ;;  %s11089_s10 = inlined_call_operand.vmem [shape: f32[2,1,128], index: 10, kind: input, shape index: {}]   ;;  %s11090_s11 = inlined_call_operand.hbm [shape: bf16[2,128,128], index: 11, kind: input, shape index: {}]   ;;  %s11091_s12 = inlined_call_operand.vmem [shape: f32[2,1,128], index: 12, kind: input, shape index: {}]   ;;  %s11092_s13 = inlined_call_operand.hbm [shape: f32[2,1,128], index: 13, kind: input, shape index: {}]   ;;  %s11093_s14 = inlined_call_operand.hbm [shape: f32[2,1,128], index: 14, kind: input, shape index: {}]   ;;  %s11094_s15 = inlined_call_operand.hbm [shape: f32[2,1,128], index: 15, kind: input, shape index: {}]   ;;  %s11095_s16 = inlined_call_operand.hbm [shape: f32[2,1,128], index: 16, kind: input, shape index: {}]   ;;  %s11096_s17 = inlined_call_operand.hbm [shape: bf16[128,128], index: 17, kind: input, shape index: {}]   ;;  %s11097_s18 = inlined_call_operand.vmem [shape: f32[1,128], index: 18, kind: input, shape index: {}]   ;;  %s11098_s19 = inlined_call_operand.vmem [shape: f32[2,8,128], index: 19, kind: output, shape index: {}]  }
   0x1   :  { %11115 = sst [smem:[#allocation29_spill]] %s11079_s0 }
   0x2   :  { %11116 = sst [smem:[#allocation30_spill]] %s11080_s1 }
   0x3   :  { %11117 = sst [smem:[#allocation31_spill]] %s11081_s2 }
   0x4   :  { %11118 = sst [smem:[#allocation32_spill]] %s11082_s3 }
   0x5   :  { %11119 = sst [smem:[#allocation33_spill]] %s11083_s4 }
   0x6   :  { %11120 = sst [smem:[#allocation34_spill]] %s11086_s7 }
   0x7   :  { %11121 = sst [smem:[#allocation35_spill]] %s11090_s11 }
   0x8   :  { %11122 = sst [smem:[#allocation36_spill]] %s11098_s19 }
   0x9   :  { %24 = vsyncpa [#allocation3], 0 }
   0xa   :  { %25 = vsyncpa [#allocation5], 0 }
   0xb   :  { %26 = vsyncpa [#allocation8], 0 }
   0xc   :  { %27 = vsyncpa [#allocation11], 0 }
   0xd   :  { %28 = vsyncpa [#allocation14], 0  ;;  %s8347_s0 = smov 0  }
   0xe LB: > { %11123 = sst [smem:[#allocation21_spill]] %s8227_s0  ;;  %s8353_s30 = sadd.s32 4294967295, %s8227_s0   ;;  %s8227_s0 = sphi %s8347_s0, %s34_s0  }
   0xf   : > { %p6438_p0 = scmp.ge.s32.totalorder %s8227_s0, 1  ;;  %p474_p1 = scmp.lt.s32.totalorder %s8227_s0, 3 }
  0x10   : > { %p7351_p2 = scmp.eq.s32.totalorder %s8353_s30, 0  ;;  %s11124_s7 = sld [smem:[#allocation34_spill]] }
  0x11   : > { %p8361_p3 = pnand %p6438_p0, %p474_p1  ;;  %s8229_s2 = smov [#allocation4]  }
  0x12   : > { %s513_s23 = sshll.u32 %s8229_s2, 4  ;;  %s11127_s11 = sld [smem:[#allocation35_spill]]  ;;  %s514_s23 = int_to_ptr.vmem [resolvable:$true] %s513_s23 }
  0x13   : > { %p7323_p4 = pneg %p8361_p3  ;;  %s8230_s27 = smov [#allocation7]  }
  0x14   : > { %s547_s28 = sshll.u32 %s8230_s27, 4  ;;  %s11101_s29 = smov 128   ;;  %s548_s28 = int_to_ptr.vmem [resolvable:$true] %s547_s28 }
  0x15   : > { %p8369_p5 = pnand %p7351_p2, %p7323_p4  ;;  %s8232_s20 = smov 8  }
  0x16   : > { %s511_s1 = sshll.u32 %s11124_s7, 4  ;;  %s11102_s21 = smov 64   ;;  %s512_s1 = int_to_ptr.hbm [resolvable:$true] %s511_s1 }
  0x17   : > { %7329 = dma.hbm_to_vmem [thread:$0]  (!%p8369_p5), %s512_s1, 1024, %s514_s23, [#allocation5], %s11101_s29, %s11101_s29, %s8232_s20  }
  0x18   : > { %s545_s26 = sshll.u32 %s11127_s11, 4  ;;  %s11104_s2 = smov 4   ;;  %s546_s26 = int_to_ptr.hbm [resolvable:$true] %s545_s26 }
  0x19   : > { %7335 = dma.hbm_to_vmem [thread:$0]  (!%p8369_p5), %s546_s26, 2048, %s548_s28, [#allocation8], %s11102_s21, %s11102_s21, %s11104_s2  }
  0x1a   : > { %s576_s27 = sshll.u32 %s11093_s14, 4  ;;  %s8235_s7 = smov [#allocation10]   ;;  %s577_s27 = int_to_ptr.hbm [resolvable:$true] %s576_s27 }
  0x1b   : > { %s578_s11 = sshll.u32 %s8235_s7, 4  ;;  %s604_s1 = sshll.u32 %s11095_s16, 4  ;;  %s579_s11 = int_to_ptr.vmem [resolvable:$true] %s578_s11  ;;  %s605_s1 = int_to_ptr.hbm [resolvable:$true] %s604_s1 }
  0x1c   : > { %s11106_s23 = smov 16   ;;  %s11108_s29 = smov 1  }
  0x1d   : > { %7341 = dma.hbm_to_vmem [thread:$0]  (!%p8369_p5), %s577_s27, 32, %s579_s11, [#allocation11], %s11106_s23, %s11106_s23, %s11108_s29  }
  0x1e   : > { %s11128_s4 = sld [smem:[#allocation33_spill]]  ;;  %s8238_s3 = smov [#allocation13]  }
  0x1f   : > { %s606_s7 = sshll.u32 %s8238_s3, 4  ;;  %s8239_s19 = smov [#allocation2]   ;;  %s607_s7 = int_to_ptr.vmem [resolvable:$true] %s606_s7 }
  0x20   : > { %7347 = dma.hbm_to_vmem [thread:$0]  (!%p8369_p5), %s605_s1, 32, %s607_s7, [#allocation14], %s11106_s23, %s11106_s23, %s11108_s29  }
  0x21   : > { %s493_s0 = sshll.u32 %s8239_s19, 4  ;;  %s528_s11 = sshll.u32 %s11088_s9, 4  ;;  %s494_s0 = int_to_ptr.vmem [resolvable:$true] %s493_s0  ;;  %s529_s11 = int_to_ptr.hbm [resolvable:$true] %s528_s11 }
  0x22   : > { %s11129_s27 = smov 128   ;;  %s562_s3 = sshll.u32 %s11092_s13, 4  ;;  %s563_s3 = int_to_ptr.hbm [resolvable:$true] %s562_s3 }
  0x23   : > { %s11130_s21 = smov 4   ;;  %s11131_s2 = smov 64  }
  0x24   : > { %s491_s25 = sshll.u32 %s11128_s4, 4  ;;  %s8240_s4 = smov [#allocation6]   ;;  %s492_s25 = int_to_ptr.hbm [resolvable:$true] %s491_s25 }
  0x25   : > { %7326 = dma.hbm_to_vmem [thread:$0]  (!%p8369_p5), %s492_s25, 1152, %s494_s0, [#allocation3], %s11129_s27, %s11129_s27, %s8232_s20  }
  0x26   : > { %s530_s1 = sshll.u32 %s8240_s4, 4  ;;  %s8241_s7 = smov [#allocation9]   ;;  %s531_s1 = int_to_ptr.vmem [resolvable:$true] %s530_s1 }
  0x27   : > { %7332 = dma.hbm_to_vmem [thread:$0]  (!%p8369_p5), %s529_s11, 2048, %s531_s1, [#allocation5], %s11131_s2, %s11131_s2, %s11130_s21  }
  0x28   : > { %s564_s19 = sshll.u32 %s8241_s7, 4  ;;  %s590_s20 = sshll.u32 %s11094_s15, 4  ;;  %s565_s19 = int_to_ptr.vmem [resolvable:$true] %s564_s19  ;;  %s591_s20 = int_to_ptr.hbm [resolvable:$true] %s590_s20 }
  0x29   : > { %s11132_s25 = smov 1   ;;  %s11133_s0 = smov 16  }
  0x2a   : > { %7338 = dma.hbm_to_vmem [thread:$0]  (!%p8369_p5), %s563_s3, 32, %s565_s19, [#allocation8], %s11133_s0, %s11133_s0, %s11132_s25  }
  0x2b   : > { %s618_s26 = sshll.u32 %s11096_s17, 4  ;;  %s8242_s28 = smov [#allocation12]   ;;  %s619_s26 = int_to_ptr.hbm [resolvable:$true] %s618_s26 }
  0x2c   : > { %s592_s11 = sshll.u32 %s8242_s28, 4  ;;  %s8243_s29 = smov [#allocation15]   ;;  %s593_s11 = int_to_ptr.vmem [resolvable:$true] %s592_s11 }
  0x2d   : > { %7344 = dma.hbm_to_vmem [thread:$0]  (!%p8369_p5), %s591_s20, 32, %s593_s11, [#allocation11], %s11133_s0, %s11133_s0, %s11132_s25  }
  0x2e   : > { %s620_s23 = sshll.u32 %s8243_s29, 4  ;;  %653 = sbr.rel (%p8361_p3) target bundleno = 5135 (0x140f), region = 96  ;;  %s621_s23 = int_to_ptr.vmem [resolvable:$true] %s620_s23 }
  0x2f   : > { %7350 = dma.hbm_to_vmem [thread:$0]  (!%p8369_p5), %s619_s26, 1024, %s621_s23, [#allocation14], %s11131_s2, %s11131_s2, %s11130_s21  }
  0x33   : > { %8206 = dma.done.wait (%p7351_p2), [#allocation3], 1152  }
  0x34   : > { %8208 = vsyncadd (%p7351_p2), [#allocation3], 4294966144 }
  0x35   : > { %8210 = dma.done.wait (%p7351_p2), [#allocation5], 3072  }
  0x36   : > { %8212 = vsyncadd (%p7351_p2), [#allocation5], 4294964224 }
  0x37   : > { %8214 = dma.done.wait (%p7351_p2), [#allocation8], 2080  }
  0x38   : > { %8216 = vsyncadd (%p7351_p2), [#allocation8], 4294965216 }
  0x39   : > { %8218 = dma.done.wait (%p7351_p2), [#allocation11], 64  }
  0x3a   : > { %8220 = vsyncadd (%p7351_p2), [#allocation11], 4294967232 }
  0x3b   : > { %8222 = dma.done.wait (%p7351_p2), [#allocation14], 1056  }
  0x3c   : > { %8224 = vsyncadd (%p7351_p2), [#allocation14], 4294966240  ;;  %p752_p6 = scmp.lt.s32.totalorder %s8353_s30, 1  ;;  %s11134_s3 = sld [smem:[#allocation31_spill]]  ;;  %v880_v24 = vld [vmem:[#allocation2] sm:$0xff]  ;;  %v881_v29 = vld [vmem:[#allocation2 + $0x8] sm:$0xff] }
  0x3d   : > { %s11135_s19 = sld [smem:[#allocation30_spill]]  ;;  %v882_v34 = vld [vmem:[#allocation2 + $0x10] sm:$0xff]  ;;  %v883_v39 = vld [vmem:[#allocation2 + $0x18] sm:$0xff]  ;;  %v884_v44 = vld [vmem:[#allocation2 + $0x20] sm:$0xff]  ;;  %s8244_s11 = smov 120  }
  0x3e   : > { %s11159_s30 = smov (!%p752_p6, %s8353_s30), 1  ;;  %s11136_s2 = sld [smem:[#allocation29_spill]]  ;;  %v885_v49 = vld [vmem:[#allocation2 + $0x28] sm:$0xff]  ;;  %v886_v54 = vld [vmem:[#allocation2 + $0x30] sm:$0xff]  ;;  %v887_v59 = vld [vmem:[#allocation2 + $0x38] sm:$0xff] }
  0x3f   : > { %s7286_s23 = smul.u32 72, %s11159_s30  ;;  %s11137_s27 = sld [smem:[#allocation32_spill]] }
  0x40   : > { %s8245_s29 = smov 112   ;;  %s11156_s25 = sld [smem:[#allocation36_spill]] }
  0x42   : > { %v7178_v0 = vld [vmem:[%s11134_s3 + $0x38] sm:$0xff]  ;;  %v7177_v1 = vld [vmem:[%s11134_s3 + $0x30] sm:$0xff]  ;;  %v7176_v2 = vld [vmem:[%s11134_s3 + $0x28] sm:$0xff] }
  0x43   : > { %847 = vmatpush.bf16.msra.mxu0 %v7178_v0  ;;  %s8478_s20 = scalar_lea.vmem %s11135_s19, %s11159_s30  ;;  %v7175_v3 = vld [vmem:[%s11134_s3 + $0x20] sm:$0xff]  ;;  %v7174_v4 = vld [vmem:[%s11134_s3 + $0x18] sm:$0xff]  ;;  %v7173_v5 = vld [vmem:[%s11134_s3 + $0x10] sm:$0xff] }
  0x44   : > { %v7172_v6 = vld [vmem:[%s11134_s3 + $0x8] sm:$0xff]  ;;  %s756_s7 = scalar_lea.vmem %s11136_s2, %s7286_s23  ;;  %v7171_v7 = vld [vmem:[%s11134_s3] sm:$0xff]  ;;  %s8246_s23 = smov 104  }
  0x45   : > { %v764_v8 = vld [vmem:[%s756_s7] sm:$0xff]  ;;  %v765_v9 = vld [vmem:[%s756_s7 + $0x8] sm:$0xff]  ;;  %v766_v11 = vld [vmem:[%s756_s7 + $0x10] sm:$0xff]  ;;  %s6460_s2 = sshll.u32 %s11159_s30, 3 }
  0x46   : > { %v774_v10 = vpack.c.bf16 %v765_v9, %v764_v8  ;;  %v767_v12 = vld [vmem:[%s756_s7 + $0x18] sm:$0xff]  ;;  %v768_v14 = vld [vmem:[%s756_s7 + $0x20] sm:$0xff]  ;;  %v769_v15 = vld [vmem:[%s756_s7 + $0x28] sm:$0xff]  ;;  %s763_s0 = scalar_lea.vmem %s11156_s25, %s6460_s2 }
  0x47   : > { %848 = vmatpush.bf16.msra.mxu0 %v7177_v1  ;;  %v775_v13 = vpack.c.bf16 %v767_v12, %v766_v11  ;;  %v776_v16 = vpack.c.bf16 %v769_v15, %v768_v14  ;;  %v770_v17 = vld [vmem:[%s756_s7 + $0x30] sm:$0xff]  ;;  %v771_v18 = vld [vmem:[%s756_s7 + $0x38] sm:$0xff]  ;;  %v772_v20 = vld [vmem:[%s756_s7 + $0x40] sm:$0xff] }
  0x48   : > { %v777_v19 = vpack.c.bf16 %v771_v18, %v770_v17  ;;  %v778_v21 = vpack.c.bf16 %v772_v20, %v772_v20  ;;  %v7516_v22 = vld [vmem:[%s11137_s27] ss:$0 sm:$0xff]  ;;  %v6581_v9 = vld [vmem:[%s11084_s5 + $0xb4] sm:$0xf0]  ;;  %v7202_v11 = vld [vmem:[%s11084_s5 + $0xb8] sm:$0xf0] }
  0x49   : > { %v888_v0 = vld [vmem:[#allocation2 + $0x40] sm:$0xff]  ;;  %v6567_v14 = vld [vmem:[%s11084_s5 + $0x90] sm:$0xf]  ;;  %v7198_v15 = vld [vmem:[%s11084_s5 + $0x98] sm:$0xf0] }
  0x4a   : > { %v6568_v17 = vor.u32 %v7198_v15, %v6567_v14  ;;  %v6569_v18 = vld [vmem:[%s11084_s5 + $0x9c] sm:$0xf0]  ;;  %v7199_v20 = vld [vmem:[%s11084_s5 + $0xa0] sm:$0xf0] }
  0x4b   : > { %849 = vmatpush.bf16.msra.mxu0 %v7176_v2 }
  0x4f   : > { %850 = vmatpush.bf16.msra.mxu0 %v7175_v3 }
  0x53   : > { %851 = vmatpush.bf16.msra.mxu0 %v7174_v4 }
  0x57   : > { %852 = vmatpush.bf16.msra.mxu0 %v7173_v5  ;;  %v6579_v5 = vld [vmem:[%s11084_s5 + $0xa8] sm:$0xf] }
  0x5b   : > { %853 = vmatpush.bf16.msra.mxu0 %v7172_v6  ;;  %v7201_v6 = vld [vmem:[%s11084_s5 + $0xb0] sm:$0xf0] }
  0x5c   : > { %v6580_v8 = vor.u32 %v7201_v6, %v6579_v5  ;;  %v6507_v6 = vld [vmem:[%s11084_s5 + $0x18] sm:$0xf] }
  0x5e   : > { %1295 = vmatpush.bf16.msra.mxu1 %v6580_v8 }
  0x5f   : > { %854 = vmatpush.bf16.msra.mxu0 %v7171_v7  ;;  %v7200_v7 = vld [vmem:[%s11084_s5 + $0xac] sm:$0xf] }
  0x60   : > { %v6584_v12 = vor.u32 %v7200_v7, %v6581_v9  ;;  %v7183_v7 = vld [vmem:[%s11084_s5 + $0x20] sm:$0xf0] }
  0x61   : > { %v6508_v9 = vor.u32 %v7183_v7, %v6507_v6 }
  0x62   : > { %855 = vmatmul.bf16.vlgmr.msra.gmra.mxu0 %v774_v10  ;;  %v6587_v10 = vld [vmem:[%s11084_s5 + $0xb0] sm:$0xf]  ;;  %1328 = vmatpush.bf16.msra.mxu2 %v6584_v12  ;;  %v6515_v12 = vld [vmem:[%s11084_s5 + $0x20] sm:$0xf] }
  0x63   : > { %1296 = vmatpush.bf16.msra.mxu1 %v6568_v17 }
  0x72   : > { %860 = vmatmul.bf16.gmra.mxu0 %v775_v13  ;;  %v6588_v13 = vor.u32 %v7202_v11, %v6587_v10  ;;  %v7182_v10 = vld [vmem:[%s11084_s5 + $0x1c] sm:$0xf]  ;;  %v6509_v11 = vld [vmem:[%s11084_s5 + $0x24] sm:$0xf0] }
  0x73   : > { %v6512_v15 = vor.u32 %v7182_v10, %v6509_v11  ;;  %v8708_v11 = vld [vmem:[#allocation9] ss:$0 sm:$0xff] }
  0x74   : > { %1361 = vmatpush.bf16.msra.mxu3 %v6588_v13 }
  0x82   : > { %865 = vmatmul.bf16.gmra.mxu0 %v776_v16  ;;  %v7197_v16 = vld [vmem:[%s11084_s5 + $0x94] sm:$0xf] }
  0x92   : > { %870 = vmatmul.bf16.gmra.mxu0 %v777_v19  ;;  %v6575_v19 = vld [vmem:[%s11084_s5 + $0x98] sm:$0xf] }
  0xa2   : > { %875 = vmatmul.bf16.gmra.mxu0 %v778_v21  ;;  %v6572_v21 = vor.u32 %v7197_v16, %v6569_v18  ;;  %v7184_v16 = vld [vmem:[%s11084_s5 + $0x28] sm:$0xf0] }
  0xa3   : > { %v6516_v17 = vor.u32 %v7184_v16, %v6515_v12 }
  0xa4   : > { %1329 = vmatpush.bf16.msra.mxu2 %v6572_v21  ;;  %v7179_v21 = vld [vmem:[%s11084_s5 + $0x4] sm:$0xf] }
  0xdf   : > { %v856_v23 = vpop.f32.mrf.mxu0 }
  0xe0   : > { %v857_v25 = vadd.f32 %v7516_v22, %v856_v23  ;;  %v6555_v23 = vld [vmem:[%s11084_s5 + $0x78] sm:$0xf] }
  0xe2   : > { %v8505_v26 = vadd.f32 %v880_v24, %v857_v25  ;;  %v7195_v24 = vld [vmem:[%s11084_s5 + $0x80] sm:$0xf0]  ;;  %v7194_v25 = vld [vmem:[%s11084_s5 + $0x7c] sm:$0xf] }
  0xe4   : > { %900 = vadd.xlane.f32.xlu0 %v8505_v26  ;;  %v927_v27 = vmul.f32 %v8505_v26, %v8505_v26 }
  0xe6   : > { %936 = vadd.xlane.f32.xlu1 %v927_v27  ;;  %v6556_v27 = vor.u32 %v7195_v24, %v6555_v23  ;;  %v6497_v23 = vld [vmem:[%s11084_s5 + $0xc] sm:$0xf0]  ;;  %v6503_v24 = vld [vmem:[%s11084_s5 + $0x8] sm:$0xf] }
  0xe7   : > { %v858_v28 = vpop.f32.mrf.mxu0 }
  0xe8   : > { %v859_v30 = vadd.f32 %v7516_v22, %v858_v28  ;;  %v6557_v28 = vld [vmem:[%s11084_s5 + $0x84] sm:$0xf0]  ;;  %1297 = vmatpush.bf16.msra.mxu1 %v6556_v27 }
  0xea   : > { %v8510_v31 = vadd.f32 %v881_v29, %v859_v30  ;;  %v6563_v29 = vld [vmem:[%s11084_s5 + $0x80] sm:$0xf]  ;;  %v7196_v30 = vld [vmem:[%s11084_s5 + $0x88] sm:$0xf0] }
  0xec   : > { %902 = vadd.xlane.f32.xlu0 %v8510_v31  ;;  %v928_v32 = vmul.f32 %v8510_v31, %v8510_v31 }
  0xee   : > { %938 = vadd.xlane.f32.xlu1 %v928_v32  ;;  %v6560_v32 = vor.u32 %v7194_v25, %v6557_v28  ;;  %v7181_v25 = vld [vmem:[%s11084_s5 + $0x10] sm:$0xf0]  ;;  %v6500_v28 = vor.u32 %v7179_v21, %v6497_v23  ;;  %v8716_v23 = vld [vmem:[#allocation10] ss:$0 sm:$0xff] }
  0xef   : > { %v861_v33 = vpop.f32.mrf.mxu0 }
  0xf0   : > { %v862_v35 = vadd.f32 %v7516_v22, %v861_v33  ;;  %v6564_v33 = vor.u32 %v7196_v30, %v6563_v29  ;;  %1330 = vmatpush.bf16.msra.mxu2 %v6560_v32  ;;  %v6504_v29 = vor.u32 %v7181_v25, %v6503_v24 }
  0xf2   : > { %v8515_v36 = vadd.f32 %v882_v34, %v862_v35  ;;  %v6543_v34 = vld [vmem:[%s11084_s5 + $0x60] sm:$0xf]  ;;  %v7192_v35 = vld [vmem:[%s11084_s5 + $0x68] sm:$0xf0] }
  0xf4   : > { %904 = vadd.xlane.f32.xlu2 %v8515_v36  ;;  %v929_v37 = vmul.f32 %v8515_v36, %v8515_v36 }
  0xf6   : > { %940 = vadd.xlane.f32.xlu0 %v929_v37  ;;  %v7191_v37 = vld [vmem:[%s11084_s5 + $0x64] sm:$0xf] }
  0xf7   : > { %v863_v38 = vpop.f32.mrf.mxu0 }
  0xf8   : > { %v864_v40 = vadd.f32 %v7516_v22, %v863_v38  ;;  %v6544_v38 = vor.u32 %v7192_v35, %v6543_v34 }
  0xfa   : > { %v8520_v41 = vadd.f32 %v883_v39, %v864_v40  ;;  %v6545_v39 = vld [vmem:[%s11084_s5 + $0x6c] sm:$0xf0]  ;;  %v6551_v40 = vld [vmem:[%s11084_s5 + $0x68] sm:$0xf]  ;;  %1298 = vmatpush.bf16.msra.mxu1 %v6544_v38 }
  0xfc   : > { %906 = vadd.xlane.f32.xlu2 %v8520_v41  ;;  %v930_v42 = vmul.f32 %v8520_v41, %v8520_v41 }
  0xfe   : > { %942 = vadd.xlane.f32.xlu1 %v930_v42  ;;  %v7193_v42 = vld [vmem:[%s11084_s5 + $0x70] sm:$0xf0] }
  0xff   : > { %v866_v43 = vpop.f32.mrf.mxu0 }
 0x100   : > { %v867_v45 = vadd.f32 %v7516_v22, %v866_v43  ;;  %v6548_v43 = vor.u32 %v7191_v37, %v6545_v39 }
 0x102   : > { %v8525_v46 = vadd.f32 %v884_v44, %v867_v45  ;;  %v6552_v44 = vor.u32 %v7193_v42, %v6551_v40  ;;  %1331 = vmatpush.bf16.msra.mxu2 %v6548_v43  ;;  %v6531_v45 = vld [vmem:[%s11084_s5 + $0x48] sm:$0xf] }
 0x104   : > { %908 = vadd.xlane.f32.xlu2 %v8525_v46  ;;  %v931_v47 = vmul.f32 %v8525_v46, %v8525_v46 }
 0x106   : > { %944 = vadd.xlane.f32.xlu1 %v931_v47  ;;  %v7189_v47 = vld [vmem:[%s11084_s5 + $0x50] sm:$0xf0] }
 0x107   : > { %v868_v48 = vpop.f32.mrf.mxu0 }
 0x108   : > { %v869_v50 = vadd.f32 %v7516_v22, %v868_v48  ;;  %v7188_v48 = vld [vmem:[%s11084_s5 + $0x4c] sm:$0xf] }
 0x10a   : > { %v8530_v51 = vadd.f32 %v885_v49, %v869_v50  ;;  %v6532_v49 = vor.u32 %v7189_v47, %v6531_v45  ;;  %v6533_v50 = vld [vmem:[%s11084_s5 + $0x54] sm:$0xf0] }
 0x10c   : > { %910 = vadd.xlane.f32.xlu0 %v8530_v51  ;;  %v932_v52 = vmul.f32 %v8530_v51, %v8530_v51  ;;  %1299 = vmatpush.bf16.msra.mxu1 %v6532_v49 }
 0x10e   : > { %946 = vadd.xlane.f32.xlu2 %v932_v52  ;;  %v6539_v52 = vld [vmem:[%s11084_s5 + $0x50] sm:$0xf] }
 0x10f   : > { %v871_v53 = vpop.f32.mrf.mxu0 }
 0x110   : > { %v872_v55 = vadd.f32 %v7516_v22, %v871_v53  ;;  %v7190_v53 = vld [vmem:[%s11084_s5 + $0x58] sm:$0xf0] }
 0x112   : > { %v8535_v56 = vadd.f32 %v886_v54, %v872_v55  ;;  %v6536_v54 = vor.u32 %v7188_v48, %v6533_v50  ;;  %v6540_v55 = vor.u32 %v7190_v53, %v6539_v52 }
 0x114   : > { %912 = vadd.xlane.f32.xlu0 %v8535_v56  ;;  %v933_v57 = vmul.f32 %v8535_v56, %v8535_v56  ;;  %1332 = vmatpush.bf16.msra.mxu2 %v6536_v54 }
 0x116   : > { %948 = vadd.xlane.f32.xlu2 %v933_v57  ;;  %v6519_v57 = vld [vmem:[%s11084_s5 + $0x30] sm:$0xf] }
 0x117   : > { %v873_v58 = vpop.f32.mrf.mxu0 }
 0x118   : > { %v874_v60 = vadd.f32 %v7516_v22, %v873_v58  ;;  %v7186_v58 = vld [vmem:[%s11084_s5 + $0x38] sm:$0xf0] }
 0x11a   : > { %v8540_v61 = vadd.f32 %v887_v59, %v874_v60  ;;  %v7185_v59 = vld [vmem:[%s11084_s5 + $0x34] sm:$0xf]  ;;  %v6520_v60 = vor.u32 %v7186_v58, %v6519_v57 }
 0x11c   : > { %914 = vadd.xlane.f32.xlu1 %v8540_v61  ;;  %v934_v62 = vmul.f32 %v8540_v61, %v8540_v61  ;;  %1300 = vmatpush.bf16.msra.mxu1 %v6520_v60 }
 0x11e   : > { %950 = vadd.xlane.f32.xlu0 %v934_v62  ;;  %v6521_v62 = vld [vmem:[%s11084_s5 + $0x3c] sm:$0xf0] }
 0x11f   : > { %v876_v63 = vpop.f32.mrf.mxu0 }
 0x120   : > { %v877_v1 = vadd.f32 %v7516_v22, %v876_v63  ;;  %v6576_v22 = vor.u32 %v7199_v20, %v6575_v19  ;;  %v6527_v63 = vld [vmem:[%s11084_s5 + $0x38] sm:$0xf]  ;;  %1301 = vmatpush.bf16.msra.mxu1 %v6508_v9  ;;  %v6495_v19 = vld [vmem:[%s11084_s5] sm:$0xf]  ;;  %v7180_v20 = vld [vmem:[%s11084_s5 + $0x8] sm:$0xf0] }
 0x122   : > { %v8545_v2 = vadd.f32 %v888_v0, %v877_v1  ;;  %1362 = vmatpush.bf16.msra.mxu3 %v6576_v22  ;;  %v7187_v0 = vld [vmem:[%s11084_s5 + $0x40] sm:$0xf0]  ;;  %v6524_v1 = vor.u32 %v7185_v59, %v6521_v62  ;;  %v6496_v22 = vor.u32 %v7180_v20, %v6495_v19 }
 0x124   : > { %11138 = vst [vmem:[#allocation22_spill] sm:$0xff] %v8545_v2  ;;  %916 = vadd.xlane.f32.xlu1 %v8545_v2  ;;  %v935_v3 = vmul.f32 %v8545_v2, %v8545_v2  ;;  %1333 = vmatpush.bf16.msra.mxu2 %v6524_v1 }
 0x125   : > { %1302 = vmatpush.bf16.msra.mxu1 %v6496_v22 }
 0x126   : > { %952 = vadd.xlane.f32.xlu2 %v935_v3  ;;  %1363 = vmatpush.bf16.msra.mxu3 %v6564_v33  ;;  %v6528_v3 = vor.u32 %v7187_v0, %v6527_v63 }
 0x127   : > { %v878_v4 = vpop.f32.mrf.mxu0 }
 0x128   : > { %1334 = vmatpush.bf16.msra.mxu2 %v6512_v15 }
 0x12a   : > { %1364 = vmatpush.bf16.msra.mxu3 %v6552_v44 }
 0x12c   : > { %1335 = vmatpush.bf16.msra.mxu2 %v6500_v28 }
 0x12e   : > { %1365 = vmatpush.bf16.msra.mxu3 %v6540_v55 }
 0x132   : > { %1366 = vmatpush.bf16.msra.mxu3 %v6528_v3 }
 0x136   : > { %1367 = vmatpush.bf16.msra.mxu3 %v6516_v17 }
 0x13a   : > { %1368 = vmatpush.bf16.msra.mxu3 %v6504_v29 }
 0x157   : > { %v901_v4 = vpop.xlane.xlu0 %900 }
 0x158   : > { %v8658_v5 = vmul.f32 0.03125, %v901_v4 }
 0x159   : > { %v937_v8 = vpop.xlane.xlu1 %936 }
 0x15a   : > { %v963_v13 = vmul.f32 %v8658_v5, %v8658_v5  ;;  %v954_v14 = vmul.f32 0.03125, %v937_v8  ;;  %v981_v4 = vsub.f32 %v8505_v26, %v8658_v5 }
 0x15c   : > { %v972_v18 = vsub.f32 %v954_v14, %v963_v13 }
 0x15e   : > { %v990_v27 = vadd.f32 1e-05, %v972_v18 }
 0x15f   : > { %v903_v30 = vpop.xlane.xlu0 %902 }
 0x160   : > { %7531 = vrsqrt.f32 %v990_v27  ;;  %v919_v32 = vmul.f32 0.03125, %v903_v30  ;;  %vm1005_vm1 = vweird.f32 %v990_v27 }
 0x161   : > { %v939_v33 = vpop.xlane.xlu1 %938 }
 0x162   : > { %v964_v34 = vmul.f32 %v919_v32, %v919_v32  ;;  %v955_v35 = vmul.f32 0.03125, %v939_v33  ;;  %v982_v15 = vsub.f32 %v8510_v31, %v919_v32 }
 0x164   : > { %v973_v37 = vsub.f32 %v955_v35, %v964_v34 }
 0x166   : > { %v7532_v38 = vpop.eup %7531  ;;  %v991_v39 = vadd.f32 1e-05, %v973_v37 }
 0x167   : > { %v1000_v40 = vmul.f32 %v7532_v38, %v990_v27  ;;  %v905_v42 = vpop.xlane.xlu2 %904  ;;  %vm1006_vm0 = vweird.f32 %v7532_v38 }
 0x168   : > { %7533 = vrsqrt.f32 %v991_v39  ;;  %v8698_v43 = vmul.f32 0.03125, %v905_v42  ;;  %vm1007_vm2 = vmor %vm1005_vm1, %vm1006_vm0  ;;  %vm1015_vm4 = vweird.f32 %v991_v39 }
 0x169   : > { %v1001_v44 = vmul.f32 %v7532_v38, %v1000_v40  ;;  %v941_v45 = vpop.xlane.xlu0 %940 }
 0x16a   : > { %v965_v47 = vmul.f32 %v8698_v43, %v8698_v43  ;;  %v956_v48 = vmul.f32 0.03125, %v941_v45 }
 0x16b   : > { %v1002_v49 = vmul.f32 0.5, %v1001_v44 }
 0x16c   : > { %v974_v50 = vsub.f32 %v956_v48, %v965_v47 }
 0x16d   : > { %v1003_v52 = vsub.f32 1.5, %v1002_v49  ;;  %v983_v49 = vsub.f32 %v8515_v36, %v8698_v43 }
 0x16e   : > { %v7534_v53 = vpop.eup %7533  ;;  %v992_v54 = vadd.f32 1e-05, %v974_v50 }
 0x16f   : > { %v1004_v55 = vmul.f32 %v7532_v38, %v1003_v52  ;;  %v1010_v57 = vmul.f32 %v7534_v53, %v991_v39  ;;  %v907_v58 = vpop.xlane.xlu2 %906  ;;  %vm1016_vm3 = vweird.f32 %v7534_v53 }
 0x170   : > { %7535 = vrsqrt.f32 %v992_v54  ;;  %v8702_v59 = vmul.f32 0.03125, %v907_v58  ;;  %vm1017_vm5 = vmor %vm1015_vm4, %vm1016_vm3  ;;  %vm1025_vm7 = vweird.f32 %v992_v54 }
 0x171   : > { %v1011_v60 = vmul.f32 %v7534_v53, %v1010_v57  ;;  %v943_v62 = vpop.xlane.xlu1 %942  ;;  %v1008_v3 = vsel %vm1007_vm2, %v7532_v38, %v1004_v55 }
 0x172   : > { %v966_v63 = vmul.f32 %v8702_v59, %v8702_v59  ;;  %v957_v0 = vmul.f32 0.03125, %v943_v62  ;;  %v1089_v10 = vmul.f32 %v1008_v3, %v981_v4  ;;  %v984_v62 = vsub.f32 %v8520_v41, %v8702_v59 }
 0x173   : > { %v1012_v1 = vmul.f32 0.5, %v1011_v60 }
 0x174   : > { %v975_v6 = vsub.f32 %v957_v0, %v966_v63  ;;  %v1101_v22 = vmul.f32 %v8708_v11, %v1089_v10 }
 0x175   : > { %v1013_v7 = vsub.f32 1.5, %v1012_v1 }
 0x176   : > { %v7536_v8 = vpop.eup %7535  ;;  %v993_v9 = vadd.f32 1e-05, %v975_v6  ;;  %v1113_v32 = vadd.f32 %v8716_v23, %v1101_v22 }
 0x177   : > { %v1014_v12 = vmul.f32 %v7534_v53, %v1013_v7  ;;  %v1020_v13 = vmul.f32 %v7536_v8, %v992_v54  ;;  %v909_v14 = vpop.xlane.xlu2 %908  ;;  %vm1026_vm6 = vweird.f32 %v7536_v8 }
 0x178   : > { %7537 = vrsqrt.f32 %v993_v9  ;;  %v8711_v16 = vmul.f32 0.03125, %v909_v14  ;;  %vm1027_vm8 = vmor %vm1025_vm7, %vm1026_vm6  ;;  %vm1035_vm10 = vweird.f32 %v993_v9 }
 0x179   : > { %v1021_v17 = vmul.f32 %v7536_v8, %v1020_v13  ;;  %v945_v5 = vpop.xlane.xlu1 %944  ;;  %v1018_v18 = vsel %vm1017_vm5, %v7534_v53, %v1014_v12 }
 0x17a   : > { %v967_v19 = vmul.f32 %v8711_v16, %v8711_v16  ;;  %v958_v20 = vmul.f32 0.03125, %v945_v5  ;;  %v1090_v21 = vmul.f32 %v1018_v18, %v982_v15 }
 0x17b   : > { %v1022_v24 = vmul.f32 0.5, %v1021_v17 }
 0x17c   : > { %v976_v25 = vsub.f32 %v958_v20, %v967_v19  ;;  %v1102_v27 = vmul.f32 %v8708_v11, %v1090_v21 }
 0x17d   : > { %v1023_v28 = vsub.f32 1.5, %v1022_v24 }
 0x17e   : > { %v7538_v29 = vpop.eup %7537  ;;  %v994_v30 = vadd.f32 1e-05, %v976_v25  ;;  %v1114_v33 = vadd.f32 %v8716_v23, %v1102_v27 }
 0x17f   : > { %v1024_v34 = vmul.f32 %v7536_v8, %v1023_v28  ;;  %v1030_v35 = vmul.f32 %v7538_v29, %v993_v9  ;;  %v911_v37 = vpop.xlane.xlu0 %910  ;;  %vm1036_vm9 = vweird.f32 %v7538_v29 }
 0x180   : > { %7539 = vrsqrt.f32 %v994_v30  ;;  %v8721_v38 = vmul.f32 0.03125, %v911_v37  ;;  %v1122_v39 = vpack.c.bf16 %v1114_v33, %v1113_v32  ;;  %vm1037_vm11 = vmor %vm1035_vm10, %vm1036_vm9  ;;  %vm1045_vm13 = vweird.f32 %v994_v30 }
 0x181   : > { %v1031_v40 = vmul.f32 %v7538_v29, %v1030_v35  ;;  %v947_v42 = vpop.xlane.xlu2 %946  ;;  %v1028_v48 = vsel %vm1027_vm8, %v7536_v8, %v1024_v34 }
 0x182   : > { %v968_v44 = vmul.f32 %v8721_v38, %v8721_v38  ;;  %v959_v45 = vmul.f32 0.03125, %v947_v42  ;;  %1303 = vmatmul.bf16.vlgmr.msra.gmra.mxu1 %v1122_v39  ;;  %1336 = vmatmul.bf16.vlgmr.msra.gmra.mxu2 %v1122_v39  ;;  %v1091_v55 = vmul.f32 %v1028_v48, %v983_v49  ;;  %v986_v42 = vsub.f32 %v8530_v51, %v8721_v38 }
 0x183   : > { %v1032_v47 = vmul.f32 0.5, %v1031_v40  ;;  %1369 = vmatmul.bf16.vlgmr.msra.gmra.mxu3 %v1122_v39 }
 0x184   : > { %v977_v50 = vsub.f32 %v959_v45, %v968_v44  ;;  %v1103_v7 = vmul.f32 %v8708_v11, %v1091_v55 }
 0x185   : > { %v1033_v52 = vsub.f32 1.5, %v1032_v47 }
 0x186   : > { %v7540_v53 = vpop.eup %7539  ;;  %v995_v54 = vadd.f32 1e-05, %v977_v50  ;;  %v1115_v14 = vadd.f32 %v8716_v23, %v1103_v7 }
 0x187   : > { %v1034_v57 = vmul.f32 %v7538_v29, %v1033_v52  ;;  %v1040_v58 = vmul.f32 %v7540_v53, %v994_v30  ;;  %v913_v60 = vpop.xlane.xlu0 %912  ;;  %vm1046_vm12 = vweird.f32 %v7540_v53 }
 0x188   : > { %7541 = vrsqrt.f32 %v995_v54  ;;  %v8729_v63 = vmul.f32 0.03125, %v913_v60  ;;  %vm1047_vm14 = vmor %vm1045_vm13, %vm1046_vm12  ;;  %vm1055_vm0 = vweird.f32 %v995_v54  ;;  %vm1514_vm12 = vcmask 588800  }
 0x189   : > { %v1041_v0 = vmul.f32 %v7540_v53, %v1040_v58  ;;  %v949_v1 = vpop.xlane.xlu2 %948  ;;  %v1038_v43 = vsel %vm1037_vm11, %v7538_v29, %v1034_v57  ;;  %v985_v29 = vsub.f32 %v8525_v46, %v8711_v16  ;;  %vm1394_vm11 = vcmask 64512  }
 0x18a   : > { %v969_v3 = vmul.f32 %v8729_v63, %v8729_v63  ;;  %v960_v4 = vmul.f32 0.03125, %v949_v1  ;;  %v1092_v6 = vmul.f32 %v1038_v43, %v984_v62  ;;  %v987_v7 = vsub.f32 %v8535_v56, %v8729_v63 }
 0x18b   : > { %v1042_v8 = vmul.f32 0.5, %v1041_v0 }
 0x18c   : > { %v978_v9 = vsub.f32 %v960_v4, %v969_v3  ;;  %v1104_v10 = vmul.f32 %v8708_v11, %v1092_v6 }
 0x18d   : > { %v1043_v12 = vsub.f32 1.5, %v1042_v8 }
 0x18e   : > { %v7542_v59 = vpop.eup %7541  ;;  %v996_v13 = vadd.f32 1e-05, %v978_v9  ;;  %v1116_v15 = vadd.f32 %v8716_v23, %v1104_v10 }
 0x18f   : > { %v1044_v17 = vmul.f32 %v7540_v53, %v1043_v12  ;;  %v1050_v5 = vmul.f32 %v7542_v59, %v995_v54  ;;  %v915_v18 = vpop.xlane.xlu1 %914  ;;  %vm1056_vm15 = vweird.f32 %v7542_v59 }
 0x190   : > { %7543 = vrsqrt.f32 %v996_v13  ;;  %v8737_v19 = vmul.f32 0.03125, %v915_v18  ;;  %v1123_v20 = vpack.c.bf16 %v1116_v15, %v1115_v14  ;;  %vm1057_vm1 = vmor %vm1055_vm0, %vm1056_vm15  ;;  %vm1065_vm3 = vweird.f32 %v996_v13 }
 0x191   : > { %v1051_v21 = vmul.f32 %v7542_v59, %v1050_v5  ;;  %v951_v22 = vpop.xlane.xlu0 %950  ;;  %v1048_v28 = vsel %vm1047_vm14, %v7540_v53, %v1044_v17 }
 0x192   : > { %v970_v24 = vmul.f32 %v8737_v19, %v8737_v19  ;;  %v961_v25 = vmul.f32 0.03125, %v951_v22  ;;  %1308 = vmatmul.bf16.gmra.mxu1 %v1123_v20  ;;  %1341 = vmatmul.bf16.gmra.mxu2 %v1123_v20  ;;  %v1093_v35 = vmul.f32 %v1048_v28, %v985_v29 }
 0x193   : > { %v1052_v27 = vmul.f32 0.5, %v1051_v21  ;;  %1374 = vmatmul.bf16.gmra.mxu3 %v1123_v20 }
 0x194   : > { %v979_v32 = vsub.f32 %v961_v25, %v970_v24  ;;  %v1105_v52 = vmul.f32 %v8708_v11, %v1093_v35 }
 0x195   : > { %v1053_v33 = vsub.f32 1.5, %v1052_v27 }
 0x196   : > { %v7544_v34 = vpop.eup %7543  ;;  %v997_v30 = vadd.f32 1e-05, %v979_v32  ;;  %v1117_v38 = vadd.f32 %v8716_v23, %v1105_v52 }
 0x197   : > { %v1054_v37 = vmul.f32 %v7542_v59, %v1053_v33  ;;  %v1060_v39 = vmul.f32 %v7544_v34, %v996_v13  ;;  %v917_v40 = vpop.xlane.xlu1 %916  ;;  %vm1066_vm2 = vweird.f32 %v7544_v34  ;;  %v988_v13 = vsub.f32 %v8540_v61, %v8737_v19 }
 0x198   : > { %7545 = vrsqrt.f32 %v997_v30  ;;  %v926_v44 = vmul.f32 0.03125, %v917_v40  ;;  %vm1067_vm4 = vmor %vm1065_vm3, %vm1066_vm2  ;;  %vm1075_vm6 = vweird.f32 %v997_v30 }
 0x199   : > { %v1061_v45 = vmul.f32 %v7544_v34, %v1060_v39  ;;  %v953_v47 = vpop.xlane.xlu2 %952  ;;  %v1058_v48 = vsel %vm1057_vm1, %v7542_v59, %v1054_v37 }
 0x19a   : > { %v971_v16 = vmul.f32 %v926_v44, %v926_v44  ;;  %v962_v49 = vmul.f32 0.03125, %v953_v47  ;;  %v1094_v50 = vmul.f32 %v1058_v48, %v986_v42  ;;  %v989_v25 = vsub.f32 %v8545_v2, %v926_v44 }
 0x19b   : > { %v1062_v53 = vmul.f32 0.5, %v1061_v45 }
 0x19c   : > { %v980_v55 = vsub.f32 %v962_v49, %v971_v16  ;;  %v1106_v54 = vmul.f32 %v8708_v11, %v1094_v50 }
 0x19d   : > { %v1063_v57 = vsub.f32 1.5, %v1062_v53 }
 0x19e   : > { %v7546_v58 = vpop.eup %7545  ;;  %v998_v60 = vadd.f32 1e-05, %v980_v55  ;;  %v1118_v62 = vadd.f32 %v8716_v23, %v1106_v54 }
 0x19f   : > { %v1064_v0 = vmul.f32 %v7544_v34, %v1063_v57  ;;  %v1070_v1 = vmul.f32 %v7546_v58, %v997_v30  ;;  %vm1076_vm5 = vweird.f32 %v7546_v58 }
 0x1a0   : > { %7547 = vrsqrt.f32 %v998_v60  ;;  %v1124_v43 = vpack.c.bf16 %v1118_v62, %v1117_v38  ;;  %vm1077_vm7 = vmor %vm1075_vm6, %vm1076_vm5  ;;  %vm1085_vm8 = vweird.f32 %v998_v60 }
 0x1a1   : > { %v1071_v3 = vmul.f32 %v7546_v58, %v1070_v1  ;;  %v1068_v6 = vsel %vm1067_vm4, %v7544_v34, %v1064_v0  ;;  %v1159_v34 = vld [vmem:[%s11085_s6] sm:$0x7] }
 0x1a2   : > { %1313 = vmatmul.bf16.gmra.mxu1 %v1124_v43  ;;  %1346 = vmatmul.bf16.gmra.mxu2 %v1124_v43  ;;  %v1095_v10 = vmul.f32 %v1068_v6, %v987_v7  ;;  %v8763_v30 = vperm.slane %v1159_v34, 0  ;;  %v8794_v50 = vperm.slane %v1159_v34, 2 }
 0x1a3   : > { %v1072_v4 = vmul.f32 0.5, %v1071_v3  ;;  %1379 = vmatmul.bf16.gmra.mxu3 %v1124_v43 }
 0x1a4   : > { %v1107_v5 = vmul.f32 %v8708_v11, %v1095_v10 }
 0x1a5   : > { %v1073_v8 = vsub.f32 1.5, %v1072_v4 }
 0x1a6   : > { %v7548_v9 = vpop.eup %7547  ;;  %v1119_v21 = vadd.f32 %v8716_v23, %v1107_v5 }
 0x1a7   : > { %v1074_v12 = vmul.f32 %v7546_v58, %v1073_v8  ;;  %v1080_v59 = vmul.f32 %v7548_v9, %v998_v60  ;;  %vm1086_vm9 = vweird.f32 %v7548_v9 }
 0x1a8   : > { %vm1087_vm10 = vmor %vm1085_vm8, %vm1086_vm9 }
 0x1a9   : > { %v1081_v14 = vmul.f32 %v7548_v9, %v1080_v59  ;;  %v1078_v15 = vsel %vm1077_vm7, %v7546_v58, %v1074_v12 }
 0x1aa   : > { %v1096_v17 = vmul.f32 %v1078_v15, %v988_v13 }
 0x1ab   : > { %v1082_v18 = vmul.f32 0.5, %v1081_v14 }
 0x1ac   : > { %v1108_v20 = vmul.f32 %v8708_v11, %v1096_v17 }
 0x1ad   : > { %v1083_v63 = vsub.f32 1.5, %v1082_v18 }
 0x1ae   : > { %v1120_v22 = vadd.f32 %v8716_v23, %v1108_v20 }
 0x1af   : > { %v1084_v24 = vmul.f32 %v7548_v9, %v1083_v63 }
 0x1b0   : > { %v1125_v19 = vpack.c.bf16 %v1120_v22, %v1119_v21 }
 0x1b1   : > { %v1088_v27 = vsel %vm1087_vm10, %v7548_v9, %v1084_v24 }
 0x1b2   : > { %1318 = vmatmul.bf16.gmra.mxu1 %v1125_v19  ;;  %1351 = vmatmul.bf16.gmra.mxu2 %v1125_v19  ;;  %v1097_v28 = vmul.f32 %v1088_v27, %v989_v25 }
 0x1b3   : > { %1384 = vmatmul.bf16.gmra.mxu3 %v1125_v19 }
 0x1b4   : > { %v1109_v29 = vmul.f32 %v8708_v11, %v1097_v28  ;;  %v8770_v11 = vperm.slane %v1159_v34, 1 }
 0x1b6   : > { %v1121_v32 = vadd.f32 %v8716_v23, %v1109_v29 }
 0x1b8   : > { %v1126_v33 = vpack.c.bf16 %v1121_v32, %v1121_v32 }
 0x1c2   : > { %1323 = vmatmul.bf16.gmra.mxu1 %v1126_v33  ;;  %1356 = vmatmul.bf16.gmra.mxu2 %v1126_v33 }
 0x1c3   : > { %1389 = vmatmul.bf16.gmra.mxu3 %v1126_v33 }
 0x1ff   : > { %v1304_v35 = vpop.f32.mrf.mxu1 }
 0x200   : > { %v8766_v37 = vadd.f32 %v1304_v35, %v8763_v30 }
 0x202   : > { %1686 = vrot.lane.b32.xlu0 %v8766_v37, %s8244_s11 }
 0x205   : > { %v1337_v23 = vpop.f32.mrf.mxu2 }
 0x206   : > { %v8773_v39 = vadd.f32 %v1337_v23, %v8770_v11  ;;  %v8775_v40 = vpop.f32.mrf.mxu3 }
 0x207   : > { %v1306_v42 = vpop.f32.mrf.mxu1 }
 0x208   : > { %v8778_v44 = vadd.f32 %v1306_v42, %v8763_v30  ;;  %1704 = vrot.lane.b32.xlu1 %v8773_v39, %s8244_s11 }
 0x20a   : > { %1688 = vrot.lane.b32.xlu2 %v8778_v44, %s8244_s11 }
 0x20d   : > { %v1339_v45 = vpop.f32.mrf.mxu2 }
 0x20e   : > { %v1372_v47 = vpop.f32.mrf.mxu3  ;;  %v8785_v16 = vadd.f32 %v1339_v45, %v8770_v11 }
 0x20f   : > { %v1309_v48 = vpop.f32.mrf.mxu1  ;;  %v8800_v54 = vadd.f32 %v1372_v47, %v8794_v50 }
 0x210   : > { %v8788_v49 = vadd.f32 %v1309_v48, %v8763_v30 }
 0x212   : > { %1706 = vrot.lane.b32.xlu2 %v8785_v16, %s8244_s11  ;;  %1690 = vrot.lane.b32.xlu1 %v8788_v49, %s8244_s11 }
 0x215   : > { %v1342_v52 = vpop.f32.mrf.mxu2 }
 0x216   : > { %v8797_v53 = vadd.f32 %v1342_v52, %v8770_v11  ;;  %v1375_v55 = vpop.f32.mrf.mxu3  ;;  %v8887_v52 = vadd.f32 %v8775_v40, %v8794_v50 }
 0x217   : > { %v8803_v57 = vadd.f32 %v1375_v55, %v8794_v50  ;;  %v1311_v58 = vpop.f32.mrf.mxu1 }
 0x218   : > { %1708 = vrot.lane.b32.xlu0 %v8797_v53, %s8244_s11  ;;  %v8812_v62 = vadd.f32 %v1311_v58, %v8763_v30 }
 0x219   : > { %v8809_v60 = vpack.i.bf16 %v8800_v54, %v8803_v57 }
 0x21d   : > { %v1344_v38 = vpop.f32.mrf.mxu2 }
 0x21e   : > { %v8815_v0 = vadd.f32 %v1344_v38, %v8770_v11  ;;  %v1377_v1 = vpop.f32.mrf.mxu3 }
 0x21f   : > { %v1314_v43 = vpop.f32.mrf.mxu1  ;;  %v1378_v7 = vadd.f32 %v1377_v1, %v8794_v50 }
 0x220   : > { %v8818_v3 = vadd.f32 %v1314_v43, %v8763_v30  ;;  %1692 = vrot.lane.b32.xlu0 %v8812_v62, %s8244_s11  ;;  %1710 = vrot.lane.b32.xlu1 %v8815_v0, %s8244_s11 }
 0x222   : > { %1694 = vrot.lane.b32.xlu2 %v8818_v3, %s8244_s11 }
 0x225   : > { %v1347_v4 = vpop.f32.mrf.mxu2 }
 0x226   : > { %v1380_v6 = vpop.f32.mrf.mxu3  ;;  %v8829_v10 = vadd.f32 %v1347_v4, %v8770_v11 }
 0x227   : > { %v1381_v8 = vadd.f32 %v1380_v6, %v8794_v50  ;;  %v1316_v9 = vpop.f32.mrf.mxu1 }
 0x228   : > { %v8832_v12 = vadd.f32 %v1316_v9, %v8763_v30 }
 0x229   : > { %v8834_v59 = vpack.i.bf16 %v1378_v7, %v1381_v8 }
 0x22a   : > { %1696 = vrot.lane.b32.xlu1 %v8832_v12, %s8244_s11  ;;  %1712 = vrot.lane.b32.xlu2 %v8829_v10, %s8244_s11 }
 0x22d   : > { %v1349_v13 = vpop.f32.mrf.mxu2 }
 0x22e   : > { %v8841_v14 = vadd.f32 %v1349_v13, %v8770_v11  ;;  %v1382_v15 = vpop.f32.mrf.mxu3 }
 0x22f   : > { %v1319_v17 = vpop.f32.mrf.mxu1  ;;  %v1383_v63 = vadd.f32 %v1382_v15, %v8794_v50 }
 0x230   : > { %1714 = vrot.lane.b32.xlu0 %v8841_v14, %s8244_s11  ;;  %v8851_v24 = vadd.f32 %v1319_v17, %v8763_v30 }
 0x232   : > { %2197 = vrot.lane.b32.xlu1 %v8841_v14, %s8245_s29 }
 0x235   : > { %v1352_v5 = vpop.f32.mrf.mxu2 }
 0x236   : > { %v1353_v18 = vadd.f32 %v1352_v5, %v8770_v11  ;;  %v1385_v20 = vpop.f32.mrf.mxu3 }
 0x237   : > { %v1386_v21 = vadd.f32 %v1385_v20, %v8794_v50  ;;  %v1321_v22 = vpop.f32.mrf.mxu1 }
 0x238   : > { %2611 = vrot.lane.b32.xlu0 %v1353_v18, %s8246_s23  ;;  %1716 = vrot.lane.b32.xlu2 %v1353_v18, %s8244_s11  ;;  %v8860_v27 = vadd.f32 %v1321_v22, %v8763_v30 }
 0x239   : > { %v8855_v25 = vpack.i.bf16 %v1383_v63, %v1386_v21 }
 0x23a   : > { %1698 = vrot.lane.b32.xlu1 %v8851_v24, %s8244_s11 }
 0x23d   : > { %v1354_v19 = vpop.f32.mrf.mxu2 }
 0x23e   : > { %v1355_v28 = vadd.f32 %v1354_v19, %v8770_v11  ;;  %v1387_v29 = vpop.f32.mrf.mxu3  ;;  %v8958_v19 = vld [vmem:[%s8478_s20] ss:$0 sm:$0xff] }
 0x23f   : > { %v1324_v32 = vpop.f32.mrf.mxu1  ;;  %v1388_v23 = vadd.f32 %v1387_v29, %v8794_v50 }
 0x240   : > { %2201 = vrot.lane.b32.xlu0 %v1355_v28, %s8245_s29  ;;  %1700 = vrot.lane.b32.xlu2 %v8860_v27, %s8244_s11 }
 0x242   : > { %2199 = vrot.lane.b32.xlu1 %v1353_v18, %s8245_s29 }
 0x245   : > { %v1357_v33 = vpop.f32.mrf.mxu2 }
 0x246   : > { %v1358_v34 = vadd.f32 %v1357_v33, %v8770_v11  ;;  %v1390_v35 = vpop.f32.mrf.mxu3 }
 0x247   : > { %v1391_v42 = vadd.f32 %v1390_v35, %v8794_v50  ;;  %v1326_v45 = vpop.f32.mrf.mxu1 }
 0x248   : > { %2613 = vrot.lane.b32.xlu2 %v1355_v28, %s8246_s23  ;;  %1720 = vrot.lane.b32.xlu0 %v1358_v34, %s8244_s11 }
 0x249   : > { %1648 = vmatpush.msrb.mxu1 %v1391_v42  ;;  %6589 = vmatpush.xpose.msk.msrb.mxu0 %vm1394_vm11, %v1358_v34  ;;  %v8873_v47 = vpack.i.bf16 %v1388_v23, %v1391_v42 }
 0x24a   : > { %1718 = vrot.lane.b32.xlu1 %v1355_v28, %s8244_s11 }
 0x24b   : > { %1649 = vmatpush.msrb.mxu1 %v1388_v23 }
 0x24d   : > { %6590 = vmatpush.xpose.msk.msrb.mxu0 %vm1394_vm11, %v1355_v28  ;;  %1650 = vmatpush.msrb.mxu1 %v1386_v21  ;;  %v1359_v11 = vpop.f32.mrf.mxu2 }
 0x24e   : > { %v1392_v48 = vpop.f32.mrf.mxu3 }
 0x24f   : > { %1651 = vmatpush.msrb.mxu1 %v1383_v63 }
 0x250   : > { %2615 = vrot.lane.b32.xlu2 %v1358_v34, %s8246_s23  ;;  %2203 = vrot.lane.b32.xlu0 %v1358_v34, %s8245_s29 }
 0x251   : > { %1652 = vmatpush.msrb.mxu1 %v1381_v8  ;;  %6591 = vmatpush.xpose.msk.msrb.mxu0 %vm1394_vm11, %v1353_v18 }
 0x252   : > { %2607 = vrot.lane.b32.xlu1 %v8829_v10, %s8246_s23 }
 0x253   : > { %1653 = vmatpush.msrb.mxu1 %v1378_v7  ;;  %v8922_v7 = vadd.f32 %v1324_v32, %v8763_v30 }
 0x255   : > { %6592 = vmatpush.xpose.msk.msrb.mxu0 %vm1394_vm11, %v8841_v14  ;;  %1654 = vmatpush.msrb.mxu1 %v8803_v57 }
 0x257   : > { %1655 = vmatpush.msrb.mxu1 %v8800_v54 }
 0x258   : > { %2195 = vrot.lane.b32.xlu2 %v8829_v10, %s8245_s29 }
 0x259   : > { %1656 = vmatpush.msrb.mxu1 %v8887_v52  ;;  %6593 = vmatpush.xpose.msk.msrb.mxu0 %vm1394_vm11, %v8829_v10 }
 0x25d   : > { %6594 = vmatpush.xpose.msk.msrb.mxu0 %vm1394_vm11, %v8815_v0 }
 0x261   : > { %6595 = vmatpush.xpose.msk.msrb.mxu0 %vm1394_vm11, %v8797_v53 }
 0x264   : > { %v1689_v1 = vpop.permute.xlu2 %1688 }
 0x265   : > { %6596 = vmatpush.xpose.msk.msrb.mxu0 %vm1394_vm11, %v8785_v16 }
 0x269   : > { %6597 = vmatpush.xpose.msk.msrb.mxu0 %vm1394_vm11, %v8773_v39 }
 0x26c   : > { %6598 = vmatmul.msk.f32.vlgmr.msrb.gmra.mxu0 %vm1394_vm11, %v8766_v37  ;;  %v1707_v6 = vpop.permute.xlu2 %1706 }
 0x274   : > { %6599 = vmatmul.msk.f32.gmra.mxu0 %vm1394_vm11, %v8778_v44  ;;  %v1687_v50 = vpop.permute.xlu0 %1686 }
 0x27a   : > { %v1705_v40 = vpop.permute.xlu1 %1704 }
 0x27c   : > { %6600 = vmatmul.msk.f32.gmra.mxu0 %vm1394_vm11, %v8788_v49  ;;  %v1695_v10 = vpop.permute.xlu2 %1694 }
 0x284   : > { %6601 = vmatmul.msk.f32.gmra.mxu0 %vm1394_vm11, %v8812_v62  ;;  %v1691_v55 = vpop.permute.xlu1 %1690  ;;  %v1713_v17 = vpop.permute.xlu2 %1712 }
 0x28a   : > { %v1709_v54 = vpop.permute.xlu0 %1708 }
 0x28c   : > { %6602 = vmatmul.msk.f32.gmra.mxu0 %vm1394_vm11, %v8818_v3 }
 0x292   : > { %v1711_v57 = vpop.permute.xlu1 %1710  ;;  %v8915_v58 = vpop.permute.xlu0 %1692 }
 0x293   : > { %v1717_v30 = vpop.permute.xlu2 %1716 }
 0x294   : > { %6603 = vmatmul.msk.f32.gmra.mxu0 %vm1394_vm11, %v8832_v12 }
 0x29b   : > { %v1701_v20 = vpop.permute.xlu2 %1700 }
 0x29c   : > { %6604 = vmatmul.msk.f32.gmra.mxu0 %vm1394_vm11, %v8851_v24  ;;  %v1697_v38 = vpop.permute.xlu1 %1696 }
 0x2a2   : > { %v1715_v43 = vpop.permute.xlu0 %1714 }
 0x2a3   : > { %v8942_v63 = vpop.permute.xlu2 %2613 }
 0x2a4   : > { %6605 = vmatmul.msk.f32.gmra.mxu0 %vm1394_vm11, %v8860_v27  ;;  %v2198_v4 = vpop.permute.xlu1 %2197 }
 0x2aa   : > { %v8924_v8 = vpop.permute.xlu0 %2611 }
 0x2ab   : > { %v8952_v22 = vpop.permute.xlu2 %2615 }
 0x2ac   : > { %6606 = vmatmul.msk.f32.gmra.mxu0 %vm1394_vm11, %v8922_v7  ;;  %v1699_v9 = vpop.permute.xlu1 %1698 }
 0x2b2   : > { %v2202_v13 = vpop.permute.xlu0 %2201 }
 0x2b3   : > { %v2196_v32 = vpop.permute.xlu2 %2195 }
 0x2b4   : > { %v2200_v15 = vpop.permute.xlu1 %2199 }
 0x2ba   : > { %v1721_v5 = vpop.permute.xlu0 %1720 }
 0x2bb   : > { %6616 = vmatpush.xpose.msk.msra.mxu0 %vm1394_vm11, %v1721_v5  ;;  %7267 = vmatpush.xpose.msk.msrb.mxu2 %vm1394_vm11, %v1721_v5 }
 0x2bc   : > { %v1719_v18 = vpop.permute.xlu1 %1718 }
 0x2bf   : > { %6617 = vmatpush.xpose.msk.msra.mxu0 %vm1394_vm11, %v1719_v18  ;;  %7268 = vmatpush.xpose.msk.msrb.mxu2 %vm1394_vm11, %v1719_v18 }
 0x2c2   : > { %v2204_v21 = vpop.permute.xlu0 %2203 }
 0x2c3   : > { %6618 = vmatpush.xpose.msk.msra.mxu0 %vm1394_vm11, %v1717_v30  ;;  %7269 = vmatpush.xpose.msk.msrb.mxu2 %vm1394_vm11, %v1717_v30 }
 0x2c7   : > { %6619 = vmatpush.xpose.msk.msra.mxu0 %vm1394_vm11, %v1715_v43  ;;  %7270 = vmatpush.xpose.msk.msrb.mxu2 %vm1394_vm11, %v1715_v43 }
 0x2cb   : > { %6620 = vmatpush.xpose.msk.msra.mxu0 %vm1394_vm11, %v1713_v17  ;;  %7271 = vmatpush.xpose.msk.msrb.mxu2 %vm1394_vm11, %v1713_v17 }
 0x2cf   : > { %6621 = vmatpush.xpose.msk.msra.mxu0 %vm1394_vm11, %v1711_v57  ;;  %7272 = vmatpush.xpose.msk.msrb.mxu2 %vm1394_vm11, %v1711_v57 }
 0x2d3   : > { %6622 = vmatpush.xpose.msk.msra.mxu0 %vm1394_vm11, %v1709_v54  ;;  %7273 = vmatpush.xpose.msk.msrb.mxu2 %vm1394_vm11, %v1709_v54 }
 0x2d7   : > { %6623 = vmatpush.xpose.msk.msra.mxu0 %vm1394_vm11, %v1707_v6  ;;  %7274 = vmatpush.xpose.msk.msrb.mxu2 %vm1394_vm11, %v1707_v6 }
 0x2db   : > { %6624 = vmatpush.xpose.msk.msra.mxu0 %vm1394_vm11, %v1705_v40  ;;  %7275 = vmatpush.xpose.msk.msrb.mxu2 %vm1394_vm11, %v1705_v40 }
 0x2de   : > { %6625 = vmatmul.msk.f32.vlgmr.msra.gmra.mxu0 %vm1394_vm11, %v1687_v50  ;;  %6629 = vmatmul.msk.f32.vlgmr.msrb.gmra.mxu2 %vm1394_vm11, %v1695_v10 }
 0x2df   : > { %6661 = vmatpush.xpose.msk.msra.mxu2 %vm1394_vm11, %v2204_v21 }
 0x2e3   : > { %6662 = vmatpush.xpose.msk.msra.mxu2 %vm1394_vm11, %v2202_v13 }
 0x2e6   : > { %6626 = vmatmul.msk.f32.gmra.mxu0 %vm1394_vm11, %v1689_v1  ;;  %6630 = vmatmul.msk.f32.gmra.mxu2 %vm1394_vm11, %v1697_v38 }
 0x2e7   : > { %6663 = vmatpush.xpose.msk.msra.mxu2 %vm1394_vm11, %v2200_v15 }
 0x2e9   : > { %v1466_v28 = vpop.f32.mrf.mxu0 }
 0x2ea   : > { %v1493_v29 = vmul.f32 0.35355338, %v1466_v28 }
 0x2eb   : > { %6664 = vmatpush.xpose.msk.msra.mxu2 %vm1394_vm11, %v2198_v4 }
 0x2ec   : > { %v1505_v33 = vadd.f32 %v8958_v19, %v1493_v29 }
 0x2ee   : > { %v1515_v34 = vsel %vm1514_vm12, %v1505_v33, -inf  ;;  %6627 = vmatmul.msk.f32.gmra.mxu0 %vm1394_vm11, %v1691_v55  ;;  %6631 = vmatmul.msk.f32.gmra.mxu2 %vm1394_vm11, %v1699_v9 }
 0x2ef   : > { %6665 = vmatpush.xpose.msk.msra.mxu2 %vm1394_vm11, %v2196_v32  ;;  %1516 = vmax.xlane.f32.xlu0 %v1515_v34 }
 0x2f1   : > { %v1469_v35 = vpop.f32.mrf.mxu0 }
 0x2f2   : > { %v1494_v23 = vmul.f32 0.35355338, %v1469_v35  ;;  %v8993_v35 = vpop.permute.xlu1 %2607 }
 0x2f4   : > { %v1506_v42 = vadd.f32 %v8958_v19, %v1494_v23 }
 0x2f6   : > { %v1518_v45 = vsel %vm1514_vm12, %v1506_v42, -inf  ;;  %6628 = vmatmul.msk.f32.gmra.mxu0 %vm1394_vm11, %v8915_v58  ;;  %6632 = vmatmul.msk.f32.gmra.mxu2 %vm1394_vm11, %v1701_v20 }
 0x2f7   : > { %1519 = vmax.xlane.f32.xlu1 %v1518_v45 }
 0x2f9   : > { %v1472_v11 = vpop.f32.mrf.mxu0 }
 0x2fa   : > { %v1495_v48 = vmul.f32 0.35355338, %v1472_v11 }
 0x2fc   : > { %v1507_v40 = vadd.f32 %v8958_v19, %v1495_v48 }
 0x2fe   : > { %v1521_v50 = vsel %vm1514_vm12, %v1507_v40, -inf }
 0x2ff   : > { %1522 = vmax.xlane.f32.xlu2 %v1521_v50 }
 0x301   : > { %v1475_v55 = vpop.f32.mrf.mxu0 }
 0x302   : > { %v1496_v15 = vmul.f32 0.35355338, %v1475_v55 }
 0x303   : > { %2609 = vrot.lane.b32.xlu0 %v8841_v14, %s8246_s23 }
 0x304   : > { %v1508_v5 = vadd.f32 %v8958_v19, %v1496_v15 }
 0x306   : > { %v1524_v21 = vsel %vm1514_vm12, %v1508_v5, -inf }
 0x309   : > { %v1478_v54 = vpop.f32.mrf.mxu0 }
 0x30a   : > { %v1497_v57 = vmul.f32 0.35355338, %v1478_v54 }
 0x30c   : > { %v1509_v38 = vadd.f32 %v8958_v19, %v1497_v57 }
 0x30e   : > { %v1527_v58 = vsel %vm1514_vm12, %v1509_v38, -inf }
 0x30f   : > { %1528 = vmax.xlane.f32.xlu1 %v1527_v58 }
 0x311   : > { %v1481_v1 = vpop.f32.mrf.mxu0 }
 0x312   : > { %v1498_v43 = vmul.f32 0.35355338, %v1481_v1 }
 0x314   : > { %v1510_v4 = vadd.f32 %v8958_v19, %v1498_v43 }
 0x316   : > { %v1530_v6 = vsel %vm1514_vm12, %v1510_v4, -inf }
 0x317   : > { %1531 = vmax.xlane.f32.xlu2 %v1530_v6 }
 0x319   : > { %v1484_v9 = vpop.f32.mrf.mxu0 }
 0x31a   : > { %v1499_v20 = vmul.f32 0.35355338, %v1484_v9 }
 0x31c   : > { %v1511_v32 = vadd.f32 %v8958_v19, %v1499_v20 }
 0x31e   : > { %v1533_v34 = vsel %vm1514_vm12, %v1511_v32, -inf }
 0x321   : > { %v1487_v10 = vpop.f32.mrf.mxu0 }
 0x322   : > { %v1500_v13 = vmul.f32 0.35355338, %v1487_v10 }
 0x324   : > { %v8980_v14 = vadd.f32 %v8958_v19, %v1500_v13 }
 0x326   : > { %v1536_v17 = vsel %vm1514_vm12, %v8980_v14, -inf }
 0x327   : > { %1537 = vmax.xlane.f32.xlu2 %v1536_v17 }
 0x329   : > { %v1490_v18 = vpop.f32.mrf.mxu0 }
 0x32a   : > { %v1501_v30 = vmul.f32 0.35355338, %v1490_v18 }
 0x32c   : > { %v8987_v28 = vadd.f32 %v8958_v19, %v1501_v30 }
 0x32d   : > { %1525 = vmax.xlane.f32.xlu0 %v1524_v21 }
 0x32e   : > { %v1539_v29 = vsel %vm1514_vm12, %v8987_v28, -inf }
 0x32f   : > { %1540 = vmax.xlane.f32.xlu1 %v1539_v29 }
 0x335   : > { %1534 = vmax.xlane.f32.xlu0 %v1533_v34 }
 0x362   : > { %v1517_v23 = vpop.xlane.xlu0 %1516 }
 0x363   : > { %v1542_v45 = vsub.f32 %v1505_v33, %v1517_v23 }
 0x365   : > { %v1551_v11 = vmul.f32 1.442695, %v1542_v45 }
 0x367   : > { %7549 = vpow2.f32 %v1551_v11  ;;  %v1685_v11 = vld [vmem:[#allocation4] sm:$0xff] }
 0x368   : > { %7276 = vmatpush.msra.mxu1 %v1685_v11 }
 0x36a   : > { %v1520_v48 = vpop.xlane.xlu1 %1519 }
 0x36b   : > { %v1543_v50 = vsub.f32 %v1506_v42, %v1520_v48 }
 0x36d   : > { %v7550_v55 = vpop.eup %7549  ;;  %v1553_v54 = vmul.f32 1.442695, %v1543_v50 }
 0x36e   : > { %v1569_v57 = vsel %vm1514_vm12, %v7550_v55, 0.0 }
 0x36f   : > { %7551 = vpow2.f32 %v1553_v54  ;;  %1570 = vadd.xlane.f32.xlu1 %v1569_v57 }
 0x372   : > { %v1523_v58 = vpop.xlane.xlu2 %1522 }
 0x373   : > { %v1544_v1 = vsub.f32 %v1507_v40, %v1523_v58 }
 0x375   : > { %v8996_v43 = vpop.eup %7551  ;;  %v1555_v6 = vmul.f32 1.442695, %v1544_v1  ;;  %v2610_v40 = vpop.permute.xlu0 %2609 }
 0x376   : > { %v1572_v9 = vsel %vm1514_vm12, %v8996_v43, 0.0 }
 0x377   : > { %7553 = vpow2.f32 %v1555_v6  ;;  %1573 = vadd.xlane.f32.xlu0 %v1572_v9 }
 0x37d   : > { %v9000_v33 = vpop.eup %7553 }
 0x37e   : > { %v1575_v42 = vsel %vm1514_vm12, %v9000_v33, 0.0 }
 0x37f   : > { %1576 = vadd.xlane.f32.xlu2 %v1575_v42 }
 0x382   : > { %v1529_v10 = vpop.xlane.xlu1 %1528 }
 0x383   : > { %v1546_v13 = vsub.f32 %v1509_v38, %v1529_v10 }
 0x385   : > { %v1559_v30 = vmul.f32 1.442695, %v1546_v13 }
 0x388   : > { %2605 = vrot.lane.b32.xlu1 %v8815_v0, %s8246_s23 }
 0x38a   : > { %v1532_v21 = vpop.xlane.xlu2 %1531 }
 0x38b   : > { %v1547_v23 = vsub.f32 %v1510_v4, %v1532_v21 }
 0x38d   : > { %v1561_v38 = vmul.f32 1.442695, %v1547_v23 }
 0x397   : > { %2193 = vrot.lane.b32.xlu2 %v8815_v0, %s8245_s29 }
 0x39a   : > { %v1538_v1 = vpop.xlane.xlu2 %1537 }
 0x3a0   : > { %v1526_v15 = vpop.xlane.xlu0 %1525 }
 0x3a1   : > { %v1545_v17 = vsub.f32 %v1508_v5, %v1526_v15 }
 0x3a2   : > { %v1541_v50 = vpop.xlane.xlu1 %1540 }
 0x3a3   : > { %v1557_v18 = vmul.f32 1.442695, %v1545_v17 }
 0x3a5   : > { %7555 = vpow2.f32 %v1557_v18 }
 0x3a6   : > { %7557 = vpow2.f32 %v1559_v30 }
 0x3a7   : > { %7559 = vpow2.f32 %v1561_v38 }
 0x3a8   : > { %v1535_v4 = vpop.xlane.xlu0 %1534 }
 0x3a9   : > { %v1548_v48 = vsub.f32 %v1511_v32, %v1535_v4 }
 0x3ab   : > { %v9008_v20 = vpop.eup %7555  ;;  %v1563_v54 = vmul.f32 1.442695, %v1548_v48 }
 0x3ac   : > { %v1578_v29 = vsel %vm1514_vm12, %v9008_v20, 0.0  ;;  %v9012_v34 = vpop.eup %7557 }
 0x3ad   : > { %1579 = vadd.xlane.f32.xlu0 %v1578_v29  ;;  %v1581_v0 = vsel %vm1514_vm12, %v9012_v34, 0.0  ;;  %v9016_v5 = vpop.eup %7559  ;;  %7561 = vpow2.f32 %v1563_v54 }
 0x3ae   : > { %v1584_v45 = vsel %vm1514_vm12, %v9016_v5, 0.0 }
 0x3b2   : > { %1582 = vadd.xlane.f32.xlu1 %v1581_v0 }
 0x3b3   : > { %v9034_v58 = vpop.eup %7561 }
 0x3b4   : > { %v1587_v9 = vsel %vm1514_vm12, %v9034_v58, 0.0 }
 0x3c0   : > { %1585 = vadd.xlane.f32.xlu2 %v1584_v45 }
 0x3c1   : > { %1702 = vrot.lane.b32.xlu0 %v8922_v7, %s8244_s11 }
 0x3cb   : > { %2189 = vrot.lane.b32.xlu1 %v8785_v16, %s8245_s29 }
 0x3d3   : > { %2599 = vrot.lane.b32.xlu1 %v8773_v39, %s8246_s23 }
 0x3d8   : > { %2603 = vrot.lane.b32.xlu2 %v8797_v53, %s8246_s23 }
 0x3db   : > { %2171 = vrot.lane.b32.xlu1 %v8778_v44, %s8245_s29 }
 0x3e0   : > { %2187 = vrot.lane.b32.xlu2 %v8773_v39, %s8245_s29 }
 0x3e2   : > { %v1571_v57 = vpop.xlane.xlu1 %1570 }
 0x3e3   : > { %7563 = vrcp.f32 %v1571_v57  ;;  %2585 = vrot.lane.b32.xlu1 %v8788_v49, %s8246_s23 }
 0x3e8   : > { %2581 = vrot.lane.b32.xlu2 %v8766_v37, %s8246_s23 }
 0x3e9   : > { %v7564_v32 = vpop.eup %7563 }
 0x3ea   : > { %v1574_v6 = vpop.xlane.xlu0 %1573  ;;  %v1605_v42 = vmul.f32 %v7564_v32, %v7550_v55 }
 0x3eb   : > { %7565 = vrcp.f32 %v1574_v6  ;;  %1588 = vadd.xlane.f32.xlu0 %v1587_v9  ;;  %2177 = vrot.lane.b32.xlu1 %v8818_v3, %s8245_s29 }
 0x3ec   : > { %6607 = vmatmul.msk.f32.vlgmr.msrb.gmra.mxu1 %vm1514_vm12, %v1605_v42 }
 0x3ed   : > { %6697 = vmatpush.xpose.msk.msrb.mxu1 %vm1394_vm11, %v8952_v22 }
 0x3f0   : > { %2173 = vrot.lane.b32.xlu2 %v8788_v49, %s8245_s29 }
 0x3f1   : > { %v7566_v39 = vpop.eup %7565  ;;  %6698 = vmatpush.xpose.msk.msrb.mxu1 %vm1394_vm11, %v8942_v63 }
 0x3f2   : > { %v1577_v10 = vpop.xlane.xlu2 %1576  ;;  %v1606_v55 = vmul.f32 %v7566_v39, %v8996_v43 }
 0x3f3   : > { %7567 = vrcp.f32 %v1577_v10  ;;  %2591 = vrot.lane.b32.xlu1 %v8832_v12, %s8246_s23 }
 0x3f4   : > { %6608 = vmatmul.msk.f32.gmra.mxu1 %vm1514_vm12, %v1606_v55 }
 0x3f5   : > { %6699 = vmatpush.xpose.msk.msrb.mxu1 %vm1394_vm11, %v8924_v8 }
 0x3f8   : > { %2587 = vrot.lane.b32.xlu2 %v8812_v62, %s8246_s23 }
 0x3f9   : > { %v7568_v49 = vpop.eup %7567  ;;  %6700 = vmatpush.xpose.msk.msrb.mxu1 %vm1394_vm11, %v2610_v40 }
 0x3fa   : > { %v2194_v22 = vpop.permute.xlu2 %2193  ;;  %v1607_v63 = vmul.f32 %v7568_v49, %v9000_v33  ;;  %v2606_v8 = vpop.permute.xlu1 %2605 }
 0x3fb   : > { %6666 = vmatpush.xpose.msk.msra.mxu2 %vm1394_vm11, %v2194_v22  ;;  %2183 = vrot.lane.b32.xlu1 %v8860_v27, %s8245_s29 }
 0x3fc   : > { %6609 = vmatmul.msk.f32.gmra.mxu1 %vm1514_vm12, %v1607_v63 }
 0x3fd   : > { %6701 = vmatpush.xpose.msk.msrb.mxu1 %vm1394_vm11, %v8993_v35  ;;  %v1549_v35 = vsub.f32 %v8980_v14, %v1538_v1 }
 0x3ff   : > { %2191 = vrot.lane.b32.xlu0 %v8797_v53, %s8245_s29  ;;  %v1565_v43 = vmul.f32 1.442695, %v1549_v35  ;;  %v1550_v53 = vsub.f32 %v8987_v28, %v1541_v50 }
 0x400   : > { %2179 = vrot.lane.b32.xlu2 %v8832_v12, %s8245_s29 }
 0x401   : > { %6702 = vmatpush.xpose.msk.msrb.mxu1 %vm1394_vm11, %v2606_v8  ;;  %7569 = vpow2.f32 %v1565_v43  ;;  %v1567_v33 = vmul.f32 1.442695, %v1550_v53 }
 0x407   : > { %2601 = vrot.lane.b32.xlu0 %v8785_v16, %s8246_s23  ;;  %v9082_v16 = vpop.eup %7569 }
 0x408   : > { %2593 = vrot.lane.b32.xlu2 %v8851_v24, %s8246_s23 }
 0x40f   : > { %2169 = vrot.lane.b32.xlu0 %v8766_v37, %s8245_s29  ;;  %v1590_v37 = vsel %vm1514_vm12, %v9082_v16, 0.0 }
 0x417   : > { %2583 = vrot.lane.b32.xlu0 %v8778_v44, %s8246_s23 }
 0x41f   : > { %2175 = vrot.lane.b32.xlu0 %v8812_v62, %s8245_s29 }
 0x420   : > { %v1580_v12 = vpop.xlane.xlu0 %1579 }
 0x421   : > { %7571 = vrcp.f32 %v1580_v12 }
 0x422   : > { %7573 = vpow2.f32 %v1567_v33 }
 0x425   : > { %1591 = vadd.xlane.f32.xlu1 %v1590_v37  ;;  %v1583_v14 = vpop.xlane.xlu1 %1582 }
 0x426   : > { %7575 = vrcp.f32 %v1583_v14 }
 0x427   : > { %v7572_v40 = vpop.eup %7571  ;;  %2589 = vrot.lane.b32.xlu0 %v8818_v3, %s8246_s23 }
 0x428   : > { %v1608_v44 = vmul.f32 %v7572_v40, %v9008_v20  ;;  %v9090_v62 = vpop.eup %7573  ;;  %v1775_v20 = vpop.f32.mrf.mxu0 }
 0x429   : > { %v1593_v13 = vsel %vm1514_vm12, %v9090_v62, 0.0  ;;  %v1802_v23 = vmul.f32 0.35355338, %v1775_v20 }
 0x42a   : > { %6610 = vmatmul.msk.f32.gmra.mxu1 %vm1514_vm12, %v1608_v44 }
 0x42b   : > { %v9109_v0 = vadd.f32 %v8958_v19, %v1802_v23 }
 0x42c   : > { %v7576_v28 = vpop.eup %7575 }
 0x42d   : > { %v1609_v15 = vmul.f32 %v7576_v28, %v9012_v34  ;;  %v1820_v48 = vsel %vm1514_vm12, %v9109_v0, -inf }
 0x42f   : > { %2181 = vrot.lane.b32.xlu0 %v8851_v24, %s8245_s29 }
 0x430   : > { %v1778_v21 = vpop.f32.mrf.mxu0 }
 0x431   : > { %1594 = vadd.xlane.f32.xlu2 %v1593_v13  ;;  %v1803_v39 = vmul.f32 0.35355338, %v1778_v21 }
 0x432   : > { %6611 = vmatmul.msk.f32.gmra.mxu1 %vm1514_vm12, %v1609_v15 }
 0x433   : > { %v1586_v17 = vpop.xlane.xlu2 %1585  ;;  %v1703_v3 = vpop.permute.xlu0 %1702  ;;  %v9129_v49 = vadd.f32 %v8958_v19, %v1803_v39 }
 0x434   : > { %7577 = vrcp.f32 %v1586_v17  ;;  %6633 = vmatmul.msk.f32.gmra.mxu2 %vm1394_vm11, %v1703_v3 }
 0x435   : > { %v1823_v8 = vsel %vm1514_vm12, %v9129_v49, -inf }
 0x437   : > { %2595 = vrot.lane.b32.xlu0 %v8860_v27, %s8246_s23  ;;  %v1787_v27 = vpop.f32.mrf.mxu2 }
 0x438   : > { %v1781_v29 = vpop.f32.mrf.mxu0  ;;  %v1806_v22 = vmul.f32 0.35355338, %v1787_v27 }
 0x439   : > { %v1804_v11 = vmul.f32 0.35355338, %v1781_v29 }
 0x43a   : > { %v7578_v18 = vpop.eup %7577  ;;  %v9141_v53 = vadd.f32 %v8958_v19, %v1806_v22 }
 0x43b   : > { %v2604_v30 = vpop.permute.xlu2 %2603  ;;  %v1610_v24 = vmul.f32 %v7578_v18, %v9016_v5  ;;  %v9114_v50 = vadd.f32 %v8958_v19, %v1804_v11 }
 0x43c   : > { %6703 = vmatpush.xpose.msk.msrb.mxu1 %vm1394_vm11, %v2604_v30  ;;  %v1832_v14 = vsel %vm1514_vm12, %v9141_v53, -inf }
 0x43d   : > { %6612 = vmatmul.msk.f32.gmra.mxu1 %vm1514_vm12, %v1610_v24  ;;  %v2190_v34 = vpop.permute.xlu1 %2189  ;;  %v1826_v6 = vsel %vm1514_vm12, %v9114_v50, -inf }
 0x43e   : > { %2597 = vrot.lane.b32.xlu1 %v8922_v7, %s8246_s23 }
 0x440   : > { %v1784_v38 = vpop.f32.mrf.mxu0 }
 0x441   : > { %v1805_v4 = vmul.f32 0.35355338, %v1784_v38 }
 0x443   : > { %v9117_v54 = vadd.f32 %v8958_v19, %v1805_v4  ;;  %v2188_v10 = vpop.permute.xlu2 %2187 }
 0x445   : > { %v2600_v5 = vpop.permute.xlu1 %2599  ;;  %v1829_v42 = vsel %vm1514_vm12, %v9117_v54, -inf }
 0x449   : > { %2185 = vrot.lane.b32.xlu2 %v8922_v7, %s8245_s29  ;;  %v1790_v7 = vpop.f32.mrf.mxu2 }
 0x44a   : > { %v1807_v1 = vmul.f32 0.35355338, %v1790_v7 }
 0x44b   : > { %v9138_v43 = vpop.permute.xlu2 %2581 }
 0x44c   : > { %v9126_v55 = vadd.f32 %v8958_v19, %v1807_v1 }
 0x44d   : > { %v2172_v9 = vpop.permute.xlu1 %2171 }
 0x451   : > { %v1793_v12 = vpop.f32.mrf.mxu2 }
 0x452   : > { %v1808_v33 = vmul.f32 0.35355338, %v1793_v12 }
 0x453   : > { %v2174_v28 = vpop.permute.xlu2 %2173 }
 0x454   : > { %v9151_v44 = vadd.f32 %v8958_v19, %v1808_v33 }
 0x455   : > { %v9135_v35 = vpop.permute.xlu1 %2585 }
 0x456   : > { %v1838_v15 = vsel %vm1514_vm12, %v9151_v44, -inf }
 0x459   : > { %v1796_v29 = vpop.f32.mrf.mxu2 }
 0x45a   : > { %v1809_v23 = vmul.f32 0.35355338, %v1796_v29 }
 0x45b   : > { %v9159_v3 = vpop.permute.xlu2 %2587 }
 0x45d   : > { %v2178_v40 = vpop.permute.xlu1 %2177 }
 0x45e   : > { %v1589_v45 = vpop.xlane.xlu0 %1588 }
 0x45f   : > { %7579 = vrcp.f32 %v1589_v45 }
 0x461   : > { %1821 = vmax.xlane.f32.xlu0 %v1820_v48 }
 0x463   : > { %v2180_v24 = vpop.permute.xlu2 %2179 }
 0x465   : > { %v7580_v57 = vpop.eup %7579  ;;  %v9157_v17 = vpop.permute.xlu1 %2591 }
 0x466   : > { %v1611_v32 = vmul.f32 %v7580_v57, %v9034_v58  ;;  %v1835_v58 = vsel %vm1514_vm12, %v9126_v55, -inf }
 0x468   : > { %1827 = vmax.xlane.f32.xlu1 %v1826_v6  ;;  %6613 = vmatmul.msk.f32.gmra.mxu1 %vm1514_vm12, %v1611_v32 }
 0x469   : > { %1830 = vmax.xlane.f32.xlu0 %v1829_v42  ;;  %v9184_v4 = vpop.f32.mrf.mxu1 }
 0x46d   : > { %v2184_v30 = vpop.permute.xlu1 %2183 }
 0x470   : > { %1836 = vmax.xlane.f32.xlu1 %v1835_v58 }
 0x471   : > { %v2192_v63 = vpop.permute.xlu0 %2191  ;;  %v1661_v57 = vpop.f32.mrf.mxu1 }
 0x472   : > { %6667 = vmatpush.xpose.msk.msra.mxu2 %vm1394_vm11, %v2192_v63  ;;  %1824 = vmax.xlane.f32.xlu2 %v1823_v8 }
 0x476   : > { %6668 = vmatpush.xpose.msk.msra.mxu2 %vm1394_vm11, %v2190_v34  ;;  %v9172_v34 = vpop.permute.xlu2 %2593 }
 0x479   : > { %v2602_v37 = vpop.permute.xlu0 %2601  ;;  %v1664_v1 = vpop.f32.mrf.mxu1 }
 0x47a   : > { %1833 = vmax.xlane.f32.xlu2 %v1832_v14  ;;  %6669 = vmatpush.xpose.msk.msra.mxu2 %vm1394_vm11, %v2188_v10 }
 0x47b   : > { %6704 = vmatpush.xpose.msk.msrb.mxu1 %vm1394_vm11, %v2602_v37 }
 0x47d   : > { %7396 = vrot.lane.b32.xlu0 %v8873_v47, %s8244_s11 }
 0x47f   : > { %6705 = vmatpush.xpose.msk.msrb.mxu1 %vm1394_vm11, %v2600_v5  ;;  %v9179_v5 = vadd.f32 %v8958_v19, %v1809_v23 }
 0x481   : > { %v2170_v13 = vpop.permute.xlu0 %2169  ;;  %v1841_v11 = vsel %vm1514_vm12, %v9179_v5, -inf }
 0x482   : > { %1839 = vmax.xlane.f32.xlu2 %v1838_v15  ;;  %6670 = vmatmul.msk.f32.vlgmr.msra.gmra.mxu2 %vm1394_vm11, %v2170_v13 }
 0x489   : > { %7401 = vrot.lane.b32.xlu1 %v8855_v25, %s8244_s11  ;;  %v9164_v18 = vpop.permute.xlu0 %2583 }
 0x48a   : > { %6671 = vmatmul.msk.f32.gmra.mxu2 %vm1394_vm11, %v2172_v9 }
 0x491   : > { %7411 = vrot.lane.b32.xlu1 %v8809_v60, %s8244_s11  ;;  %v2176_v21 = vpop.permute.xlu0 %2175 }
 0x492   : > { %6672 = vmatmul.msk.f32.gmra.mxu2 %vm1394_vm11, %v2174_v28 }
 0x498   : > { %v1592_v20 = vpop.xlane.xlu1 %1591 }
 0x499   : > { %7581 = vrcp.f32 %v1592_v20  ;;  %v9186_v48 = vpop.permute.xlu0 %2589 }
 0x49a   : > { %7406 = vrot.lane.b32.xlu2 %v8834_v59, %s8244_s11  ;;  %6673 = vmatmul.msk.f32.gmra.mxu2 %vm1394_vm11, %v2176_v21 }
 0x49f   : > { %v7582_v27 = vpop.eup %7581 }
 0x4a0   : > { %v1612_v38 = vmul.f32 %v7582_v27, %v9082_v16 }
 0x4a1   : > { %v2182_v32 = vpop.permute.xlu0 %2181 }
 0x4a2   : > { %1928 = vrot.lane.b32.xlu2 %v8887_v52, %s8244_s11  ;;  %6614 = vmatmul.msk.f32.gmra.mxu1 %vm1514_vm12, %v1612_v38 }
 0x4a3   : > { %6674 = vmatmul.msk.f32.gmra.mxu2 %vm1394_vm11, %v2178_v40 }
 0x4a4   : > { %v1595_v45 = vpop.xlane.xlu2 %1594 }
 0x4a5   : > { %7583 = vrcp.f32 %v1595_v45 }
 0x4a7   : > { %1842 = vmax.xlane.f32.xlu0 %v1841_v11 }
 0x4a9   : > { %v9205_v22 = vpop.permute.xlu0 %2595 }
 0x4ab   : > { %v7584_v16 = vpop.eup %7583  ;;  %6675 = vmatmul.msk.f32.gmra.mxu2 %vm1394_vm11, %v2180_v24 }
 0x4ac   : > { %v1613_v7 = vmul.f32 %v7584_v16, %v9090_v62  ;;  %v2186_v9 = vpop.permute.xlu2 %2185  ;;  %v1667_v62 = vpop.f32.mrf.mxu1 }
 0x4ae   : > { %6615 = vmatmul.msk.f32.gmra.mxu1 %vm1514_vm12, %v1613_v7 }
 0x4b0   : > { %v9210_v12 = vpop.permute.xlu1 %2597 }
 0x4b3   : > { %6676 = vmatmul.msk.f32.gmra.mxu2 %vm1394_vm11, %v2182_v32 }
 0x4b4   : > { %v1670_v58 = vpop.f32.mrf.mxu1 }
 0x4b6   : > { %6653 = vmatmul.msk.f32.vlgmr.msra.gmra.mxu1 %vm1394_vm11, %v1661_v57 }
 0x4b7   : > { %v1799_v6 = vpop.f32.mrf.mxu2 }
 0x4b8   : > { %v1810_v42 = vmul.f32 0.35355338, %v1799_v6 }
 0x4ba   : > { %v9200_v39 = vadd.f32 %v8958_v19, %v1810_v42 }
 0x4bb   : > { %6677 = vmatmul.msk.f32.gmra.mxu2 %vm1394_vm11, %v2184_v30  ;;  %7416 = vrot.lane.b32.xlu0 %v8873_v47, %s8246_s23 }
 0x4bc   : > { %v1844_v10 = vsel %vm1514_vm12, %v9200_v39, -inf  ;;  %v1673_v63 = vpop.f32.mrf.mxu1 }
 0x4be   : > { %6654 = vmatmul.msk.f32.gmra.mxu1 %vm1394_vm11, %v1664_v1 }
 0x4c3   : > { %6678 = vmatmul.msk.f32.gmra.mxu2 %vm1394_vm11, %v2186_v9 }
 0x4c6   : > { %6655 = vmatmul.msk.f32.gmra.mxu1 %vm1394_vm11, %v1667_v62 }
 0x4cb   : > { %1845 = vmax.xlane.f32.xlu2 %v1844_v10 }
 0x4ce   : > { %6656 = vmatmul.msk.f32.gmra.mxu1 %vm1394_vm11, %v1670_v58 }
 0x4d4   : > { %v9208_v8 = vpop.xlane.xlu0 %1821 }
 0x4d6   : > { %6657 = vmatmul.msk.f32.gmra.mxu1 %vm1394_vm11, %v1673_v63 }
 0x4db   : > { %v9217_v40 = vpop.xlane.xlu1 %1827 }
 0x4dc   : > { %v9215_v14 = vpop.xlane.xlu0 %1830 }
 0x4e3   : > { %v9219_v24 = vpop.xlane.xlu1 %1836 }
 0x4e5   : > { %v9212_v33 = vpop.xlane.xlu2 %1824  ;;  %v1676_v37 = vpop.f32.mrf.mxu1 }
 0x4e6   : > { %6658 = vmatmul.msk.f32.gmra.mxu1 %vm1394_vm11, %v1676_v37 }
 0x4ed   : > { %v1834_v28 = vpop.xlane.xlu2 %1833 }
 0x4ef   : > { %v7397_v13 = vpop.permute.xlu0 %7396 }
 0x4f0   : > { %v7398_v15 = vunpack.i.l.bf16 %v7397_v13  ;;  %v7399_v30 = vunpack.i.h.bf16 %v7397_v13 }
 0x4f2   : > { %1989 = vmatpush.msrb.mxu3 %v7398_v15 }
 0x4f4   : > { %1990 = vmatpush.msrb.mxu3 %v7399_v30 }
 0x4f5   : > { %v9221_v20 = vpop.xlane.xlu2 %1839 }
 0x4fb   : > { %v7402_v21 = vpop.permute.xlu1 %7401 }
 0x4fc   : > { %v7403_v29 = vunpack.i.l.bf16 %v7402_v21  ;;  %v7404_v27 = vunpack.i.h.bf16 %v7402_v21 }
 0x4fd   : > { %v7407_v23 = vpop.permute.xlu2 %7406 }
 0x4fe   : > { %1991 = vmatpush.msrb.mxu3 %v7403_v29  ;;  %v7408_v38 = vunpack.i.l.bf16 %v7407_v23  ;;  %v7409_v45 = vunpack.i.h.bf16 %v7407_v23 }
 0x500   : > { %1992 = vmatpush.msrb.mxu3 %v7404_v27 }
 0x502   : > { %1993 = vmatpush.msrb.mxu3 %v7408_v38 }
 0x503   : > { %v7412_v11 = vpop.permute.xlu1 %7411 }
 0x504   : > { %1994 = vmatpush.msrb.mxu3 %v7409_v45  ;;  %v7413_v16 = vunpack.i.l.bf16 %v7412_v11  ;;  %v7414_v32 = vunpack.i.h.bf16 %v7412_v11 }
 0x505   : > { %v2258_v7 = vpop.f32.mrf.mxu2  ;;  %v1929_v6 = vpop.permute.xlu2 %1928 }
 0x506   : > { %v2285_v57 = vmul.f32 0.35355338, %v2258_v7  ;;  %1995 = vmatpush.msrb.mxu3 %v7413_v16 }
 0x508   : > { %1996 = vmatpush.msrb.mxu3 %v7414_v32  ;;  %v9224_v1 = vadd.f32 %v8958_v19, %v2285_v57 }
 0x50a   : > { %1997 = vmatpush.msrb.mxu3 %v1929_v6  ;;  %v2303_v9 = vsel %vm1514_vm12, %v9224_v1, -inf  ;;  %v1851_v6 = vsub.f32 %v9141_v53, %v1834_v28 }
 0x50b   : > { %2304 = vmax.xlane.f32.xlu1 %v2303_v9 }
 0x50c   : > { %v1864_v9 = vmul.f32 1.442695, %v1851_v6 }
 0x50d   : > { %v2261_v42 = vpop.f32.mrf.mxu2 }
 0x50e   : > { %v2286_v62 = vmul.f32 0.35355338, %v2261_v42  ;;  %7585 = vpow2.f32 %v1864_v9 }
 0x510   : > { %v9229_v10 = vadd.f32 %v8958_v19, %v2286_v62 }
 0x512   : > { %v2306_v58 = vsel %vm1514_vm12, %v9229_v10, -inf }
 0x513   : > { %2307 = vmax.xlane.f32.xlu2 %v2306_v58  ;;  %v1852_v58 = vsub.f32 %v9126_v55, %v9219_v24 }
 0x514   : > { %v9265_v28 = vpop.eup %7585 }
 0x515   : > { %v2264_v63 = vpop.f32.mrf.mxu2  ;;  %v1886_v55 = vsel %vm1514_vm12, %v9265_v28, 0.0 }
 0x516   : > { %v2287_v37 = vmul.f32 0.35355338, %v2264_v63  ;;  %v1849_v63 = vsub.f32 %v9114_v50, %v9217_v40  ;;  %v1848_v50 = vsub.f32 %v9129_v49, %v9212_v33 }
 0x518   : > { %v9234_v13 = vadd.f32 %v8958_v19, %v2287_v37 }
 0x51a   : > { %v2309_v15 = vsel %vm1514_vm12, %v9234_v13, -inf  ;;  %v1843_v38 = vpop.xlane.xlu0 %1842 }
 0x51b   : > { %2310 = vmax.xlane.f32.xlu2 %v2309_v15 }
 0x51d   : > { %v2267_v30 = vpop.f32.mrf.mxu2 }
 0x51e   : > { %v2288_v21 = vmul.f32 0.35355338, %v2267_v30  ;;  %v1850_v30 = vsub.f32 %v9117_v54, %v9215_v14 }
 0x51f   : > { %v1679_v29 = vpop.f32.mrf.mxu1 }
 0x520   : > { %6659 = vmatmul.msk.f32.gmra.mxu1 %vm1394_vm11, %v1679_v29  ;;  %v9240_v23 = vadd.f32 %v8958_v19, %v2288_v21  ;;  %v1862_v49 = vmul.f32 1.442695, %v1850_v30 }
 0x522   : > { %v2312_v27 = vsel %vm1514_vm12, %v9240_v23, -inf }
 0x523   : > { %2313 = vmax.xlane.f32.xlu2 %v2312_v27 }
 0x524   : > { %7426 = vrot.lane.b32.xlu1 %v8855_v25, %s8246_s23 }
 0x526   : > { %v2270_v45 = vpop.f32.mrf.mxu2 }
 0x527   : > { %v2289_v21 = vmul.f32 0.35355338, %v2270_v45 }
 0x529   : > { %v9303_v27 = vadd.f32 %v8958_v19, %v2289_v21 }
 0x52b   : > { %v1682_v11 = vpop.f32.mrf.mxu1 }
 0x52c   : > { %7431 = vrot.lane.b32.xlu1 %v8855_v25, %s8245_s29  ;;  %6660 = vmatmul.msk.f32.gmra.mxu1 %vm1394_vm11, %v1682_v11 }
 0x52d   : > { %v7417_v16 = vpop.permute.xlu0 %7416 }
 0x52e   : > { %v7418_v7 = vunpack.i.l.bf16 %v7417_v16  ;;  %v2273_v57 = vpop.f32.mrf.mxu2  ;;  %v7419_v32 = vunpack.i.h.bf16 %v7417_v16  ;;  %v2315_v16 = vsel %vm1514_vm12, %v9303_v27, -inf }
 0x52f   : > { %v2290_v45 = vmul.f32 0.35355338, %v2273_v57 }
 0x530   : > { %2875 = vmatpush.msrb.mxu2 %v7418_v7 }
 0x531   : > { %v9317_v6 = vadd.f32 %v8958_v19, %v2290_v45 }
 0x532   : > { %2876 = vmatpush.msrb.mxu2 %v7419_v32 }
 0x533   : > { %v2318_v57 = vsel %vm1514_vm12, %v9317_v6, -inf }
 0x534   : > { %7436 = vrot.lane.b32.xlu1 %v8834_v59, %s8246_s23  ;;  %6706 = vmatmul.msk.f32.vlgmr.msrb.gmra.mxu1 %vm1394_vm11, %v9138_v43  ;;  %v1866_v43 = vmul.f32 1.442695, %v1852_v58 }
 0x536   : > { %v2276_v42 = vpop.f32.mrf.mxu2  ;;  %7587 = vpow2.f32 %v1866_v43 }
 0x537   : > { %v2291_v62 = vmul.f32 0.35355338, %v2276_v42 }
 0x539   : > { %v9255_v25 = vadd.f32 %v8958_v19, %v2291_v62 }
 0x53b   : > { %7421 = vrot.lane.b32.xlu2 %v8873_v47, %s8245_s29  ;;  %v2321_v53 = vsel %vm1514_vm12, %v9255_v25, -inf  ;;  %v1860_v47 = vmul.f32 1.442695, %v1849_v63 }
 0x53c   : > { %2322 = vmax.xlane.f32.xlu0 %v2321_v53  ;;  %6707 = vmatmul.msk.f32.gmra.mxu1 %vm1394_vm11, %v9164_v18  ;;  %v9273_v24 = vpop.eup %7587  ;;  %v1853_v18 = vsub.f32 %v9151_v44, %v9221_v20  ;;  %v1854_v20 = vsub.f32 %v9179_v5, %v1843_v38  ;;  %v1847_v5 = vsub.f32 %v9109_v0, %v9208_v8 }
 0x53d   : > { %7589 = vpow2.f32 %v1860_v47  ;;  %v1889_v37 = vsel %vm1514_vm12, %v9273_v24, 0.0 }
 0x53e   : > { %v1868_v40 = vmul.f32 1.442695, %v1853_v18  ;;  %v1846_v29 = vpop.xlane.xlu2 %1845  ;;  %v1856_v7 = vmul.f32 1.442695, %v1847_v5 }
 0x53f   : > { %v1855_v38 = vsub.f32 %v9200_v39, %v1846_v29  ;;  %v9321_v39 = vpop.f32.mrf.mxu1 }
 0x540   : > { %7591 = vpow2.f32 %v1868_v40 }
 0x541   : > { %v1872_v32 = vmul.f32 1.442695, %v1855_v38 }
 0x543   : > { %v9283_v15 = vpop.eup %7589 }
 0x544   : > { %1887 = vadd.xlane.f32.xlu0 %v1886_v55  ;;  %6708 = vmatmul.msk.f32.gmra.mxu1 %vm1394_vm11, %v9135_v35  ;;  %v1858_v35 = vmul.f32 1.442695, %v1848_v50  ;;  %v1880_v44 = vsel %vm1514_vm12, %v9283_v15, 0.0 }
 0x546   : > { %7593 = vpow2.f32 %v1858_v35  ;;  %v9291_v33 = vpop.eup %7591 }
 0x547   : > { %7595 = vpow2.f32 %v1862_v49  ;;  %v1892_v54 = vsel %vm1514_vm12, %v9291_v33, 0.0  ;;  %v9333_v42 = vpop.f32.mrf.mxu1 }
 0x54c   : > { %1890 = vadd.xlane.f32.xlu0 %v1889_v37  ;;  %6709 = vmatmul.msk.f32.gmra.mxu1 %vm1394_vm11, %v9159_v3  ;;  %v9293_v3 = vpop.eup %7593 }
 0x54d   : > { %v1877_v14 = vsel %vm1514_vm12, %v9293_v3, 0.0  ;;  %v9305_v11 = vpop.eup %7595 }
 0x54f   : > { %v9341_v53 = vpop.f32.mrf.mxu1 }
 0x554   : > { %1881 = vadd.xlane.f32.xlu0 %v1880_v44  ;;  %6710 = vmatmul.msk.f32.gmra.mxu1 %vm1394_vm11, %v9186_v48  ;;  %v1870_v48 = vmul.f32 1.442695, %v1854_v20 }
 0x556   : > { %7597 = vpow2.f32 %v1870_v48 }
 0x557   : > { %7599 = vpow2.f32 %v1856_v7  ;;  %v9346_v47 = vpop.f32.mrf.mxu1 }
 0x558   : > { %7601 = vpow2.f32 %v1872_v32 }
 0x55c   : > { %1893 = vadd.xlane.f32.xlu0 %v1892_v54  ;;  %6711 = vmatmul.msk.f32.gmra.mxu1 %vm1394_vm11, %v9157_v17  ;;  %v1883_v17 = vsel %vm1514_vm12, %v9305_v11, 0.0  ;;  %v9319_v0 = vpop.eup %7597 }
 0x55d   : > { %v1895_v8 = vsel %vm1514_vm12, %v9319_v0, 0.0 }
 0x55e   : > { %1878 = vadd.xlane.f32.xlu1 %v1877_v14 }
 0x55f   : > { %v9356_v50 = vpop.f32.mrf.mxu1 }
 0x564   : > { %1884 = vadd.xlane.f32.xlu0 %v1883_v17  ;;  %2316 = vmax.xlane.f32.xlu2 %v2315_v16 }
 0x565   : > { %6712 = vmatmul.msk.f32.gmra.mxu1 %vm1394_vm11, %v9172_v34  ;;  %v9329_v34 = vpop.eup %7599 }
 0x566   : > { %v9331_v9 = vpop.eup %7601  ;;  %v1874_v58 = vsel %vm1514_vm12, %v9329_v34, 0.0 }
 0x567   : > { %v1898_v62 = vsel %vm1514_vm12, %v9331_v9, 0.0  ;;  %v9360_v30 = vpop.f32.mrf.mxu1 }
 0x56c   : > { %1896 = vadd.xlane.f32.xlu0 %v1895_v8  ;;  %2319 = vmax.xlane.f32.xlu2 %v2318_v57 }
 0x56d   : > { %6713 = vmatmul.msk.f32.gmra.mxu1 %vm1394_vm11, %v9205_v22 }
 0x574   : > { %1899 = vadd.xlane.f32.xlu0 %v1898_v62  ;;  %1875 = vadd.xlane.f32.xlu2 %v1874_v58 }
 0x575   : > { %6714 = vmatmul.msk.f32.gmra.mxu1 %vm1394_vm11, %v9210_v12 }
 0x57e   : > { %v2305_v22 = vpop.xlane.xlu1 %2304 }
 0x57f   : > { %v2330_v43 = vsub.f32 %v9224_v1, %v2305_v22 }
 0x581   : > { %v2339_v63 = vmul.f32 1.442695, %v2330_v43 }
 0x583   : > { %7603 = vpow2.f32 %v2339_v63 }
 0x586   : > { %v9344_v55 = vpop.xlane.xlu2 %2307 }
 0x589   : > { %v9348_v18 = vpop.eup %7603 }
 0x58a   : > { %v2357_v37 = vsel %vm1514_vm12, %v9348_v18, 0.0 }
 0x58b   : > { %2358 = vadd.xlane.f32.xlu1 %v2357_v37 }
 0x58c   : > { %7446 = vrot.lane.b32.xlu2 %v8809_v60, %s8246_s23 }
 0x58e   : > { %v9354_v12 = vpop.xlane.xlu2 %2310 }
 0x596   : > { %v9358_v1 = vpop.xlane.xlu2 %2313  ;;  %v7427_v40 = vpop.permute.xlu1 %7426 }
 0x597   : > { %v7428_v35 = vunpack.i.l.bf16 %v7427_v40  ;;  %v7429_v44 = vunpack.i.h.bf16 %v7427_v40 }
 0x599   : > { %2877 = vmatpush.msrb.mxu2 %v7428_v35 }
 0x59b   : > { %2878 = vmatpush.msrb.mxu2 %v7429_v44 }
 0x59d   : > { %v9362_v54 = vpop.f32.mrf.mxu1 }
 0x59e   : > { %v7422_v49 = vpop.permute.xlu2 %7421  ;;  %v7432_v20 = vpop.permute.xlu1 %7431 }
 0x59f   : > { %v7423_v21 = vunpack.i.l.bf16 %v7422_v49  ;;  %v7424_v14 = vunpack.i.h.bf16 %v7422_v49  ;;  %v7433_v48 = vunpack.i.l.bf16 %v7432_v20  ;;  %v7434_v29 = vunpack.i.h.bf16 %v7432_v20 }
 0x5a1   : > { %2463 = vmatpush.msra.mxu3 %v7423_v21 }
 0x5a3   : > { %2464 = vmatpush.msra.mxu3 %v7424_v14 }
 0x5a5   : > { %2465 = vmatpush.msra.mxu3 %v7433_v48 }
 0x5a6   : > { %v7437_v5 = vpop.permute.xlu1 %7436 }
 0x5a7   : > { %v7438_v38 = vunpack.i.l.bf16 %v7437_v5  ;;  %2466 = vmatpush.msra.mxu3 %v7434_v29  ;;  %v7439_v45 = vunpack.i.h.bf16 %v7437_v5  ;;  %v9391_v5 = vld [vmem:[%s8478_s20] ss:$0 sm:$0xff] }
 0x5a9   : > { %v9364_v17 = vpop.f32.mrf.mxu1  ;;  %2879 = vmatpush.msrb.mxu2 %v7438_v38 }
 0x5aa   : > { %11139 = vst [vmem:[#allocation23_spill] sm:$0xff] %v9364_v17 }
 0x5ab   : > { %2880 = vmatpush.msrb.mxu2 %v7439_v45 }
 0x5af   : > { %v9381_v44 = vpop.xlane.xlu0 %2322 }
 0x5b1   : > { %v2670_v16 = vpop.f32.mrf.mxu1 }
 0x5b2   : > { %v2697_v7 = vmul.f32 0.35355338, %v2670_v16 }
 0x5b4   : > { %v9367_v32 = vadd.f32 %v8958_v19, %v2697_v7 }
 0x5b6   : > { %v2715_v8 = vsel %vm1514_vm12, %v9367_v32, -inf }
 0x5b7   : > { %2716 = vmax.xlane.f32.xlu0 %v2715_v8  ;;  %v1888_v29 = vpop.xlane.xlu0 %1887 }
 0x5b9   : > { %v2673_v57 = vpop.f32.mrf.mxu1 }
 0x5ba   : > { %v2698_v62 = vmul.f32 0.35355338, %v2673_v57 }
 0x5bc   : > { %v9372_v58 = vadd.f32 %v8958_v19, %v2698_v62 }
 0x5be   : > { %v2718_v22 = vsel %vm1514_vm12, %v9372_v58, -inf }
 0x5bf   : > { %2719 = vmax.xlane.f32.xlu1 %v2718_v22  ;;  %v1891_v8 = vpop.xlane.xlu0 %1890 }
 0x5c1   : > { %v2676_v43 = vpop.f32.mrf.mxu1 }
 0x5c2   : > { %v2699_v63 = vmul.f32 0.35355338, %v2676_v43 }
 0x5c4   : > { %v9377_v37 = vadd.f32 %v8958_v19, %v2699_v63 }
 0x5c6   : > { %v2721_v40 = vsel %vm1514_vm12, %v9377_v37, -inf }
 0x5c7   : > { %2722 = vmax.xlane.f32.xlu1 %v2721_v40 }
 0x5c9   : > { %v2679_v35 = vpop.f32.mrf.mxu1 }
 0x5ca   : > { %v2700_v49 = vmul.f32 0.35355338, %v2679_v35 }
 0x5cb   : > { %7441 = vrot.lane.b32.xlu0 %v8834_v59, %s8245_s29 }
 0x5cc   : > { %v9386_v20 = vadd.f32 %v8958_v19, %v2700_v49  ;;  %v1882_v49 = vpop.xlane.xlu0 %1881 }
 0x5ce   : > { %v2724_v21 = vsel %vm1514_vm12, %v9386_v20, -inf }
 0x5cf   : > { %2725 = vmax.xlane.f32.xlu1 %v2724_v21  ;;  %v2279_v21 = vpop.f32.mrf.mxu2 }
 0x5d1   : > { %v2682_v14 = vpop.f32.mrf.mxu1 }
 0x5d2   : > { %v2701_v48 = vmul.f32 0.35355338, %v2682_v14  ;;  %v2292_v14 = vmul.f32 0.35355338, %v2279_v21 }
 0x5d4   : > { %v9394_v38 = vadd.f32 %v9391_v5, %v2701_v48  ;;  %v1879_v48 = vpop.xlane.xlu1 %1878  ;;  %v1894_v2 = vpop.xlane.xlu0 %1893 }
 0x5d6   : > { %v2727_v45 = vsel %vm1514_vm12, %v9394_v38, -inf }
 0x5d7   : > { %v9398_v16 = vpop.xlane.xlu2 %2316  ;;  %2728 = vmax.xlane.f32.xlu1 %v2727_v45 }
 0x5d9   : > { %v2685_v59 = vpop.f32.mrf.mxu1 }
 0x5da   : > { %v2702_v19 = vmul.f32 0.35355338, %v2685_v59 }
 0x5dc   : > { %v9401_v7 = vadd.f32 %v9391_v5, %v2702_v19 }
 0x5de   : > { %v2730_v57 = vsel %vm1514_vm12, %v9401_v7, -inf }
 0x5df   : > { %v9405_v62 = vpop.xlane.xlu2 %2319  ;;  %2731 = vmax.xlane.f32.xlu1 %v2730_v57 }
 0x5e2   : > { %v2688_v22 = vpop.f32.mrf.mxu1 }
 0x5e3   : > { %v2703_v43 = vmul.f32 0.35355338, %v2688_v22 }
 0x5e5   : > { %v9408_v63 = vadd.f32 %v9391_v5, %v2703_v43  ;;  %v9414_v43 = vadd.f32 %v9391_v5, %v2292_v14 }
 0x5e7   : > { %v1876_v40 = vpop.xlane.xlu2 %1875  ;;  %v2733_v35 = vsel %vm1514_vm12, %v9408_v63, -inf }
 0x5e8   : > { %2734 = vmax.xlane.f32.xlu1 %v2733_v35  ;;  %7605 = vrcp.f32 %v1876_v40  ;;  %v2324_v40 = vsel %vm1514_vm12, %v9414_v43, -inf }
 0x5e9   : > { %7607 = vrcp.f32 %v1879_v48 }
 0x5ea   : > { %v2691_v59 = vpop.f32.mrf.mxu1  ;;  %7609 = vrcp.f32 %v1882_v49 }
 0x5eb   : > { %v2704_v35 = vmul.f32 0.35355338, %v2691_v59 }
 0x5ee   : > { %v7606_v45 = vpop.eup %7605 }
 0x5ef   : > { %v7447_v19 = vpop.permute.xlu2 %7446  ;;  %v1910_v22 = vmul.f32 %v7606_v45, %v9329_v34  ;;  %v7608_v21 = vpop.eup %7607  ;;  %v9421_v34 = vadd.f32 %v9391_v5, %v2704_v35 }
 0x5f0   : > { %v7448_v57 = vunpack.i.l.bf16 %v7447_v19  ;;  %v7449_v17 = vunpack.i.h.bf16 %v7447_v19  ;;  %v1911_v48 = vmul.f32 %v7608_v21, %v9293_v3  ;;  %v1885_v45 = vpop.xlane.xlu0 %1884 }
 0x5f1   : > { %6634 = vmatmul.msk.f32.vlgmr.msrb.gmra.mxu3 %vm1514_vm12, %v1910_v22  ;;  %v2736_v59 = vsel %vm1514_vm12, %v9421_v34, -inf  ;;  %7611 = vrcp.f32 %v1885_v45 }
 0x5f2   : > { %2881 = vmatpush.msrb.mxu2 %v7448_v57  ;;  %v2694_v14 = vpop.f32.mrf.mxu1  ;;  %7613 = vrcp.f32 %v1888_v29 }
 0x5f3   : > { %v2705_v19 = vmul.f32 0.35355338, %v2694_v14  ;;  %7615 = vrcp.f32 %v1891_v8 }
 0x5f4   : > { %2882 = vmatpush.msrb.mxu2 %v7449_v17  ;;  %v7610_v17 = vpop.eup %7609  ;;  %7617 = vrcp.f32 %v1894_v2 }
 0x5f5   : > { %2325 = vmax.xlane.f32.xlu0 %v2324_v40  ;;  %v1912_v57 = vmul.f32 %v7610_v17, %v9283_v15  ;;  %v9428_v49 = vadd.f32 %v9391_v5, %v2705_v19 }
 0x5f7   : > { %v2739_v3 = vsel %vm1514_vm12, %v9428_v49, -inf  ;;  %v7612_v22 = vpop.eup %7611 }
 0x5f8   : > { %v1913_v35 = vmul.f32 %v7612_v22, %v9305_v11  ;;  %v7614_v40 = vpop.eup %7613 }
 0x5f9   : > { %6635 = vmatmul.msk.f32.gmra.mxu3 %vm1514_vm12, %v1911_v48  ;;  %v1914_v15 = vmul.f32 %v7614_v40, %v9265_v28  ;;  %v7616_v21 = vpop.eup %7615  ;;  %v1897_v48 = vpop.xlane.xlu0 %1896 }
 0x5fa   : > { %v1915_v14 = vmul.f32 %v7616_v21, %v9273_v24  ;;  %v7618_v45 = vpop.eup %7617  ;;  %7619 = vrcp.f32 %v1897_v48 }
 0x5fb   : > { %v1916_v29 = vmul.f32 %v7618_v45, %v9291_v33 }
 0x5fd   : > { %2737 = vmax.xlane.f32.xlu0 %v2736_v59 }
 0x5fe   : > { %v9444_v8 = vpop.xlane.xlu1 %2358 }
 0x600   : > { %v7620_v19 = vpop.eup %7619 }
 0x601   : > { %2814 = vrot.lane.b32.xlu1 %v8887_v52, %s8246_s23  ;;  %6636 = vmatmul.msk.f32.gmra.mxu3 %vm1514_vm12, %v1912_v57  ;;  %v1900_v11 = vpop.xlane.xlu0 %1899  ;;  %v1917_v28 = vmul.f32 %v7620_v19, %v9319_v0 }
 0x602   : > { %7621 = vrcp.f32 %v1900_v11 }
 0x605   : > { %2740 = vmax.xlane.f32.xlu0 %v2739_v3 }
 0x608   : > { %v7622_v59 = vpop.eup %7621 }
 0x609   : > { %6637 = vmatmul.msk.f32.gmra.mxu3 %vm1514_vm12, %v1913_v35  ;;  %v1918_v57 = vmul.f32 %v7622_v59, %v9331_v9 }
 0x611   : > { %6638 = vmatmul.msk.f32.gmra.mxu3 %vm1514_vm12, %v1914_v15 }
 0x619   : > { %6639 = vmatmul.msk.f32.gmra.mxu3 %vm1514_vm12, %v1915_v14 }
 0x621   : > { %6640 = vmatmul.msk.f32.gmra.mxu3 %vm1514_vm12, %v1916_v29 }
 0x629   : > { %6641 = vmatmul.msk.f32.gmra.mxu3 %vm1514_vm12, %v1917_v28 }
 0x62a   : > { %v2717_v2 = vpop.xlane.xlu0 %2716 }
 0x62b   : > { %v2742_v24 = vsub.f32 %v9367_v32, %v2717_v2 }
 0x62d   : > { %v2751_v17 = vmul.f32 1.442695, %v2742_v24 }
 0x62f   : > { %7623 = vpow2.f32 %v2751_v17 }
 0x631   : > { %6642 = vmatmul.msk.f32.gmra.mxu3 %vm1514_vm12, %v1918_v57 }
 0x632   : > { %v2720_v33 = vpop.xlane.xlu1 %2719 }
 0x633   : > { %v2743_v3 = vsub.f32 %v9372_v58, %v2720_v33  ;;  %v2026_v33 = vld [vmem:[#allocation4 + $0x8] sm:$0xff] }
 0x634   : > { %2069 = vmatpush.msrb.mxu0 %v2026_v33 }
 0x635   : > { %v9451_v22 = vpop.eup %7623  ;;  %v2753_v0 = vmul.f32 1.442695, %v2743_v3 }
 0x636   : > { %v2769_v35 = vsel %vm1514_vm12, %v9451_v22, 0.0 }
 0x637   : > { %7625 = vpow2.f32 %v2753_v0  ;;  %2770 = vadd.xlane.f32.xlu2 %v2769_v35  ;;  %v7928_v35 = vld [vmem:[#allocation4] sm:$0xff] }
 0x638   : > { %2140 = vmatpush.msra.mxu0 %v7928_v35  ;;  %v2282_v35 = vpop.f32.mrf.mxu2 }
 0x63a   : > { %v2723_v40 = vpop.xlane.xlu1 %2722 }
 0x63b   : > { %v2744_v32 = vsub.f32 %v9377_v37, %v2723_v40 }
 0x63d   : > { %v9456_v15 = vpop.eup %7625  ;;  %v2755_v21 = vmul.f32 1.442695, %v2744_v32  ;;  %v7442_v9 = vpop.permute.xlu0 %7441 }
 0x63e   : > { %v7443_v48 = vunpack.i.l.bf16 %v7442_v9  ;;  %v2772_v14 = vsel %vm1514_vm12, %v9456_v15, 0.0  ;;  %v7444_v58 = vunpack.i.h.bf16 %v7442_v9 }
 0x63f   : > { %7627 = vpow2.f32 %v2755_v21  ;;  %2773 = vadd.xlane.f32.xlu1 %v2772_v14 }
 0x640   : > { %2467 = vmatpush.msra.mxu3 %v7443_v48  ;;  %v2331_v48 = vsub.f32 %v9229_v10, %v9344_v55 }
 0x642   : > { %v2726_v45 = vpop.xlane.xlu1 %2725  ;;  %2468 = vmatpush.msra.mxu3 %v7444_v58  ;;  %v2341_v58 = vmul.f32 1.442695, %v2331_v48  ;;  %v2293_v48 = vmul.f32 0.35355338, %v2282_v35 }
 0x643   : > { %v2745_v29 = vsub.f32 %v9386_v20, %v2726_v45 }
 0x645   : > { %v9461_v11 = vpop.eup %7627  ;;  %v2757_v19 = vmul.f32 1.442695, %v2745_v29  ;;  %v2333_v29 = vsub.f32 %v9240_v23, %v9358_v1  ;;  %v2334_v23 = vsub.f32 %v9303_v27, %v9398_v16 }
 0x646   : > { %v2775_v37 = vsel %vm1514_vm12, %v9461_v11, 0.0 }
 0x647   : > { %7629 = vpow2.f32 %v2757_v19  ;;  %2776 = vadd.xlane.f32.xlu0 %v2775_v37  ;;  %v2332_v19 = vsub.f32 %v9234_v13, %v9354_v12  ;;  %v2345_v37 = vmul.f32 1.442695, %v2333_v29  ;;  %v2336_v12 = vsub.f32 %v9255_v25, %v9381_v44 }
 0x648   : > { %v2347_v1 = vmul.f32 1.442695, %v2334_v23 }
 0x64a   : > { %v2729_v28 = vpop.xlane.xlu1 %2728 }
 0x64b   : > { %v2746_v2 = vsub.f32 %v9394_v38, %v2729_v28 }
 0x64d   : > { %v9466_v24 = vpop.eup %7629  ;;  %v2759_v59 = vmul.f32 1.442695, %v2746_v2 }
 0x64e   : > { %v2778_v17 = vsel %vm1514_vm12, %v9466_v24, 0.0 }
 0x64f   : > { %7631 = vpow2.f32 %v2759_v59  ;;  %7451 = vrot.lane.b32.xlu2 %v8809_v60, %s8245_s29  ;;  %2779 = vadd.xlane.f32.xlu0 %v2778_v17  ;;  %v2343_v59 = vmul.f32 1.442695, %v2332_v19 }
 0x652   : > { %v2732_v20 = vpop.xlane.xlu1 %2731 }
 0x653   : > { %v2747_v57 = vsub.f32 %v9401_v7, %v2732_v20 }
 0x655   : > { %v9473_v3 = vpop.eup %7631  ;;  %v2761_v0 = vmul.f32 1.442695, %v2747_v57  ;;  %v2351_v57 = vmul.f32 1.442695, %v2336_v12 }
 0x656   : > { %v2781_v38 = vsel %vm1514_vm12, %v9473_v3, 0.0 }
 0x657   : > { %7633 = vpow2.f32 %v2761_v0  ;;  %2782 = vadd.xlane.f32.xlu0 %v2781_v38 }
 0x658   : > { %2402 = vrot.lane.b32.xlu1 %v8887_v52, %s8245_s29 }
 0x65b   : > { %v2735_v60 = vpop.xlane.xlu1 %2734 }
 0x65c   : > { %v2748_v40 = vsub.f32 %v9408_v63, %v2735_v60 }
 0x65d   : > { %v9480_v32 = vpop.eup %7633 }
 0x65e   : > { %v2763_v7 = vmul.f32 1.442695, %v2748_v40  ;;  %v2784_v21 = vsel %vm1514_vm12, %v9480_v32, 0.0 }
 0x65f   : > { %2785 = vadd.xlane.f32.xlu0 %v2784_v21  ;;  %v2335_v21 = vsub.f32 %v9317_v6, %v9405_v62 }
 0x660   : > { %7635 = vpow2.f32 %v2763_v7 }
 0x666   : > { %v9484_v9 = vpop.eup %7635 }
 0x667   : > { %v2787_v14 = vsel %vm1514_vm12, %v9484_v9, 0.0 }
 0x668   : > { %2788 = vadd.xlane.f32.xlu0 %v2787_v14  ;;  %v2326_v52 = vpop.xlane.xlu0 %2325 }
 0x669   : > { %v2337_v63 = vsub.f32 %v9414_v43, %v2326_v52  ;;  %v2349_v52 = vmul.f32 1.442695, %v2335_v21 }
 0x66b   : > { %v2353_v45 = vmul.f32 1.442695, %v2337_v63  ;;  %v9530_v63 = vadd.f32 %v9391_v5, %v2293_v48 }
 0x66d   : > { %7637 = vpow2.f32 %v2353_v45  ;;  %v2327_v62 = vsel %vm1514_vm12, %v9530_v63, -inf }
 0x66e   : > { %7639 = vpow2.f32 %v2341_v58 }
 0x66f   : > { %7641 = vpow2.f32 %v2345_v37 }
 0x670   : > { %v2738_v10 = vpop.xlane.xlu0 %2737  ;;  %7643 = vpow2.f32 %v2343_v59 }
 0x671   : > { %7645 = vpow2.f32 %v2347_v1  ;;  %v2749_v6 = vsub.f32 %v9421_v34, %v2738_v10 }
 0x672   : > { %7647 = vpow2.f32 %v2351_v57 }
 0x673   : > { %v9495_v28 = vpop.eup %7637  ;;  %v2815_v55 = vpop.permute.xlu1 %2814  ;;  %v2765_v19 = vmul.f32 1.442695, %v2749_v6 }
 0x674   : > { %v9497_v2 = vpop.eup %7639  ;;  %2883 = vmatpush.msrb.mxu2 %v2815_v55  ;;  %v2378_v43 = vsel %vm1514_vm12, %v9495_v28, 0.0  ;;  %v1999_v17 = vpop.f32.mrf.mxu3 }
 0x675   : > { %2379 = vadd.xlane.f32.xlu0 %v2378_v43  ;;  %6643 = vmatmul.msk.f32.vlgmr.msrb.gmra.mxu0 %vm1394_vm11, %v1999_v17  ;;  %v2360_v13 = vsel %vm1514_vm12, %v9497_v2, 0.0  ;;  %v9508_v20 = vpop.eup %7641 }
 0x676   : > { %v9510_v38 = vpop.eup %7643  ;;  %v2366_v27 = vsel %vm1514_vm12, %v9508_v20, 0.0 }
 0x677   : > { %v2363_v25 = vsel %vm1514_vm12, %v9510_v38, 0.0  ;;  %v9518_v44 = vpop.eup %7645 }
 0x678   : > { %2361 = vadd.xlane.f32.xlu2 %v2360_v13  ;;  %v2741_v33 = vpop.xlane.xlu0 %2740  ;;  %v9520_v7 = vpop.eup %7647 }
 0x679   : > { %v2750_v16 = vsub.f32 %v9428_v49, %v2741_v33  ;;  %v2369_v49 = vsel %vm1514_vm12, %v9518_v44, 0.0  ;;  %v2375_v14 = vsel %vm1514_vm12, %v9520_v7, 0.0 }
 0x67b   : > { %v2767_v60 = vmul.f32 1.442695, %v2750_v16 }
 0x67c   : > { %v2002_v0 = vpop.f32.mrf.mxu3 }
 0x67d   : > { %6644 = vmatmul.msk.f32.gmra.mxu0 %vm1394_vm11, %v2002_v0  ;;  %7649 = vpow2.f32 %v2767_v60 }
 0x67e   : > { %7651 = vpow2.f32 %v2349_v52 }
 0x67f   : > { %7653 = vpow2.f32 %v2765_v19 }
 0x680   : > { %2367 = vadd.xlane.f32.xlu2 %v2366_v27 }
 0x682   : > { %2364 = vadd.xlane.f32.xlu1 %v2363_v25 }
 0x683   : > { %v9532_v45 = vpop.eup %7649 }
 0x684   : > { %v2005_v40 = vpop.f32.mrf.mxu3  ;;  %v2793_v29 = vsel %vm1514_vm12, %v9532_v45, 0.0  ;;  %v9540_v37 = vpop.eup %7651 }
 0x685   : > { %6645 = vmatmul.msk.f32.gmra.mxu0 %vm1394_vm11, %v2005_v40  ;;  %v2372_v34 = vsel %vm1514_vm12, %v9540_v37, 0.0  ;;  %v9545_v10 = vpop.eup %7653 }
 0x686   : > { %v2790_v59 = vsel %vm1514_vm12, %v9545_v10, 0.0 }
 0x688   : > { %2370 = vadd.xlane.f32.xlu2 %v2369_v49 }
 0x68a   : > { %2376 = vadd.xlane.f32.xlu1 %v2375_v14 }
 0x68c   : > { %v2008_v58 = vpop.f32.mrf.mxu3 }
 0x68d   : > { %6646 = vmatmul.msk.f32.gmra.mxu0 %vm1394_vm11, %v2008_v58 }
 0x690   : > { %2328 = vmax.xlane.f32.xlu2 %v2327_v62 }
 0x692   : > { %2794 = vadd.xlane.f32.xlu1 %v2793_v29 }
 0x694   : > { %v2011_v5 = vpop.f32.mrf.mxu3 }
 0x695   : > { %6647 = vmatmul.msk.f32.gmra.mxu0 %vm1394_vm11, %v2011_v5 }
 0x698   : > { %2373 = vadd.xlane.f32.xlu2 %v2372_v34 }
 0x69c   : > { %v2014_v55 = vpop.f32.mrf.mxu3 }
 0x69d   : > { %6648 = vmatmul.msk.f32.gmra.mxu0 %vm1394_vm11, %v2014_v55 }
 0x6a0   : > { %2791 = vadd.xlane.f32.xlu2 %v2790_v59 }
 0x6a4   : > { %v2017_v43 = vpop.f32.mrf.mxu3 }
 0x6a5   : > { %6649 = vmatmul.msk.f32.gmra.mxu0 %vm1394_vm11, %v2017_v43 }
 0x6aa   : > { %v2771_v17 = vpop.xlane.xlu2 %2770 }
 0x6ab   : > { %7655 = vrcp.f32 %v2771_v17 }
 0x6ac   : > { %v2020_v23 = vpop.f32.mrf.mxu3 }
 0x6ad   : > { %6650 = vmatmul.msk.f32.gmra.mxu0 %vm1394_vm11, %v2020_v23 }
 0x6b1   : > { %v7656_v13 = vpop.eup %7655 }
 0x6b2   : > { %v2805_v12 = vmul.f32 %v7656_v13, %v9451_v22  ;;  %v7452_v1 = vpop.permute.xlu2 %7451  ;;  %v2774_v57 = vpop.xlane.xlu1 %2773 }
 0x6b3   : > { %v7453_v33 = vunpack.i.l.bf16 %v7452_v1  ;;  %7657 = vrcp.f32 %v2774_v57  ;;  %v7454_v0 = vunpack.i.h.bf16 %v7452_v1 }
 0x6b4   : > { %6715 = vmatmul.msk.f32.vlgmr.msrb.gmra.mxu2 %vm1514_vm12, %v2805_v12  ;;  %v2023_v27 = vpop.f32.mrf.mxu3 }
 0x6b5   : > { %2469 = vmatpush.msra.mxu3 %v7453_v33  ;;  %6651 = vmatmul.msk.f32.gmra.mxu0 %vm1394_vm11, %v2023_v27 }
 0x6b7   : > { %2470 = vmatpush.msra.mxu3 %v7454_v0 }
 0x6b9   : > { %v7658_v16 = vpop.eup %7657 }
 0x6ba   : > { %v2777_v25 = vpop.xlane.xlu0 %2776  ;;  %v2806_v35 = vmul.f32 %v7658_v16, %v9456_v15 }
 0x6bb   : > { %7659 = vrcp.f32 %v2777_v25 }
 0x6bc   : > { %6716 = vmatmul.msk.f32.gmra.mxu2 %vm1514_vm12, %v2806_v35  ;;  %7661 = vrcp.f32 %v9444_v8 }
 0x6bd   : > { %6652 = vmatmul.msk.f32.vlgmr.msra.gmra.mxu0 %vm1394_vm11, %v9184_v4 }
 0x6c1   : > { %v7660_v22 = vpop.eup %7659 }
 0x6c2   : > { %v2780_v60 = vpop.xlane.xlu0 %2779  ;;  %v2807_v40 = vmul.f32 %v7660_v22, %v9461_v11  ;;  %v7662_v21 = vpop.eup %7661 }
 0x6c3   : > { %7663 = vrcp.f32 %v2780_v60  ;;  %v2393_v49 = vmul.f32 %v7662_v21, %v9348_v18 }
 0x6c4   : > { %6717 = vmatmul.msk.f32.gmra.mxu2 %vm1514_vm12, %v2807_v40 }
 0x6c9   : > { %v7664_v48 = vpop.eup %7663 }
 0x6ca   : > { %v2783_v15 = vpop.xlane.xlu0 %2782  ;;  %v2403_v14 = vpop.permute.xlu1 %2402  ;;  %v2808_v52 = vmul.f32 %v7664_v48, %v9466_v24  ;;  %v2500_v48 = vld [vmem:[#allocation4 + $0x10] sm:$0xff] }
 0x6cb   : > { %7665 = vrcp.f32 %v2783_v15  ;;  %2471 = vmatpush.msra.mxu3 %v2403_v14  ;;  %2543 = vmatpush.msrb.mxu0 %v2500_v48 }
 0x6cc   : > { %6679 = vmatmul.msk.f32.vlgmr.msra.gmra.mxu3 %vm1514_vm12, %v2393_v49  ;;  %6718 = vmatmul.msk.f32.gmra.mxu2 %vm1514_vm12, %v2808_v52  ;;  %v2912_v49 = vld [vmem:[#allocation4 + $0x18] sm:$0xff] }
 0x6cd   : > { %2955 = vmatpush.msrb.mxu3 %v2912_v49 }
 0x6d1   : > { %v7666_v4 = vpop.eup %7665 }
 0x6d2   : > { %v2786_v8 = vpop.xlane.xlu0 %2785  ;;  %v2809_v11 = vmul.f32 %v7666_v4, %v9473_v3 }
 0x6d3   : > { %7667 = vrcp.f32 %v2786_v8 }
 0x6d4   : > { %6719 = vmatmul.msk.f32.gmra.mxu2 %vm1514_vm12, %v2809_v11 }
 0x6d9   : > { %v7668_v58 = vpop.eup %7667 }
 0x6da   : > { %v2810_v18 = vmul.f32 %v7668_v58, %v9480_v32 }
 0x6db   : > { %v2789_v6 = vpop.xlane.xlu0 %2788 }
 0x6dc   : > { %7669 = vrcp.f32 %v2789_v6  ;;  %6720 = vmatmul.msk.f32.gmra.mxu2 %vm1514_vm12, %v2810_v18 }
 0x6e2   : > { %v7670_v24 = vpop.eup %7669 }
 0x6e3   : > { %v2811_v62 = vmul.f32 %v7670_v24, %v9484_v9 }
 0x6e5   : > { %6721 = vmatmul.msk.f32.gmra.mxu2 %vm1514_vm12, %v2811_v62 }
 0x6e8   : > { %v2380_v25 = vpop.xlane.xlu0 %2379 }
 0x6eb   : > { %v2362_v29 = vpop.xlane.xlu2 %2361 }
 0x6ec   : > { %7671 = vrcp.f32 %v2362_v29 }
 0x6f2   : > { %v7672_v19 = vpop.eup %7671  ;;  %v2071_v62 = vpop.f32.mrf.mxu0 }
 0x6f3   : > { %v2368_v5 = vpop.xlane.xlu2 %2367  ;;  %v2394_v3 = vmul.f32 %v7672_v19, %v9497_v2 }
 0x6f5   : > { %v2365_v34 = vpop.xlane.xlu1 %2364  ;;  %6680 = vmatmul.msk.f32.gmra.mxu3 %vm1514_vm12, %v2394_v3 }
 0x6f6   : > { %7673 = vrcp.f32 %v2365_v34 }
 0x6f7   : > { %7675 = vrcp.f32 %v2368_v5 }
 0x6fa   : > { %v2074_v5 = vpop.f32.mrf.mxu0 }
 0x6fb   : > { %v2371_v32 = vpop.xlane.xlu2 %2370 }
 0x6fc   : > { %v7674_v55 = vpop.eup %7673  ;;  %7677 = vrcp.f32 %v2371_v32 }
 0x6fd   : > { %v2395_v59 = vmul.f32 %v7674_v55, %v9510_v38  ;;  %v7676_v9 = vpop.eup %7675  ;;  %v2377_v1 = vpop.xlane.xlu1 %2376 }
 0x6fe   : > { %v2396_v23 = vmul.f32 %v7676_v9, %v9508_v20 }
 0x6ff   : > { %6681 = vmatmul.msk.f32.gmra.mxu3 %vm1514_vm12, %v2395_v59 }
 0x702   : > { %v7678_v2 = vpop.eup %7677  ;;  %v2077_v34 = vpop.f32.mrf.mxu0 }
 0x703   : > { %v2329_v43 = vpop.xlane.xlu2 %2328  ;;  %v2397_v57 = vmul.f32 %v7678_v2, %v9518_v44 }
 0x704   : > { %v2338_v17 = vsub.f32 %v9530_v63, %v2329_v43 }
 0x705   : > { %v2795_v27 = vpop.xlane.xlu1 %2794 }
 0x706   : > { %v2355_v13 = vmul.f32 1.442695, %v2338_v17 }
 0x707   : > { %6682 = vmatmul.msk.f32.gmra.mxu3 %vm1514_vm12, %v2396_v23 }
 0x708   : > { %7679 = vpow2.f32 %v2355_v13 }
 0x70a   : > { %v2080_v55 = vpop.f32.mrf.mxu0 }
 0x70b   : > { %v2374_v12 = vpop.xlane.xlu2 %2373 }
 0x70c   : > { %7681 = vrcp.f32 %v2374_v12 }
 0x70d   : > { %7683 = vrcp.f32 %v2377_v1 }
 0x70e   : > { %v7680_v38 = vpop.eup %7679 }
 0x70f   : > { %6683 = vmatmul.msk.f32.gmra.mxu3 %vm1514_vm12, %v2397_v57  ;;  %v2381_v33 = vsel %vm1514_vm12, %v7680_v38, 0.0 }
 0x710   : > { %2382 = vadd.xlane.f32.xlu2 %v2381_v33 }
 0x712   : > { %v7682_v0 = vpop.eup %7681  ;;  %v2083_v9 = vpop.f32.mrf.mxu0 }
 0x713   : > { %v2792_v63 = vpop.xlane.xlu2 %2791  ;;  %v2398_v20 = vmul.f32 %v7682_v0, %v9540_v37  ;;  %v7684_v16 = vpop.eup %7683 }
 0x714   : > { %7685 = vrcp.f32 %v2792_v63  ;;  %v2399_v22 = vmul.f32 %v7684_v16, %v9520_v7  ;;  %v9620_v63 = vld [vmem:[%s11087_s8] ss:$0 sm:$0xff] }
 0x715   : > { %7687 = vrcp.f32 %v2795_v27 }
 0x716   : > { %7689 = vrcp.f32 %v2380_v25 }
 0x717   : > { %6684 = vmatmul.msk.f32.gmra.mxu3 %vm1514_vm12, %v2398_v20 }
 0x71a   : > { %v7686_v35 = vpop.eup %7685  ;;  %v2086_v17 = vpop.f32.mrf.mxu0 }
 0x71b   : > { %v2812_v44 = vmul.f32 %v7686_v35, %v9545_v10  ;;  %v7688_v60 = vpop.eup %7687  ;;  %v2146_v35 = vadd.f32 %v9321_v39, %v2074_v5 }
 0x71c   : > { %v7690_v40 = vpop.eup %7689  ;;  %v2813_v37 = vmul.f32 %v7688_v60, %v9532_v45 }
 0x71d   : > { %6722 = vmatmul.msk.f32.gmra.mxu2 %vm1514_vm12, %v2812_v44  ;;  %v2400_v21 = vmul.f32 %v7690_v40, %v9495_v28 }
 0x71f   : > { %6685 = vmatmul.msk.f32.gmra.mxu3 %vm1514_vm12, %v2399_v22 }
 0x722   : > { %v9610_v23 = vpop.f32.mrf.mxu0 }
 0x725   : > { %6723 = vmatmul.msk.f32.gmra.mxu2 %vm1514_vm12, %v2813_v37 }
 0x727   : > { %6686 = vmatmul.msk.f32.gmra.mxu3 %vm1514_vm12, %v2400_v21 }
 0x72a   : > { %v9612_v13 = vpop.f32.mrf.mxu0 }
 0x732   : > { %v9614_v2 = vpop.f32.mrf.mxu0 }
 0x737   : > { %v2885_v45 = vpop.f32.mrf.mxu2 }
 0x73a   : > { %v2142_v12 = vpop.f32.mrf.mxu0 }
 0x73b   : > { %v2143_v33 = vadd.f32 %v2142_v12, %v2071_v62 }
 0x73f   : > { %v2888_v8 = vpop.f32.mrf.mxu2 }
 0x747   : > { %v2891_v58 = vpop.f32.mrf.mxu2 }
 0x74f   : > { %v2473_v10 = vpop.f32.mrf.mxu3  ;;  %v2894_v24 = vpop.f32.mrf.mxu2 }
 0x750   : > { %6688 = vmatmul.msk.f32.vlgmr.msrb.gmra.mxu0 %vm1394_vm11, %v2473_v10  ;;  %v2149_v10 = vadd.f32 %v9333_v42, %v2077_v34 }
 0x757   : > { %v2897_v19 = vpop.f32.mrf.mxu2 }
 0x75f   : > { %v2900_v3 = vpop.f32.mrf.mxu2 }
 0x768   : > { %v2903_v32 = vpop.f32.mrf.mxu2 }
 0x778   : > { %v2476_v7 = vpop.f32.mrf.mxu3 }
 0x779   : > { %6689 = vmatmul.msk.f32.gmra.mxu0 %vm1394_vm11, %v2476_v7 }
 0x782   : > { %v2479_v15 = vpop.f32.mrf.mxu3 }
 0x783   : > { %v2383_v14 = vpop.xlane.xlu2 %2382  ;;  %6690 = vmatmul.msk.f32.gmra.mxu0 %vm1394_vm11, %v2479_v15 }
 0x784   : > { %7691 = vrcp.f32 %v2383_v14 }
 0x78a   : > { %v7692_v52 = vpop.eup %7691  ;;  %v2482_v28 = vpop.f32.mrf.mxu3 }
 0x78b   : > { %6691 = vmatmul.msk.f32.gmra.mxu0 %vm1394_vm11, %v2482_v28  ;;  %v2401_v4 = vmul.f32 %v7692_v52, %v7680_v38 }
 0x78d   : > { %6687 = vmatmul.msk.f32.gmra.mxu3 %vm1514_vm12, %v2401_v4 }
 0x792   : > { %v2485_v11 = vpop.f32.mrf.mxu3 }
 0x793   : > { %6692 = vmatmul.msk.f32.gmra.mxu0 %vm1394_vm11, %v2485_v11 }
 0x795   : > { %6724 = vmatmul.msk.f32.vlgmr.msrb.gmra.mxu3 %vm1394_vm11, %v2885_v45  ;;  %v2152_v45 = vadd.f32 %v9341_v53, %v2080_v55 }
 0x79a   : > { %v2488_v18 = vpop.f32.mrf.mxu3 }
 0x79b   : > { %6693 = vmatmul.msk.f32.gmra.mxu0 %vm1394_vm11, %v2488_v18 }
 0x79d   : > { %6725 = vmatmul.msk.f32.gmra.mxu3 %vm1394_vm11, %v2888_v8 }
 0x7a0   : > { %v2906_v59 = vpop.f32.mrf.mxu2 }
 0x7a2   : > { %v2491_v6 = vpop.f32.mrf.mxu3 }
 0x7a3   : > { %6694 = vmatmul.msk.f32.gmra.mxu0 %vm1394_vm11, %v2491_v6 }
 0x7a5   : > { %6726 = vmatmul.msk.f32.gmra.mxu3 %vm1394_vm11, %v2891_v58  ;;  %v2155_v58 = vadd.f32 %v9346_v47, %v2083_v9 }
 0x7a8   : > { %v2909_v43 = vpop.f32.mrf.mxu2 }
 0x7aa   : > { %v2494_v29 = vpop.f32.mrf.mxu3 }
 0x7ab   : > { %6695 = vmatmul.msk.f32.gmra.mxu0 %vm1394_vm11, %v2494_v29 }
 0x7ad   : > { %6727 = vmatmul.msk.f32.gmra.mxu3 %vm1394_vm11, %v2894_v24 }
 0x7b5   : > { %6728 = vmatmul.msk.f32.gmra.mxu3 %vm1394_vm11, %v2897_v19  ;;  %v2158_v19 = vadd.f32 %v9356_v50, %v2086_v17 }
 0x7bd   : > { %6729 = vmatmul.msk.f32.gmra.mxu3 %vm1394_vm11, %v2900_v3 }
 0x7c5   : > { %6730 = vmatmul.msk.f32.gmra.mxu3 %vm1394_vm11, %v2903_v32 }
 0x7cd   : > { %6731 = vmatmul.msk.f32.gmra.mxu3 %vm1394_vm11, %v2906_v59  ;;  %v2545_v1 = vpop.f32.mrf.mxu0  ;;  %v2161_v59 = vadd.f32 %v9360_v30, %v9610_v23 }
 0x7ce   : > { %v2572_v0 = vadd.f32 %v2545_v1, %v2143_v33 }
 0x7d5   : > { %6732 = vmatmul.msk.f32.gmra.mxu3 %vm1394_vm11, %v2909_v43 }
 0x7f6   : > { %v2548_v38 = vpop.f32.mrf.mxu0 }
 0x7f7   : > { %v2573_v22 = vadd.f32 %v2548_v38, %v2146_v35 }
 0x800   : > { %v2551_v16 = vpop.f32.mrf.mxu0 }
 0x801   : > { %v2574_v39 = vadd.f32 %v2551_v16, %v2149_v10  ;;  %v7207_v16 = vld [vmem:[#allocation6 + $0x20] sm:$0xff] }
 0x808   : > { %v2554_v48 = vpop.f32.mrf.mxu0 }
 0x809   : > { %v2575_v28 = vadd.f32 %v2554_v48, %v2152_v45 }
 0x810   : > { %v2497_v57 = vpop.f32.mrf.mxu3  ;;  %v2557_v42 = vpop.f32.mrf.mxu0 }
 0x811   : > { %6696 = vmatmul.msk.f32.gmra.mxu0 %vm1394_vm11, %v2497_v57  ;;  %v2576_v53 = vadd.f32 %v2557_v42, %v2155_v58  ;;  %v2164_v57 = vadd.f32 %v9362_v54, %v9612_v13  ;;  %v7210_v54 = vld [vmem:[#allocation6 + $0x38] sm:$0xff]  ;;  %v7209_v13 = vld [vmem:[#allocation6 + $0x30] sm:$0xff]  ;;  %v7204_v42 = vld [vmem:[#allocation6 + $0x8] sm:$0xff] }
 0x812   : > { %3312 = vmatpush.bf16.msra.mxu0 %v7210_v54 }
 0x816   : > { %3313 = vmatpush.bf16.msra.mxu0 %v7209_v13 }
 0x818   : > { %v2957_v20 = vpop.f32.mrf.mxu3  ;;  %v2560_v6 = vpop.f32.mrf.mxu0 }
 0x819   : > { %v2984_v27 = vadd.f32 %v2957_v20, %v2572_v0  ;;  %v2577_v47 = vadd.f32 %v2560_v6, %v2158_v19 }
 0x81b   : > { %v2997_v25 = vadd.f32 %v9620_v63, %v2984_v27  ;;  %v7208_v27 = vld [vmem:[#allocation6 + $0x28] sm:$0xff] }
 0x81c   : > { %3314 = vmatpush.bf16.msra.mxu0 %v7208_v27 }
 0x81d   : > { %v9625_v44 = vadd.f32 %v2997_v25, %v8505_v26  ;;  %v11140_v25 = vld [vmem:[#allocation23_spill] sm:$0xff] }
 0x81e   : > { %v2167_v35 = vadd.f32 %v11140_v25, %v9614_v2 }
 0x81f   : > { %3017 = vadd.xlane.f32.xlu0 %v9625_v44  ;;  %v3044_v60 = vmul.f32 %v9625_v44, %v9625_v44 }
 0x820   : > { %v2960_v40 = vpop.f32.mrf.mxu3  ;;  %v2563_v32 = vpop.f32.mrf.mxu0  ;;  %3315 = vmatpush.bf16.msra.mxu0 %v7207_v16  ;;  %v9705_v16 = vld [vmem:[#allocation12] ss:$0 sm:$0xff] }
 0x821   : > { %v2985_v37 = vadd.f32 %v2960_v40, %v2573_v22  ;;  %3053 = vadd.xlane.f32.xlu2 %v3044_v60  ;;  %v7206_v22 = vld [vmem:[#allocation6 + $0x18] sm:$0xff] }
 0x823   : > { %v2998_v21 = vadd.f32 %v9620_v63, %v2985_v37 }
 0x824   : > { %3316 = vmatpush.bf16.msra.mxu0 %v7206_v22 }
 0x825   : > { %v9633_v49 = vadd.f32 %v2998_v21, %v8510_v31  ;;  %v7205_v21 = vld [vmem:[#allocation6 + $0x10] sm:$0xff] }
 0x827   : > { %3019 = vadd.xlane.f32.xlu1 %v9633_v49  ;;  %v3045_v26 = vmul.f32 %v9633_v49, %v9633_v49 }
 0x828   : > { %v2963_v7 = vpop.f32.mrf.mxu3  ;;  %v2566_v1 = vpop.f32.mrf.mxu0  ;;  %3317 = vmatpush.bf16.msra.mxu0 %v7205_v21 }
 0x829   : > { %v2986_v15 = vadd.f32 %v2963_v7, %v2574_v39  ;;  %3055 = vadd.xlane.f32.xlu0 %v3045_v26 }
 0x82b   : > { %v2999_v14 = vadd.f32 %v9620_v63, %v2986_v15 }
 0x82c   : > { %3318 = vmatpush.bf16.msra.mxu0 %v7204_v42 }
 0x82d   : > { %v9641_v52 = vadd.f32 %v2999_v14, %v8515_v36  ;;  %v11141_v14 = vld [vmem:[#allocation22_spill] sm:$0xff] }
 0x82f   : > { %3021 = vadd.xlane.f32.xlu1 %v9641_v52  ;;  %v3046_v31 = vmul.f32 %v9641_v52, %v9641_v52 }
 0x830   : > { %v2966_v4 = vpop.f32.mrf.mxu3 }
 0x831   : > { %v2987_v8 = vadd.f32 %v2966_v4, %v2575_v28  ;;  %3057 = vadd.xlane.f32.xlu0 %v3046_v31  ;;  %v7203_v4 = vld [vmem:[#allocation6] sm:$0xff] }
 0x832   : > { %3319 = vmatpush.bf16.msra.mxu0 %v7203_v4 }
 0x833   : > { %v3000_v11 = vadd.f32 %v9620_v63, %v2987_v8 }
 0x835   : > { %v9649_v18 = vadd.f32 %v3000_v11, %v8520_v41 }
 0x837   : > { %3023 = vadd.xlane.f32.xlu2 %v9649_v18  ;;  %v3047_v36 = vmul.f32 %v9649_v18, %v9649_v18 }
 0x838   : > { %v2969_v24 = vpop.f32.mrf.mxu3 }
 0x839   : > { %v2988_v62 = vadd.f32 %v2969_v24, %v2576_v53  ;;  %3059 = vadd.xlane.f32.xlu1 %v3047_v36 }
 0x83b   : > { %v3001_v29 = vadd.f32 %v9620_v63, %v2988_v62 }
 0x83d   : > { %v9657_v5 = vadd.f32 %v3001_v29, %v8525_v46  ;;  %v2578_v46 = vadd.f32 %v2563_v32, %v2161_v59 }
 0x83f   : > { %3025 = vadd.xlane.f32.xlu2 %v9657_v5  ;;  %v3048_v41 = vmul.f32 %v9657_v5, %v9657_v5 }
 0x840   : > { %v2972_v3 = vpop.f32.mrf.mxu3 }
 0x841   : > { %v2989_v34 = vadd.f32 %v2972_v3, %v2577_v47  ;;  %3061 = vadd.xlane.f32.xlu1 %v3048_v41 }
 0x843   : > { %v3002_v55 = vadd.f32 %v9620_v63, %v2989_v34 }
 0x845   : > { %v9666_v50 = vadd.f32 %v3002_v55, %v8530_v51  ;;  %v2579_v51 = vadd.f32 %v2566_v1, %v2164_v57 }
 0x847   : > { %3027 = vadd.xlane.f32.xlu0 %v9666_v50  ;;  %v3049_v9 = vmul.f32 %v9666_v50, %v9666_v50 }
 0x848   : > { %v2975_v43 = vpop.f32.mrf.mxu3 }
 0x849   : > { %v2990_v17 = vadd.f32 %v2975_v43, %v2578_v46  ;;  %3063 = vadd.xlane.f32.xlu2 %v3049_v9 }
 0x84b   : > { %v3003_v12 = vadd.f32 %v9620_v63, %v2990_v17 }
 0x84d   : > { %v9675_v30 = vadd.f32 %v3003_v12, %v8535_v56 }
 0x84f   : > { %3029 = vadd.xlane.f32.xlu0 %v9675_v30  ;;  %v3050_v23 = vmul.f32 %v9675_v30, %v9675_v30 }
 0x850   : > { %v2978_v38 = vpop.f32.mrf.mxu3 }
 0x851   : > { %v2991_v33 = vadd.f32 %v2978_v38, %v2579_v51  ;;  %3065 = vadd.xlane.f32.xlu2 %v3050_v23 }
 0x853   : > { %v3004_v0 = vadd.f32 %v9620_v63, %v2991_v33 }
 0x855   : > { %v9682_v20 = vadd.f32 %v3004_v0, %v8540_v61 }
 0x857   : > { %3031 = vadd.xlane.f32.xlu1 %v9682_v20  ;;  %v3051_v56 = vmul.f32 %v9682_v20, %v9682_v20 }
 0x858   : > { %v2981_v40 = vpop.f32.mrf.mxu3 }
 0x859   : > { %3067 = vadd.xlane.f32.xlu0 %v3051_v56 }
 0x88e   : > { %v2569_v61 = vpop.f32.mrf.mxu0 }
 0x88f   : > { %v2580_v60 = vadd.f32 %v2569_v61, %v2167_v35 }
 0x891   : > { %v2992_v37 = vadd.f32 %v2981_v40, %v2580_v60 }
 0x892   : > { %v3018_v48 = vpop.xlane.xlu0 %3017 }
 0x893   : > { %v3005_v10 = vadd.f32 %v9620_v63, %v2992_v37  ;;  %v3035_v39 = vmul.f32 0.03125, %v3018_v48 }
 0x894   : > { %v3054_v26 = vpop.xlane.xlu2 %3053 }
 0x895   : > { %v3080_v7 = vmul.f32 %v3035_v39, %v3035_v39  ;;  %v3071_v15 = vmul.f32 0.03125, %v3054_v26  ;;  %v9691_v45 = vadd.f32 %v3005_v10, %v11141_v14  ;;  %v3098_v56 = vsub.f32 %v9625_v44, %v3035_v39  ;;  %v9713_v14 = vld [vmem:[#allocation13] ss:$0 sm:$0xff] }
 0x897   : > { %v3089_v2 = vsub.f32 %v3071_v15, %v3080_v7  ;;  %3033 = vadd.xlane.f32.xlu1 %v9691_v45  ;;  %v3052_v28 = vmul.f32 %v9691_v45, %v9691_v45 }
 0x899   : > { %v3107_v31 = vadd.f32 1e-05, %v3089_v2  ;;  %3069 = vadd.xlane.f32.xlu2 %v3052_v28 }
 0x89a   : > { %v3020_v63 = vpop.xlane.xlu1 %3019 }
 0x89b   : > { %7693 = vrsqrt.f32 %v3107_v31  ;;  %v3036_v8 = vmul.f32 0.03125, %v3020_v63  ;;  %vm3122_vm14 = vweird.f32 %v3107_v31 }
 0x89c   : > { %v3056_v11 = vpop.xlane.xlu0 %3055 }
 0x89d   : > { %v3081_v58 = vmul.f32 %v3036_v8, %v3036_v8  ;;  %v3072_v53 = vmul.f32 0.03125, %v3056_v11  ;;  %v3099_v40 = vsub.f32 %v9633_v49, %v3036_v8 }
 0x89f   : > { %v3090_v36 = vsub.f32 %v3072_v53, %v3081_v58 }
 0x8a1   : > { %v7694_v6 = vpop.eup %7693  ;;  %v3108_v24 = vadd.f32 1e-05, %v3090_v36 }
 0x8a2   : > { %v3117_v62 = vmul.f32 %v7694_v6, %v3107_v31  ;;  %v3022_v29 = vpop.xlane.xlu1 %3021  ;;  %vm3123_vm13 = vweird.f32 %v7694_v6 }
 0x8a3   : > { %7695 = vrsqrt.f32 %v3108_v24  ;;  %v9696_v19 = vmul.f32 0.03125, %v3022_v29  ;;  %vm3124_vm15 = vmor %vm3122_vm14, %vm3123_vm13  ;;  %vm3132_vm1 = vweird.f32 %v3108_v24 }
 0x8a4   : > { %v3118_v47 = vmul.f32 %v7694_v6, %v3117_v62  ;;  %v3058_v41 = vpop.xlane.xlu0 %3057 }
 0x8a5   : > { %v3082_v3 = vmul.f32 %v9696_v19, %v9696_v19  ;;  %v3073_v34 = vmul.f32 0.03125, %v3058_v41 }
 0x8a6   : > { %v3119_v32 = vmul.f32 0.5, %v3118_v47 }
 0x8a7   : > { %v3091_v55 = vsub.f32 %v3073_v34, %v3082_v3 }
 0x8a8   : > { %v3120_v59 = vsub.f32 1.5, %v3119_v32  ;;  %v3100_v32 = vsub.f32 %v9641_v52, %v9696_v19 }
 0x8a9   : > { %v7696_v46 = vpop.eup %7695  ;;  %v3109_v9 = vadd.f32 1e-05, %v3091_v55 }
 0x8aa   : > { %v3121_v43 = vmul.f32 %v7694_v6, %v3120_v59  ;;  %v3127_v17 = vmul.f32 %v7696_v46, %v3108_v24  ;;  %v3024_v12 = vpop.xlane.xlu2 %3023  ;;  %vm3133_vm0 = vweird.f32 %v7696_v46 }
 0x8ab   : > { %7697 = vrsqrt.f32 %v3109_v9  ;;  %v9700_v1 = vmul.f32 0.03125, %v3024_v12  ;;  %vm3134_vm2 = vmor %vm3132_vm1, %vm3133_vm0  ;;  %vm3142_vm4 = vweird.f32 %v3109_v9 }
 0x8ac   : > { %v3128_v57 = vmul.f32 %v7696_v46, %v3127_v17  ;;  %v3060_v51 = vpop.xlane.xlu1 %3059  ;;  %v3125_v33 = vsel %vm3124_vm15, %v7694_v6, %v3121_v43 }
 0x8ad   : > { %v3083_v23 = vmul.f32 %v9700_v1, %v9700_v1  ;;  %v3074_v38 = vmul.f32 0.03125, %v3060_v51  ;;  %v3206_v25 = vmul.f32 %v3125_v33, %v3098_v56  ;;  %v3101_v51 = vsub.f32 %v9649_v18, %v9700_v1 }
 0x8ae   : > { %v3129_v0 = vmul.f32 0.5, %v3128_v57 }
 0x8af   : > { %v3092_v54 = vsub.f32 %v3074_v38, %v3083_v23  ;;  %v3218_v39 = vmul.f32 %v9705_v16, %v3206_v25 }
 0x8b0   : > { %v3130_v13 = vsub.f32 1.5, %v3129_v0 }
 0x8b1   : > { %v7698_v27 = vpop.eup %7697  ;;  %v3110_v35 = vadd.f32 1e-05, %v3092_v54  ;;  %v3230_v8 = vadd.f32 %v9713_v14, %v3218_v39 }
 0x8b2   : > { %v3131_v22 = vmul.f32 %v7696_v46, %v3130_v13  ;;  %v3137_v61 = vmul.f32 %v7698_v27, %v3109_v9  ;;  %v3026_v60 = vpop.xlane.xlu2 %3025  ;;  %vm3143_vm3 = vweird.f32 %v7698_v27 }
 0x8b3   : > { %7699 = vrsqrt.f32 %v3110_v35  ;;  %v9708_v37 = vmul.f32 0.03125, %v3026_v60  ;;  %vm3144_vm5 = vmor %vm3142_vm4, %vm3143_vm3  ;;  %vm3152_vm7 = vweird.f32 %v3110_v35 }
 0x8b4   : > { %v3135_v21 = vsel %vm3134_vm2, %v7696_v46, %v3131_v22  ;;  %v3138_v48 = vmul.f32 %v7698_v27, %v3137_v61  ;;  %v3062_v10 = vpop.xlane.xlu1 %3061 }
 0x8b5   : > { %v3207_v26 = vmul.f32 %v3135_v21, %v3099_v40  ;;  %v3084_v7 = vmul.f32 %v9708_v37, %v9708_v37  ;;  %v3075_v15 = vmul.f32 0.03125, %v3062_v10 }
 0x8b6   : > { %v3139_v42 = vmul.f32 0.5, %v3138_v48 }
 0x8b7   : > { %v3219_v2 = vmul.f32 %v9705_v16, %v3207_v26  ;;  %v3093_v28 = vsub.f32 %v3075_v15, %v3084_v7 }
 0x8b8   : > { %v3140_v31 = vsub.f32 1.5, %v3139_v42 }
 0x8b9   : > { %v7700_v4 = vpop.eup %7699  ;;  %v3111_v63 = vadd.f32 1e-05, %v3093_v28  ;;  %v3231_v11 = vadd.f32 %v9713_v14, %v3219_v2 }
 0x8ba   : > { %v3141_v58 = vmul.f32 %v7698_v27, %v3140_v31  ;;  %v3147_v53 = vmul.f32 %v7700_v4, %v3110_v35  ;;  %v3028_v36 = vpop.xlane.xlu0 %3027  ;;  %vm3153_vm6 = vweird.f32 %v7700_v4 }
 0x8bb   : > { %7701 = vrsqrt.f32 %v3111_v63  ;;  %v9718_v6 = vmul.f32 0.03125, %v3028_v36  ;;  %v3239_v24 = vpack.c.bf16 %v3231_v11, %v3230_v8  ;;  %vm3154_vm8 = vmor %vm3152_vm7, %vm3153_vm6  ;;  %vm3162_vm10 = vweird.f32 %v3111_v63 }
 0x8bc   : > { %v3148_v62 = vmul.f32 %v7700_v4, %v3147_v53  ;;  %v3064_v29 = vpop.xlane.xlu2 %3063  ;;  %v3145_v34 = vsel %vm3144_vm5, %v7698_v27, %v3141_v58 }
 0x8bd   : > { %v3085_v47 = vmul.f32 %v9718_v6, %v9718_v6  ;;  %v3076_v41 = vmul.f32 0.03125, %v3064_v29  ;;  %3320 = vmatmul.bf16.vlgmr.msra.gmra.mxu0 %v3239_v24  ;;  %v3208_v17 = vmul.f32 %v3145_v34, %v3100_v32 }
 0x8be   : > { %v3149_v3 = vmul.f32 0.5, %v3148_v62  ;;  %v3103_v62 = vsub.f32 %v9666_v50, %v9718_v6 }
 0x8bf   : > { %v3094_v55 = vsub.f32 %v3076_v41, %v3085_v47  ;;  %v3220_v13 = vmul.f32 %v9705_v16, %v3208_v17 }
 0x8c0   : > { %v3150_v59 = vsub.f32 1.5, %v3149_v3 }
 0x8c1   : > { %v7702_v46 = vpop.eup %7701  ;;  %v3112_v43 = vadd.f32 1e-05, %v3094_v55  ;;  %v3232_v60 = vadd.f32 %v9713_v14, %v3220_v13 }
 0x8c2   : > { %v3151_v9 = vmul.f32 %v7700_v4, %v3150_v59  ;;  %v3157_v12 = vmul.f32 %v7702_v46, %v3111_v63  ;;  %v3030_v57 = vpop.xlane.xlu0 %3029  ;;  %vm3163_vm9 = vweird.f32 %v7702_v46 }
 0x8c3   : > { %7703 = vrsqrt.f32 %v3112_v43  ;;  %v9726_v23 = vmul.f32 0.03125, %v3030_v57  ;;  %vm3164_vm13 = vmor %vm3162_vm10, %vm3163_vm9  ;;  %vm3172_vm15 = vweird.f32 %v3112_v43 }
 0x8c4   : > { %v3158_v38 = vmul.f32 %v7702_v46, %v3157_v12  ;;  %v3066_v33 = vpop.xlane.xlu2 %3065  ;;  %v3155_v19 = vsel %vm3154_vm8, %v7700_v4, %v3151_v9  ;;  %v3102_v4 = vsub.f32 %v9657_v5, %v9708_v37 }
 0x8c5   : > { %v3086_v0 = vmul.f32 %v9726_v23, %v9726_v23  ;;  %v3077_v56 = vmul.f32 0.03125, %v3066_v33  ;;  %v3209_v54 = vmul.f32 %v3155_v19, %v3101_v51  ;;  %v3104_v51 = vsub.f32 %v9675_v30, %v9726_v23 }
 0x8c6   : > { %v3159_v27 = vmul.f32 0.5, %v3158_v38 }
 0x8c7   : > { %v3095_v25 = vsub.f32 %v3077_v56, %v3086_v0  ;;  %v3221_v35 = vmul.f32 %v9705_v16, %v3209_v54 }
 0x8c8   : > { %v3160_v22 = vsub.f32 1.5, %v3159_v27 }
 0x8c9   : > { %v7704_v1 = vpop.eup %7703  ;;  %v3113_v61 = vadd.f32 1e-05, %v3095_v25  ;;  %v3233_v40 = vadd.f32 %v9713_v14, %v3221_v35 }
 0x8ca   : > { %v3161_v21 = vmul.f32 %v7702_v46, %v3160_v22  ;;  %v3167_v48 = vmul.f32 %v7704_v1, %v3112_v43  ;;  %v3032_v10 = vpop.xlane.xlu1 %3031  ;;  %vm3173_vm14 = vweird.f32 %v7704_v1 }
 0x8cb   : > { %7705 = vrsqrt.f32 %v3113_v61  ;;  %v3042_v39 = vmul.f32 0.03125, %v3032_v10  ;;  %v3240_v26 = vpack.c.bf16 %v3233_v40, %v3232_v60  ;;  %vm3174_vm0 = vmor %vm3172_vm15, %vm3173_vm14  ;;  %vm3182_vm2 = vweird.f32 %v3113_v61 }
 0x8cc   : > { %v3168_v7 = vmul.f32 %v7704_v1, %v3167_v48  ;;  %v3068_v15 = vpop.xlane.xlu0 %3067  ;;  %v3165_v31 = vsel %vm3164_vm13, %v7702_v46, %v3161_v21 }
 0x8cd   : > { %v3087_v42 = vmul.f32 %v3042_v39, %v3042_v39  ;;  %v3078_v2 = vmul.f32 0.03125, %v3068_v15  ;;  %3325 = vmatmul.bf16.gmra.mxu0 %v3240_v26  ;;  %v3210_v36 = vmul.f32 %v3165_v31, %v3102_v4  ;;  %v3105_v0 = vsub.f32 %v9682_v20, %v3042_v39  ;;  %v7218_v15 = vld [vmem:[#allocation7 + $0x38] sm:$0xff] }
 0x8ce   : > { %v3169_v28 = vmul.f32 0.5, %v3168_v7  ;;  %3499 = vmatpush.bf16.msra.mxu1 %v7218_v15 }
 0x8cf   : > { %v3096_v8 = vsub.f32 %v3078_v2, %v3087_v42  ;;  %v3222_v3 = vmul.f32 %v9705_v16, %v3210_v36  ;;  %v7215_v36 = vld [vmem:[#allocation7 + $0x20] sm:$0xff] }
 0x8d0   : > { %v3170_v11 = vsub.f32 1.5, %v3169_v28  ;;  %v7217_v28 = vld [vmem:[#allocation7 + $0x30] sm:$0xff] }
 0x8d1   : > { %v7706_v58 = vpop.eup %7705  ;;  %v3114_v53 = vadd.f32 1e-05, %v3096_v8  ;;  %v3234_v59 = vadd.f32 %v9713_v14, %v3222_v3 }
 0x8d2   : > { %v3171_v24 = vmul.f32 %v7704_v1, %v3170_v11  ;;  %v3177_v63 = vmul.f32 %v7706_v58, %v3113_v61  ;;  %vm3183_vm1 = vweird.f32 %v7706_v58  ;;  %3500 = vmatpush.bf16.msra.mxu1 %v7217_v28  ;;  %v7216_v11 = vld [vmem:[#allocation7 + $0x28] sm:$0xff] }
 0x8d3   : > { %7707 = vrsqrt.f32 %v3114_v53  ;;  %vm3184_vm3 = vmor %vm3182_vm2, %vm3183_vm1  ;;  %vm3192_vm5 = vweird.f32 %v3114_v53 }
 0x8d4   : > { %v3178_v29 = vmul.f32 %v7706_v58, %v3177_v63  ;;  %v3175_v47 = vsel %vm3174_vm0, %v7704_v1, %v3171_v24  ;;  %v7214_v63 = vld [vmem:[#allocation7 + $0x18] sm:$0xff] }
 0x8d5   : > { %v3211_v41 = vmul.f32 %v3175_v47, %v3103_v62  ;;  %v7213_v62 = vld [vmem:[#allocation7 + $0x10] sm:$0xff]  ;;  %v9755_v47 = vld [vmem:[%s11089_s10] ss:$0 sm:$0xff] }
 0x8d6   : > { %v3179_v37 = vmul.f32 0.5, %v3178_v29  ;;  %3501 = vmatpush.bf16.msra.mxu1 %v7216_v11  ;;  %v7212_v29 = vld [vmem:[#allocation7 + $0x8] sm:$0xff] }
 0x8d7   : > { %v3223_v34 = vmul.f32 %v9705_v16, %v3211_v41 }
 0x8d8   : > { %v3180_v32 = vsub.f32 1.5, %v3179_v37 }
 0x8d9   : > { %v7708_v55 = vpop.eup %7707  ;;  %v3235_v46 = vadd.f32 %v9713_v14, %v3223_v34 }
 0x8da   : > { %v3181_v43 = vmul.f32 %v7706_v58, %v3180_v32  ;;  %v3187_v17 = vmul.f32 %v7708_v55, %v3114_v53  ;;  %vm3193_vm4 = vweird.f32 %v7708_v55  ;;  %3502 = vmatpush.bf16.msra.mxu1 %v7215_v36 }
 0x8db   : > { %v3241_v6 = vpack.c.bf16 %v3235_v46, %v3234_v59  ;;  %vm3194_vm6 = vmor %vm3192_vm5, %vm3193_vm4 }
 0x8dc   : > { %v3188_v9 = vmul.f32 %v7708_v55, %v3187_v17  ;;  %v3185_v57 = vsel %vm3184_vm3, %v7706_v58, %v3181_v43 }
 0x8dd   : > { %3330 = vmatmul.bf16.gmra.mxu0 %v3241_v6  ;;  %v3212_v33 = vmul.f32 %v3185_v57, %v3104_v51 }
 0x8de   : > { %v3189_v12 = vmul.f32 0.5, %v3188_v9  ;;  %3503 = vmatpush.bf16.msra.mxu1 %v7214_v63 }
 0x8df   : > { %v3224_v13 = vmul.f32 %v9705_v16, %v3212_v33 }
 0x8e0   : > { %v3190_v38 = vsub.f32 1.5, %v3189_v12 }
 0x8e1   : > { %v3236_v25 = vadd.f32 %v9713_v14, %v3224_v13 }
 0x8e2   : > { %v3191_v19 = vmul.f32 %v7708_v55, %v3190_v38  ;;  %3504 = vmatpush.bf16.msra.mxu1 %v7213_v62 }
 0x8e4   : > { %v3195_v56 = vsel %vm3194_vm6, %v7708_v55, %v3191_v19 }
 0x8e5   : > { %v3213_v54 = vmul.f32 %v3195_v56, %v3105_v0 }
 0x8e6   : > { %3505 = vmatpush.bf16.msra.mxu1 %v7212_v29 }
 0x8e7   : > { %v3225_v27 = vmul.f32 %v9705_v16, %v3213_v54 }
 0x8e9   : > { %v3237_v35 = vadd.f32 %v9713_v14, %v3225_v27 }
 0x8eb   : > { %v3242_v22 = vpack.c.bf16 %v3237_v35, %v3236_v25 }
 0x8ed   : > { %3335 = vmatmul.bf16.gmra.mxu0 %v3242_v22 }
 0x90a   : > { %v3034_v23 = vpop.xlane.xlu1 %3033 }
 0x90b   : > { %v3043_v1 = vmul.f32 0.03125, %v3034_v23 }
 0x90c   : > { %v3070_v61 = vpop.xlane.xlu2 %3069 }
 0x90d   : > { %v3088_v60 = vmul.f32 %v3043_v1, %v3043_v1  ;;  %v3079_v40 = vmul.f32 0.03125, %v3070_v61  ;;  %v3106_v31 = vsub.f32 %v9691_v45, %v3043_v1 }
 0x90f   : > { %v3097_v21 = vsub.f32 %v3079_v40, %v3088_v60 }
 0x911   : > { %v3115_v48 = vadd.f32 1e-05, %v3097_v21 }
 0x913   : > { %7709 = vrsqrt.f32 %v3115_v48  ;;  %vm3202_vm8 = vweird.f32 %v3115_v48 }
 0x919   : > { %v7710_v10 = vpop.eup %7709 }
 0x91a   : > { %v3197_v39 = vmul.f32 %v7710_v10, %v3115_v48  ;;  %vm3203_vm7 = vweird.f32 %v7710_v10 }
 0x91b   : > { %vm3204_vm9 = vmor %vm3202_vm8, %vm3203_vm7 }
 0x91c   : > { %v3198_v26 = vmul.f32 %v7710_v10, %v3197_v39 }
 0x91e   : > { %v3199_v7 = vmul.f32 0.5, %v3198_v26 }
 0x920   : > { %v3200_v42 = vsub.f32 1.5, %v3199_v7 }
 0x922   : > { %v3201_v2 = vmul.f32 %v7710_v10, %v3200_v42 }
 0x924   : > { %v3205_v4 = vsel %vm3204_vm9, %v7710_v10, %v3201_v2 }
 0x925   : > { %v3214_v8 = vmul.f32 %v3205_v4, %v3106_v31 }
 0x927   : > { %v3226_v58 = vmul.f32 %v9705_v16, %v3214_v8  ;;  %v7211_v16 = vld [vmem:[#allocation7] sm:$0xff] }
 0x928   : > { %3506 = vmatpush.bf16.msra.mxu1 %v7211_v16 }
 0x929   : > { %v3238_v53 = vadd.f32 %v9713_v14, %v3226_v58 }
 0x92b   : > { %v3243_v24 = vpack.c.bf16 %v3238_v53, %v3238_v53 }
 0x92d   : > { %3340 = vmatmul.bf16.gmra.mxu0 %v3243_v24 }
 0x93a   : > { %v3321_v41 = vpop.f32.mrf.mxu0 }
 0x93b   : > { %v3322_v3 = vadd.f32 %v9755_v47, %v3321_v41 }
 0x93d   : > { %v3345_v14 = vmul.f32 %v3322_v3, %v3322_v3 }
 0x93f   : > { %v3354_v37 = vmul.f32 %v3345_v14, %v3322_v3 }
 0x941   : > { %v3363_v34 = vmul.f32 0.044715, %v3354_v37 }
 0x942   : > { %v3323_v32 = vpop.f32.mrf.mxu0 }
 0x943   : > { %v3372_v55 = vadd.f32 %v3363_v34, %v3322_v3  ;;  %v3324_v59 = vadd.f32 %v9755_v47, %v3323_v32 }
 0x945   : > { %v3381_v46 = vmul.f32 0.7978846, %v3372_v55  ;;  %v3346_v43 = vmul.f32 %v3324_v59, %v3324_v59 }
 0x947   : > { %v3355_v17 = vmul.f32 %v3346_v43, %v3324_v59  ;;  %7711 = vtanh.f32 %v3381_v46 }
 0x949   : > { %v3364_v6 = vmul.f32 0.044715, %v3355_v17 }
 0x94a   : > { %v3326_v9 = vpop.f32.mrf.mxu0 }
 0x94b   : > { %v3373_v12 = vadd.f32 %v3364_v6, %v3324_v59  ;;  %v3327_v57 = vadd.f32 %v9755_v47, %v3326_v9 }
 0x94d   : > { %v3382_v51 = vmul.f32 0.7978846, %v3373_v12  ;;  %v3347_v38 = vmul.f32 %v3327_v57, %v3327_v57  ;;  %v7712_v33 = vpop.eup %7711 }
 0x94e   : > { %v3399_v56 = vadd.f32 1.0, %v7712_v33 }
 0x94f   : > { %7713 = vtanh.f32 %v3382_v51  ;;  %v3356_v19 = vmul.f32 %v3347_v38, %v3327_v57 }
 0x950   : > { %v3408_v23 = vmul.f32 0.5, %v3399_v56 }
 0x951   : > { %v3365_v0 = vmul.f32 0.044715, %v3356_v19 }
 0x952   : > { %v3328_v54 = vpop.f32.mrf.mxu0  ;;  %v3417_v21 = vmul.f32 %v3408_v23, %v3322_v3 }
 0x953   : > { %v3374_v13 = vadd.f32 %v3365_v0, %v3327_v57  ;;  %v3329_v27 = vadd.f32 %v9755_v47, %v3328_v54 }
 0x955   : > { %v7714_v25 = vpop.eup %7713  ;;  %v3383_v35 = vmul.f32 0.7978846, %v3374_v13  ;;  %v3348_v22 = vmul.f32 %v3329_v27, %v3329_v27 }
 0x956   : > { %v3400_v1 = vadd.f32 1.0, %v7714_v25 }
 0x957   : > { %v3357_v61 = vmul.f32 %v3348_v22, %v3329_v27  ;;  %7715 = vtanh.f32 %v3383_v35 }
 0x958   : > { %v3409_v60 = vmul.f32 0.5, %v3400_v1 }
 0x959   : > { %v3366_v40 = vmul.f32 0.044715, %v3357_v61 }
 0x95a   : > { %v3418_v48 = vmul.f32 %v3409_v60, %v3324_v59  ;;  %v3331_v10 = vpop.f32.mrf.mxu0 }
 0x95b   : > { %v3375_v39 = vadd.f32 %v3366_v40, %v3329_v27  ;;  %v3332_v26 = vadd.f32 %v9755_v47, %v3331_v10 }
 0x95c   : > { %v3426_v7 = vpack.c.bf16 %v3418_v48, %v3417_v21 }
 0x95d   : > { %v3384_v15 = vmul.f32 0.7978846, %v3375_v39  ;;  %v3349_v42 = vmul.f32 %v3332_v26, %v3332_v26  ;;  %v7716_v2 = vpop.eup %7715 }
 0x95e   : > { %3507 = vmatmul.bf16.vlgmr.msra.gmra.mxu1 %v3426_v7  ;;  %v3401_v8 = vadd.f32 1.0, %v7716_v2 }
 0x95f   : > { %v3358_v28 = vmul.f32 %v3349_v42, %v3332_v26  ;;  %7717 = vtanh.f32 %v3384_v15 }
 0x960   : > { %v3410_v62 = vmul.f32 0.5, %v3401_v8 }
 0x961   : > { %v3367_v31 = vmul.f32 0.044715, %v3358_v28 }
 0x962   : > { %v3333_v4 = vpop.f32.mrf.mxu0  ;;  %v3419_v14 = vmul.f32 %v3410_v62, %v3327_v57  ;;  %v9769_v62 = vld [vmem:[%s11091_s12] ss:$0 sm:$0xff] }
 0x963   : > { %v3376_v11 = vadd.f32 %v3367_v31, %v3332_v26  ;;  %v3334_v58 = vadd.f32 %v9755_v47, %v3333_v4 }
 0x965   : > { %v7718_v53 = vpop.eup %7717  ;;  %v3385_v36 = vmul.f32 0.7978846, %v3376_v11  ;;  %v3350_v24 = vmul.f32 %v3334_v58, %v3334_v58 }
 0x966   : > { %v3402_v63 = vadd.f32 1.0, %v7718_v53 }
 0x967   : > { %v3359_v29 = vmul.f32 %v3350_v24, %v3334_v58  ;;  %7719 = vtanh.f32 %v3385_v36 }
 0x968   : > { %v3411_v41 = vmul.f32 0.5, %v3402_v63 }
 0x969   : > { %v3368_v16 = vmul.f32 0.044715, %v3359_v29 }
 0x96a   : > { %v3336_v3 = vpop.f32.mrf.mxu0  ;;  %v3420_v37 = vmul.f32 %v3411_v41, %v3329_v27 }
 0x96b   : > { %v3377_v34 = vadd.f32 %v3368_v16, %v3334_v58  ;;  %v3337_v32 = vadd.f32 %v9755_v47, %v3336_v3 }
 0x96c   : > { %v3427_v55 = vpack.c.bf16 %v3420_v37, %v3419_v14 }
 0x96d   : > { %v3386_v59 = vmul.f32 0.7978846, %v3377_v34  ;;  %v3351_v46 = vmul.f32 %v3337_v32, %v3337_v32  ;;  %v7720_v43 = vpop.eup %7719 }
 0x96e   : > { %3512 = vmatmul.bf16.gmra.mxu1 %v3427_v55  ;;  %v3403_v12 = vadd.f32 1.0, %v7720_v43 }
 0x96f   : > { %v3360_v17 = vmul.f32 %v3351_v46, %v3337_v32  ;;  %7721 = vtanh.f32 %v3386_v59 }
 0x970   : > { %v3412_v56 = vmul.f32 0.5, %v3403_v12 }
 0x971   : > { %v3369_v6 = vmul.f32 0.044715, %v3360_v17 }
 0x972   : > { %v3338_v9 = vpop.f32.mrf.mxu0  ;;  %v3421_v25 = vmul.f32 %v3412_v56, %v3332_v26 }
 0x973   : > { %v3378_v51 = vadd.f32 %v3369_v6, %v3337_v32  ;;  %v3339_v38 = vadd.f32 %v9755_v47, %v3338_v9 }
 0x975   : > { %v7722_v33 = vpop.eup %7721  ;;  %v3387_v19 = vmul.f32 0.7978846, %v3378_v51  ;;  %v3352_v57 = vmul.f32 %v3339_v38, %v3339_v38 }
 0x976   : > { %v3404_v0 = vadd.f32 1.0, %v7722_v33 }
 0x977   : > { %v3361_v54 = vmul.f32 %v3352_v57, %v3339_v38  ;;  %7723 = vtanh.f32 %v3387_v19 }
 0x978   : > { %v3413_v13 = vmul.f32 0.5, %v3404_v0 }
 0x979   : > { %v3370_v27 = vmul.f32 0.044715, %v3361_v54 }
 0x97a   : > { %v3422_v35 = vmul.f32 %v3413_v13, %v3334_v58 }
 0x97b   : > { %v3379_v22 = vadd.f32 %v3370_v27, %v3339_v38  ;;  %v7241_v27 = vld [vmem:[%s11084_s5 + $0x170] sm:$0xf0] }
 0x97c   : > { %v3428_v23 = vpack.c.bf16 %v3422_v35, %v3421_v25  ;;  %v7240_v25 = vld [vmem:[%s11084_s5 + $0x16c] sm:$0xf]  ;;  %v6918_v35 = vld [vmem:[%s11084_s5 + $0x174] sm:$0xf0] }
 0x97d   : > { %v3388_v1 = vmul.f32 0.7978846, %v3379_v22  ;;  %v7724_v61 = vpop.eup %7723  ;;  %v6924_v22 = vld [vmem:[%s11084_s5 + $0x170] sm:$0xf] }
 0x97e   : > { %3517 = vmatmul.bf16.gmra.mxu1 %v3428_v23  ;;  %v3405_v60 = vadd.f32 1.0, %v7724_v61  ;;  %v7242_v23 = vld [vmem:[%s11084_s5 + $0x178] sm:$0xf0] }
 0x97f   : > { %7725 = vtanh.f32 %v3388_v1  ;;  %v6921_v1 = vor.u32 %v7240_v25, %v6918_v35  ;;  %v6925_v61 = vor.u32 %v7242_v23, %v6924_v22  ;;  %v6844_v23 = vld [vmem:[%s11084_s5 + $0xd8] sm:$0xf] }
 0x980   : > { %v3414_v48 = vmul.f32 0.5, %v3405_v60  ;;  %v6904_v60 = vld [vmem:[%s11084_s5 + $0x150] sm:$0xf] }
 0x981   : > { %3975 = vmatpush.bf16.msra.mxu3 %v6921_v1  ;;  %4008 = vmatpush.bf16.msrb.mxu0 %v6925_v61  ;;  %v7223_v1 = vld [vmem:[%s11084_s5 + $0xe0] sm:$0xf0]  ;;  %v7222_v61 = vld [vmem:[%s11084_s5 + $0xdc] sm:$0xf] }
 0x982   : > { %v3423_v39 = vmul.f32 %v3414_v48, %v3337_v32 }
 0x985   : > { %v7726_v40 = vpop.eup %7725 }
 0x986   : > { %v3406_v21 = vadd.f32 1.0, %v7726_v40  ;;  %v7238_v40 = vld [vmem:[%s11084_s5 + $0x158] sm:$0xf0] }
 0x987   : > { %v6905_v48 = vor.u32 %v7238_v40, %v6904_v60 }
 0x988   : > { %v3415_v10 = vmul.f32 0.5, %v3406_v21  ;;  %v7237_v21 = vld [vmem:[%s11084_s5 + $0x154] sm:$0xf] }
 0x98a   : > { %v3424_v7 = vmul.f32 %v3415_v10, %v3339_v38  ;;  %v6906_v10 = vld [vmem:[%s11084_s5 + $0x15c] sm:$0xf0] }
 0x98c   : > { %v3429_v15 = vpack.c.bf16 %v3424_v7, %v3423_v39  ;;  %v6912_v39 = vld [vmem:[%s11084_s5 + $0x158] sm:$0xf]  ;;  %v7239_v7 = vld [vmem:[%s11084_s5 + $0x160] sm:$0xf0] }
 0x98e   : > { %3522 = vmatmul.bf16.gmra.mxu1 %v3429_v15 }
 0x9aa   : > { %v3341_v42 = vpop.f32.mrf.mxu0 }
 0x9ab   : > { %v3342_v2 = vadd.f32 %v9755_v47, %v3341_v42  ;;  %v6909_v42 = vor.u32 %v7237_v21, %v6906_v10  ;;  %v6845_v21 = vor.u32 %v7223_v1, %v6844_v23  ;;  %v6852_v10 = vld [vmem:[%s11084_s5 + $0xe0] sm:$0xf] }
 0x9ad   : > { %v3353_v26 = vmul.f32 %v3342_v2, %v3342_v2  ;;  %3976 = vmatpush.bf16.msra.mxu3 %v6909_v42 }
 0x9af   : > { %v3362_v28 = vmul.f32 %v3353_v26, %v3342_v2 }
 0x9b1   : > { %v3371_v31 = vmul.f32 0.044715, %v3362_v28  ;;  %v6892_v28 = vld [vmem:[%s11084_s5 + $0x138] sm:$0xf] }
 0x9b2   : > { %v3343_v4 = vpop.f32.mrf.mxu0 }
 0x9b3   : > { %v3380_v8 = vadd.f32 %v3371_v31, %v3342_v2  ;;  %v7235_v31 = vld [vmem:[%s11084_s5 + $0x140] sm:$0xf0]  ;;  %v7234_v4 = vld [vmem:[%s11084_s5 + $0x13c] sm:$0xf] }
 0x9b5   : > { %v3389_v11 = vmul.f32 0.7978846, %v3380_v8 }
 0x9b7   : > { %7727 = vtanh.f32 %v3389_v11  ;;  %v6893_v11 = vor.u32 %v7235_v31, %v6892_v28  ;;  %v7219_v28 = vld [vmem:[%s11084_s5 + $0xc4] sm:$0xf] }
 0x9bd   : > { %v7728_v58 = vpop.eup %7727 }
 0x9be   : > { %v3407_v53 = vadd.f32 1.0, %v7728_v58  ;;  %v6894_v58 = vld [vmem:[%s11084_s5 + $0x144] sm:$0xf0] }
 0x9c0   : > { %v3416_v36 = vmul.f32 0.5, %v3407_v53  ;;  %v6900_v53 = vld [vmem:[%s11084_s5 + $0x140] sm:$0xf] }
 0x9c2   : > { %v3425_v24 = vmul.f32 %v3416_v36, %v3342_v2  ;;  %v6913_v2 = vor.u32 %v7239_v7, %v6912_v39  ;;  %v7236_v36 = vld [vmem:[%s11084_s5 + $0x148] sm:$0xf0] }
 0x9c3   : > { %v7224_v7 = vld [vmem:[%s11084_s5 + $0xe8] sm:$0xf0] }
 0x9c4   : > { %v3430_v63 = vpack.c.bf16 %v3425_v24, %v3425_v24  ;;  %4009 = vmatpush.bf16.msrb.mxu0 %v6913_v2  ;;  %v6897_v24 = vor.u32 %v7234_v4, %v6894_v58  ;;  %v6853_v42 = vor.u32 %v7224_v7, %v6852_v10  ;;  %v6832_v2 = vld [vmem:[%s11084_s5 + $0xc0] sm:$0xf]  ;;  %v6840_v58 = vld [vmem:[%s11084_s5 + $0xc8] sm:$0xf] }
 0x9c6   : > { %3527 = vmatmul.bf16.gmra.mxu1 %v3430_v63  ;;  %v6901_v63 = vor.u32 %v7236_v36, %v6900_v53  ;;  %3977 = vmatpush.bf16.msra.mxu3 %v6897_v24  ;;  %v7221_v24 = vld [vmem:[%s11084_s5 + $0xd0] sm:$0xf0] }
 0x9c8   : > { %4010 = vmatpush.bf16.msrb.mxu0 %v6901_v63 }
 0x9db   : > { %v3508_v29 = vpop.f32.mrf.mxu1 }
 0x9dc   : > { %v3509_v47 = vadd.f32 %v9769_v62, %v3508_v29  ;;  %v7232_v29 = vld [vmem:[%s11084_s5 + $0x128] sm:$0xf0] }
 0x9de   : > { %v9773_v41 = vadd.f32 %v3509_v47, %v9625_v44  ;;  %v7231_v47 = vld [vmem:[%s11084_s5 + $0x124] sm:$0xf] }
 0x9e0   : > { %3545 = vadd.xlane.f32.xlu0 %v9773_v41  ;;  %v3572_v16 = vmul.f32 %v9773_v41, %v9773_v41 }
 0x9e2   : > { %3581 = vadd.xlane.f32.xlu2 %v3572_v16 }
 0x9e3   : > { %v3510_v3 = vpop.f32.mrf.mxu1 }
 0x9e4   : > { %v3511_v14 = vadd.f32 %v9769_v62, %v3510_v3  ;;  %v6882_v3 = vld [vmem:[%s11084_s5 + $0x12c] sm:$0xf0] }
 0x9e6   : > { %v9780_v37 = vadd.f32 %v3511_v14, %v9633_v49  ;;  %v6888_v14 = vld [vmem:[%s11084_s5 + $0x128] sm:$0xf] }
 0x9e8   : > { %3547 = vadd.xlane.f32.xlu1 %v9780_v37  ;;  %v3573_v34 = vmul.f32 %v9780_v37, %v9780_v37 }
 0x9ea   : > { %3583 = vadd.xlane.f32.xlu0 %v3573_v34  ;;  %v7233_v34 = vld [vmem:[%s11084_s5 + $0x130] sm:$0xf0] }
 0x9eb   : > { %v3513_v44 = vpop.f32.mrf.mxu1 }
 0x9ec   : > { %v3514_v32 = vadd.f32 %v9769_v62, %v3513_v44 }
 0x9ee   : > { %v9787_v55 = vadd.f32 %v3514_v32, %v9641_v52  ;;  %v6885_v32 = vor.u32 %v7231_v47, %v6882_v3 }
 0x9f0   : > { %3549 = vadd.xlane.f32.xlu1 %v9787_v55  ;;  %v3574_v59 = vmul.f32 %v9787_v55, %v9787_v55  ;;  %3978 = vmatpush.bf16.msra.mxu3 %v6885_v32 }
 0x9f2   : > { %3585 = vadd.xlane.f32.xlu0 %v3574_v59  ;;  %v6889_v59 = vor.u32 %v7233_v34, %v6888_v14 }
 0x9f3   : > { %v3515_v49 = vpop.f32.mrf.mxu1 }
 0x9f4   : > { %v3516_v46 = vadd.f32 %v9769_v62, %v3515_v49  ;;  %4011 = vmatpush.bf16.msrb.mxu0 %v6889_v59  ;;  %v6868_v49 = vld [vmem:[%s11084_s5 + $0x108] sm:$0xf] }
 0x9f6   : > { %v9794_v43 = vadd.f32 %v3516_v46, %v9649_v18  ;;  %v7229_v46 = vld [vmem:[%s11084_s5 + $0x110] sm:$0xf0] }
 0x9f8   : > { %3551 = vadd.xlane.f32.xlu2 %v9794_v43  ;;  %v3575_v17 = vmul.f32 %v9794_v43, %v9794_v43 }
 0x9fa   : > { %3587 = vadd.xlane.f32.xlu1 %v3575_v17  ;;  %v7228_v17 = vld [vmem:[%s11084_s5 + $0x10c] sm:$0xf] }
 0x9fb   : > { %v3518_v52 = vpop.f32.mrf.mxu1 }
 0x9fc   : > { %v3519_v6 = vadd.f32 %v9769_v62, %v3518_v52  ;;  %v6869_v52 = vor.u32 %v7229_v46, %v6868_v49 }
 0x9fe   : > { %v9801_v9 = vadd.f32 %v3519_v6, %v9657_v5  ;;  %v6870_v6 = vld [vmem:[%s11084_s5 + $0x114] sm:$0xf0] }
 0xa00   : > { %3553 = vadd.xlane.f32.xlu2 %v9801_v9  ;;  %v3576_v12 = vmul.f32 %v9801_v9, %v9801_v9 }
 0xa02   : > { %3589 = vadd.xlane.f32.xlu1 %v3576_v12  ;;  %v6876_v12 = vld [vmem:[%s11084_s5 + $0x110] sm:$0xf] }
 0xa03   : > { %v3520_v18 = vpop.f32.mrf.mxu1 }
 0xa04   : > { %v3521_v51 = vadd.f32 %v9769_v62, %v3520_v18  ;;  %v7230_v18 = vld [vmem:[%s11084_s5 + $0x118] sm:$0xf0] }
 0xa06   : > { %v9808_v38 = vadd.f32 %v3521_v51, %v9666_v50  ;;  %v6873_v51 = vor.u32 %v7228_v17, %v6870_v6 }
 0xa08   : > { %11142 = vst [vmem:[#allocation23_spill] sm:$0xff] %v9808_v38  ;;  %3555 = vadd.xlane.f32.xlu0 %v9808_v38  ;;  %v3577_v33 = vmul.f32 %v9808_v38, %v9808_v38  ;;  %3979 = vmatpush.bf16.msra.mxu3 %v6873_v51 }
 0xa0a   : > { %3591 = vadd.xlane.f32.xlu2 %v3577_v33  ;;  %v6877_v33 = vor.u32 %v7230_v18, %v6876_v12 }
 0xa0b   : > { %v3523_v5 = vpop.f32.mrf.mxu1 }
 0xa0c   : > { %v3524_v19 = vadd.f32 %v9769_v62, %v3523_v5  ;;  %4012 = vmatpush.bf16.msrb.mxu0 %v6877_v33  ;;  %v6856_v5 = vld [vmem:[%s11084_s5 + $0xf0] sm:$0xf] }
 0xa0e   : > { %v9815_v57 = vadd.f32 %v3524_v19, %v9675_v30  ;;  %v6916_v30 = vld [vmem:[%s11084_s5 + $0x168] sm:$0xf]  ;;  %v7226_v19 = vld [vmem:[%s11084_s5 + $0xf8] sm:$0xf0] }
 0xa10   : > { %11143 = vst [vmem:[#allocation22_spill] sm:$0xff] %v9815_v57  ;;  %3557 = vadd.xlane.f32.xlu0 %v9815_v57  ;;  %v3578_v0 = vmul.f32 %v9815_v57, %v9815_v57 }
 0xa12   : > { %3593 = vadd.xlane.f32.xlu2 %v3578_v0  ;;  %v7225_v0 = vld [vmem:[%s11084_s5 + $0xf4] sm:$0xf] }
 0xa13   : > { %v3525_v50 = vpop.f32.mrf.mxu1 }
 0xa14   : > { %v3526_v56 = vadd.f32 %v9769_v62, %v3525_v50  ;;  %v6857_v50 = vor.u32 %v7226_v19, %v6856_v5 }
 0xa16   : > { %v9822_v54 = vadd.f32 %v3526_v56, %v9682_v20  ;;  %v6917_v20 = vor.u32 %v7241_v27, %v6916_v30  ;;  %v6858_v56 = vld [vmem:[%s11084_s5 + $0xfc] sm:$0xf0]  ;;  %v7227_v30 = vld [vmem:[%s11084_s5 + $0x100] sm:$0xf0] }
 0xa17   : > { %v6861_v25 = vor.u32 %v7225_v0, %v6858_v56 }
 0xa18   : > { %11144 = vst [vmem:[#allocation24_spill] sm:$0xff] %v9822_v54  ;;  %3559 = vadd.xlane.f32.xlu1 %v9822_v54  ;;  %v3579_v13 = vmul.f32 %v9822_v54, %v9822_v54  ;;  %3942 = vmatpush.bf16.msra.mxu2 %v6917_v20 }
 0xa19   : > { %3980 = vmatpush.bf16.msra.mxu3 %v6861_v25 }
 0xa1a   : > { %3595 = vadd.xlane.f32.xlu0 %v3579_v13  ;;  %v6864_v13 = vld [vmem:[%s11084_s5 + $0xf8] sm:$0xf] }
 0xa1b   : > { %v6865_v20 = vor.u32 %v7227_v30, %v6864_v13 }
 0xa1c   : > { %3943 = vmatpush.bf16.msra.mxu2 %v6905_v48  ;;  %v6846_v48 = vld [vmem:[%s11084_s5 + $0xe4] sm:$0xf0] }
 0xa1d   : > { %4013 = vmatpush.bf16.msrb.mxu0 %v6865_v20  ;;  %v6849_v39 = vor.u32 %v7222_v61, %v6846_v48  ;;  %v9992_v61 = vld [vmem:[#allocation9 + $0x1] ss:$0 sm:$0xff] }
 0xa1f   : > { %3981 = vmatpush.bf16.msra.mxu3 %v6849_v39 }
 0xa20   : > { %3944 = vmatpush.bf16.msra.mxu2 %v6893_v11  ;;  %v6834_v11 = vld [vmem:[%s11084_s5 + $0xcc] sm:$0xf0] }
 0xa21   : > { %4014 = vmatpush.bf16.msrb.mxu0 %v6853_v42  ;;  %v6837_v36 = vor.u32 %v7219_v28, %v6834_v11 }
 0xa23   : > { %3982 = vmatpush.bf16.msra.mxu3 %v6837_v36 }
 0xa43   : > { %v3528_v15 = vpop.f32.mrf.mxu1 }
 0xa44   : > { %v3529_v26 = vadd.f32 %v9769_v62, %v3528_v15  ;;  %v6880_v62 = vld [vmem:[%s11084_s5 + $0x120] sm:$0xf] }
 0xa45   : > { %v6881_v16 = vor.u32 %v7232_v29, %v6880_v62 }
 0xa46   : > { %v9874_v8 = vadd.f32 %v3529_v26, %v9691_v45  ;;  %v7220_v26 = vld [vmem:[%s11084_s5 + $0xc8] sm:$0xf0] }
 0xa47   : > { %3945 = vmatpush.bf16.msra.mxu2 %v6881_v16  ;;  %v6833_v4 = vor.u32 %v7220_v26, %v6832_v2 }
 0xa48   : > { %11145 = vst [vmem:[#allocation25_spill] sm:$0xff] %v9874_v8  ;;  %3561 = vadd.xlane.f32.xlu1 %v9874_v8  ;;  %v3580_v45 = vmul.f32 %v9874_v8, %v9874_v8 }
 0xa4a   : > { %3597 = vadd.xlane.f32.xlu2 %v3580_v45  ;;  %v6841_v45 = vor.u32 %v7221_v24, %v6840_v58 }
 0xa4b   : > { %v3530_v44 = vpop.f32.mrf.mxu1  ;;  %3946 = vmatpush.bf16.msra.mxu2 %v6869_v52 }
 0xa4c   : > { %4015 = vmatpush.bf16.msrb.mxu0 %v6841_v45 }
 0xa4f   : > { %3947 = vmatpush.bf16.msra.mxu2 %v6857_v50 }
 0xa53   : > { %v3546_v27 = vpop.xlane.xlu0 %3545  ;;  %3948 = vmatpush.bf16.msra.mxu2 %v6845_v21 }
 0xa54   : > { %v9942_v35 = vmul.f32 0.03125, %v3546_v27 }
 0xa55   : > { %v3582_v22 = vpop.xlane.xlu2 %3581 }
 0xa56   : > { %v3608_v60 = vmul.f32 %v9942_v35, %v9942_v35  ;;  %v3599_v40 = vmul.f32 0.03125, %v3582_v22  ;;  %v3626_v20 = vsub.f32 %v9773_v41, %v9942_v35 }
 0xa57   : > { %3949 = vmatpush.bf16.msra.mxu2 %v6833_v4  ;;  %v10000_v4 = vld [vmem:[#allocation10 + $0x1] ss:$0 sm:$0xff] }
 0xa58   : > { %v3617_v15 = vsub.f32 %v3599_v40, %v3608_v60 }
 0xa5a   : > { %v3635_v31 = vadd.f32 1e-05, %v3617_v15 }
 0xa5b   : > { %v3548_v53 = vpop.xlane.xlu1 %3547 }
 0xa5c   : > { %7729 = vrsqrt.f32 %v3635_v31  ;;  %v3564_v63 = vmul.f32 0.03125, %v3548_v53  ;;  %vm3650_vm13 = vweird.f32 %v3635_v31 }
 0xa5d   : > { %v3584_v62 = vpop.xlane.xlu0 %3583 }
 0xa5e   : > { %v3609_v29 = vmul.f32 %v3564_v63, %v3564_v63  ;;  %v3600_v47 = vmul.f32 0.03125, %v3584_v62  ;;  %v3627_v39 = vsub.f32 %v9780_v37, %v3564_v63 }
 0xa60   : > { %v3618_v16 = vsub.f32 %v3600_v47, %v3609_v29 }
 0xa62   : > { %v7730_v3 = vpop.eup %7729  ;;  %v3636_v14 = vadd.f32 1e-05, %v3618_v16 }
 0xa63   : > { %v3645_v34 = vmul.f32 %v7730_v3, %v3635_v31  ;;  %v3550_v44 = vpop.xlane.xlu1 %3549  ;;  %vm3651_vm10 = vweird.f32 %v7730_v3 }
 0xa64   : > { %7731 = vrsqrt.f32 %v3636_v14  ;;  %v9982_v32 = vmul.f32 0.03125, %v3550_v44  ;;  %vm3652_vm14 = vmor %vm3650_vm13, %vm3651_vm10  ;;  %vm3660_vm0 = vweird.f32 %v3636_v14 }
 0xa65   : > { %v3646_v59 = vmul.f32 %v7730_v3, %v3645_v34  ;;  %v3586_v49 = vpop.xlane.xlu0 %3585 }
 0xa66   : > { %v3610_v46 = vmul.f32 %v9982_v32, %v9982_v32  ;;  %v3601_v17 = vmul.f32 0.03125, %v3586_v49 }
 0xa67   : > { %v3647_v52 = vmul.f32 0.5, %v3646_v59 }
 0xa68   : > { %v3619_v6 = vsub.f32 %v3601_v17, %v3610_v46 }
 0xa69   : > { %v3648_v12 = vsub.f32 1.5, %v3647_v52  ;;  %v3628_v52 = vsub.f32 %v9787_v55, %v9982_v32 }
 0xa6a   : > { %v7732_v18 = vpop.eup %7731  ;;  %v3637_v51 = vadd.f32 1e-05, %v3619_v6 }
 0xa6b   : > { %v3649_v33 = vmul.f32 %v7730_v3, %v3648_v12  ;;  %v3655_v5 = vmul.f32 %v7732_v18, %v3636_v14  ;;  %v3552_v19 = vpop.xlane.xlu2 %3551  ;;  %vm3661_vm15 = vweird.f32 %v7732_v18 }
 0xa6c   : > { %7733 = vrsqrt.f32 %v3637_v51  ;;  %v9986_v0 = vmul.f32 0.03125, %v3552_v19  ;;  %vm3662_vm1 = vmor %vm3660_vm0, %vm3661_vm15  ;;  %vm3670_vm3 = vweird.f32 %v3637_v51 }
 0xa6d   : > { %v3656_v50 = vmul.f32 %v7732_v18, %v3655_v5  ;;  %v3588_v56 = vpop.xlane.xlu1 %3587  ;;  %v3653_v27 = vsel %vm3652_vm14, %v7730_v3, %v3649_v33 }
 0xa6e   : > { %v3611_v13 = vmul.f32 %v9986_v0, %v9986_v0  ;;  %v3602_v30 = vmul.f32 0.03125, %v3588_v56  ;;  %v3734_v60 = vmul.f32 %v3653_v27, %v3626_v20  ;;  %v3629_v56 = vsub.f32 %v9794_v43, %v9986_v0 }
 0xa6f   : > { %v3657_v25 = vmul.f32 0.5, %v3656_v50 }
 0xa70   : > { %v3620_v22 = vsub.f32 %v3602_v30, %v3611_v13  ;;  %v3746_v2 = vmul.f32 %v9992_v61, %v3734_v60 }
 0xa71   : > { %v3658_v23 = vsub.f32 1.5, %v3657_v25 }
 0xa72   : > { %v7734_v1 = vpop.eup %7733  ;;  %v3638_v40 = vadd.f32 1e-05, %v3620_v22  ;;  %v3758_v45 = vadd.f32 %v10000_v4, %v3746_v2 }
 0xa73   : > { %v3659_v21 = vmul.f32 %v7732_v18, %v3658_v23  ;;  %v3665_v48 = vmul.f32 %v7734_v1, %v3637_v51  ;;  %v3554_v10 = vpop.xlane.xlu2 %3553  ;;  %vm3671_vm2 = vweird.f32 %v7734_v1 }
 0xa74   : > { %7735 = vrsqrt.f32 %v3638_v40  ;;  %v9995_v7 = vmul.f32 0.03125, %v3554_v10  ;;  %vm3672_vm4 = vmor %vm3670_vm3, %vm3671_vm2  ;;  %vm3680_vm6 = vweird.f32 %v3638_v40 }
 0xa75   : > { %v3663_v15 = vsel %vm3662_vm1, %v7732_v18, %v3659_v21  ;;  %v3666_v35 = vmul.f32 %v7734_v1, %v3665_v48  ;;  %v3590_v42 = vpop.xlane.xlu1 %3589 }
 0xa76   : > { %v3735_v26 = vmul.f32 %v3663_v15, %v3627_v39  ;;  %v3612_v28 = vmul.f32 %v9995_v7, %v9995_v7  ;;  %v3603_v31 = vmul.f32 0.03125, %v3590_v42 }
 0xa77   : > { %v3667_v11 = vmul.f32 0.5, %v3666_v35 }
 0xa78   : > { %v3747_v58 = vmul.f32 %v9992_v61, %v3735_v26  ;;  %v3621_v53 = vsub.f32 %v3603_v31, %v3612_v28 }
 0xa79   : > { %v3668_v36 = vsub.f32 1.5, %v3667_v11 }
 0xa7a   : > { %v7736_v24 = vpop.eup %7735  ;;  %v3639_v63 = vadd.f32 1e-05, %v3621_v53  ;;  %v3759_v62 = vadd.f32 %v10000_v4, %v3747_v58 }
 0xa7b   : > { %v3669_v29 = vmul.f32 %v7734_v1, %v3668_v36  ;;  %v3675_v47 = vmul.f32 %v7736_v24, %v3638_v40  ;;  %v3556_v16 = vpop.xlane.xlu0 %3555  ;;  %vm3681_vm5 = vweird.f32 %v7736_v24 }
 0xa7c   : > { %7737 = vrsqrt.f32 %v3639_v63  ;;  %v10005_v3 = vmul.f32 0.03125, %v3556_v16  ;;  %v3767_v14 = vpack.c.bf16 %v3759_v62, %v3758_v45  ;;  %vm3682_vm7 = vmor %vm3680_vm6, %vm3681_vm5  ;;  %vm3690_vm9 = vweird.f32 %v3639_v63 }
 0xa7d   : > { %v3676_v34 = vmul.f32 %v7736_v24, %v3675_v47  ;;  %v3592_v44 = vpop.xlane.xlu2 %3591  ;;  %v3673_v17 = vsel %vm3672_vm4, %v7734_v1, %v3669_v29 }
 0xa7e   : > { %v3613_v59 = vmul.f32 %v10005_v3, %v10005_v3  ;;  %v3604_v49 = vmul.f32 0.03125, %v3592_v44  ;;  %3950 = vmatmul.bf16.vlgmr.msra.gmra.mxu2 %v3767_v14  ;;  %3983 = vmatmul.bf16.vlgmr.msra.gmra.mxu3 %v3767_v14  ;;  %v3736_v33 = vmul.f32 %v3673_v17, %v3628_v52 }
 0xa7f   : > { %v3677_v46 = vmul.f32 0.5, %v3676_v34  ;;  %4016 = vmatmul.bf16.vlgmr.msrb.gmra.mxu0 %v3767_v14  ;;  %v3631_v34 = vsub.f32 %v9808_v38, %v10005_v3 }
 0xa80   : > { %v3622_v6 = vsub.f32 %v3604_v49, %v3613_v59  ;;  %v3748_v23 = vmul.f32 %v9992_v61, %v3736_v33 }
 0xa81   : > { %v3678_v12 = vsub.f32 1.5, %v3677_v46 }
 0xa82   : > { %v7738_v18 = vpop.eup %7737  ;;  %v3640_v51 = vadd.f32 1e-05, %v3622_v6  ;;  %v3760_v10 = vadd.f32 %v10000_v4, %v3748_v23 }
 0xa83   : > { %v3679_v5 = vmul.f32 %v7736_v24, %v3678_v12  ;;  %v3685_v19 = vmul.f32 %v7738_v18, %v3639_v63  ;;  %v3558_v50 = vpop.xlane.xlu0 %3557  ;;  %vm3691_vm8 = vweird.f32 %v7738_v18 }
 0xa84   : > { %7739 = vrsqrt.f32 %v3640_v51  ;;  %v10013_v13 = vmul.f32 0.03125, %v3558_v50  ;;  %vm3692_vm10 = vmor %vm3690_vm9, %vm3691_vm8  ;;  %vm3700_vm14 = vweird.f32 %v3640_v51 }
 0xa85   : > { %v3683_v30 = vsel %vm3682_vm7, %v7736_v24, %v3679_v5  ;;  %v3686_v27 = vmul.f32 %v7738_v18, %v3685_v19  ;;  %v3594_v32 = vpop.xlane.xlu2 %3593  ;;  %v3630_v24 = vsub.f32 %v9801_v9, %v9995_v7 }
 0xa86   : > { %v3614_v25 = vmul.f32 %v10013_v13, %v10013_v13  ;;  %v3605_v20 = vmul.f32 0.03125, %v3594_v32  ;;  %v3737_v22 = vmul.f32 %v3683_v30, %v3629_v56  ;;  %v3632_v56 = vsub.f32 %v9815_v57, %v10013_v13 }
 0xa87   : > { %v3687_v1 = vmul.f32 0.5, %v3686_v27 }
 0xa88   : > { %v3623_v60 = vsub.f32 %v3605_v20, %v3614_v25  ;;  %v3749_v40 = vmul.f32 %v9992_v61, %v3737_v22 }
 0xa89   : > { %v3688_v21 = vsub.f32 1.5, %v3687_v1 }
 0xa8a   : > { %v7740_v0 = vpop.eup %7739  ;;  %v3641_v48 = vadd.f32 1e-05, %v3623_v60  ;;  %v3761_v39 = vadd.f32 %v10000_v4, %v3749_v40 }
 0xa8b   : > { %v3689_v15 = vmul.f32 %v7738_v18, %v3688_v21  ;;  %v3695_v35 = vmul.f32 %v7740_v0, %v3640_v51  ;;  %v3560_v42 = vpop.xlane.xlu1 %3559  ;;  %vm3701_vm13 = vweird.f32 %v7740_v0 }
 0xa8c   : > { %7741 = vrsqrt.f32 %v3641_v48  ;;  %v3570_v2 = vmul.f32 0.03125, %v3560_v42  ;;  %v3768_v26 = vpack.c.bf16 %v3761_v39, %v3760_v10  ;;  %vm3702_vm15 = vmor %vm3700_vm14, %vm3701_vm13  ;;  %vm3710_vm1 = vweird.f32 %v3641_v48 }
 0xa8d   : > { %v3696_v28 = vmul.f32 %v7740_v0, %v3695_v35  ;;  %v3596_v31 = vpop.xlane.xlu0 %3595  ;;  %v3693_v53 = vsel %vm3692_vm10, %v7738_v18, %v3689_v15 }
 0xa8e   : > { %v3615_v11 = vmul.f32 %v3570_v2, %v3570_v2  ;;  %v3606_v58 = vmul.f32 0.03125, %v3596_v31  ;;  %3955 = vmatmul.bf16.gmra.mxu2 %v3768_v26  ;;  %3988 = vmatmul.bf16.gmra.mxu3 %v3768_v26  ;;  %v3738_v16 = vmul.f32 %v3693_v53, %v3630_v24  ;;  %v3633_v25 = vsub.f32 %v9822_v54, %v3570_v2 }
 0xa8f   : > { %v3697_v36 = vmul.f32 0.5, %v3696_v28  ;;  %4021 = vmatmul.bf16.gmra.mxu0 %v3768_v26 }
 0xa90   : > { %v3624_v45 = vsub.f32 %v3606_v58, %v3615_v11  ;;  %v3750_v46 = vmul.f32 %v9992_v61, %v3738_v16 }
 0xa91   : > { %v3698_v62 = vsub.f32 1.5, %v3697_v36 }
 0xa92   : > { %v7742_v29 = vpop.eup %7741  ;;  %v3642_v47 = vadd.f32 1e-05, %v3624_v45  ;;  %v3762_v12 = vadd.f32 %v10000_v4, %v3750_v46 }
 0xa93   : > { %v3699_v63 = vmul.f32 %v7740_v0, %v3698_v62  ;;  %v3705_v14 = vmul.f32 %v7742_v29, %v3641_v48  ;;  %vm3711_vm0 = vweird.f32 %v7742_v29 }
 0xa94   : > { %7743 = vrsqrt.f32 %v3642_v47  ;;  %vm3712_vm2 = vmor %vm3710_vm1, %vm3711_vm0  ;;  %vm3720_vm4 = vweird.f32 %v3642_v47 }
 0xa95   : > { %v3706_v44 = vmul.f32 %v7742_v29, %v3705_v14  ;;  %v3703_v59 = vsel %vm3702_vm15, %v7740_v0, %v3699_v63 }
 0xa96   : > { %v3739_v49 = vmul.f32 %v3703_v59, %v3631_v34 }
 0xa97   : > { %v3707_v7 = vmul.f32 0.5, %v3706_v44 }
 0xa98   : > { %v3751_v17 = vmul.f32 %v9992_v61, %v3739_v49 }
 0xa99   : > { %v3708_v52 = vsub.f32 1.5, %v3707_v7 }
 0xa9a   : > { %v7744_v6 = vpop.eup %7743  ;;  %v3763_v18 = vadd.f32 %v10000_v4, %v3751_v17 }
 0xa9b   : > { %v3709_v51 = vmul.f32 %v7742_v29, %v3708_v52  ;;  %v3715_v33 = vmul.f32 %v7744_v6, %v3642_v47  ;;  %vm3721_vm3 = vweird.f32 %v7744_v6  ;;  %v6829_v47 = vld [vmem:[%s11085_s6 + $0x3] sm:$0x7] }
 0xa9c   : > { %v3769_v3 = vpack.c.bf16 %v3763_v18, %v3762_v12  ;;  %vm3722_vm5 = vmor %vm3720_vm4, %vm3721_vm3  ;;  %v10044_v16 = vperm.slane %v6829_v47, 1 }
 0xa9d   : > { %v3716_v5 = vmul.f32 %v7744_v6, %v3715_v33  ;;  %v3713_v50 = vsel %vm3712_vm2, %v7742_v29, %v3709_v51 }
 0xa9e   : > { %3960 = vmatmul.bf16.gmra.mxu2 %v3769_v3  ;;  %3993 = vmatmul.bf16.gmra.mxu3 %v3769_v3  ;;  %v3740_v27 = vmul.f32 %v3713_v50, %v3632_v56 }
 0xa9f   : > { %v3717_v19 = vmul.f32 0.5, %v3716_v5  ;;  %4026 = vmatmul.bf16.gmra.mxu0 %v3769_v3 }
 0xaa0   : > { %v3752_v23 = vmul.f32 %v9992_v61, %v3740_v27 }
 0xaa1   : > { %v3718_v30 = vsub.f32 1.5, %v3717_v19 }
 0xaa2   : > { %v3764_v60 = vadd.f32 %v10000_v4, %v3752_v23 }
 0xaa3   : > { %v3719_v32 = vmul.f32 %v7744_v6, %v3718_v30 }
 0xaa5   : > { %v3723_v20 = vsel %vm3722_vm5, %v7744_v6, %v3719_v32 }
 0xaa6   : > { %v3741_v22 = vmul.f32 %v3723_v20, %v3633_v25 }
 0xaa8   : > { %v3753_v1 = vmul.f32 %v9992_v61, %v3741_v22 }
 0xaaa   : > { %v3765_v40 = vadd.f32 %v10000_v4, %v3753_v1  ;;  %v3810_v1 = vperm.slane %v6829_v47, 2 }
 0xaac   : > { %v3770_v21 = vpack.c.bf16 %v3765_v40, %v3764_v60 }
 0xaae   : > { %3965 = vmatmul.bf16.gmra.mxu2 %v3770_v21  ;;  %3998 = vmatmul.bf16.gmra.mxu3 %v3770_v21 }
 0xaaf   : > { %4031 = vmatmul.bf16.gmra.mxu0 %v3770_v21 }
 0xabb   : > { %v3562_v13 = vpop.xlane.xlu1 %3561 }
 0xabc   : > { %v3571_v0 = vmul.f32 0.03125, %v3562_v13 }
 0xabd   : > { %v3598_v48 = vpop.xlane.xlu2 %3597 }
 0xabe   : > { %v3616_v10 = vmul.f32 %v3571_v0, %v3571_v0  ;;  %v3607_v39 = vmul.f32 0.03125, %v3598_v48  ;;  %v3634_v58 = vsub.f32 %v9874_v8, %v3571_v0  ;;  %v10685_v8 = vld [vmem:[%s8478_s20] ss:$0 sm:$0xff] }
 0xac0   : > { %v3625_v15 = vsub.f32 %v3607_v39, %v3616_v10 }
 0xac2   : > { %v3643_v35 = vadd.f32 1e-05, %v3625_v15 }
 0xac4   : > { %7745 = vrsqrt.f32 %v3643_v35  ;;  %vm3730_vm7 = vweird.f32 %v3643_v35 }
 0xaca   : > { %v7746_v42 = vpop.eup %7745 }
 0xacb   : > { %v3725_v2 = vmul.f32 %v7746_v42, %v3643_v35  ;;  %vm3731_vm6 = vweird.f32 %v7746_v42 }
 0xacc   : > { %vm3732_vm8 = vmor %vm3730_vm7, %vm3731_vm6 }
 0xacd   : > { %v3726_v26 = vmul.f32 %v7746_v42, %v3725_v2 }
 0xacf   : > { %v3727_v28 = vmul.f32 0.5, %v3726_v26 }
 0xad1   : > { %v3728_v31 = vsub.f32 1.5, %v3727_v28 }
 0xad3   : > { %v3729_v11 = vmul.f32 %v7746_v42, %v3728_v31 }
 0xad5   : > { %v3733_v53 = vsel %vm3732_vm8, %v7746_v42, %v3729_v11 }
 0xad6   : > { %v3742_v36 = vmul.f32 %v3733_v53, %v3634_v58 }
 0xad8   : > { %v3754_v24 = vmul.f32 %v9992_v61, %v3742_v36 }
 0xada   : > { %v3766_v45 = vadd.f32 %v10000_v4, %v3754_v24  ;;  %v10053_v4 = vperm.slane %v6829_v47, 0 }
 0xadc   : > { %v3771_v62 = vpack.c.bf16 %v3766_v45, %v3766_v45 }
 0xade   : > { %3970 = vmatmul.bf16.gmra.mxu2 %v3771_v62  ;;  %4003 = vmatmul.bf16.gmra.mxu3 %v3771_v62 }
 0xadf   : > { %4036 = vmatmul.bf16.gmra.mxu0 %v3771_v62 }
 0xafc   : > { %v10039_v29 = vpop.f32.mrf.mxu0 }
 0xb01   : > { %v3951_v63 = vpop.f32.mrf.mxu2  ;;  %v3984_v14 = vpop.f32.mrf.mxu3 }
 0xb02   : > { %v10047_v34 = vadd.f32 %v3984_v14, %v10044_v16  ;;  %v10056_v49 = vadd.f32 %v3951_v63, %v10053_v4 }
 0xb04   : > { %v10049_v61 = vpop.f32.mrf.mxu0  ;;  %4347 = vrot.lane.b32.xlu0 %v10047_v34, %s8244_s11 }
 0xb09   : > { %v3953_v44 = vpop.f32.mrf.mxu2  ;;  %v3986_v59 = vpop.f32.mrf.mxu3 }
 0xb0a   : > { %v10059_v46 = vadd.f32 %v3986_v59, %v10044_v16  ;;  %v10068_v6 = vadd.f32 %v3953_v44, %v10053_v4 }
 0xb0c   : > { %v10061_v7 = vpop.f32.mrf.mxu0  ;;  %4349 = vrot.lane.b32.xlu2 %v10059_v46, %s8244_s11  ;;  %4329 = vrot.lane.b32.xlu0 %v10056_v49, %s8244_s11 }
 0xb11   : > { %v3956_v17 = vpop.f32.mrf.mxu2  ;;  %v3989_v52 = vpop.f32.mrf.mxu3 }
 0xb12   : > { %v10071_v12 = vadd.f32 %v3956_v17, %v10053_v4  ;;  %v10080_v3 = vadd.f32 %v3989_v52, %v10044_v16  ;;  %v10158_v17 = vadd.f32 %v10049_v61, %v3810_v1  ;;  %v10162_v52 = vadd.f32 %v10039_v29, %v3810_v1 }
 0xb14   : > { %v10073_v18 = vpop.f32.mrf.mxu0  ;;  %4331 = vrot.lane.b32.xlu0 %v10068_v6, %s8244_s11  ;;  %4333 = vrot.lane.b32.xlu2 %v10071_v12, %s8244_s11 }
 0xb15   : > { %v10147_v14 = vadd.f32 %v10073_v18, %v3810_v1 }
 0xb19   : > { %v3958_v51 = vpop.f32.mrf.mxu2  ;;  %v3991_v33 = vpop.f32.mrf.mxu3 }
 0xb1a   : > { %v10083_v5 = vadd.f32 %v3991_v33, %v10044_v16  ;;  %v10090_v30 = vadd.f32 %v3958_v51, %v10053_v4 }
 0xb1c   : > { %v4027_v19 = vpop.f32.mrf.mxu0  ;;  %4351 = vrot.lane.b32.xlu0 %v10080_v3, %s8244_s11  ;;  %4353 = vrot.lane.b32.xlu2 %v10083_v5, %s8244_s11 }
 0xb1d   : > { %v10141_v63 = vadd.f32 %v4027_v19, %v3810_v1 }
 0xb21   : > { %v3961_v50 = vpop.f32.mrf.mxu2  ;;  %v3994_v56 = vpop.f32.mrf.mxu3 }
 0xb22   : > { %v10093_v27 = vadd.f32 %v3961_v50, %v10053_v4  ;;  %v10100_v22 = vadd.f32 %v3994_v56, %v10044_v16 }
 0xb24   : > { %v4029_v32 = vpop.f32.mrf.mxu0  ;;  %4335 = vrot.lane.b32.xlu0 %v10090_v30, %s8244_s11  ;;  %4337 = vrot.lane.b32.xlu2 %v10093_v27, %s8244_s11 }
 0xb25   : > { %v4030_v40 = vadd.f32 %v4029_v32, %v3810_v1 }
 0xb29   : > { %v3963_v25 = vpop.f32.mrf.mxu2  ;;  %v3996_v20 = vpop.f32.mrf.mxu3 }
 0xb2a   : > { %v3997_v23 = vadd.f32 %v3996_v20, %v10044_v16  ;;  %v10110_v48 = vadd.f32 %v3963_v25, %v10053_v4 }
 0xb2c   : > { %v4032_v60 = vpop.f32.mrf.mxu0  ;;  %4840 = vrot.lane.b32.xlu1 %v3997_v23, %s8245_s29  ;;  %4355 = vrot.lane.b32.xlu0 %v10100_v22, %s8244_s11 }
 0xb2d   : > { %v4033_v21 = vadd.f32 %v4032_v60, %v3810_v1  ;;  %4357 = vrot.lane.b32.xlu2 %v3997_v23, %s8244_s11 }
 0xb2f   : > { %v10107_v13 = vpack.i.bf16 %v4030_v40, %v4033_v21 }
 0xb31   : > { %v3966_v0 = vpop.f32.mrf.mxu2  ;;  %v3999_v39 = vpop.f32.mrf.mxu3 }
 0xb32   : > { %v10113_v10 = vadd.f32 %v3966_v0, %v10053_v4  ;;  %v4000_v42 = vadd.f32 %v3999_v39, %v10044_v16 }
 0xb34   : > { %4339 = vrot.lane.b32.xlu0 %v10110_v48, %s8244_s11  ;;  %v4034_v28 = vpop.f32.mrf.mxu0 }
 0xb35   : > { %4341 = vrot.lane.b32.xlu2 %v10113_v10, %s8244_s11  ;;  %v4035_v11 = vadd.f32 %v4034_v28, %v3810_v1 }
 0xb39   : > { %v3968_v15 = vpop.f32.mrf.mxu2  ;;  %v4001_v2 = vpop.f32.mrf.mxu3 }
 0xb3a   : > { %v10120_v35 = vadd.f32 %v3968_v15, %v10053_v4  ;;  %v4002_v26 = vadd.f32 %v4001_v2, %v10044_v16 }
 0xb3c   : > { %5252 = vrot.lane.b32.xlu0 %v3997_v23, %s8246_s23  ;;  %4343 = vrot.lane.b32.xlu1 %v10120_v35, %s8244_s11 }
 0xb3d   : > { %5254 = vrot.lane.b32.xlu2 %v4000_v42, %s8246_s23 }
 0xb44   : > { %4359 = vrot.lane.b32.xlu0 %v4000_v42, %s8244_s11  ;;  %5256 = vrot.lane.b32.xlu1 %v4002_v26, %s8246_s23 }
 0xb45   : > { %4361 = vrot.lane.b32.xlu2 %v4002_v26, %s8244_s11 }
 0xb4c   : > { %4842 = vrot.lane.b32.xlu0 %v4000_v42, %s8245_s29 }
 0xb4d   : > { %4844 = vrot.lane.b32.xlu2 %v4002_v26, %s8245_s29 }
 0xb5c   : > { %v4037_v31 = vpop.f32.mrf.mxu0 }
 0xb5d   : > { %v4038_v58 = vadd.f32 %v4037_v31, %v3810_v1  ;;  %v4328_v31 = vld [vmem:[#allocation4 + $0x20] sm:$0xff] }
 0xb5f   : > { %4290 = vmatpush.msrb.mxu2 %v4038_v58  ;;  %v10133_v53 = vpack.i.bf16 %v4035_v11, %v4038_v58 }
 0xb61   : > { %4291 = vmatpush.msrb.mxu2 %v4035_v11  ;;  %v3971_v36 = vpop.f32.mrf.mxu2  ;;  %v4004_v24 = vpop.f32.mrf.mxu3 }
 0xb62   : > { %v10136_v45 = vadd.f32 %v3971_v36, %v10053_v4  ;;  %v4005_v62 = vadd.f32 %v4004_v24, %v10044_v16  ;;  %v10153_v4 = vadd.f32 %v10061_v7, %v3810_v1  ;;  %v10241_v24 = vld [vmem:[%s8478_s20] ss:$0 sm:$0xff] }
 0xb63   : > { %4292 = vmatpush.msrb.mxu2 %v4033_v21 }
 0xb64   : > { %v4039_v47 = vpop.f32.mrf.mxu0  ;;  %5258 = vrot.lane.b32.xlu0 %v4005_v62, %s8246_s23  ;;  %4363 = vrot.lane.b32.xlu1 %v4005_v62, %s8244_s11 }
 0xb65   : > { %4293 = vmatpush.msrb.mxu2 %v4030_v40  ;;  %6926 = vmatpush.xpose.msk.msrb.mxu1 %vm1394_vm11, %v4005_v62 }
 0xb66   : > { %4345 = vrot.lane.b32.xlu2 %v10136_v45, %s8244_s11  ;;  %v10150_v16 = vpop.permute.xlu2 %4349 }
 0xb67   : > { %4294 = vmatpush.msrb.mxu2 %v10141_v63 }
 0xb69   : > { %6927 = vmatpush.xpose.msk.msrb.mxu1 %vm1394_vm11, %v4002_v26  ;;  %4295 = vmatpush.msrb.mxu2 %v10147_v14  ;;  %v3973_v44 = vpop.f32.mrf.mxu2  ;;  %v4006_v59 = vpop.f32.mrf.mxu3 }
 0xb6b   : > { %4296 = vmatpush.msrb.mxu2 %v10153_v4 }
 0xb6d   : > { %6928 = vmatpush.xpose.msk.msrb.mxu1 %vm1394_vm11, %v4000_v42  ;;  %4297 = vmatpush.msrb.mxu2 %v10158_v17 }
 0xb6e   : > { %4846 = vrot.lane.b32.xlu2 %v4005_v62, %s8245_s29  ;;  %v10169_v7 = vpop.permute.xlu2 %4333 }
 0xb6f   : > { %4298 = vmatpush.msrb.mxu2 %v10162_v52 }
 0xb71   : > { %6929 = vmatpush.xpose.msk.msrb.mxu1 %vm1394_vm11, %v3997_v23 }
 0xb75   : > { %6930 = vmatpush.xpose.msk.msrb.mxu1 %vm1394_vm11, %v10100_v22 }
 0xb76   : > { %v4348_v61 = vpop.permute.xlu0 %4347  ;;  %v4354_v29 = vpop.permute.xlu2 %4353 }
 0xb79   : > { %6931 = vmatpush.xpose.msk.msrb.mxu1 %vm1394_vm11, %v10083_v5 }
 0xb7d   : > { %6932 = vmatpush.xpose.msk.msrb.mxu1 %vm1394_vm11, %v10080_v3 }
 0xb7e   : > { %v10177_v18 = vpop.permute.xlu0 %4329  ;;  %v10183_v51 = vpop.permute.xlu2 %4337 }
 0xb81   : > { %6933 = vmatpush.xpose.msk.msrb.mxu1 %vm1394_vm11, %v10059_v46 }
 0xb85   : > { %6934 = vmatpush.xpose.msk.msrb.mxu1 %vm1394_vm11, %v10047_v34 }
 0xb86   : > { %v10187_v33 = vpop.permute.xlu0 %4331 }
 0xb87   : > { %v4358_v19 = vpop.permute.xlu2 %4357 }
 0xb88   : > { %6935 = vmatmul.msk.f32.vlgmr.msrb.gmra.mxu1 %vm1394_vm11, %v10056_v49 }
 0xb8e   : > { %v4352_v50 = vpop.permute.xlu0 %4351 }
 0xb8f   : > { %v10193_v56 = vpop.permute.xlu2 %4341 }
 0xb90   : > { %6936 = vmatmul.msk.f32.gmra.mxu1 %vm1394_vm11, %v10068_v6 }
 0xb96   : > { %v4336_v32 = vpop.permute.xlu0 %4335 }
 0xb97   : > { %v5255_v25 = vpop.permute.xlu2 %5254 }
 0xb98   : > { %6937 = vmatmul.msk.f32.gmra.mxu1 %vm1394_vm11, %v10071_v12 }
 0xb9e   : > { %v4356_v20 = vpop.permute.xlu0 %4355  ;;  %v4841_v40 = vpop.permute.xlu1 %4840 }
 0xb9f   : > { %v4362_v23 = vpop.permute.xlu2 %4361 }
 0xba0   : > { %6938 = vmatmul.msk.f32.gmra.mxu1 %vm1394_vm11, %v10090_v30 }
 0xba6   : > { %v4340_v1 = vpop.permute.xlu0 %4339 }
 0xba7   : > { %v4845_v60 = vpop.permute.xlu2 %4844 }
 0xba8   : > { %6939 = vmatmul.msk.f32.gmra.mxu1 %vm1394_vm11, %v10093_v27 }
 0xbae   : > { %v5253_v21 = vpop.permute.xlu0 %5252  ;;  %v4344_v39 = vpop.permute.xlu1 %4343 }
 0xbb0   : > { %6940 = vmatmul.msk.f32.gmra.mxu1 %vm1394_vm11, %v10110_v48 }
 0xbb6   : > { %v4360_v15 = vpop.permute.xlu0 %4359  ;;  %v5257_v2 = vpop.permute.xlu1 %5256 }
 0xbb8   : > { %6941 = vmatmul.msk.f32.gmra.mxu1 %vm1394_vm11, %v10113_v10 }
 0xbbe   : > { %v4843_v26 = vpop.permute.xlu0 %4842 }
 0xbc0   : > { %v10203_v0 = vpop.permute.xlu2 %4345  ;;  %6942 = vmatmul.msk.f32.gmra.mxu1 %vm1394_vm11, %v10120_v35 }
 0xbc8   : > { %v4847_v42 = vpop.permute.xlu2 %4846  ;;  %6943 = vmatmul.msk.f32.gmra.mxu1 %vm1394_vm11, %v10136_v45 }
 0xbc9   : > { %6998 = vmatpush.xpose.msk.msra.mxu0 %vm1394_vm11, %v4847_v42 }
 0xbcd   : > { %6999 = vmatpush.xpose.msk.msra.mxu0 %vm1394_vm11, %v4845_v60 }
 0xbd1   : > { %7000 = vmatpush.xpose.msk.msra.mxu0 %vm1394_vm11, %v4843_v26 }
 0xbd5   : > { %7001 = vmatpush.xpose.msk.msra.mxu0 %vm1394_vm11, %v4841_v40 }
 0xbd6   : > { %v4364_v28 = vpop.permute.xlu1 %4363  ;;  %v5259_v11 = vpop.permute.xlu0 %5258 }
 0xbd7   : > { %6953 = vmatpush.xpose.msk.msra.mxu2 %vm1394_vm11, %v4364_v28  ;;  %7277 = vmatpush.xpose.msk.msrb.mxu3 %vm1394_vm11, %v4364_v28 }
 0xbdb   : > { %6954 = vmatpush.xpose.msk.msra.mxu2 %vm1394_vm11, %v4362_v23  ;;  %7278 = vmatpush.xpose.msk.msrb.mxu3 %vm1394_vm11, %v4362_v23 }
 0xbdf   : > { %6955 = vmatpush.xpose.msk.msra.mxu2 %vm1394_vm11, %v4360_v15  ;;  %7279 = vmatpush.xpose.msk.msrb.mxu3 %vm1394_vm11, %v4360_v15 }
 0xbe3   : > { %6956 = vmatpush.xpose.msk.msra.mxu2 %vm1394_vm11, %v4358_v19  ;;  %7280 = vmatpush.xpose.msk.msrb.mxu3 %vm1394_vm11, %v4358_v19 }
 0xbe7   : > { %6957 = vmatpush.xpose.msk.msra.mxu2 %vm1394_vm11, %v4356_v20  ;;  %7281 = vmatpush.xpose.msk.msrb.mxu3 %vm1394_vm11, %v4356_v20 }
 0xbeb   : > { %6958 = vmatpush.xpose.msk.msra.mxu2 %vm1394_vm11, %v4354_v29  ;;  %7282 = vmatpush.xpose.msk.msrb.mxu3 %vm1394_vm11, %v4354_v29 }
 0xbef   : > { %6959 = vmatpush.xpose.msk.msra.mxu2 %vm1394_vm11, %v4352_v50  ;;  %7283 = vmatpush.xpose.msk.msrb.mxu3 %vm1394_vm11, %v4352_v50 }
 0xbf3   : > { %6960 = vmatpush.xpose.msk.msra.mxu2 %vm1394_vm11, %v10150_v16  ;;  %7284 = vmatpush.xpose.msk.msrb.mxu3 %vm1394_vm11, %v10150_v16 }
 0xbf7   : > { %6961 = vmatpush.xpose.msk.msra.mxu2 %vm1394_vm11, %v4348_v61  ;;  %7285 = vmatpush.xpose.msk.msrb.mxu3 %vm1394_vm11, %v4348_v61 }
 0xbfa   : > { %6964 = vmatmul.msk.f32.vlgmr.msrb.gmra.mxu3 %vm1394_vm11, %v10169_v7 }
 0xbfb   : > { %4783 = vmatpush.msra.mxu3 %v4328_v31 }
 0xbfd   : > { %7034 = vmatpush.xpose.msk.msrb.mxu3 %vm1394_vm11, %v5259_v11 }
 0xc01   : > { %7035 = vmatpush.xpose.msk.msrb.mxu3 %vm1394_vm11, %v5257_v2 }
 0xc02   : > { %6965 = vmatmul.msk.f32.gmra.mxu3 %vm1394_vm11, %v4336_v32 }
 0xc05   : > { %7036 = vmatpush.xpose.msk.msrb.mxu3 %vm1394_vm11, %v5255_v25  ;;  %v4112_v58 = vpop.f32.mrf.mxu1 }
 0xc06   : > { %v4139_v36 = vmul.f32 0.35355338, %v4112_v58 }
 0xc08   : > { %v4148_v62 = vadd.f32 %v10241_v24, %v4139_v36 }
 0xc09   : > { %7037 = vmatpush.xpose.msk.msrb.mxu3 %vm1394_vm11, %v5253_v21 }
 0xc0a   : > { %v4157_v47 = vsel %vm1514_vm12, %v4148_v62, -inf  ;;  %6966 = vmatmul.msk.f32.gmra.mxu3 %vm1394_vm11, %v10183_v51 }
 0xc0b   : > { %4158 = vmax.xlane.f32.xlu0 %v4157_v47 }
 0xc0d   : > { %v4115_v16 = vpop.f32.mrf.mxu1 }
 0xc0e   : > { %v4140_v44 = vmul.f32 0.35355338, %v4115_v16 }
 0xc10   : > { %v4149_v59 = vadd.f32 %v10241_v24, %v4140_v44 }
 0xc12   : > { %v4160_v7 = vsel %vm1514_vm12, %v4149_v59, -inf  ;;  %6967 = vmatmul.msk.f32.gmra.mxu3 %vm1394_vm11, %v4340_v1 }
 0xc13   : > { %4161 = vmax.xlane.f32.xlu1 %v4160_v7 }
 0xc15   : > { %v4118_v61 = vpop.f32.mrf.mxu1 }
 0xc16   : > { %v4141_v29 = vmul.f32 0.35355338, %v4118_v61 }
 0xc18   : > { %v4150_v19 = vadd.f32 %v10241_v24, %v4141_v29 }
 0xc1a   : > { %v4163_v50 = vsel %vm1514_vm12, %v4150_v19, -inf  ;;  %6968 = vmatmul.msk.f32.gmra.mxu3 %vm1394_vm11, %v10193_v56 }
 0xc1b   : > { %4164 = vmax.xlane.f32.xlu2 %v4163_v50 }
 0xc1d   : > { %v4121_v51 = vpop.f32.mrf.mxu1 }
 0xc1e   : > { %v4142_v32 = vmul.f32 0.35355338, %v4121_v51 }
 0xc20   : > { %v4151_v25 = vadd.f32 %v10241_v24, %v4142_v32 }
 0xc22   : > { %v4166_v20 = vsel %vm1514_vm12, %v4151_v25, -inf  ;;  %6969 = vmatmul.msk.f32.gmra.mxu3 %vm1394_vm11, %v4344_v39 }
 0xc23   : > { %4167 = vmax.xlane.f32.xlu0 %v4166_v20 }
 0xc25   : > { %v4124_v23 = vpop.f32.mrf.mxu1 }
 0xc26   : > { %v4143_v1 = vmul.f32 0.35355338, %v4124_v23 }
 0xc28   : > { %v4152_v60 = vadd.f32 %v10241_v24, %v4143_v1 }
 0xc2a   : > { %v4169_v40 = vsel %vm1514_vm12, %v4152_v60, -inf  ;;  %6970 = vmatmul.msk.f32.gmra.mxu3 %vm1394_vm11, %v10203_v0 }
 0xc2b   : > { %4170 = vmax.xlane.f32.xlu1 %v4169_v40 }
 0xc2d   : > { %v4127_v56 = vpop.f32.mrf.mxu1 }
 0xc2e   : > { %v4144_v21 = vmul.f32 0.35355338, %v4127_v56 }
 0xc30   : > { %v4153_v15 = vadd.f32 %v10241_v24, %v4144_v21 }
 0xc32   : > { %v4172_v42 = vsel %vm1514_vm12, %v4153_v15, -inf }
 0xc33   : > { %4173 = vmax.xlane.f32.xlu2 %v4172_v42 }
 0xc35   : > { %v4130_v2 = vpop.f32.mrf.mxu1 }
 0xc36   : > { %v4145_v39 = vmul.f32 0.35355338, %v4130_v2 }
 0xc38   : > { %v10264_v26 = vadd.f32 %v10241_v24, %v4145_v39 }
 0xc3a   : > { %v4175_v28 = vsel %vm1514_vm12, %v10264_v26, -inf }
 0xc3b   : > { %4176 = vmax.xlane.f32.xlu0 %v4175_v28 }
 0xc3d   : > { %v4133_v31 = vpop.f32.mrf.mxu1 }
 0xc3e   : > { %v4146_v11 = vmul.f32 0.35355338, %v4133_v31 }
 0xc40   : > { %v10269_v0 = vadd.f32 %v10241_v24, %v4146_v11 }
 0xc42   : > { %v4178_v58 = vsel %vm1514_vm12, %v10269_v0, -inf }
 0xc43   : > { %4179 = vmax.xlane.f32.xlu2 %v4178_v58 }
 0xc45   : > { %v4136_v36 = vpop.f32.mrf.mxu1 }
 0xc46   : > { %v4147_v47 = vmul.f32 0.35355338, %v4136_v36 }
 0xc48   : > { %v10274_v16 = vadd.f32 %v10241_v24, %v4147_v47 }
 0xc4a   : > { %v4181_v44 = vsel %vm1514_vm12, %v10274_v16, -inf }
 0xc4b   : > { %4182 = vmax.xlane.f32.xlu1 %v4181_v44 }
 0xc7e   : > { %v4159_v7 = vpop.xlane.xlu0 %4158 }
 0xc7f   : > { %v4184_v61 = vsub.f32 %v4148_v62, %v4159_v7 }
 0xc81   : > { %v4193_v29 = vmul.f32 1.442695, %v4184_v61 }
 0xc83   : > { %7747 = vpow2.f32 %v4193_v29 }
 0xc86   : > { %v4162_v50 = vpop.xlane.xlu1 %4161 }
 0xc87   : > { %v4185_v51 = vsub.f32 %v4149_v59, %v4162_v50 }
 0xc89   : > { %v7748_v32 = vpop.eup %7747  ;;  %v4195_v20 = vmul.f32 1.442695, %v4185_v51 }
 0xc8a   : > { %v4211_v23 = vsel %vm1514_vm12, %v7748_v32, 0.0 }
 0xc8b   : > { %7749 = vpow2.f32 %v4195_v20  ;;  %4212 = vadd.xlane.f32.xlu1 %v4211_v23 }
 0xc8e   : > { %v4165_v1 = vpop.xlane.xlu2 %4164 }
 0xc8f   : > { %v4186_v40 = vsub.f32 %v4150_v19, %v4165_v1 }
 0xc91   : > { %v7750_v56 = vpop.eup %7749  ;;  %v4197_v21 = vmul.f32 1.442695, %v4186_v40 }
 0xc92   : > { %v4214_v42 = vsel %vm1514_vm12, %v7750_v56, 0.0 }
 0xc93   : > { %7751 = vpow2.f32 %v4197_v21  ;;  %4215 = vadd.xlane.f32.xlu0 %v4214_v42 }
 0xc96   : > { %v4168_v19 = vpop.xlane.xlu0 %4167 }
 0xc97   : > { %v4187_v28 = vsub.f32 %v4151_v25, %v4168_v19 }
 0xc99   : > { %v10280_v2 = vpop.eup %7751  ;;  %v4199_v11 = vmul.f32 1.442695, %v4187_v28 }
 0xc9a   : > { %v4217_v62 = vsel %vm1514_vm12, %v10280_v2, 0.0 }
 0xc9b   : > { %4218 = vadd.xlane.f32.xlu2 %v4217_v62 }
 0xc9e   : > { %v4171_v59 = vpop.xlane.xlu1 %4170 }
 0xc9f   : > { %v4188_v39 = vsub.f32 %v4152_v60, %v4171_v59 }
 0xca1   : > { %v4201_v31 = vmul.f32 1.442695, %v4188_v39 }
 0xca3   : > { %7753 = vpow2.f32 %v4201_v31 }
 0xca4   : > { %5250 = vrot.lane.b32.xlu1 %v10100_v22, %s8246_s23  ;;  %7755 = vpow2.f32 %v4199_v11 }
 0xca6   : > { %v4174_v58 = vpop.xlane.xlu2 %4173 }
 0xca7   : > { %4836 = vrot.lane.b32.xlu0 %v10083_v5, %s8245_s29  ;;  %v4189_v47 = vsub.f32 %v4153_v15, %v4174_v58 }
 0xca9   : > { %v10290_v36 = vpop.eup %7753  ;;  %v4203_v61 = vmul.f32 1.442695, %v4189_v47 }
 0xcaa   : > { %v10292_v44 = vpop.eup %7755  ;;  %v4223_v7 = vsel %vm1514_vm12, %v10290_v36, 0.0 }
 0xcab   : > { %7757 = vpow2.f32 %v4203_v61 }
 0xcb1   : > { %v10298_v25 = vpop.eup %7757 }
 0xcb2   : > { %v4226_v60 = vsel %vm1514_vm12, %v10298_v25, 0.0 }
 0xcb3   : > { %4838 = vrot.lane.b32.xlu2 %v10100_v22, %s8245_s29  ;;  %v4220_v22 = vsel %vm1514_vm12, %v10292_v44, 0.0 }
 0xcbe   : > { %v4183_v15 = vpop.xlane.xlu1 %4182 }
 0xcce   : > { %4224 = vadd.xlane.f32.xlu1 %v4223_v7 }
 0xcd1   : > { %4221 = vadd.xlane.f32.xlu0 %v4220_v22 }
 0xcdc   : > { %4227 = vadd.xlane.f32.xlu2 %v4226_v60 }
 0xce5   : > { %5246 = vrot.lane.b32.xlu0 %v10080_v3, %s8246_s23 }
 0xce7   : > { %4834 = vrot.lane.b32.xlu1 %v10080_v3, %s8245_s29  ;;  %v4177_v3 = vpop.xlane.xlu0 %4176 }
 0xced   : > { %4830 = vrot.lane.b32.xlu0 %v10047_v34, %s8245_s29 }
 0xcef   : > { %5244 = vrot.lane.b32.xlu1 %v10059_v46, %s8246_s23 }
 0xcf4   : > { %5248 = vrot.lane.b32.xlu2 %v10083_v5, %s8246_s23 }
 0xcf5   : > { %5224 = vrot.lane.b32.xlu0 %v10056_v49, %s8246_s23 }
 0xcf7   : > { %4812 = vrot.lane.b32.xlu1 %v10056_v49, %s8245_s29  ;;  %v4180_v49 = vpop.xlane.xlu2 %4179 }
 0xcf8   : > { %v4191_v21 = vsub.f32 %v10269_v0, %v4180_v49 }
 0xcfa   : > { %v4207_v42 = vmul.f32 1.442695, %v4191_v21 }
 0xcfc   : > { %4832 = vrot.lane.b32.xlu2 %v10059_v46, %s8245_s29 }
 0xcfd   : > { %4816 = vrot.lane.b32.xlu0 %v10071_v12, %s8245_s29 }
 0xcfe   : > { %v4213_v29 = vpop.xlane.xlu1 %4212 }
 0xcff   : > { %7759 = vrcp.f32 %v4213_v29  ;;  %5226 = vrot.lane.b32.xlu1 %v10068_v6, %s8246_s23 }
 0xd04   : > { %5242 = vrot.lane.b32.xlu2 %v10047_v34, %s8246_s23 }
 0xd05   : > { %v7760_v5 = vpop.eup %7759  ;;  %5230 = vrot.lane.b32.xlu0 %v10090_v30, %s8246_s23 }
 0xd06   : > { %v4247_v50 = vmul.f32 %v7760_v5, %v7748_v32  ;;  %v4216_v51 = vpop.xlane.xlu0 %4215 }
 0xd07   : > { %7761 = vrcp.f32 %v4216_v51  ;;  %4818 = vrot.lane.b32.xlu1 %v10090_v30, %s8245_s29 }
 0xd08   : > { %6944 = vmatmul.msk.f32.vlgmr.msrb.gmra.mxu2 %vm1514_vm12, %v4247_v50 }
 0xd0c   : > { %4814 = vrot.lane.b32.xlu2 %v10068_v6, %s8245_s29 }
 0xd0d   : > { %v7762_v46 = vpop.eup %7761  ;;  %4822 = vrot.lane.b32.xlu0 %v10110_v48, %s8245_s29 }
 0xd0e   : > { %v4219_v34 = vpop.xlane.xlu2 %4218  ;;  %v4248_v20 = vmul.f32 %v7762_v46, %v7750_v56 }
 0xd0f   : > { %7763 = vrcp.f32 %v4219_v34  ;;  %5232 = vrot.lane.b32.xlu1 %v10093_v27, %s8246_s23 }
 0xd10   : > { %6945 = vmatmul.msk.f32.gmra.mxu2 %vm1514_vm12, %v4248_v20 }
 0xd14   : > { %5228 = vrot.lane.b32.xlu2 %v10071_v12, %s8246_s23  ;;  %v4190_v12 = vsub.f32 %v10264_v26, %v4177_v3 }
 0xd15   : > { %v7764_v30 = vpop.eup %7763  ;;  %5236 = vrot.lane.b32.xlu0 %v10113_v10, %s8246_s23 }
 0xd16   : > { %v5251_v6 = vpop.permute.xlu1 %5250  ;;  %v4839_v32 = vpop.permute.xlu2 %4838  ;;  %v4249_v23 = vmul.f32 %v7764_v30, %v10280_v2  ;;  %v4205_v40 = vmul.f32 1.442695, %v4190_v12 }
 0xd17   : > { %4824 = vrot.lane.b32.xlu1 %v10113_v10, %s8245_s29  ;;  %7002 = vmatpush.xpose.msk.msra.mxu0 %vm1394_vm11, %v4839_v32  ;;  %v4192_v10 = vsub.f32 %v10274_v16, %v4183_v15 }
 0xd18   : > { %7038 = vmatpush.xpose.msk.msrb.mxu3 %vm1394_vm11, %v5251_v6  ;;  %6946 = vmatmul.msk.f32.gmra.mxu2 %vm1514_vm12, %v4249_v23  ;;  %7765 = vpow2.f32 %v4205_v40 }
 0xd19   : > { %v4837_v1 = vpop.permute.xlu0 %4836  ;;  %v4209_v56 = vmul.f32 1.442695, %v4192_v10 }
 0xd1b   : > { %7003 = vmatpush.xpose.msk.msra.mxu0 %vm1394_vm11, %v4837_v1  ;;  %7767 = vpow2.f32 %v4209_v56 }
 0xd1c   : > { %4820 = vrot.lane.b32.xlu2 %v10093_v27, %s8245_s29  ;;  %v4424_v27 = vpop.f32.mrf.mxu3  ;;  %7769 = vpow2.f32 %v4207_v42 }
 0xd1d   : > { %v4447_v7 = vmul.f32 0.35355338, %v4424_v27 }
 0xd1e   : > { %v10358_v2 = vpop.eup %7765 }
 0xd1f   : > { %v4229_v26 = vsel %vm1514_vm12, %v10358_v2, 0.0  ;;  %v10376_v15 = vadd.f32 %v10241_v24, %v4447_v7 }
 0xd21   : > { %v4469_v5 = vsel %vm1514_vm12, %v10376_v15, -inf }
 0xd24   : > { %5234 = vrot.lane.b32.xlu2 %v10110_v48, %s8246_s23  ;;  %v10360_v48 = vpop.eup %7767  ;;  %v4427_v59 = vpop.f32.mrf.mxu3 }
 0xd25   : > { %v4235_v16 = vsel %vm1514_vm12, %v10360_v48, 0.0  ;;  %v10366_v62 = vpop.eup %7769  ;;  %v4448_v40 = vmul.f32 0.35355338, %v4427_v59 }
 0xd26   : > { %v4232_v19 = vsel %vm1514_vm12, %v10366_v62, 0.0 }
 0xd27   : > { %v10410_v21 = vadd.f32 %v10241_v24, %v4448_v40 }
 0xd2c   : > { %4826 = vrot.lane.b32.xlu2 %v10120_v35, %s8245_s29  ;;  %v4430_v11 = vpop.f32.mrf.mxu3 }
 0xd34   : > { %5240 = vrot.lane.b32.xlu2 %v10136_v45, %s8246_s23  ;;  %v4433_v22 = vpop.f32.mrf.mxu3 }
 0xd35   : > { %v4450_v56 = vmul.f32 0.35355338, %v4433_v22  ;;  %v10449_v22 = vpack.i.bf16 %v10158_v17, %v10153_v4 }
 0xd37   : > { %v10415_v42 = vadd.f32 %v10241_v24, %v4450_v56 }
 0xd39   : > { %v4478_v59 = vsel %vm1514_vm12, %v10415_v42, -inf }
 0xd3c   : > { %v4436_v51 = vpop.f32.mrf.mxu3 }
 0xd3d   : > { %v4451_v34 = vmul.f32 0.35355338, %v4436_v51 }
 0xd3f   : > { %4230 = vadd.xlane.f32.xlu0 %v4229_v26  ;;  %v10398_v30 = vadd.f32 %v10241_v24, %v4451_v34 }
 0xd41   : > { %4236 = vadd.xlane.f32.xlu1 %v4235_v16  ;;  %v4225_v39 = vpop.xlane.xlu1 %4224  ;;  %v4481_v32 = vsel %vm1514_vm12, %v10398_v30, -inf  ;;  %v4472_v16 = vsel %vm1514_vm12, %v10410_v21, -inf }
 0xd44   : > { %v4222_v0 = vpop.xlane.xlu0 %4221  ;;  %v4439_v7 = vpop.f32.mrf.mxu3 }
 0xd45   : > { %7771 = vrcp.f32 %v4222_v0  ;;  %v10422_v0 = vpack.i.bf16 %v10147_v14, %v10141_v63 }
 0xd46   : > { %7773 = vrcp.f32 %v4225_v39 }
 0xd47   : > { %4233 = vadd.xlane.f32.xlu0 %v4232_v19 }
 0xd4b   : > { %v7772_v28 = vpop.eup %7771 }
 0xd4c   : > { %v4250_v31 = vmul.f32 %v7772_v28, %v10292_v44  ;;  %v7774_v47 = vpop.eup %7773 }
 0xd4d   : > { %v4251_v61 = vmul.f32 %v7774_v47, %v10290_v36  ;;  %v4449_v36 = vmul.f32 0.35355338, %v4430_v11 }
 0xd4e   : > { %6947 = vmatmul.msk.f32.gmra.mxu2 %vm1514_vm12, %v4250_v31 }
 0xd4f   : > { %v4228_v58 = vpop.xlane.xlu2 %4227 }
 0xd50   : > { %7775 = vrcp.f32 %v4228_v58 }
 0xd56   : > { %6948 = vmatmul.msk.f32.gmra.mxu2 %vm1514_vm12, %v4251_v61  ;;  %v7776_v3 = vpop.eup %7775 }
 0xd57   : > { %v5249_v60 = vpop.permute.xlu2 %5248  ;;  %v5247_v44 = vpop.permute.xlu0 %5246  ;;  %v4252_v49 = vmul.f32 %v7776_v3, %v10298_v25 }
 0xd58   : > { %7039 = vmatpush.xpose.msk.msrb.mxu3 %vm1394_vm11, %v5249_v60  ;;  %v4442_v60 = vpop.f32.mrf.mxu3 }
 0xd59   : > { %v4835_v29 = vpop.permute.xlu1 %4834 }
 0xd5a   : > { %5238 = vrot.lane.b32.xlu1 %v10120_v35, %s8246_s23  ;;  %7004 = vmatpush.xpose.msk.msra.mxu0 %vm1394_vm11, %v4835_v29  ;;  %v10390_v35 = vadd.f32 %v10241_v24, %v4449_v36 }
 0xd5b   : > { %4828 = vrot.lane.b32.xlu0 %v10136_v45, %s8245_s29 }
 0xd5c   : > { %7040 = vmatpush.xpose.msk.msrb.mxu3 %vm1394_vm11, %v5247_v44  ;;  %v4475_v25 = vsel %vm1514_vm12, %v10390_v35, -inf  ;;  %v4453_v44 = vmul.f32 0.35355338, %v4442_v60 }
 0xd5d   : > { %4470 = vmax.xlane.f32.xlu2 %v4469_v5 }
 0xd5e   : > { %6949 = vmatmul.msk.f32.gmra.mxu2 %vm1514_vm12, %v4252_v49  ;;  %v10456_v29 = vadd.f32 %v10241_v24, %v4453_v44 }
 0xd5f   : > { %v4833_v50 = vpop.permute.xlu2 %4832  ;;  %v4831_v45 = vpop.permute.xlu0 %4830 }
 0xd60   : > { %7005 = vmatpush.xpose.msk.msra.mxu0 %vm1394_vm11, %v4833_v50  ;;  %v4487_v5 = vsel %vm1514_vm12, %v10456_v29, -inf  ;;  %v4452_v50 = vmul.f32 0.35355338, %v4439_v7 }
 0xd61   : > { %v5245_v46 = vpop.permute.xlu1 %5244 }
 0xd62   : > { %7041 = vmatpush.xpose.msk.msrb.mxu3 %vm1394_vm11, %v5245_v46  ;;  %v10463_v51 = vadd.f32 %v10241_v24, %v4452_v50 }
 0xd64   : > { %7006 = vmatpush.xpose.msk.msra.mxu0 %vm1394_vm11, %v4831_v45  ;;  %v4484_v34 = vsel %vm1514_vm12, %v10463_v51, -inf }
 0xd65   : > { %4476 = vmax.xlane.f32.xlu2 %v4475_v25 }
 0xd67   : > { %v5243_v20 = vpop.permute.xlu2 %5242  ;;  %v10403_v23 = vpop.permute.xlu0 %5224 }
 0xd68   : > { %7042 = vmatpush.xpose.msk.msrb.mxu3 %vm1394_vm11, %v5243_v20 }
 0xd69   : > { %v4813_v6 = vpop.permute.xlu1 %4812 }
 0xd6a   : > { %7007 = vmatmul.msk.f32.vlgmr.msra.gmra.mxu0 %vm1394_vm11, %v4813_v6 }
 0xd6d   : > { %4482 = vmax.xlane.f32.xlu2 %v4481_v32 }
 0xd6f   : > { %v4815_v1 = vpop.permute.xlu2 %4814  ;;  %v4817_v10 = vpop.permute.xlu0 %4816 }
 0xd71   : > { %v10406_v12 = vpop.permute.xlu1 %5226 }
 0xd72   : > { %7008 = vmatmul.msk.f32.gmra.mxu0 %vm1394_vm11, %v4815_v1 }
 0xd77   : > { %v10412_v27 = vpop.permute.xlu2 %5228  ;;  %v10428_v19 = vpop.permute.xlu0 %5230 }
 0xd79   : > { %v4819_v26 = vpop.permute.xlu1 %4818 }
 0xd7a   : > { %7009 = vmatmul.msk.f32.gmra.mxu0 %vm1394_vm11, %v4817_v10 }
 0xd7f   : > { %v4821_v39 = vpop.permute.xlu2 %4820  ;;  %v4823_v14 = vpop.permute.xlu0 %4822 }
 0xd81   : > { %v10434_v63 = vpop.permute.xlu1 %5232 }
 0xd82   : > { %7010 = vmatmul.msk.f32.gmra.mxu0 %vm1394_vm11, %v4819_v26 }
 0xd84   : > { %4473 = vmax.xlane.f32.xlu1 %v4472_v16 }
 0xd85   : > { %7466 = vrot.lane.b32.xlu2 %v10422_v0, %s8244_s11  ;;  %4479 = vmax.xlane.f32.xlu0 %v4478_v59 }
 0xd87   : > { %v10438_v11 = vpop.permute.xlu2 %5234  ;;  %v10453_v3 = vpop.permute.xlu0 %5236 }
 0xd89   : > { %v4825_v58 = vpop.permute.xlu1 %4824 }
 0xd8a   : > { %7011 = vmatmul.msk.f32.gmra.mxu0 %vm1394_vm11, %v4821_v39 }
 0xd8b   : > { %v4300_v28 = vpop.f32.mrf.mxu2 }
 0xd8c   : > { %6989 = vmatmul.msk.f32.vlgmr.msra.gmra.mxu3 %vm1394_vm11, %v4300_v28 }
 0xd8d   : > { %4571 = vrot.lane.b32.xlu2 %v10162_v52, %s8244_s11 }
 0xd8f   : > { %v4827_v61 = vpop.permute.xlu2 %4826 }
 0xd92   : > { %7012 = vmatmul.msk.f32.gmra.mxu0 %vm1394_vm11, %v4823_v14 }
 0xd93   : > { %v4303_v31 = vpop.f32.mrf.mxu2 }
 0xd94   : > { %6990 = vmatmul.msk.f32.gmra.mxu3 %vm1394_vm11, %v4303_v31 }
 0xd97   : > { %v10484_v26 = vpop.permute.xlu2 %5240 }
 0xd99   : > { %7461 = vrot.lane.b32.xlu0 %v10107_v13, %s8244_s11 }
 0xd9a   : > { %7013 = vmatmul.msk.f32.gmra.mxu0 %vm1394_vm11, %v4825_v58 }
 0xd9b   : > { %v4306_v47 = vpop.f32.mrf.mxu2 }
 0xd9c   : > { %6991 = vmatmul.msk.f32.gmra.mxu3 %vm1394_vm11, %v4306_v47 }
 0xd9d   : > { %7456 = vrot.lane.b32.xlu1 %v10133_v53, %s8244_s11 }
 0xda2   : > { %7014 = vmatmul.msk.f32.gmra.mxu0 %vm1394_vm11, %v4827_v61 }
 0xda5   : > { %7471 = vrot.lane.b32.xlu1 %v10449_v22, %s8244_s11 }
 0xdb2   : > { %v4231_v36 = vpop.xlane.xlu0 %4230 }
 0xdb3   : > { %7777 = vrcp.f32 %v4231_v36 }
 0xdb4   : > { %v4237_v46 = vpop.xlane.xlu1 %4236 }
 0xdb6   : > { %4488 = vmax.xlane.f32.xlu2 %v4487_v5 }
 0xdb9   : > { %v7778_v49 = vpop.eup %7777 }
 0xdba   : > { %v4234_v4 = vpop.xlane.xlu0 %4233  ;;  %v4253_v17 = vmul.f32 %v7778_v49, %v10358_v2 }
 0xdbb   : > { %7779 = vrcp.f32 %v4234_v4 }
 0xdbc   : > { %6950 = vmatmul.msk.f32.gmra.mxu2 %vm1514_vm12, %v4253_v17  ;;  %7781 = vrcp.f32 %v4237_v46 }
 0xdc1   : > { %v7780_v45 = vpop.eup %7779 }
 0xdc2   : > { %v4254_v25 = vmul.f32 %v7780_v45, %v10366_v62  ;;  %v7782_v20 = vpop.eup %7781 }
 0xdc3   : > { %4485 = vmax.xlane.f32.xlu0 %v4484_v34  ;;  %v4255_v2 = vmul.f32 %v7782_v20, %v10360_v48 }
 0xdc4   : > { %6951 = vmatmul.msk.f32.gmra.mxu2 %vm1514_vm12, %v4254_v25 }
 0xdcc   : > { %6952 = vmatmul.msk.f32.gmra.mxu2 %vm1514_vm12, %v4255_v2  ;;  %v10498_v47 = vpop.permute.xlu1 %5238 }
 0xdcd   : > { %v4829_v6 = vpop.permute.xlu0 %4828 }
 0xdce   : > { %7015 = vmatmul.msk.f32.gmra.mxu0 %vm1394_vm11, %v4829_v6 }
 0xdd0   : > { %v10491_v39 = vpop.xlane.xlu2 %4470 }
 0xdd1   : > { %v4309_v32 = vpop.f32.mrf.mxu2 }
 0xdd2   : > { %6992 = vmatmul.msk.f32.gmra.mxu3 %vm1394_vm11, %v4309_v32 }
 0xdd4   : > { %6962 = vmatmul.msk.f32.vlgmr.msra.gmra.mxu2 %vm1394_vm11, %v10177_v18 }
 0xdd8   : > { %v10500_v60 = vpop.xlane.xlu2 %4476 }
 0xdd9   : > { %v4312_v1 = vpop.f32.mrf.mxu2 }
 0xdda   : > { %6993 = vmatmul.msk.f32.gmra.mxu3 %vm1394_vm11, %v4312_v1 }
 0xddc   : > { %6963 = vmatmul.msk.f32.gmra.mxu2 %vm1394_vm11, %v10187_v33 }
 0xde0   : > { %v10514_v46 = vpop.xlane.xlu2 %4482 }
 0xde1   : > { %v4315_v62 = vpop.f32.mrf.mxu2 }
 0xde2   : > { %6994 = vmatmul.msk.f32.gmra.mxu3 %vm1394_vm11, %v4315_v62 }
 0xde7   : > { %v4901_v48 = vpop.f32.mrf.mxu0 }
 0xde8   : > { %v4928_v10 = vmul.f32 0.35355338, %v4901_v48  ;;  %v7467_v48 = vpop.permute.xlu2 %7466 }
 0xdea   : > { %v10480_v40 = vadd.f32 %v10241_v24, %v4928_v10 }
 0xdec   : > { %v4946_v56 = vsel %vm1514_vm12, %v10480_v40, -inf }
 0xded   : > { %4947 = vmax.xlane.f32.xlu0 %v4946_v56 }
 0xdef   : > { %v4904_v18 = vpop.f32.mrf.mxu0 }
 0xdf0   : > { %v4929_v16 = vmul.f32 0.35355338, %v4904_v18  ;;  %v7468_v18 = vunpack.i.l.bf16 %v7467_v48 }
 0xdf2   : > { %v10487_v59 = vadd.f32 %v10241_v24, %v4929_v16 }
 0xdf4   : > { %v4949_v33 = vsel %vm1514_vm12, %v10487_v59, -inf }
 0xdf5   : > { %4950 = vmax.xlane.f32.xlu0 %v4949_v33 }
 0xdf7   : > { %v4907_v28 = vpop.f32.mrf.mxu0  ;;  %v4474_v5 = vpop.xlane.xlu1 %4473 }
 0xdf8   : > { %v4930_v14 = vmul.f32 0.35355338, %v4907_v28  ;;  %v10507_v4 = vpop.xlane.xlu0 %4479 }
 0xdfa   : > { %v10494_v31 = vadd.f32 %v10241_v24, %v4930_v14  ;;  %v7469_v14 = vunpack.i.h.bf16 %v7467_v48  ;;  %v4492_v48 = vsub.f32 %v10376_v15, %v10491_v39  ;;  %v4494_v15 = vsub.f32 %v10390_v35, %v10500_v60 }
 0xdfb   : > { %v4495_v35 = vsub.f32 %v10415_v42, %v10507_v4 }
 0xdfc   : > { %v4952_v58 = vsel %vm1514_vm12, %v10494_v31, -inf }
 0xdfd   : > { %4953 = vmax.xlane.f32.xlu1 %v4952_v58 }
 0xdff   : > { %v4910_v7 = vpop.f32.mrf.mxu0 }
 0xe00   : > { %v4931_v61 = vmul.f32 0.35355338, %v4910_v7 }
 0xe02   : > { %v10503_v44 = vadd.f32 %v10241_v24, %v4931_v61 }
 0xe04   : > { %v4955_v36 = vsel %vm1514_vm12, %v10503_v44, -inf }
 0xe05   : > { %4956 = vmax.xlane.f32.xlu1 %v4955_v36 }
 0xe07   : > { %v4913_v49 = vpop.f32.mrf.mxu0 }
 0xe08   : > { %v4932_v50 = vmul.f32 0.35355338, %v4913_v49  ;;  %v4572_v49 = vpop.permute.xlu2 %4571 }
 0xe09   : > { %7486 = vrot.lane.b32.xlu0 %v10422_v0, %s8245_s29 }
 0xe0a   : > { %v10512_v17 = vadd.f32 %v10241_v24, %v4932_v50 }
 0xe0b   : > { %v7462_v2 = vpop.permute.xlu0 %7461 }
 0xe0c   : > { %v4958_v45 = vsel %vm1514_vm12, %v10512_v17, -inf  ;;  %v7463_v62 = vunpack.i.l.bf16 %v7462_v2  ;;  %v7464_v56 = vunpack.i.h.bf16 %v7462_v2 }
 0xe0d   : > { %4959 = vmax.xlane.f32.xlu1 %v4958_v45 }
 0xe0f   : > { %v7457_v34 = vpop.permute.xlu1 %7456  ;;  %v4916_v20 = vpop.f32.mrf.mxu0 }
 0xe10   : > { %v7458_v25 = vunpack.i.l.bf16 %v7457_v34  ;;  %v4933_v6 = vmul.f32 0.35355338, %v4916_v20  ;;  %v7459_v32 = vunpack.i.h.bf16 %v7457_v34  ;;  %v4493_v34 = vsub.f32 %v10410_v21, %v4474_v5 }
 0xe12   : > { %4632 = vmatpush.msra.mxu1 %v7458_v25  ;;  %v10519_v1 = vadd.f32 %v10241_v24, %v4933_v6  ;;  %v4505_v20 = vmul.f32 1.442695, %v4493_v34 }
 0xe14   : > { %4633 = vmatpush.msra.mxu1 %v7459_v32  ;;  %v4961_v10 = vsel %vm1514_vm12, %v10519_v1, -inf  ;;  %7783 = vpow2.f32 %v4505_v20 }
 0xe15   : > { %4962 = vmax.xlane.f32.xlu1 %v4961_v10 }
 0xe16   : > { %4634 = vmatpush.msra.mxu1 %v7463_v62 }
 0xe17   : > { %v4919_v16 = vpop.f32.mrf.mxu0  ;;  %v7472_v33 = vpop.permute.xlu1 %7471 }
 0xe18   : > { %4635 = vmatpush.msra.mxu1 %v7464_v56  ;;  %v4934_v28 = vmul.f32 0.35355338, %v4919_v16  ;;  %v7473_v7 = vunpack.i.l.bf16 %v7472_v33  ;;  %v7474_v36 = vunpack.i.h.bf16 %v7472_v33 }
 0xe1a   : > { %4636 = vmatpush.msra.mxu1 %v7468_v18  ;;  %v10524_v58 = vadd.f32 %v10241_v24, %v4934_v28  ;;  %v10540_v6 = vpop.eup %7783  ;;  %v4503_v18 = vmul.f32 1.442695, %v4492_v48  ;;  %v4507_v28 = vmul.f32 1.442695, %v4494_v15 }
 0xe1b   : > { %v4526_v21 = vsel %vm1514_vm12, %v10540_v6, 0.0 }
 0xe1c   : > { %4637 = vmatpush.msra.mxu1 %v7469_v14  ;;  %v4964_v61 = vsel %vm1514_vm12, %v10524_v58, -inf }
 0xe1d   : > { %4965 = vmax.xlane.f32.xlu2 %v4964_v61 }
 0xe1e   : > { %4638 = vmatpush.msra.mxu1 %v7473_v7  ;;  %v4509_v7 = vmul.f32 1.442695, %v4495_v35 }
 0xe1f   : > { %v4922_v56 = vpop.f32.mrf.mxu0 }
 0xe20   : > { %4639 = vmatpush.msra.mxu1 %v7474_v36  ;;  %v4935_v16 = vmul.f32 0.35355338, %v4922_v56 }
 0xe22   : > { %4640 = vmatpush.msra.mxu1 %v4572_v49  ;;  %v10561_v39 = vadd.f32 %v10241_v24, %v4935_v16 }
 0xe2e   : > { %7476 = vrot.lane.b32.xlu1 %v10133_v53, %s8245_s29 }
 0xe35   : > { %7481 = vrot.lane.b32.xlu2 %v10107_v13, %s8245_s29 }
 0xe36   : > { %7491 = vrot.lane.b32.xlu1 %v10133_v53, %s8246_s23  ;;  %v4486_v2 = vpop.xlane.xlu0 %4485 }
 0xe3f   : > { %v4318_v50 = vpop.f32.mrf.mxu2 }
 0xe40   : > { %6995 = vmatmul.msk.f32.gmra.mxu3 %vm1394_vm11, %v4318_v50 }
 0xe47   : > { %v4321_v45 = vpop.f32.mrf.mxu2 }
 0xe48   : > { %6996 = vmatmul.msk.f32.gmra.mxu3 %vm1394_vm11, %v4321_v45  ;;  %v4489_v45 = vpop.xlane.xlu2 %4488 }
 0xe4f   : > { %v4324_v25 = vpop.f32.mrf.mxu2 }
 0xe50   : > { %6997 = vmatmul.msk.f32.gmra.mxu3 %vm1394_vm11, %v4324_v25  ;;  %v10598_v25 = vpop.f32.mrf.mxu3 }
 0xe57   : > { %v4418_v53 = vpop.f32.mrf.mxu2 }
 0xe58   : > { %7043 = vmatmul.msk.f32.vlgmr.msrb.gmra.mxu3 %vm1394_vm11, %v10403_v23  ;;  %v4445_v32 = vmul.f32 0.35355338, %v4418_v53 }
 0xe5a   : > { %v10550_v23 = vadd.f32 %v10241_v24, %v4445_v32  ;;  %v10611_v32 = vpop.f32.mrf.mxu3 }
 0xe60   : > { %v4948_v62 = vpop.xlane.xlu0 %4947  ;;  %7044 = vmatmul.msk.f32.gmra.mxu3 %vm1394_vm11, %v10406_v12  ;;  %4527 = vadd.xlane.f32.xlu1 %v4526_v21  ;;  %v4463_v12 = vsel %vm1514_vm12, %v10550_v23, -inf }
 0xe61   : > { %v4973_v5 = vsub.f32 %v10480_v40, %v4948_v62 }
 0xe63   : > { %v4982_v10 = vmul.f32 1.442695, %v4973_v5  ;;  %v10623_v5 = vpop.f32.mrf.mxu3 }
 0xe65   : > { %7785 = vpow2.f32 %v4982_v10 }
 0xe66   : > { %7787 = vpow2.f32 %v4503_v18 }
 0xe67   : > { %7789 = vpow2.f32 %v4507_v28 }
 0xe68   : > { %7045 = vmatmul.msk.f32.gmra.mxu3 %vm1394_vm11, %v10412_v27  ;;  %4464 = vmax.xlane.f32.xlu1 %v4463_v12  ;;  %v4967_v27 = vsel %vm1514_vm12, %v10561_v39, -inf  ;;  %7791 = vpow2.f32 %v4509_v7  ;;  %v4951_v48 = vpop.xlane.xlu0 %4950 }
 0xe6b   : > { %v10556_v40 = vpop.eup %7785 }
 0xe6c   : > { %v5000_v33 = vsel %vm1514_vm12, %v10556_v40, 0.0  ;;  %v10569_v14 = vpop.eup %7787 }
 0xe6d   : > { %5001 = vadd.xlane.f32.xlu0 %v5000_v33  ;;  %v4523_v60 = vsel %vm1514_vm12, %v10569_v14, 0.0  ;;  %v10577_v61 = vpop.eup %7789 }
 0xe6e   : > { %v4529_v49 = vsel %vm1514_vm12, %v10577_v61, 0.0  ;;  %v10587_v4 = vpop.eup %7791 }
 0xe6f   : > { %v4532_v50 = vsel %vm1514_vm12, %v10587_v4, 0.0 }
 0xe70   : > { %7046 = vmatmul.msk.f32.gmra.mxu3 %vm1394_vm11, %v10428_v19  ;;  %4968 = vmax.xlane.f32.xlu1 %v4967_v27  ;;  %v4496_v19 = vsub.f32 %v10398_v30, %v10514_v46  ;;  %v10581_v36 = vpop.xlane.xlu1 %4953 }
 0xe72   : > { %v4511_v42 = vmul.f32 1.442695, %v4496_v19 }
 0xe74   : > { %7793 = vpow2.f32 %v4511_v42 }
 0xe75   : > { %4524 = vadd.xlane.f32.xlu0 %v4523_v60 }
 0xe78   : > { %7047 = vmatmul.msk.f32.gmra.mxu3 %vm1394_vm11, %v10434_v63  ;;  %v4497_v63 = vsub.f32 %v10463_v51, %v4486_v2  ;;  %v10592_v30 = vpop.xlane.xlu1 %4956 }
 0xe7a   : > { %v4513_v46 = vmul.f32 1.442695, %v4497_v63  ;;  %v10596_v34 = vpop.eup %7793 }
 0xe7b   : > { %v4535_v51 = vsel %vm1514_vm12, %v10596_v34, 0.0  ;;  %v7487_v15 = vpop.permute.xlu0 %7486 }
 0xe7c   : > { %7795 = vpow2.f32 %v4513_v46  ;;  %v7488_v27 = vunpack.i.l.bf16 %v7487_v15  ;;  %v7489_v60 = vunpack.i.h.bf16 %v7487_v15 }
 0xe7d   : > { %4530 = vadd.xlane.f32.xlu0 %v4529_v49 }
 0xe80   : > { %7048 = vmatmul.msk.f32.gmra.mxu3 %vm1394_vm11, %v10438_v11  ;;  %v4498_v11 = vsub.f32 %v10456_v29, %v4489_v45  ;;  %v10603_v2 = vpop.xlane.xlu1 %4959 }
 0xe82   : > { %v4515_v20 = vmul.f32 1.442695, %v4498_v11  ;;  %v10607_v53 = vpop.eup %7795 }
 0xe84   : > { %7797 = vpow2.f32 %v4515_v20 }
 0xe85   : > { %4533 = vadd.xlane.f32.xlu0 %v4532_v50  ;;  %v4421_v50 = vpop.f32.mrf.mxu2 }
 0xe86   : > { %v4446_v46 = vmul.f32 0.35355338, %v4421_v50 }
 0xe88   : > { %7049 = vmatmul.msk.f32.gmra.mxu3 %vm1394_vm11, %v10453_v3  ;;  %v4538_v3 = vsel %vm1514_vm12, %v10607_v53, 0.0  ;;  %v10617_v62 = vpop.xlane.xlu1 %4962 }
 0xe8a   : > { %v10615_v29 = vpop.eup %7797 }
 0xe8d   : > { %4536 = vadd.xlane.f32.xlu0 %v4535_v51  ;;  %v10642_v51 = vadd.f32 %v10241_v24, %v4446_v46  ;;  %v4974_v46 = vsub.f32 %v10487_v59, %v4951_v48 }
 0xe8f   : > { %v4466_v20 = vsel %vm1514_vm12, %v10642_v51, -inf }
 0xe90   : > { %7050 = vmatmul.msk.f32.gmra.mxu3 %vm1394_vm11, %v10498_v47  ;;  %v10619_v21 = vpop.xlane.xlu2 %4965  ;;  %v4541_v47 = vsel %vm1514_vm12, %v10615_v29, 0.0 }
 0xe95   : > { %4539 = vadd.xlane.f32.xlu0 %v4538_v3 }
 0xe98   : > { %7051 = vmatmul.msk.f32.gmra.mxu3 %vm1394_vm11, %v10484_v26  ;;  %v7482_v18 = vpop.permute.xlu2 %7481  ;;  %v10625_v26 = vpop.f32.mrf.mxu3 }
 0xe99   : > { %v7483_v12 = vunpack.i.l.bf16 %v7482_v18  ;;  %v7484_v33 = vunpack.i.h.bf16 %v7482_v18 }
 0xe9d   : > { %4542 = vadd.xlane.f32.xlu0 %v4541_v47 }
 0xea0   : > { %v7477_v10 = vpop.permute.xlu1 %7476  ;;  %v10627_v19 = vpop.f32.mrf.mxu3 }
 0xea1   : > { %v7478_v56 = vunpack.i.l.bf16 %v7477_v10  ;;  %v7479_v16 = vunpack.i.h.bf16 %v7477_v10 }
 0xea3   : > { %5106 = vmatpush.msrb.mxu1 %v7478_v56 }
 0xea5   : > { %5107 = vmatpush.msrb.mxu1 %v7479_v16 }
 0xea7   : > { %5108 = vmatpush.msrb.mxu1 %v7483_v12 }
 0xea8   : > { %v7492_v28 = vpop.permute.xlu1 %7491  ;;  %v10631_v49 = vpop.f32.mrf.mxu3 }
 0xea9   : > { %v7493_v35 = vunpack.i.l.bf16 %v7492_v28  ;;  %5109 = vmatpush.msrb.mxu1 %v7484_v33  ;;  %v7494_v7 = vunpack.i.h.bf16 %v7492_v28 }
 0xeab   : > { %5110 = vmatpush.msrb.mxu1 %v7488_v27  ;;  %5518 = vmatpush.msrb.mxu0 %v7493_v35 }
 0xead   : > { %5111 = vmatpush.msrb.mxu1 %v7489_v60  ;;  %5519 = vmatpush.msrb.mxu0 %v7494_v7 }
 0xeb1   : > { %7496 = vrot.lane.b32.xlu0 %v10449_v22, %s8245_s29 }
 0xec3   : > { %v10633_v42 = vpop.f32.mrf.mxu3 }
 0xec4   : > { %11146 = vst [vmem:[#allocation26_spill] sm:$0xff] %v10633_v42 }
 0xecb   : > { %v10635_v63 = vpop.f32.mrf.mxu3 }
 0xecc   : > { %11147 = vst [vmem:[#allocation27_spill] sm:$0xff] %v10635_v63 }
 0xed3   : > { %v10637_v45 = vpop.f32.mrf.mxu3  ;;  %v10639_v11 = vpop.xlane.xlu1 %4527 }
 0xed4   : > { %11148 = vst [vmem:[#allocation28_spill] sm:$0xff] %v10637_v45 }
 0xedb   : > { %v5313_v3 = vpop.f32.mrf.mxu3  ;;  %4467 = vmax.xlane.f32.xlu0 %v4466_v20  ;;  %v4465_v10 = vpop.xlane.xlu1 %4464 }
 0xedc   : > { %v5340_v47 = vmul.f32 0.35355338, %v5313_v3  ;;  %v4490_v56 = vsub.f32 %v10550_v23, %v4465_v10  ;;  %v4984_v3 = vmul.f32 1.442695, %v4974_v46 }
 0xede   : > { %v10648_v18 = vadd.f32 %v10241_v24, %v5340_v47  ;;  %v4499_v16 = vmul.f32 1.442695, %v4490_v56 }
 0xee0   : > { %v10650_v12 = vpop.xlane.xlu0 %5001  ;;  %v5358_v15 = vsel %vm1514_vm12, %v10648_v18, -inf  ;;  %7799 = vpow2.f32 %v4499_v16 }
 0xee1   : > { %5359 = vmax.xlane.f32.xlu1 %v5358_v15  ;;  %7801 = vpow2.f32 %v4984_v3 }
 0xee3   : > { %v5316_v23 = vpop.f32.mrf.mxu3 }
 0xee4   : > { %v5341_v48 = vmul.f32 0.35355338, %v5316_v23 }
 0xee6   : > { %v10654_v33 = vpop.eup %7799 }
 0xee7   : > { %v4517_v28 = vsel %vm1514_vm12, %v10654_v33, 0.0 }
 0xee8   : > { %4518 = vadd.xlane.f32.xlu2 %v4517_v28  ;;  %v10658_v27 = vpop.xlane.xlu0 %4524 }
 0xeeb   : > { %v5319_v60 = vpop.f32.mrf.mxu3 }
 0xeef   : > { %7501 = vrot.lane.b32.xlu0 %v10107_v13, %s8246_s23  ;;  %v10673_v13 = vpop.eup %7801 }
 0xef0   : > { %v10662_v35 = vpop.xlane.xlu0 %4530  ;;  %v5003_v15 = vsel %vm1514_vm12, %v10673_v13, 0.0 }
 0xef3   : > { %v5322_v50 = vpop.f32.mrf.mxu3 }
 0xef4   : > { %v5343_v23 = vmul.f32 0.35355338, %v5322_v50 }
 0xef6   : > { %v10698_v54 = vadd.f32 %v10685_v8, %v5343_v23 }
 0xef8   : > { %v10664_v7 = vpop.xlane.xlu0 %4533 }
 0xefb   : > { %v5325_v47 = vpop.f32.mrf.mxu3 }
 0xf00   : > { %7506 = vrot.lane.b32.xlu2 %v10422_v0, %s8246_s23  ;;  %v10669_v20 = vpop.xlane.xlu0 %4536 }
 0xf03   : > { %v5328_v56 = vpop.f32.mrf.mxu3 }
 0xf04   : > { %v5345_v16 = vmul.f32 0.35355338, %v5328_v56  ;;  %v10688_v56 = vadd.f32 %v10685_v8, %v5341_v48  ;;  %v5367_v48 = vsel %vm1514_vm12, %v10698_v54, -inf }
 0xf06   : > { %v10680_v0 = vadd.f32 %v10241_v24, %v5345_v16  ;;  %v5361_v24 = vsel %vm1514_vm12, %v10688_v56, -inf }
 0xf08   : > { %v10671_v10 = vpop.xlane.xlu0 %4539  ;;  %v5373_v59 = vsel %vm1514_vm12, %v10680_v0, -inf }
 0xf10   : > { %v10677_v28 = vpop.xlane.xlu0 %4542 }
 0xf19   : > { %5004 = vadd.xlane.f32.xlu0 %v5003_v15  ;;  %v5342_v15 = vmul.f32 0.35355338, %v5319_v60  ;;  %v5344_v60 = vmul.f32 0.35355338, %v5325_v47 }
 0xf1b   : > { %v10693_v16 = vadd.f32 %v10685_v8, %v5342_v15  ;;  %v10707_v50 = vadd.f32 %v10685_v8, %v5344_v60 }
 0xf21   : > { %5374 = vmax.xlane.f32.xlu0 %v5373_v59  ;;  %v5364_v59 = vsel %vm1514_vm12, %v10693_v16, -inf }
 0xf23   : > { %v7497_v46 = vpop.permute.xlu0 %7496 }
 0xf24   : > { %v7498_v3 = vunpack.i.l.bf16 %v7497_v46  ;;  %v7499_v45 = vunpack.i.h.bf16 %v7497_v46 }
 0xf26   : > { %5112 = vmatpush.msrb.mxu1 %v7498_v3  ;;  %v5370_v3 = vsel %vm1514_vm12, %v10707_v50, -inf }
 0xf28   : > { %5113 = vmatpush.msrb.mxu1 %v7499_v45  ;;  %v4975_v45 = vsub.f32 %v10494_v31, %v10581_v36  ;;  %v10715_v36 = vpop.xlane.xlu1 %4968 }
 0xf29   : > { %5362 = vmax.xlane.f32.xlu2 %v5361_v24 }
 0xf2a   : > { %v4986_v46 = vmul.f32 1.442695, %v4975_v45 }
 0xf2c   : > { %7803 = vpow2.f32 %v4986_v46 }
 0xf31   : > { %5365 = vmax.xlane.f32.xlu2 %v5364_v59 }
 0xf32   : > { %v10711_v15 = vpop.eup %7803 }
 0xf33   : > { %v5006_v31 = vsel %vm1514_vm12, %v10711_v15, 0.0 }
 0xf35   : > { %7511 = vrot.lane.b32.xlu0 %v10449_v22, %s8246_s23  ;;  %v5331_v22 = vpop.f32.mrf.mxu3 }
 0xf36   : > { %v5346_v24 = vmul.f32 0.35355338, %v5331_v22 }
 0xf38   : > { %v10718_v47 = vadd.f32 %v10685_v8, %v5346_v24 }
 0xf39   : > { %5368 = vmax.xlane.f32.xlu2 %v5367_v48 }
 0xf3a   : > { %v5376_v60 = vsel %vm1514_vm12, %v10718_v47, -inf }
 0xf41   : > { %5371 = vmax.xlane.f32.xlu2 %v5370_v3  ;;  %v4976_v3 = vsub.f32 %v10503_v44, %v10592_v30 }
 0xf49   : > { %5007 = vadd.xlane.f32.xlu2 %v5006_v31 }
 0xf4e   : > { %v4468_v23 = vpop.xlane.xlu0 %4467 }
 0xf4f   : > { %v4491_v59 = vsub.f32 %v10642_v51, %v4468_v23  ;;  %v4988_v51 = vmul.f32 1.442695, %v4976_v3 }
 0xf51   : > { %v4501_v45 = vmul.f32 1.442695, %v4491_v59  ;;  %5377 = vmax.xlane.f32.xlu2 %v5376_v60 }
 0xf53   : > { %7805 = vpow2.f32 %v4501_v45 }
 0xf54   : > { %v5360_v48 = vpop.xlane.xlu1 %5359 }
 0xf55   : > { %v5385_v46 = vsub.f32 %v10648_v18, %v5360_v48 }
 0xf57   : > { %v5394_v22 = vmul.f32 1.442695, %v5385_v46 }
 0xf59   : > { %v10726_v31 = vpop.eup %7805  ;;  %7807 = vpow2.f32 %v5394_v22 }
 0xf5a   : > { %v4520_v24 = vsel %vm1514_vm12, %v10726_v31, 0.0 }
 0xf5b   : > { %4521 = vadd.xlane.f32.xlu1 %v4520_v24  ;;  %v4519_v23 = vpop.xlane.xlu2 %4518 }
 0xf5c   : > { %7809 = vrcp.f32 %v4519_v23 }
 0xf5d   : > { %7811 = vpow2.f32 %v4988_v51 }
 0xf5f   : > { %v10730_v59 = vpop.eup %7807 }
 0xf60   : > { %v5412_v18 = vsel %vm1514_vm12, %v10730_v59, 0.0 }
 0xf61   : > { %5413 = vadd.xlane.f32.xlu2 %v5412_v18  ;;  %v7502_v45 = vpop.permute.xlu0 %7501 }
 0xf62   : > { %v7503_v44 = vunpack.i.l.bf16 %v7502_v45  ;;  %v7810_v30 = vpop.eup %7809  ;;  %v7504_v48 = vunpack.i.h.bf16 %v7502_v45 }
 0xf63   : > { %v4553_v60 = vmul.f32 %v7810_v30, %v10654_v33  ;;  %v7507_v46 = vpop.permute.xlu2 %7506  ;;  %v10735_v22 = vpop.eup %7811 }
 0xf64   : > { %5520 = vmatpush.msrb.mxu0 %v7503_v44  ;;  %v7508_v3 = vunpack.i.l.bf16 %v7507_v46  ;;  %v7509_v24 = vunpack.i.h.bf16 %v7507_v46  ;;  %v5009_v51 = vsel %vm1514_vm12, %v10735_v22, 0.0  ;;  %v5334_v33 = vpop.f32.mrf.mxu3 }
 0xf65   : > { %6971 = vmatmul.msk.f32.vlgmr.msra.gmra.mxu1 %vm1514_vm12, %v4553_v60  ;;  %v5347_v23 = vmul.f32 0.35355338, %v5334_v33 }
 0xf66   : > { %5521 = vmatpush.msrb.mxu0 %v7504_v48 }
 0xf67   : > { %v10745_v45 = vadd.f32 %v10685_v8, %v5347_v23  ;;  %v4977_v23 = vsub.f32 %v10512_v17, %v10603_v2  ;;  %v4978_v17 = vsub.f32 %v10519_v1, %v10617_v62  ;;  %v4979_v1 = vsub.f32 %v10524_v58, %v10619_v21 }
 0xf68   : > { %5522 = vmatpush.msrb.mxu0 %v7508_v3  ;;  %v4980_v21 = vsub.f32 %v10561_v39, %v10715_v36 }
 0xf69   : > { %5010 = vadd.xlane.f32.xlu2 %v5009_v51  ;;  %v5379_v30 = vsel %vm1514_vm12, %v10745_v45, -inf }
 0xf6a   : > { %5523 = vmatpush.msrb.mxu0 %v7509_v24  ;;  %v4925_v24 = vpop.f32.mrf.mxu0 }
 0xf6b   : > { %v4936_v42 = vmul.f32 0.35355338, %v4925_v24  ;;  %v4992_v24 = vmul.f32 1.442695, %v4978_v17  ;;  %v4669_v17 = vld [vmem:[#allocation4 + $0x28] sm:$0xff] }
 0xf6c   : > { %4712 = vmatpush.msrb.mxu2 %v4669_v17 }
 0xf74   : > { %5045 = vrot.lane.b32.xlu1 %v10162_v52, %s8245_s29 }
 0xf8c   : > { %v10742_v18 = vpop.xlane.xlu0 %5004 }
 0xf94   : > { %v5375_v48 = vpop.xlane.xlu0 %5374 }
 0xf95   : > { %v5390_v62 = vsub.f32 %v10680_v0, %v5375_v48 }
 0xf9c   : > { %v5363_v44 = vpop.xlane.xlu2 %5362 }
 0xf9d   : > { %v5386_v60 = vsub.f32 %v10688_v56, %v5363_v44 }
 0xf9e   : > { %5380 = vmax.xlane.f32.xlu1 %v5379_v30  ;;  %v4990_v30 = vmul.f32 1.442695, %v4977_v23 }
 0xf9f   : > { %v5396_v46 = vmul.f32 1.442695, %v5386_v60 }
 0xfa1   : > { %7813 = vpow2.f32 %v5396_v46  ;;  %v5337_v46 = vpop.f32.mrf.mxu3 }
 0xfa2   : > { %v5348_v2 = vmul.f32 0.35355338, %v5337_v46 }
 0xfa4   : > { %v5366_v3 = vpop.xlane.xlu2 %5365 }
 0xfa5   : > { %v5387_v51 = vsub.f32 %v10693_v16, %v5366_v3  ;;  %v10758_v16 = vadd.f32 %v10685_v8, %v4936_v42  ;;  %v10769_v42 = vadd.f32 %v10685_v8, %v5348_v2  ;;  %v4996_v2 = vmul.f32 1.442695, %v4980_v21 }
 0xfa7   : > { %v7512_v33 = vpop.permute.xlu0 %7511  ;;  %v10751_v63 = vpop.eup %7813  ;;  %v5398_v57 = vmul.f32 1.442695, %v5387_v51 }
 0xfa8   : > { %v7513_v38 = vunpack.i.l.bf16 %v7512_v33  ;;  %v5415_v56 = vsel %vm1514_vm12, %v10751_v63, 0.0  ;;  %v7514_v44 = vunpack.i.h.bf16 %v7512_v33 }
 0xfa9   : > { %7815 = vpow2.f32 %v5398_v57  ;;  %5416 = vadd.xlane.f32.xlu0 %v5415_v56  ;;  %v4970_v57 = vsel %vm1514_vm12, %v10758_v16, -inf }
 0xfaa   : > { %5524 = vmatpush.msrb.mxu0 %v7513_v38  ;;  %7817 = vpow2.f32 %v4990_v30  ;;  %v5404_v30 = vmul.f32 1.442695, %v5390_v62 }
 0xfab   : > { %7819 = vpow2.f32 %v4992_v24 }
 0xfac   : > { %5525 = vmatpush.msrb.mxu0 %v7514_v44  ;;  %v5369_v60 = vpop.xlane.xlu2 %5368  ;;  %v5382_v44 = vsel %vm1514_vm12, %v10769_v42, -inf }
 0xfaf   : > { %v10760_v3 = vpop.eup %7815 }
 0xfb0   : > { %v5418_v38 = vsel %vm1514_vm12, %v10760_v3, 0.0  ;;  %v10771_v33 = vpop.eup %7817 }
 0xfb1   : > { %4971 = vmax.xlane.f32.xlu0 %v4970_v57  ;;  %5419 = vadd.xlane.f32.xlu2 %v5418_v38  ;;  %v5012_v8 = vsel %vm1514_vm12, %v10771_v33, 0.0  ;;  %v10785_v58 = vpop.eup %7819 }
 0xfb2   : > { %v5015_v0 = vsel %vm1514_vm12, %v10785_v58, 0.0 }
 0xfb4   : > { %v5372_v51 = vpop.xlane.xlu2 %5371 }
 0xfb5   : > { %v5389_v23 = vsub.f32 %v10707_v50, %v5372_v51  ;;  %v4994_v50 = vmul.f32 1.442695, %v4979_v1 }
 0xfb7   : > { %5457 = vrot.lane.b32.xlu1 %v10162_v52, %s8246_s23  ;;  %v5402_v56 = vmul.f32 1.442695, %v5389_v23 }
 0xfb9   : > { %7821 = vpow2.f32 %v5402_v56  ;;  %5383 = vmax.xlane.f32.xlu0 %v5382_v44  ;;  %5013 = vadd.xlane.f32.xlu2 %v5012_v8  ;;  %v5388_v56 = vsub.f32 %v10698_v54, %v5369_v60 }
 0xfba   : > { %7823 = vpow2.f32 %v4994_v50 }
 0xfbb   : > { %7825 = vpow2.f32 %v5404_v30  ;;  %v5400_v50 = vmul.f32 1.442695, %v5388_v56 }
 0xfbc   : > { %v10783_v46 = vpop.xlane.xlu2 %5007  ;;  %7827 = vpow2.f32 %v4996_v2 }
 0xfbf   : > { %v10787_v52 = vpop.eup %7821 }
 0xfc0   : > { %v5424_v48 = vsel %vm1514_vm12, %v10787_v52, 0.0  ;;  %v10795_v57 = vpop.eup %7823 }
 0xfc1   : > { %5016 = vadd.xlane.f32.xlu2 %v5015_v0  ;;  %5425 = vadd.xlane.f32.xlu0 %v5424_v48  ;;  %v10797_v24 = vpop.eup %7825  ;;  %v5018_v36 = vsel %vm1514_vm12, %v10795_v57, 0.0 }
 0xfc2   : > { %v5427_v23 = vsel %vm1514_vm12, %v10797_v24, 0.0  ;;  %v10804_v1 = vpop.eup %7827 }
 0xfc4   : > { %v5378_v38 = vpop.xlane.xlu2 %5377 }
 0xfc5   : > { %v5391_v51 = vsub.f32 %v10718_v47, %v5378_v38  ;;  %v5021_v47 = vsel %vm1514_vm12, %v10804_v1, 0.0 }
 0xfc7   : > { %v5406_v39 = vmul.f32 1.442695, %v5391_v51 }
 0xfc9   : > { %7829 = vpow2.f32 %v5406_v39  ;;  %5019 = vadd.xlane.f32.xlu2 %v5018_v36  ;;  %5428 = vadd.xlane.f32.xlu0 %v5427_v23 }
 0xfce   : > { %v4522_v62 = vpop.xlane.xlu1 %4521 }
 0xfcf   : > { %7831 = vrcp.f32 %v4522_v62  ;;  %v10807_v44 = vpop.eup %7829 }
 0xfd0   : > { %v5430_v8 = vsel %vm1514_vm12, %v10807_v44, 0.0  ;;  %7833 = vrcp.f32 %v10658_v27 }
 0xfd1   : > { %5022 = vadd.xlane.f32.xlu2 %v5021_v47  ;;  %5431 = vadd.xlane.f32.xlu0 %v5430_v8  ;;  %7835 = vpow2.f32 %v5400_v50 }
 0xfd2   : > { %7837 = vrcp.f32 %v10639_v11 }
 0xfd3   : > { %7839 = vrcp.f32 %v10662_v35 }
 0xfd4   : > { %7841 = vrcp.f32 %v10664_v7  ;;  %v5414_v36 = vpop.xlane.xlu2 %5413 }
 0xfd5   : > { %v7832_v30 = vpop.eup %7831  ;;  %7843 = vrcp.f32 %v10669_v20 }
 0xfd6   : > { %v4554_v21 = vmul.f32 %v7832_v30, %v10726_v31  ;;  %v7834_v54 = vpop.eup %7833  ;;  %7845 = vrcp.f32 %v10671_v10 }
 0xfd7   : > { %v10816_v60 = vpop.eup %7835  ;;  %v4555_v0 = vmul.f32 %v7834_v54, %v10569_v14  ;;  %7847 = vrcp.f32 %v10677_v28 }
 0xfd8   : > { %6972 = vmatmul.msk.f32.gmra.mxu1 %vm1514_vm12, %v4554_v21  ;;  %v5421_v48 = vsel %vm1514_vm12, %v10816_v60, 0.0  ;;  %v7838_v17 = vpop.eup %7837  ;;  %7849 = vrcp.f32 %v10650_v12 }
 0xfd9   : > { %v4556_v2 = vmul.f32 %v7838_v17, %v10540_v6  ;;  %v7840_v11 = vpop.eup %7839  ;;  %7851 = vrcp.f32 %v10742_v18 }
 0xfda   : > { %v4557_v14 = vmul.f32 %v7840_v11, %v10577_v61  ;;  %v7842_v38 = vpop.eup %7841 }
 0xfdb   : > { %v4558_v51 = vmul.f32 %v7842_v38, %v10587_v4  ;;  %v7844_v35 = vpop.eup %7843 }
 0xfdc   : > { %v4559_v6 = vmul.f32 %v7844_v35, %v10596_v34  ;;  %v7846_v39 = vpop.eup %7845 }
 0xfdd   : > { %v4560_v61 = vmul.f32 %v7846_v39, %v10607_v53  ;;  %v7848_v7 = vpop.eup %7847 }
 0xfde   : > { %v4561_v4 = vmul.f32 %v7848_v7, %v10615_v29  ;;  %v7850_v34 = vpop.eup %7849  ;;  %v5011_v29 = vpop.xlane.xlu2 %5010 }
 0xfdf   : > { %v5036_v28 = vmul.f32 %v7850_v34, %v10556_v40  ;;  %v7852_v53 = vpop.eup %7851 }
 0xfe0   : > { %6973 = vmatmul.msk.f32.gmra.mxu1 %vm1514_vm12, %v4555_v0  ;;  %v5037_v56 = vmul.f32 %v7852_v53, %v10673_v13 }
 0xfe1   : > { %5422 = vadd.xlane.f32.xlu1 %v5421_v48 }
 0xfe2   : > { %v4642_v27 = vpop.f32.mrf.mxu1 }
 0xfe3   : > { %6980 = vmatmul.msk.f32.vlgmr.msrb.gmra.mxu2 %vm1394_vm11, %v4642_v27 }
 0xfe6   : > { %v5046_v31 = vpop.permute.xlu1 %5045 }
 0xfe7   : > { %5114 = vmatpush.msrb.mxu1 %v5046_v31 }
 0xfe8   : > { %6974 = vmatmul.msk.f32.gmra.mxu1 %vm1514_vm12, %v4556_v2 }
 0xff0   : > { %6975 = vmatmul.msk.f32.gmra.mxu1 %vm1514_vm12, %v4557_v14 }
 0xff8   : > { %6976 = vmatmul.msk.f32.gmra.mxu1 %vm1514_vm12, %v4558_v51 }
0x1000   : > { %6977 = vmatmul.msk.f32.gmra.mxu1 %vm1514_vm12, %v4559_v6 }
0x1008   : > { %6978 = vmatmul.msk.f32.gmra.mxu1 %vm1514_vm12, %v4560_v61 }
0x1010   : > { %6979 = vmatmul.msk.f32.gmra.mxu1 %vm1514_vm12, %v4561_v4 }
0x1011   : > { %v5381_v20 = vpop.xlane.xlu1 %5380 }
0x1012   : > { %v5392_v10 = vsub.f32 %v10745_v45, %v5381_v20 }
0x1014   : > { %v5408_v23 = vmul.f32 1.442695, %v5392_v10 }
0x1016   : > { %7853 = vpow2.f32 %v5408_v23 }
0x1017   : > { %7855 = vrcp.f32 %v10783_v46 }
0x1018   : > { %7016 = vmatmul.msk.f32.vlgmr.msrb.gmra.mxu1 %vm1514_vm12, %v5036_v28  ;;  %7857 = vrcp.f32 %v5414_v36 }
0x1019   : > { %7859 = vrcp.f32 %v5011_v29 }
0x101c   : > { %v10846_v62 = vpop.eup %7853  ;;  %v5417_v12 = vpop.xlane.xlu0 %5416 }
0x101d   : > { %v5433_v45 = vsel %vm1514_vm12, %v10846_v62, 0.0  ;;  %v7856_v40 = vpop.eup %7855  ;;  %7861 = vrcp.f32 %v5417_v12 }
0x101e   : > { %5434 = vadd.xlane.f32.xlu2 %v5433_v45  ;;  %v7858_v8 = vpop.eup %7857  ;;  %v5038_v46 = vmul.f32 %v7856_v40, %v10711_v15 }
0x101f   : > { %v5448_v21 = vmul.f32 %v7858_v8, %v10730_v59  ;;  %v7860_v13 = vpop.eup %7859 }
0x1020   : > { %7017 = vmatmul.msk.f32.gmra.mxu1 %vm1514_vm12, %v5037_v56  ;;  %v5039_v15 = vmul.f32 %v7860_v13, %v10735_v22 }
0x1023   : > { %v7862_v17 = vpop.eup %7861 }
0x1024   : > { %v4972_v18 = vpop.xlane.xlu0 %4971  ;;  %v5420_v47 = vpop.xlane.xlu2 %5419  ;;  %v5449_v2 = vmul.f32 %v7862_v17, %v10751_v63 }
0x1025   : > { %v4981_v50 = vsub.f32 %v10758_v16, %v4972_v18 }
0x1027   : > { %v4998_v30 = vmul.f32 1.442695, %v4981_v50 }
0x1028   : > { %7018 = vmatmul.msk.f32.gmra.mxu1 %vm1514_vm12, %v5038_v46 }
0x1029   : > { %v5458_v54 = vpop.permute.xlu1 %5457  ;;  %7863 = vpow2.f32 %v4998_v30 }
0x102a   : > { %5526 = vmatpush.msrb.mxu0 %v5458_v54 }
0x102b   : > { %7052 = vmatmul.msk.f32.vlgmr.msrb.gmra.mxu0 %vm1514_vm12, %v5448_v21 }
0x102c   : > { %v5384_v0 = vpop.xlane.xlu0 %5383  ;;  %v5014_v48 = vpop.xlane.xlu2 %5013 }
0x102d   : > { %v5393_v27 = vsub.f32 %v10769_v42, %v5384_v0  ;;  %7865 = vrcp.f32 %v5014_v48 }
0x102e   : > { %7867 = vrcp.f32 %v5420_v47 }
0x102f   : > { %v10860_v16 = vpop.eup %7863  ;;  %v5410_v31 = vmul.f32 1.442695, %v5393_v27 }
0x1030   : > { %7019 = vmatmul.msk.f32.gmra.mxu1 %vm1514_vm12, %v5039_v15  ;;  %v5024_v59 = vsel %vm1514_vm12, %v10860_v16, 0.0 }
0x1031   : > { %7869 = vpow2.f32 %v5410_v31  ;;  %5025 = vadd.xlane.f32.xlu0 %v5024_v59 }
0x1033   : > { %7053 = vmatmul.msk.f32.gmra.mxu0 %vm1514_vm12, %v5449_v2  ;;  %v7866_v11 = vpop.eup %7865 }
0x1034   : > { %v5017_v42 = vpop.xlane.xlu2 %5016  ;;  %v7868_v14 = vpop.eup %7867  ;;  %v5040_v22 = vmul.f32 %v7866_v11, %v10771_v33 }
0x1035   : > { %7871 = vrcp.f32 %v5017_v42  ;;  %v5450_v35 = vmul.f32 %v7868_v14, %v10760_v3  ;;  %v5426_v20 = vpop.xlane.xlu0 %5425 }
0x1037   : > { %v10868_v38 = vpop.eup %7869 }
0x1038   : > { %7020 = vmatmul.msk.f32.gmra.mxu1 %vm1514_vm12, %v5040_v22  ;;  %v5436_v51 = vsel %vm1514_vm12, %v10868_v38, 0.0 }
0x1039   : > { %5437 = vadd.xlane.f32.xlu2 %v5436_v51 }
0x103b   : > { %7054 = vmatmul.msk.f32.gmra.mxu0 %vm1514_vm12, %v5450_v35  ;;  %v7872_v63 = vpop.eup %7871 }
0x103c   : > { %v5020_v6 = vpop.xlane.xlu2 %5019  ;;  %v5041_v39 = vmul.f32 %v7872_v63, %v10785_v58 }
0x103d   : > { %7873 = vrcp.f32 %v5020_v6 }
0x1040   : > { %7021 = vmatmul.msk.f32.gmra.mxu1 %vm1514_vm12, %v5041_v39 }
0x1043   : > { %v7874_v33 = vpop.eup %7873 }
0x1044   : > { %v5023_v61 = vpop.xlane.xlu2 %5022  ;;  %v5042_v7 = vmul.f32 %v7874_v33, %v10795_v57  ;;  %v5429_v57 = vpop.xlane.xlu0 %5428 }
0x1045   : > { %7875 = vrcp.f32 %v5023_v61 }
0x1048   : > { %7022 = vmatmul.msk.f32.gmra.mxu1 %vm1514_vm12, %v5042_v7 }
0x104b   : > { %v7876_v4 = vpop.eup %7875 }
0x104c   : > { %v5043_v3 = vmul.f32 %v7876_v4, %v10804_v1  ;;  %v5432_v29 = vpop.xlane.xlu0 %5431 }
0x1050   : > { %7023 = vmatmul.msk.f32.gmra.mxu1 %vm1514_vm12, %v5043_v3 }
0x1054   : > { %v5423_v10 = vpop.xlane.xlu1 %5422 }
0x1055   : > { %7877 = vrcp.f32 %v5423_v10  ;;  %v4645_v34 = vpop.f32.mrf.mxu1 }
0x1056   : > { %6981 = vmatmul.msk.f32.gmra.mxu2 %vm1394_vm11, %v4645_v34  ;;  %7879 = vrcp.f32 %v5426_v20 }
0x1057   : > { %7881 = vrcp.f32 %v5429_v57 }
0x1058   : > { %7883 = vrcp.f32 %v5432_v29 }
0x105b   : > { %v7878_v58 = vpop.eup %7877 }
0x105c   : > { %v5451_v36 = vmul.f32 %v7878_v58, %v10816_v60  ;;  %v7880_v28 = vpop.eup %7879 }
0x105d   : > { %v4648_v23 = vpop.f32.mrf.mxu1  ;;  %v5452_v1 = vmul.f32 %v7880_v28, %v10787_v52  ;;  %v7882_v12 = vpop.eup %7881  ;;  %v5143_v52 = vld [vmem:[#allocation4 + $0x30] sm:$0xff]  ;;  %v10930_v28 = vld [vmem:[%s11087_s8 + $0x1] ss:$0 sm:$0xff] }
0x105e   : > { %6982 = vmatmul.msk.f32.gmra.mxu2 %vm1394_vm11, %v4648_v23  ;;  %7055 = vmatmul.msk.f32.gmra.mxu0 %vm1514_vm12, %v5451_v36  ;;  %v5453_v60 = vmul.f32 %v7882_v12, %v10797_v24  ;;  %v7884_v56 = vpop.eup %7883 }
0x105f   : > { %v5454_v40 = vmul.f32 %v7884_v56, %v10807_v44  ;;  %5186 = vmatpush.msra.mxu2 %v5143_v52  ;;  %v5555_v44 = vld [vmem:[#allocation4 + $0x38] sm:$0xff] }
0x1060   : > { %5598 = vmatpush.msra.mxu1 %v5555_v44 }
0x1065   : > { %v4651_v53 = vpop.f32.mrf.mxu1 }
0x1066   : > { %6983 = vmatmul.msk.f32.gmra.mxu2 %vm1394_vm11, %v4651_v53  ;;  %7056 = vmatmul.msk.f32.gmra.mxu0 %vm1514_vm12, %v5452_v1 }
0x106d   : > { %v4654_v45 = vpop.f32.mrf.mxu1 }
0x106e   : > { %6984 = vmatmul.msk.f32.gmra.mxu2 %vm1394_vm11, %v4654_v45  ;;  %7057 = vmatmul.msk.f32.gmra.mxu0 %vm1514_vm12, %v5453_v60 }
0x1075   : > { %v4657_v18 = vpop.f32.mrf.mxu1 }
0x1076   : > { %6985 = vmatmul.msk.f32.gmra.mxu2 %vm1394_vm11, %v4657_v18  ;;  %7058 = vmatmul.msk.f32.gmra.mxu0 %vm1514_vm12, %v5454_v40 }
0x107d   : > { %v4660_v47 = vpop.f32.mrf.mxu1 }
0x107e   : > { %6986 = vmatmul.msk.f32.gmra.mxu2 %vm1394_vm11, %v4660_v47 }
0x1085   : > { %v4663_v8 = vpop.f32.mrf.mxu1 }
0x1086   : > { %6987 = vmatmul.msk.f32.gmra.mxu2 %vm1394_vm11, %v4663_v8 }
0x108d   : > { %v4666_v24 = vpop.f32.mrf.mxu1 }
0x108e   : > { %6988 = vmatmul.msk.f32.gmra.mxu2 %vm1394_vm11, %v4666_v24 }
0x1091   : > { %v5435_v50 = vpop.xlane.xlu2 %5434 }
0x1092   : > { %7885 = vrcp.f32 %v5435_v50 }
0x1095   : > { %v5116_v46 = vpop.f32.mrf.mxu1 }
0x1096   : > { %7025 = vmatmul.msk.f32.vlgmr.msra.gmra.mxu2 %vm1394_vm11, %v5116_v46 }
0x1098   : > { %v7886_v30 = vpop.eup %7885 }
0x1099   : > { %v5455_v21 = vmul.f32 %v7886_v30, %v10846_v62 }
0x109b   : > { %7059 = vmatmul.msk.f32.gmra.mxu0 %vm1514_vm12, %v5455_v21 }
0x109d   : > { %v5119_v54 = vpop.f32.mrf.mxu1 }
0x109e   : > { %7026 = vmatmul.msk.f32.gmra.mxu2 %vm1394_vm11, %v5119_v54 }
0x10a4   : > { %v5026_v13 = vpop.xlane.xlu0 %5025 }
0x10a5   : > { %v5122_v0 = vpop.f32.mrf.mxu1  ;;  %7887 = vrcp.f32 %v5026_v13 }
0x10a6   : > { %7027 = vmatmul.msk.f32.gmra.mxu2 %vm1394_vm11, %v5122_v0 }
0x10a8   : > { %v5528_v62 = vpop.f32.mrf.mxu0 }
0x10ab   : > { %v7888_v48 = vpop.eup %7887 }
0x10ac   : > { %v5438_v17 = vpop.xlane.xlu2 %5437  ;;  %v5044_v15 = vmul.f32 %v7888_v48, %v10860_v16 }
0x10ad   : > { %v5125_v27 = vpop.f32.mrf.mxu1  ;;  %7889 = vrcp.f32 %v5438_v17 }
0x10ae   : > { %7028 = vmatmul.msk.f32.gmra.mxu2 %vm1394_vm11, %v5125_v27  ;;  %7024 = vmatmul.msk.f32.gmra.mxu1 %vm1514_vm12, %v5044_v15 }
0x10b0   : > { %v5531_v11 = vpop.f32.mrf.mxu0 }
0x10b3   : > { %v7890_v31 = vpop.eup %7889 }
0x10b4   : > { %v5456_v2 = vmul.f32 %v7890_v31, %v10868_v38  ;;  %v4714_v38 = vpop.f32.mrf.mxu2 }
0x10b5   : > { %v5128_v59 = vpop.f32.mrf.mxu1  ;;  %v4786_v23 = vadd.f32 %v10598_v25, %v4714_v38 }
0x10b6   : > { %7029 = vmatmul.msk.f32.gmra.mxu2 %vm1394_vm11, %v5128_v59  ;;  %7060 = vmatmul.msk.f32.gmra.mxu0 %vm1514_vm12, %v5456_v2 }
0x10b7   : > { %7061 = vmatmul.msk.f32.vlgmr.msra.gmra.mxu1 %vm1394_vm11, %v5528_v62 }
0x10b8   : > { %v5534_v14 = vpop.f32.mrf.mxu0 }
0x10bd   : > { %v5131_v42 = vpop.f32.mrf.mxu1 }
0x10be   : > { %7030 = vmatmul.msk.f32.gmra.mxu2 %vm1394_vm11, %v5131_v42 }
0x10bf   : > { %7062 = vmatmul.msk.f32.gmra.mxu1 %vm1394_vm11, %v5531_v11 }
0x10c5   : > { %v5134_v16 = vpop.f32.mrf.mxu1 }
0x10c6   : > { %7031 = vmatmul.msk.f32.gmra.mxu2 %vm1394_vm11, %v5134_v16 }
0x10c7   : > { %7063 = vmatmul.msk.f32.gmra.mxu1 %vm1394_vm11, %v5534_v14 }
0x10cd   : > { %v5137_v22 = vpop.f32.mrf.mxu1 }
0x10ce   : > { %7032 = vmatmul.msk.f32.gmra.mxu2 %vm1394_vm11, %v5137_v22 }
0x10d9   : > { %v4717_v35 = vpop.f32.mrf.mxu2 }
0x10da   : > { %v4789_v45 = vadd.f32 %v10611_v32, %v4717_v35  ;;  %v11149_v35 = vld [vmem:[#allocation26_spill] sm:$0xff] }
0x10db   : > { %v5537_v51 = vpop.f32.mrf.mxu0 }
0x10dc   : > { %7064 = vmatmul.msk.f32.gmra.mxu1 %vm1394_vm11, %v5537_v51 }
0x10e1   : > { %v4720_v6 = vpop.f32.mrf.mxu2 }
0x10e2   : > { %v4792_v24 = vadd.f32 %v10623_v5, %v4720_v6  ;;  %v11150_v6 = vld [vmem:[#allocation23_spill] sm:$0xff] }
0x10e3   : > { %v5540_v63 = vpop.f32.mrf.mxu0 }
0x10e4   : > { %7065 = vmatmul.msk.f32.gmra.mxu1 %vm1394_vm11, %v5540_v63 }
0x10e9   : > { %v4723_v33 = vpop.f32.mrf.mxu2 }
0x10ea   : > { %v4795_v54 = vadd.f32 %v10625_v26, %v4723_v33 }
0x10eb   : > { %v5543_v39 = vpop.f32.mrf.mxu0 }
0x10ec   : > { %7066 = vmatmul.msk.f32.gmra.mxu1 %vm1394_vm11, %v5543_v39 }
0x10f1   : > { %v4726_v7 = vpop.f32.mrf.mxu2 }
0x10f2   : > { %v4798_v15 = vadd.f32 %v10627_v19, %v4726_v7 }
0x10f3   : > { %v5546_v61 = vpop.f32.mrf.mxu0 }
0x10f4   : > { %7067 = vmatmul.msk.f32.gmra.mxu1 %vm1394_vm11, %v5546_v61 }
0x10f9   : > { %v4729_v4 = vpop.f32.mrf.mxu2 }
0x10fa   : > { %v4801_v42 = vadd.f32 %v10631_v49, %v4729_v4  ;;  %v11151_v4 = vld [vmem:[#allocation22_spill] sm:$0xff] }
0x1101   : > { %v10918_v3 = vpop.f32.mrf.mxu2 }
0x1102   : > { %v4804_v63 = vadd.f32 %v11149_v35, %v10918_v3 }
0x1109   : > { %v10920_v20 = vpop.f32.mrf.mxu2 }
0x1111   : > { %v10923_v34 = vpop.f32.mrf.mxu2 }
0x1118   : > { %v5549_v10 = vpop.f32.mrf.mxu0 }
0x1119   : > { %7068 = vmatmul.msk.f32.gmra.mxu1 %vm1394_vm11, %v5549_v10  ;;  %v5188_v58 = vpop.f32.mrf.mxu2 }
0x111a   : > { %v5215_v57 = vadd.f32 %v5188_v58, %v4786_v23 }
0x1121   : > { %v5191_v12 = vpop.f32.mrf.mxu2 }
0x1122   : > { %v5216_v25 = vadd.f32 %v5191_v12, %v4789_v45  ;;  %v7250_v12 = vld [vmem:[#allocation6 + $0x78] sm:$0xff] }
0x1123   : > { %5960 = vmatpush.bf16.msrb.mxu2 %v7250_v12 }
0x1129   : > { %v5194_v8 = vpop.f32.mrf.mxu2 }
0x112a   : > { %v5217_v32 = vadd.f32 %v5194_v8, %v4792_v24  ;;  %v11154_v24 = vld [vmem:[#allocation28_spill] sm:$0xff] }
0x112b   : > { %v5140_v36 = vpop.f32.mrf.mxu1 }
0x112c   : > { %7033 = vmatmul.msk.f32.gmra.mxu2 %vm1394_vm11, %v5140_v36  ;;  %v11152_v36 = vld [vmem:[#allocation27_spill] sm:$0xff] }
0x112d   : > { %v4807_v23 = vadd.f32 %v11152_v36, %v10920_v20  ;;  %v7247_v20 = vld [vmem:[#allocation6 + $0x60] sm:$0xff] }
0x1131   : > { %v5197_v5 = vpop.f32.mrf.mxu2 }
0x1132   : > { %v5218_v13 = vadd.f32 %v5197_v5, %v4795_v54  ;;  %v7244_v54 = vld [vmem:[#allocation6 + $0x48] sm:$0xff] }
0x1133   : > { %v5552_v1 = vpop.f32.mrf.mxu0 }
0x1134   : > { %v5600_v53 = vpop.f32.mrf.mxu1  ;;  %7069 = vmatmul.msk.f32.gmra.mxu1 %vm1394_vm11, %v5552_v1 }
0x1135   : > { %v5627_v29 = vadd.f32 %v5600_v53, %v5215_v57 }
0x1137   : > { %v5641_v60 = vadd.f32 %v10930_v28, %v5627_v29 }
0x1139   : > { %v10936_v56 = vadd.f32 %v5641_v60, %v9773_v41  ;;  %v5200_v0 = vpop.f32.mrf.mxu2  ;;  %v11153_v60 = vld [vmem:[#allocation24_spill] sm:$0xff] }
0x113a   : > { %v5219_v62 = vadd.f32 %v5200_v0, %v4798_v15  ;;  %v7243_v15 = vld [vmem:[#allocation6 + $0x40] sm:$0xff] }
0x113b   : > { %5663 = vadd.xlane.f32.xlu1 %v10936_v56  ;;  %v5690_v40 = vmul.f32 %v10936_v56, %v10936_v56 }
0x113c   : > { %v5603_v18 = vpop.f32.mrf.mxu1 }
0x113d   : > { %v5628_v52 = vadd.f32 %v5603_v18, %v5216_v25  ;;  %5699 = vadd.xlane.f32.xlu2 %v5690_v40  ;;  %v7249_v40 = vld [vmem:[#allocation6 + $0x70] sm:$0xff]  ;;  %v7248_v18 = vld [vmem:[#allocation6 + $0x68] sm:$0xff] }
0x113e   : > { %5961 = vmatpush.bf16.msrb.mxu2 %v7249_v40 }
0x113f   : > { %v5642_v47 = vadd.f32 %v10930_v28, %v5628_v52  ;;  %v7246_v52 = vld [vmem:[#allocation6 + $0x58] sm:$0xff] }
0x1141   : > { %v10944_v50 = vadd.f32 %v5642_v47, %v9780_v37  ;;  %v5203_v26 = vpop.f32.mrf.mxu2  ;;  %v7245_v47 = vld [vmem:[#allocation6 + $0x50] sm:$0xff] }
0x1142   : > { %v5220_v19 = vadd.f32 %v5203_v26, %v4801_v42  ;;  %5962 = vmatpush.bf16.msrb.mxu2 %v7248_v18 }
0x1143   : > { %5665 = vadd.xlane.f32.xlu0 %v10944_v50  ;;  %v5691_v41 = vmul.f32 %v10944_v50, %v10944_v50 }
0x1144   : > { %v5606_v46 = vpop.f32.mrf.mxu1 }
0x1145   : > { %v5629_v44 = vadd.f32 %v5606_v46, %v5217_v32  ;;  %5701 = vadd.xlane.f32.xlu1 %v5691_v41  ;;  %v4810_v32 = vadd.f32 %v11154_v24, %v10923_v34 }
0x1146   : > { %5963 = vmatpush.bf16.msrb.mxu2 %v7247_v20 }
0x1147   : > { %v5643_v30 = vadd.f32 %v10930_v28, %v5629_v44 }
0x1149   : > { %v10951_v21 = vadd.f32 %v5643_v30, %v9787_v55  ;;  %v5206_v51 = vpop.f32.mrf.mxu2 }
0x114a   : > { %5964 = vmatpush.bf16.msrb.mxu2 %v7246_v52  ;;  %v11016_v52 = vld [vmem:[#allocation13 + $0x1] ss:$0 sm:$0xff] }
0x114b   : > { %5667 = vadd.xlane.f32.xlu0 %v10951_v21  ;;  %v5692_v37 = vmul.f32 %v10951_v21, %v10951_v21 }
0x114d   : > { %5703 = vadd.xlane.f32.xlu1 %v5692_v37 }
0x114e   : > { %5965 = vmatpush.bf16.msrb.mxu2 %v7245_v47 }
0x1151   : > { %v5209_v58 = vpop.f32.mrf.mxu2 }
0x1152   : > { %v5222_v57 = vadd.f32 %v5209_v58, %v4807_v23  ;;  %5966 = vmatpush.bf16.msrb.mxu2 %v7244_v54 }
0x1156   : > { %5967 = vmatpush.bf16.msrb.mxu2 %v7243_v15 }
0x1159   : > { %v5609_v48 = vpop.f32.mrf.mxu1 }
0x115a   : > { %v5630_v17 = vadd.f32 %v5609_v48, %v5218_v13 }
0x115c   : > { %v5644_v27 = vadd.f32 %v10930_v28, %v5630_v17 }
0x115e   : > { %v10960_v55 = vadd.f32 %v5644_v27, %v9794_v43 }
0x1160   : > { %5669 = vadd.xlane.f32.xlu2 %v10960_v55  ;;  %v5693_v31 = vmul.f32 %v10960_v55, %v10960_v55 }
0x1161   : > { %v5612_v59 = vpop.f32.mrf.mxu1 }
0x1162   : > { %v5631_v2 = vadd.f32 %v5612_v59, %v5219_v62  ;;  %5705 = vadd.xlane.f32.xlu0 %v5693_v31  ;;  %v11155_v31 = vld [vmem:[#allocation25_spill] sm:$0xff] }
0x1164   : > { %v5645_v11 = vadd.f32 %v10930_v28, %v5631_v2 }
0x1166   : > { %v10968_v16 = vadd.f32 %v5645_v11, %v9801_v9  ;;  %v5221_v9 = vadd.f32 %v5206_v51, %v4804_v63 }
0x1168   : > { %5671 = vadd.xlane.f32.xlu2 %v10968_v16  ;;  %v5694_v43 = vmul.f32 %v10968_v16, %v10968_v16 }
0x1169   : > { %v5615_v14 = vpop.f32.mrf.mxu1 }
0x116a   : > { %v5632_v22 = vadd.f32 %v5615_v14, %v5220_v19  ;;  %5707 = vadd.xlane.f32.xlu0 %v5694_v43 }
0x116c   : > { %v5646_v38 = vadd.f32 %v10930_v28, %v5632_v22 }
0x116e   : > { %v10977_v49 = vadd.f32 %v5646_v38, %v11150_v6 }
0x1170   : > { %5673 = vadd.xlane.f32.xlu1 %v10977_v49  ;;  %v5695_v39 = vmul.f32 %v10977_v49, %v10977_v49 }
0x1171   : > { %v5618_v33 = vpop.f32.mrf.mxu1 }
0x1172   : > { %v5633_v61 = vadd.f32 %v5618_v33, %v5221_v9  ;;  %5709 = vadd.xlane.f32.xlu2 %v5695_v39 }
0x1174   : > { %v5647_v7 = vadd.f32 %v10930_v28, %v5633_v61 }
0x1176   : > { %v10984_v10 = vadd.f32 %v5647_v7, %v11151_v4 }
0x1178   : > { %5675 = vadd.xlane.f32.xlu1 %v10984_v10  ;;  %v5696_v3 = vmul.f32 %v10984_v10, %v10984_v10 }
0x117a   : > { %5711 = vadd.xlane.f32.xlu2 %v5696_v3 }
0x1196   : > { %v5621_v1 = vpop.f32.mrf.mxu1 }
0x1197   : > { %v5634_v53 = vadd.f32 %v5621_v1, %v5222_v57 }
0x1199   : > { %v5648_v29 = vadd.f32 %v10930_v28, %v5634_v53  ;;  %v11012_v53 = vld [vmem:[#allocation12 + $0x1] ss:$0 sm:$0xff] }
0x119b   : > { %v10993_v45 = vadd.f32 %v5648_v29, %v11153_v60 }
0x119d   : > { %5677 = vadd.xlane.f32.xlu0 %v10993_v45  ;;  %v5697_v25 = vmul.f32 %v10993_v45, %v10993_v45 }
0x119f   : > { %5713 = vadd.xlane.f32.xlu1 %v5697_v25 }
0x11ae   : > { %v5664_v8 = vpop.xlane.xlu1 %5663 }
0x11af   : > { %v5681_v41 = vmul.f32 0.03125, %v5664_v8  ;;  %v5212_v44 = vpop.f32.mrf.mxu2 }
0x11b0   : > { %v5700_v46 = vpop.xlane.xlu2 %5699  ;;  %v5223_v5 = vadd.f32 %v5212_v44, %v4810_v32 }
0x11b1   : > { %v5726_v30 = vmul.f32 %v5681_v41, %v5681_v41  ;;  %v5717_v37 = vmul.f32 0.03125, %v5700_v46  ;;  %v5624_v13 = vpop.f32.mrf.mxu1  ;;  %v5744_v57 = vsub.f32 %v10936_v56, %v5681_v41 }
0x11b2   : > { %v5635_v48 = vadd.f32 %v5624_v13, %v5223_v5 }
0x11b3   : > { %v5735_v0 = vsub.f32 %v5717_v37, %v5726_v30 }
0x11b4   : > { %v5649_v27 = vadd.f32 %v10930_v28, %v5635_v48 }
0x11b5   : > { %v5753_v17 = vadd.f32 1e-05, %v5735_v0 }
0x11b6   : > { %v5666_v62 = vpop.xlane.xlu0 %5665  ;;  %v11002_v34 = vadd.f32 %v5649_v27, %v11155_v31 }
0x11b7   : > { %7891 = vrsqrt.f32 %v5753_v17  ;;  %v5682_v59 = vmul.f32 0.03125, %v5666_v62  ;;  %vm5768_vm12 = vweird.f32 %v5753_v17 }
0x11b8   : > { %v5702_v2 = vpop.xlane.xlu1 %5701  ;;  %5679 = vadd.xlane.f32.xlu0 %v11002_v34  ;;  %v5698_v42 = vmul.f32 %v11002_v34, %v11002_v34 }
0x11b9   : > { %v5727_v26 = vmul.f32 %v5682_v59, %v5682_v59  ;;  %v5718_v11 = vmul.f32 0.03125, %v5702_v2  ;;  %v5745_v60 = vsub.f32 %v10944_v50, %v5682_v59 }
0x11ba   : > { %5715 = vadd.xlane.f32.xlu2 %v5698_v42 }
0x11bb   : > { %v5736_v19 = vsub.f32 %v5718_v11, %v5727_v26 }
0x11bd   : > { %v7892_v43 = vpop.eup %7891  ;;  %v5754_v28 = vadd.f32 1e-05, %v5736_v19 }
0x11be   : > { %v5763_v14 = vmul.f32 %v7892_v43, %v5753_v17  ;;  %v5668_v22 = vpop.xlane.xlu0 %5667  ;;  %vm5769_vm11 = vweird.f32 %v7892_v43 }
0x11bf   : > { %7893 = vrsqrt.f32 %v5754_v28  ;;  %v11007_v38 = vmul.f32 0.03125, %v5668_v22  ;;  %vm5770_vm9 = vmor %vm5768_vm12, %vm5769_vm11  ;;  %vm5778_vm13 = vweird.f32 %v5754_v28 }
0x11c0   : > { %v5764_v51 = vmul.f32 %v7892_v43, %v5763_v14  ;;  %v5704_v35 = vpop.xlane.xlu1 %5703 }
0x11c1   : > { %v5728_v63 = vmul.f32 %v11007_v38, %v11007_v38  ;;  %v5719_v6 = vmul.f32 0.03125, %v5704_v35 }
0x11c2   : > { %v5765_v9 = vmul.f32 0.5, %v5764_v51 }
0x11c3   : > { %v5737_v39 = vsub.f32 %v5719_v6, %v5728_v63 }
0x11c4   : > { %v5766_v33 = vsub.f32 1.5, %v5765_v9  ;;  %v5746_v9 = vsub.f32 %v10951_v21, %v11007_v38 }
0x11c5   : > { %v7894_v61 = vpop.eup %7893  ;;  %v5755_v3 = vadd.f32 1e-05, %v5737_v39 }
0x11c6   : > { %v5767_v7 = vmul.f32 %v7892_v43, %v5766_v33  ;;  %v5773_v4 = vmul.f32 %v7894_v61, %v5754_v28  ;;  %vm5779_vm10 = vweird.f32 %v7894_v61 }
0x11c7   : > { %7895 = vrsqrt.f32 %v5755_v3  ;;  %vm5780_vm14 = vmor %vm5778_vm13, %vm5779_vm10  ;;  %vm5788_vm0 = vweird.f32 %v5755_v3 }
0x11c8   : > { %v5774_v58 = vmul.f32 %v7894_v61, %v5773_v4  ;;  %v5771_v36 = vsel %vm5770_vm9, %v7892_v43, %v5767_v7 }
0x11c9   : > { %v5852_v29 = vmul.f32 %v5771_v36, %v5744_v57 }
0x11ca   : > { %v5775_v23 = vmul.f32 0.5, %v5774_v58 }
0x11cb   : > { %v5864_v18 = vmul.f32 %v11012_v53, %v5852_v29 }
0x11cc   : > { %v5776_v1 = vsub.f32 1.5, %v5775_v23 }
0x11cd   : > { %v7896_v25 = vpop.eup %7895  ;;  %v5876_v46 = vadd.f32 %v11016_v52, %v5864_v18 }
0x11ce   : > { %v5777_v12 = vmul.f32 %v7894_v61, %v5776_v1  ;;  %v5783_v8 = vmul.f32 %v7896_v25, %v5755_v3  ;;  %vm5789_vm15 = vweird.f32 %v7896_v25 }
0x11cf   : > { %vm5790_vm1 = vmor %vm5788_vm0, %vm5789_vm15 }
0x11d0   : > { %v5781_v40 = vsel %vm5780_vm14, %v7894_v61, %v5777_v12  ;;  %v5784_v5 = vmul.f32 %v7896_v25, %v5783_v8 }
0x11d1   : > { %v5853_v20 = vmul.f32 %v5781_v40, %v5745_v60 }
0x11d2   : > { %v5785_v48 = vmul.f32 0.5, %v5784_v5 }
0x11d3   : > { %v5865_v47 = vmul.f32 %v11012_v53, %v5853_v20  ;;  %v5670_v24 = vpop.xlane.xlu2 %5669 }
0x11d4   : > { %v5684_v32 = vmul.f32 0.03125, %v5670_v24  ;;  %v5786_v59 = vsub.f32 1.5, %v5785_v48 }
0x11d5   : > { %v5706_v41 = vpop.xlane.xlu0 %5705  ;;  %v5877_v44 = vadd.f32 %v11016_v52, %v5865_v47 }
0x11d6   : > { %v5729_v30 = vmul.f32 %v5684_v32, %v5684_v32  ;;  %v5720_v37 = vmul.f32 0.03125, %v5706_v41  ;;  %v5787_v42 = vmul.f32 %v7896_v25, %v5786_v59  ;;  %v5747_v3 = vsub.f32 %v10960_v55, %v5684_v32 }
0x11d7   : > { %v5885_v54 = vpack.c.bf16 %v5877_v44, %v5876_v46 }
0x11d8   : > { %v5738_v13 = vsub.f32 %v5720_v37, %v5729_v30  ;;  %v5791_v63 = vsel %vm5790_vm1, %v7896_v25, %v5787_v42 }
0x11d9   : > { %5968 = vmatmul.bf16.vlgmr.msrb.gmra.mxu2 %v5885_v54  ;;  %v5854_v4 = vmul.f32 %v5791_v63, %v5746_v9 }
0x11da   : > { %v5756_v0 = vadd.f32 1e-05, %v5738_v13 }
0x11db   : > { %v5672_v17 = vpop.xlane.xlu2 %5671  ;;  %v5866_v29 = vmul.f32 %v11012_v53, %v5854_v4 }
0x11dc   : > { %7897 = vrsqrt.f32 %v5756_v0  ;;  %v5685_v27 = vmul.f32 0.03125, %v5672_v17  ;;  %vm5798_vm3 = vweird.f32 %v5756_v0 }
0x11dd   : > { %v5708_v15 = vpop.xlane.xlu0 %5707  ;;  %v5878_v40 = vadd.f32 %v11016_v52, %v5866_v29 }
0x11de   : > { %v5730_v62 = vmul.f32 %v5685_v27, %v5685_v27  ;;  %v5721_v31 = vmul.f32 0.03125, %v5708_v15  ;;  %v5748_v30 = vsub.f32 %v10968_v16, %v5685_v27 }
0x11e0   : > { %v5739_v2 = vsub.f32 %v5721_v31, %v5730_v62 }
0x11e2   : > { %v7898_v26 = vpop.eup %7897  ;;  %v5757_v11 = vadd.f32 1e-05, %v5739_v2 }
0x11e3   : > { %v5793_v19 = vmul.f32 %v7898_v26, %v5756_v0  ;;  %v5674_v43 = vpop.xlane.xlu1 %5673  ;;  %vm5799_vm2 = vweird.f32 %v7898_v26 }
0x11e4   : > { %7899 = vrsqrt.f32 %v5757_v11  ;;  %v5686_v28 = vmul.f32 0.03125, %v5674_v43  ;;  %vm5800_vm4 = vmor %vm5798_vm3, %vm5799_vm2  ;;  %vm5808_vm6 = vweird.f32 %v5757_v11 }
0x11e5   : > { %v5794_v14 = vmul.f32 %v7898_v26, %v5793_v19  ;;  %v5710_v22 = vpop.xlane.xlu2 %5709 }
0x11e6   : > { %v5731_v51 = vmul.f32 %v5686_v28, %v5686_v28  ;;  %v5722_v35 = vmul.f32 0.03125, %v5710_v22  ;;  %v5749_v17 = vsub.f32 %v10977_v49, %v5686_v28 }
0x11e7   : > { %v5795_v6 = vmul.f32 0.5, %v5794_v14 }
0x11e8   : > { %v5740_v39 = vsub.f32 %v5722_v35, %v5731_v51 }
0x11e9   : > { %v5796_v33 = vsub.f32 1.5, %v5795_v6 }
0x11ea   : > { %v7900_v61 = vpop.eup %7899  ;;  %v5758_v7 = vadd.f32 1e-05, %v5740_v39 }
0x11eb   : > { %v5797_v58 = vmul.f32 %v7898_v26, %v5796_v33  ;;  %v5803_v36 = vmul.f32 %v7900_v61, %v5757_v11  ;;  %vm5809_vm5 = vweird.f32 %v7900_v61  ;;  %v5676_v8 = vpop.xlane.xlu1 %5675 }
0x11ec   : > { %7901 = vrsqrt.f32 %v5758_v7  ;;  %vm5810_vm7 = vmor %vm5808_vm6, %vm5809_vm5  ;;  %v5687_v44 = vmul.f32 0.03125, %v5676_v8  ;;  %vm5818_vm11 = vweird.f32 %v5758_v7 }
0x11ed   : > { %v5801_v23 = vsel %vm5800_vm4, %v7898_v26, %v5797_v58  ;;  %v5804_v57 = vmul.f32 %v7900_v61, %v5803_v36  ;;  %v5712_v37 = vpop.xlane.xlu2 %5711 }
0x11ee   : > { %v5855_v1 = vmul.f32 %v5801_v23, %v5747_v3  ;;  %v5732_v0 = vmul.f32 %v5687_v44, %v5687_v44  ;;  %v5723_v48 = vmul.f32 0.03125, %v5712_v37  ;;  %v5750_v23 = vsub.f32 %v10984_v10, %v5687_v44 }
0x11ef   : > { %v5805_v12 = vmul.f32 0.5, %v5804_v57 }
0x11f0   : > { %v5867_v38 = vmul.f32 %v11012_v53, %v5855_v1  ;;  %v5741_v59 = vsub.f32 %v5723_v48, %v5732_v0  ;;  %v7258_v0 = vld [vmem:[#allocation7 + $0x78] sm:$0xff] }
0x11f1   : > { %v5806_v60 = vsub.f32 1.5, %v5805_v12  ;;  %6149 = vmatpush.bf16.msra.mxu3 %v7258_v0 }
0x11f2   : > { %v7902_v25 = vpop.eup %7901  ;;  %v5879_v18 = vadd.f32 %v11016_v52, %v5867_v38  ;;  %v5759_v11 = vadd.f32 1e-05, %v5741_v59 }
0x11f3   : > { %v5807_v20 = vmul.f32 %v7900_v61, %v5806_v60  ;;  %v5813_v47 = vmul.f32 %v7902_v25, %v5758_v7  ;;  %vm5819_vm8 = vweird.f32 %v7902_v25 }
0x11f4   : > { %v5886_v24 = vpack.c.bf16 %v5879_v18, %v5878_v40  ;;  %vm5820_vm12 = vmor %vm5818_vm11, %vm5819_vm8  ;;  %7903 = vrsqrt.f32 %v5759_v11  ;;  %vm5828_vm10 = vweird.f32 %v5759_v11 }
0x11f5   : > { %v5814_v32 = vmul.f32 %v7902_v25, %v5813_v47  ;;  %v5811_v41 = vsel %vm5810_vm7, %v7900_v61, %v5807_v20 }
0x11f6   : > { %5973 = vmatmul.bf16.gmra.mxu2 %v5886_v24  ;;  %v5856_v54 = vmul.f32 %v5811_v41, %v5748_v30 }
0x11f7   : > { %v5815_v46 = vmul.f32 0.5, %v5814_v32 }
0x11f8   : > { %v5868_v31 = vmul.f32 %v11012_v53, %v5856_v54 }
0x11f9   : > { %v5816_v5 = vsub.f32 1.5, %v5815_v46 }
0x11fa   : > { %v5880_v27 = vadd.f32 %v11016_v52, %v5868_v31  ;;  %v7904_v19 = vpop.eup %7903 }
0x11fb   : > { %v5817_v13 = vmul.f32 %v7902_v25, %v5816_v5  ;;  %v5823_v43 = vmul.f32 %v7904_v19, %v5759_v11  ;;  %vm5829_vm9 = vweird.f32 %v7904_v19  ;;  %v7255_v11 = vld [vmem:[#allocation7 + $0x60] sm:$0xff] }
0x11fc   : > { %vm5830_vm13 = vmor %vm5828_vm10, %vm5829_vm9 }
0x11fd   : > { %v5821_v15 = vsel %vm5820_vm12, %v7902_v25, %v5817_v13  ;;  %v5824_v63 = vmul.f32 %v7904_v19, %v5823_v43  ;;  %v7253_v43 = vld [vmem:[#allocation7 + $0x50] sm:$0xff] }
0x11fe   : > { %v5857_v62 = vmul.f32 %v5821_v15, %v5749_v17  ;;  %v7257_v15 = vld [vmem:[#allocation7 + $0x70] sm:$0xff] }
0x11ff   : > { %v5825_v39 = vmul.f32 0.5, %v5824_v63  ;;  %6150 = vmatpush.bf16.msra.mxu3 %v7257_v15 }
0x1200   : > { %v5869_v2 = vmul.f32 %v11012_v53, %v5857_v62 }
0x1201   : > { %v5826_v33 = vsub.f32 1.5, %v5825_v39 }
0x1202   : > { %v5881_v26 = vadd.f32 %v11016_v52, %v5869_v2  ;;  %v7256_v2 = vld [vmem:[#allocation7 + $0x68] sm:$0xff] }
0x1203   : > { %v5827_v7 = vmul.f32 %v7904_v19, %v5826_v33  ;;  %6151 = vmatpush.bf16.msra.mxu3 %v7256_v2 }
0x1204   : > { %v5887_v42 = vpack.c.bf16 %v5881_v26, %v5880_v27 }
0x1205   : > { %v5831_v36 = vsel %vm5830_vm13, %v7904_v19, %v5827_v7  ;;  %v7254_v19 = vld [vmem:[#allocation7 + $0x58] sm:$0xff] }
0x1206   : > { %5978 = vmatmul.bf16.gmra.mxu2 %v5887_v42  ;;  %v5858_v1 = vmul.f32 %v5831_v36, %v5750_v23 }
0x1207   : > { %6152 = vmatpush.bf16.msra.mxu3 %v7255_v11 }
0x1208   : > { %v5870_v25 = vmul.f32 %v11012_v53, %v5858_v1 }
0x120a   : > { %v5882_v32 = vadd.f32 %v11016_v52, %v5870_v25 }
0x120b   : > { %6153 = vmatpush.bf16.msra.mxu3 %v7254_v19 }
0x120f   : > { %6154 = vmatpush.bf16.msra.mxu3 %v7253_v43 }
0x1210   : > { %v5678_v14 = vpop.xlane.xlu0 %5677 }
0x1211   : > { %v5688_v28 = vmul.f32 0.03125, %v5678_v14  ;;  %v7252_v14 = vld [vmem:[#allocation7 + $0x48] sm:$0xff] }
0x1212   : > { %v5714_v22 = vpop.xlane.xlu1 %5713 }
0x1213   : > { %v5733_v51 = vmul.f32 %v5688_v28, %v5688_v28  ;;  %v5724_v35 = vmul.f32 0.03125, %v5714_v22  ;;  %v5751_v12 = vsub.f32 %v10993_v45, %v5688_v28  ;;  %v11046_v28 = vld [vmem:[%s11089_s10 + $0x1] ss:$0 sm:$0xff]  ;;  %6155 = vmatpush.bf16.msra.mxu3 %v7252_v14 }
0x1215   : > { %v5742_v6 = vsub.f32 %v5724_v35, %v5733_v51 }
0x1217   : > { %v5760_v9 = vadd.f32 1e-05, %v5742_v6 }
0x1219   : > { %7905 = vrsqrt.f32 %v5760_v9  ;;  %vm5838_vm15 = vweird.f32 %v5760_v9 }
0x121f   : > { %v7906_v61 = vpop.eup %7905 }
0x1220   : > { %v5833_v4 = vmul.f32 %v7906_v61, %v5760_v9  ;;  %vm5839_vm14 = vweird.f32 %v7906_v61 }
0x1221   : > { %vm5840_vm0 = vmor %vm5838_vm15, %vm5839_vm14 }
0x1222   : > { %v5834_v58 = vmul.f32 %v7906_v61, %v5833_v4 }
0x1224   : > { %v5835_v3 = vmul.f32 0.5, %v5834_v58 }
0x1226   : > { %v5836_v57 = vsub.f32 1.5, %v5835_v3 }
0x1228   : > { %v5837_v29 = vmul.f32 %v7906_v61, %v5836_v57 }
0x122a   : > { %v5841_v38 = vsel %vm5840_vm0, %v7906_v61, %v5837_v29 }
0x122b   : > { %v5859_v60 = vmul.f32 %v5841_v38, %v5751_v12  ;;  %v5680_v40 = vpop.xlane.xlu0 %5679 }
0x122c   : > { %v5689_v18 = vmul.f32 0.03125, %v5680_v40 }
0x122d   : > { %v5871_v20 = vmul.f32 %v11012_v53, %v5859_v60  ;;  %v5716_v47 = vpop.xlane.xlu2 %5715 }
0x122e   : > { %v5734_v8 = vmul.f32 %v5689_v18, %v5689_v18  ;;  %v5725_v24 = vmul.f32 0.03125, %v5716_v47  ;;  %v5752_v62 = vsub.f32 %v11002_v34, %v5689_v18 }
0x122f   : > { %v5883_v41 = vadd.f32 %v11016_v52, %v5871_v20 }
0x1230   : > { %v5743_v46 = vsub.f32 %v5725_v24, %v5734_v8 }
0x1231   : > { %v5888_v44 = vpack.c.bf16 %v5883_v41, %v5882_v32 }
0x1232   : > { %v5761_v30 = vadd.f32 1e-05, %v5743_v46 }
0x1233   : > { %5983 = vmatmul.bf16.gmra.mxu2 %v5888_v44 }
0x1234   : > { %7907 = vrsqrt.f32 %v5761_v30  ;;  %vm5848_vm2 = vweird.f32 %v5761_v30 }
0x123a   : > { %v7908_v37 = vpop.eup %7907 }
0x123b   : > { %v5843_v5 = vmul.f32 %v7908_v37, %v5761_v30  ;;  %vm5849_vm1 = vweird.f32 %v7908_v37 }
0x123c   : > { %vm5850_vm3 = vmor %vm5848_vm2, %vm5849_vm1 }
0x123d   : > { %v5844_v54 = vmul.f32 %v7908_v37, %v5843_v5 }
0x123f   : > { %v5845_v13 = vmul.f32 0.5, %v5844_v54 }
0x1241   : > { %v5846_v48 = vsub.f32 1.5, %v5845_v13 }
0x1243   : > { %v5847_v17 = vmul.f32 %v7908_v37, %v5846_v48 }
0x1245   : > { %v5851_v31 = vsel %vm5850_vm3, %v7908_v37, %v5847_v17 }
0x1246   : > { %v5860_v59 = vmul.f32 %v5851_v31, %v5752_v62 }
0x1248   : > { %v5872_v27 = vmul.f32 %v11012_v53, %v5860_v59  ;;  %v7251_v53 = vld [vmem:[#allocation7 + $0x40] sm:$0xff] }
0x1249   : > { %6156 = vmatpush.bf16.msra.mxu3 %v7251_v53 }
0x124a   : > { %v5884_v26 = vadd.f32 %v11016_v52, %v5872_v27 }
0x124c   : > { %v5889_v42 = vpack.c.bf16 %v5884_v26, %v5884_v26 }
0x124e   : > { %5988 = vmatmul.bf16.gmra.mxu2 %v5889_v42 }
0x125c   : > { %v5969_v22 = vpop.f32.mrf.mxu2 }
0x125d   : > { %v5970_v51 = vadd.f32 %v11046_v28, %v5969_v22 }
0x125f   : > { %v5993_v52 = vmul.f32 %v5970_v51, %v5970_v51 }
0x1261   : > { %v6002_v35 = vmul.f32 %v5993_v52, %v5970_v51 }
0x1263   : > { %v6011_v63 = vmul.f32 0.044715, %v6002_v35 }
0x1264   : > { %v5971_v6 = vpop.f32.mrf.mxu2 }
0x1265   : > { %v6020_v9 = vadd.f32 %v6011_v63, %v5970_v51  ;;  %v5972_v39 = vadd.f32 %v11046_v28, %v5971_v6 }
0x1267   : > { %v6029_v33 = vmul.f32 0.7978846, %v6020_v9  ;;  %v5994_v61 = vmul.f32 %v5972_v39, %v5972_v39 }
0x1269   : > { %v6003_v7 = vmul.f32 %v5994_v61, %v5972_v39  ;;  %7909 = vtanh.f32 %v6029_v33 }
0x126b   : > { %v6012_v4 = vmul.f32 0.044715, %v6003_v7 }
0x126d   : > { %v6021_v58 = vadd.f32 %v6012_v4, %v5972_v39 }
0x126f   : > { %v6030_v36 = vmul.f32 0.7978846, %v6021_v58  ;;  %v7910_v3 = vpop.eup %7909 }
0x1270   : > { %v6047_v23 = vadd.f32 1.0, %v7910_v3 }
0x1271   : > { %7911 = vtanh.f32 %v6030_v36 }
0x1272   : > { %v6056_v1 = vmul.f32 0.5, %v6047_v23 }
0x1274   : > { %v6065_v25 = vmul.f32 %v6056_v1, %v5970_v51 }
0x1277   : > { %v7912_v57 = vpop.eup %7911 }
0x1278   : > { %v6048_v29 = vadd.f32 1.0, %v7912_v57 }
0x1279   : > { %v5974_v12 = vpop.f32.mrf.mxu2 }
0x127a   : > { %v6057_v38 = vmul.f32 0.5, %v6048_v29  ;;  %v5975_v60 = vadd.f32 %v11046_v28, %v5974_v12 }
0x127c   : > { %v6066_v40 = vmul.f32 %v6057_v38, %v5972_v39  ;;  %v5995_v18 = vmul.f32 %v5975_v60, %v5975_v60 }
0x127e   : > { %v6074_v20 = vpack.c.bf16 %v6066_v40, %v6065_v25  ;;  %v6004_v47 = vmul.f32 %v5995_v18, %v5975_v60 }
0x1280   : > { %v6013_v8 = vmul.f32 0.044715, %v6004_v47  ;;  %6157 = vmatmul.bf16.vlgmr.msra.gmra.mxu3 %v6074_v20 }
0x1281   : > { %v5976_v24 = vpop.f32.mrf.mxu2 }
0x1282   : > { %v6022_v32 = vadd.f32 %v6013_v8, %v5975_v60  ;;  %v5977_v41 = vadd.f32 %v11046_v28, %v5976_v24 }
0x1284   : > { %v6031_v46 = vmul.f32 0.7978846, %v6022_v32  ;;  %v5996_v44 = vmul.f32 %v5977_v41, %v5977_v41 }
0x1286   : > { %v6005_v30 = vmul.f32 %v5996_v44, %v5977_v41  ;;  %7913 = vtanh.f32 %v6031_v46 }
0x1288   : > { %v6014_v37 = vmul.f32 0.044715, %v6005_v30 }
0x1289   : > { %v5979_v5 = vpop.f32.mrf.mxu2 }
0x128a   : > { %v6023_v54 = vadd.f32 %v6014_v37, %v5977_v41  ;;  %v5980_v13 = vadd.f32 %v11046_v28, %v5979_v5 }
0x128c   : > { %v6032_v0 = vmul.f32 0.7978846, %v6023_v54  ;;  %v5997_v48 = vmul.f32 %v5980_v13, %v5980_v13  ;;  %v7914_v17 = vpop.eup %7913 }
0x128d   : > { %v6049_v59 = vadd.f32 1.0, %v7914_v17 }
0x128e   : > { %7915 = vtanh.f32 %v6032_v0  ;;  %v6006_v15 = vmul.f32 %v5997_v48, %v5980_v13 }
0x128f   : > { %v6058_v43 = vmul.f32 0.5, %v6049_v59 }
0x1290   : > { %v6015_v62 = vmul.f32 0.044715, %v6006_v15 }
0x1291   : > { %v5981_v31 = vpop.f32.mrf.mxu2  ;;  %v6067_v51 = vmul.f32 %v6058_v43, %v5975_v60 }
0x1292   : > { %v6024_v2 = vadd.f32 %v6015_v62, %v5980_v13  ;;  %v5982_v27 = vadd.f32 %v11046_v28, %v5981_v31 }
0x1294   : > { %v7916_v26 = vpop.eup %7915  ;;  %v6033_v11 = vmul.f32 0.7978846, %v6024_v2  ;;  %v5998_v42 = vmul.f32 %v5982_v27, %v5982_v27 }
0x1295   : > { %v6050_v19 = vadd.f32 1.0, %v7916_v26 }
0x1296   : > { %v6007_v14 = vmul.f32 %v5998_v42, %v5982_v27  ;;  %7917 = vtanh.f32 %v6033_v11 }
0x1297   : > { %v6059_v22 = vmul.f32 0.5, %v6050_v19 }
0x1298   : > { %v6016_v53 = vmul.f32 0.044715, %v6007_v14 }
0x1299   : > { %v6068_v52 = vmul.f32 %v6059_v22, %v5977_v41 }
0x129a   : > { %v6025_v35 = vadd.f32 %v6016_v53, %v5982_v27  ;;  %v7266_v53 = vld [vmem:[#allocation15 + $0x38] sm:$0xff] }
0x129b   : > { %v6075_v63 = vpack.c.bf16 %v6068_v52, %v6067_v51  ;;  %6271 = vmatpush.bf16.msra.mxu0 %v7266_v53  ;;  %v7265_v51 = vld [vmem:[#allocation15 + $0x30] sm:$0xff] }
0x129c   : > { %v6034_v6 = vmul.f32 0.7978846, %v6025_v35  ;;  %v7918_v9 = vpop.eup %7917  ;;  %v7264_v35 = vld [vmem:[#allocation15 + $0x28] sm:$0xff] }
0x129d   : > { %6162 = vmatmul.bf16.gmra.mxu3 %v6075_v63  ;;  %v6051_v39 = vadd.f32 1.0, %v7918_v9  ;;  %v7263_v63 = vld [vmem:[#allocation15 + $0x20] sm:$0xff]  ;;  %v7262_v9 = vld [vmem:[#allocation15 + $0x18] sm:$0xff] }
0x129e   : > { %7919 = vtanh.f32 %v6034_v6 }
0x129f   : > { %v6060_v7 = vmul.f32 0.5, %v6051_v39  ;;  %6272 = vmatpush.bf16.msra.mxu0 %v7265_v51  ;;  %v7261_v39 = vld [vmem:[#allocation15 + $0x10] sm:$0xff] }
0x12a1   : > { %v6069_v58 = vmul.f32 %v6060_v7, %v5980_v13  ;;  %v7259_v7 = vld [vmem:[#allocation15] sm:$0xff] }
0x12a3   : > { %6273 = vmatpush.bf16.msra.mxu0 %v7264_v35 }
0x12a4   : > { %v7920_v33 = vpop.eup %7919 }
0x12a5   : > { %v6052_v61 = vadd.f32 1.0, %v7920_v33 }
0x12a7   : > { %v6061_v4 = vmul.f32 0.5, %v6052_v61  ;;  %6274 = vmatpush.bf16.msra.mxu0 %v7263_v63  ;;  %v7260_v61 = vld [vmem:[#allocation15 + $0x8] sm:$0xff] }
0x12a9   : > { %v6070_v36 = vmul.f32 %v6061_v4, %v5982_v27  ;;  %v7530_v4 = vld [vmem:[%s11091_s12 + $0x1] ss:$0 sm:$0xff] }
0x12ab   : > { %v6076_v3 = vpack.c.bf16 %v6070_v36, %v6069_v58  ;;  %6275 = vmatpush.bf16.msra.mxu0 %v7262_v9 }
0x12ad   : > { %6167 = vmatmul.bf16.gmra.mxu3 %v6076_v3 }
0x12af   : > { %6276 = vmatpush.bf16.msra.mxu0 %v7261_v39 }
0x12b3   : > { %6277 = vmatpush.bf16.msra.mxu0 %v7260_v61 }
0x12b6   : > { %v5984_v23 = vpop.f32.mrf.mxu2 }
0x12b7   : > { %v5985_v57 = vadd.f32 %v11046_v28, %v5984_v23  ;;  %6278 = vmatpush.bf16.msra.mxu0 %v7259_v7 }
0x12b9   : > { %v5999_v1 = vmul.f32 %v5985_v57, %v5985_v57 }
0x12bb   : > { %v6008_v29 = vmul.f32 %v5999_v1, %v5985_v57 }
0x12bd   : > { %v6017_v12 = vmul.f32 0.044715, %v6008_v29 }
0x12be   : > { %v5986_v38 = vpop.f32.mrf.mxu2 }
0x12bf   : > { %v6026_v60 = vadd.f32 %v6017_v12, %v5985_v57  ;;  %v5987_v25 = vadd.f32 %v11046_v28, %v5986_v38 }
0x12c1   : > { %v6035_v40 = vmul.f32 0.7978846, %v6026_v60  ;;  %v6000_v18 = vmul.f32 %v5987_v25, %v5987_v25 }
0x12c3   : > { %v6009_v20 = vmul.f32 %v6000_v18, %v5987_v25  ;;  %7921 = vtanh.f32 %v6035_v40 }
0x12c5   : > { %v6018_v47 = vmul.f32 0.044715, %v6009_v20 }
0x12c7   : > { %v6027_v8 = vadd.f32 %v6018_v47, %v5987_v25 }
0x12c9   : > { %v6036_v24 = vmul.f32 0.7978846, %v6027_v8  ;;  %v7922_v32 = vpop.eup %7921 }
0x12ca   : > { %v6053_v41 = vadd.f32 1.0, %v7922_v32 }
0x12cb   : > { %7923 = vtanh.f32 %v6036_v24 }
0x12cc   : > { %v6062_v37 = vmul.f32 0.5, %v6053_v41 }
0x12ce   : > { %v6071_v0 = vmul.f32 %v6062_v37, %v5985_v57 }
0x12d1   : > { %v7924_v46 = vpop.eup %7923  ;;  %v5989_v44 = vpop.f32.mrf.mxu2 }
0x12d2   : > { %v6054_v30 = vadd.f32 1.0, %v7924_v46  ;;  %v5990_v5 = vadd.f32 %v11046_v28, %v5989_v44 }
0x12d4   : > { %v6063_v54 = vmul.f32 0.5, %v6054_v30  ;;  %v6001_v13 = vmul.f32 %v5990_v5, %v5990_v5 }
0x12d6   : > { %v6072_v48 = vmul.f32 %v6063_v54, %v5987_v25  ;;  %v6010_v17 = vmul.f32 %v6001_v13, %v5990_v5 }
0x12d8   : > { %v6077_v15 = vpack.c.bf16 %v6072_v48, %v6071_v0  ;;  %v6019_v62 = vmul.f32 0.044715, %v6010_v17 }
0x12d9   : > { %v5991_v31 = vpop.f32.mrf.mxu2 }
0x12da   : > { %6172 = vmatmul.bf16.gmra.mxu3 %v6077_v15  ;;  %v6028_v59 = vadd.f32 %v6019_v62, %v5990_v5 }
0x12dc   : > { %v6037_v2 = vmul.f32 0.7978846, %v6028_v59 }
0x12de   : > { %7925 = vtanh.f32 %v6037_v2 }
0x12e4   : > { %v7926_v27 = vpop.eup %7925 }
0x12e5   : > { %v6055_v26 = vadd.f32 1.0, %v7926_v27 }
0x12e7   : > { %v6064_v11 = vmul.f32 0.5, %v6055_v26 }
0x12e9   : > { %v6073_v42 = vmul.f32 %v6064_v11, %v5990_v5 }
0x12eb   : > { %v6078_v19 = vpack.c.bf16 %v6073_v42, %v6073_v42 }
0x12ed   : > { %6177 = vmatmul.bf16.gmra.mxu3 %v6078_v19 }
0x1303   : > { %v6158_v43 = vpop.f32.mrf.mxu3 }
0x1304   : > { %v6159_v23 = vadd.f32 %v7530_v4, %v6158_v43 }
0x1306   : > { %v6182_v40 = vadd.f32 %v6159_v23, %v10936_v56 }
0x130b   : > { %v6160_v28 = vpop.f32.mrf.mxu3 }
0x130c   : > { %v6161_v12 = vadd.f32 %v7530_v4, %v6160_v28 }
0x130e   : > { %v6183_v32 = vadd.f32 %v6161_v12, %v10944_v50 }
0x1320   : > { %v6163_v14 = vpop.f32.mrf.mxu3 }
0x1321   : > { %v6164_v38 = vadd.f32 %v7530_v4, %v6163_v14 }
0x1323   : > { %v6184_v41 = vadd.f32 %v6164_v38, %v10951_v21  ;;  %v6222_v21 = vld [vmem:[%s11097_s18] sm:$0x1] }
0x1328   : > { %v6165_v22 = vpop.f32.mrf.mxu3 }
0x1329   : > { %v6166_v57 = vadd.f32 %v7530_v4, %v6165_v22 }
0x132b   : > { %v6185_v20 = vadd.f32 %v6166_v57, %v10960_v55 }
0x1330   : > { %v6168_v52 = vpop.f32.mrf.mxu3 }
0x1331   : > { %v6169_v36 = vadd.f32 %v7530_v4, %v6168_v52 }
0x1333   : > { %v6186_v60 = vadd.f32 %v6169_v36, %v10968_v16 }
0x1335   : > { %v6191_v46 = vmax.f32 %v6182_v40, %v6186_v60 }
0x1338   : > { %v6170_v6 = vpop.f32.mrf.mxu3 }
0x1339   : > { %v6171_v1 = vadd.f32 %v7530_v4, %v6170_v6 }
0x133b   : > { %v6187_v47 = vadd.f32 %v6171_v1, %v10977_v49 }
0x133d   : > { %v6192_v30 = vmax.f32 %v6183_v32, %v6187_v47 }
0x135d   : > { %v6173_v33 = vpop.f32.mrf.mxu3 }
0x135e   : > { %v6174_v29 = vadd.f32 %v7530_v4, %v6173_v33 }
0x1360   : > { %v6188_v8 = vadd.f32 %v6174_v29, %v10984_v10 }
0x1365   : > { %v6175_v58 = vpop.f32.mrf.mxu3 }
0x1366   : > { %v6176_v3 = vadd.f32 %v7530_v4, %v6175_v58 }
0x1368   : > { %v6189_v25 = vadd.f32 %v6176_v3, %v10993_v45  ;;  %v6193_v45 = vmax.f32 %v6184_v41, %v6188_v8 }
0x136a   : > { %v6194_v44 = vmax.f32 %v6185_v20, %v6189_v25 }
0x136c   : > { %v6197_v37 = vmax.f32 %v6193_v45, %v6194_v44 }
0x1370   : > { %v6178_v18 = vpop.f32.mrf.mxu3 }
0x1371   : > { %v6179_v24 = vadd.f32 %v7530_v4, %v6178_v18 }
0x1373   : > { %v6190_v16 = vadd.f32 %v6179_v24, %v11002_v34 }
0x1375   : > { %v6195_v56 = vmax.f32 %v6191_v46, %v6190_v16 }
0x1377   : > { %v6196_v5 = vmax.f32 %v6195_v56, %v6192_v30 }
0x1378   : > { %v6180_v55 = vpop.f32.mrf.mxu3 }
0x1379   : > { %v6198_v54 = vmax.f32 %v6196_v5, %v6197_v37 }
0x137b   : > { %v6199_v49 = vrot.slane %v6198_v54, 4 }
0x137d   : > { %v6200_v13 = vmax.f32 %v6198_v54, %v6199_v49 }
0x137f   : > { %v6201_v10 = vrot.slane %v6200_v13, 2 }
0x1381   : > { %v6202_v0 = vmax.f32 %v6200_v13, %v6201_v10 }
0x1383   : > { %v6203_v48 = vrot.slane %v6202_v0, 1 }
0x1385   : > { %v6204_v50 = vmax.f32 %v6202_v0, %v6203_v48 }
0x1387   : > { %v6205_v17 = vpack.c.bf16 %v6204_v50, %v6204_v50 }
0x1389   : > { %6279 = vmatmul.bf16.vlgmr.msra.gmra.mxu0 %v6205_v17 }
0x1406   : > { %v6280_v34 = vpop.f32.mrf.mxu0 }
0x1407   : > { %v6281_v15 = vadd.f32 %v6280_v34, %v6222_v21 }
0x1409   : > { %v6284_v62 = vperm.slane %v6281_v15, 0 }
0x140b   : > { %6285 = vst [vmem:[%s763_s0] sm:$0xff] %v6284_v62 }
0x140e   : > { %v6282_v31 = vpop.f32.mrf.mxu0 }
0x140f PF: > { %s11157_s4 = sld [smem:[#allocation21_spill]] }
0x1415   : > { %s34_s0 = sadd.s32 1, %s11157_s4  }
0x1416   : > { %p31_p7 = scmp.ge.s32.totalorder %s34_s0, 4  }
0x1418   :  { %33 = sbr.rel (!%p31_p7) target bundleno = 14 (0xe), region = 178 }
0x141d   :  { %6305 = vsyncpa [#allocation3], 1 }
0x141e   :  { %6307 = vsyncpa [#allocation3 + $0x1], 1 }
0x141f   :  { %6308 = vsyncpa [#allocation5], 1 }
0x1420   :  { %6309 = vsyncpa [#allocation8], 1 }
0x1421   :  { %6310 = vsyncpa [#allocation11], 1 }
0x1422   :  { %6311 = vsyncpa [#allocation14], 1 }

</bundles_post_ra>
